<compile_context>
chip_gen: v5e
topology: v5e:2x2
jax: 0.10.0
libtpu: 0.0.40
codegen_flags: <defaults>
</compile_context>

<pallas_src>
import functools

import jax
import jax.numpy as jnp
from jax.experimental import pallas as pl
from jax.experimental.pallas import tpu as pltpu


# ----------------------------------------------------------------------------
# Fused per-layer Pallas kernel.
#
# Activation layout in HBM and in-kernel: [B, R, T*C] with R = num_target +
# num_context node rows (target rows first); element (b, r, t*C + c) equals
# x[b, r, c, t] of the PyTorch [B, nodes, C, T] layout.
# ----------------------------------------------------------------------------
def _fused_layer_kernel(*refs, nm, nn, t, c_out, groups, eps, with_fe, with_post):
    it = iter(refs)
    h_ref = next(it)        # [1, R, T*din]
    emb_ref = next(it)      # [1, R, T*c_in]   diff-emb on target rows, zeros on ctx rows
    at_ref = next(it)       # [1, Nm, Nn]      row-normalised adj^T
    a2_ref = next(it)       # [1, Nm, Nm]      fused two-hop operator  at_norm @ a_norm
    mask_ref = next(it)     # [1, Nn, T*c_in]  lane-dense context mask
    if with_fe:
        few_ref = next(it)  # [T*dy, T*c_in]   kron(I_T, fe_w)
        feb_ref = next(it)  # [1, T*c_in]
    gak_ref = next(it)      # [3, T*c_in, T*c_in]  kron-expanded GA 1x1 mix blocks
    gab_ref = next(it)      # [1, T*c_in]
    tw_ref = next(it)       # [T*c_in, T*c_out]    dense causal dilated conv operator
    tb_ref = next(it)       # [1, T*c_out]
    if with_post:
        rw_ref = next(it)   # [T*c_in, T*c_out]    kron(I_T, res_w)
        rb_ref = next(it)   # [1, T*c_out]
        p_ref = next(it)    # [T*c_out, T*c_out]   GroupNorm group-pooling matrix
        gg_ref = next(it)   # [1, T*c_out]         gamma tiled over time
        gb_ref = next(it)   # [1, T*c_out]         beta tiled over time
    out_ref = next(it)      # [1, R, T*c_out]

    f32 = jnp.float32

    # One layout end-to-end: node rows x (time-major, channel-minor) lanes.
    xf = h_ref[0]                                            # [R, T*din]
    if with_fe:
        # feature_embedding 1x1 conv as a block-diagonal time-invariant matmul
        xf = jnp.dot(xf, few_ref[...], preferred_element_type=f32) + feb_ref[...]
    xf = xf + emb_ref[0]                                     # diff emb (target rows only)
    tgt = xf[:nm, :]                                         # [Nm, T*c_in]
    ctx = xf[nm:, :]                                         # [Nn, T*c_in]

    # ---- GraphAggregation (order = 2) ---------------------------------------
    # Node-space hops are M,K <= 8 matmuls: pure MXU push/pop latency, fully
    # hidden under the big tw matmul below (latency-only, acknowledged).
    h1 = jnp.dot(at_ref[0], mask_ref[0] * ctx, preferred_element_type=f32)
    h2 = jnp.dot(a2_ref[0], h1, preferred_element_type=f32)

    # 1x1 mix of concat([target, hop1, hop2]) as 3 accumulating matmuls with
    # kron-expanded (block-diagonal) weights -> stays in the [R, T*C] layout.
    ga = (jnp.dot(tgt, gak_ref[0], preferred_element_type=f32)
          + jnp.dot(h1, gak_ref[1], preferred_element_type=f32)
          + jnp.dot(h2, gak_ref[2], preferred_element_type=f32)
          + gab_ref[...])                                    # [Nm, T*c_in]

    # ---- TemporalLearning: causal dilated conv as ONE dense matmul ----------
    tw = tw_ref[...]
    tb = tb_ref[...]
    conv_t = jnp.maximum(jnp.dot(ga, tw, preferred_element_type=f32) + tb, 0.0)
    conv_c = jnp.maximum(jnp.dot(ctx, tw, preferred_element_type=f32) + tb, 0.0)

    if not with_post:
        # disjoint row-range writes, no concat/reshape
        out_ref[0, :nm, :] = conv_t.astype(out_ref.dtype)
        out_ref[0, nm:, :] = conv_c.astype(out_ref.dtype)
        return

    # ---- residual 1x1 conv + GroupNorm(groups, c_out) -----------------------
    rw = rw_ref[...]
    rb = rb_ref[...]
    y_t = conv_t + jnp.dot(tgt, rw, preferred_element_type=f32) + rb
    y_c = conv_c + jnp.dot(ctx, rw, preferred_element_type=f32) + rb

    pmat = p_ref[...]
    gamma = gg_ref[...]
    beta = gb_ref[...]
    cg = c_out // groups

    def gnorm(v, n_rows):
        # stats per (sample, group) over (nodes, time, Cg); affine per channel.
        inv_cnt = 1.0 / float(n_rows * t * cg)
        s = jnp.sum(v, axis=0, keepdims=True)                          # [1, T*c_out]
        mean = jnp.dot(s, pmat, preferred_element_type=f32) * inv_cnt
        d = v - mean
        ss = jnp.sum(d * d, axis=0, keepdims=True)
        var = jnp.dot(ss, pmat, preferred_element_type=f32) * inv_cnt
        return d * jax.lax.rsqrt(var + eps) * gamma + beta

    out_ref[0, :nm, :] = gnorm(y_t, nm).astype(out_ref.dtype)
    out_ref[0, nm:, :] = gnorm(y_c, nn).astype(out_ref.dtype)


# ----------------------------------------------------------------------------
# pallas_call plumbing
# ----------------------------------------------------------------------------
def _run_fused_layer(h, emb_full, at_norm, a2, mask_dense, lp, fe_wk, fe_bt, *,
                     nm, nn, t, c_out, groups, with_post):
    b = h.shape[0]
    r_tot = nm + nn
    with_fe = fe_wk is not None

    inputs = [h, emb_full, at_norm, a2, mask_dense]
    in_specs = [
        pl.BlockSpec((1,) + h.shape[1:], lambda i: (i, 0, 0)),
        pl.BlockSpec((1,) + emb_full.shape[1:], lambda i: (i, 0, 0)),
        pl.BlockSpec((1,) + at_norm.shape[1:], lambda i: (i, 0, 0)),
        pl.BlockSpec((1,) + a2.shape[1:], lambda i: (i, 0, 0)),
        pl.BlockSpec((1,) + mask_dense.shape[1:], lambda i: (i, 0, 0)),
    ]

    def add_weight(w):
        # grid-invariant weights: constant index_map -> DMA'd once.
        inputs.append(w)
        zeros = (0,) * w.ndim
        in_specs.append(pl.BlockSpec(w.shape, lambda i, _z=zeros: _z))

    if with_fe:
        add_weight(fe_wk)
        add_weight(fe_bt)
    add_weight(lp["gak"])
    add_weight(lp["gab"])
    add_weight(lp["tw"])
    add_weight(lp["tb"])
    if with_post:
        add_weight(lp["resk"])
        add_weight(lp["resb"])
        add_weight(lp["gn_p"])
        add_weight(lp["gn_gamma"])
        add_weight(lp["gn_beta"])

    kern = functools.partial(
        _fused_layer_kernel, nm=nm, nn=nn, t=t, c_out=c_out,
        groups=groups, eps=1e-5, with_fe=with_fe, with_post=with_post)

    return pl.pallas_call(
        kern,
        out_shape=jax.ShapeDtypeStruct((b, r_tot, t * c_out), jnp.float32),
        grid=(b,),
        in_specs=in_specs,
        out_specs=pl.BlockSpec((1, r_tot, t * c_out), lambda i: (i, 0, 0)),
        compiler_params=pltpu.CompilerParams(
            dimension_semantics=("parallel",)),   # v7x: one batch element per TC
    )(*inputs)


# ----------------------------------------------------------------------------
# Operator precompute (ONCE per parameter set, outside jit)
# ----------------------------------------------------------------------------
def _build_time_mixing_weight(w, t, dilation):
    """Fold a causal dilated Conv1d (weight [K, Cin, Cout]) into a dense
    [T*Cin, T*Cout] time-mixing operator: out[r,t,o] = sum_k x[r, t-(K-1-k)*d] @ w[k]."""
    k, cin, cout = w.shape
    t_idx = jnp.arange(t, dtype=jnp.int32)[None, :, None]
    u_idx = jnp.arange(t, dtype=jnp.int32)[None, None, :]
    shifts = ((k - 1) - jnp.arange(k, dtype=jnp.int32))[:, None, None] * dilation
    sel = (u_idx == (t_idx - shifts)).astype(w.dtype)          # [K, T, T]
    weff = jnp.einsum("ktu,kio->uito", sel, w)                 # [T, Cin, T, Cout]
    return weff.reshape(t * cin, t * cout)


def prepare_operators(params, t):
    """Fold parameters into the dense lane-dense operators consumed by the
    fused kernel.  Depends only on params and static T, so it is called once
    (outside jit) instead of re-einsum'ing per forward call."""
    f32 = jnp.float32
    eye_t = jnp.eye(t, dtype=f32)
    ops = {
        "fe_wk": jnp.kron(eye_t, params["fe_w"]),              # [T*dy, T*c0]
        "fe_bt": jnp.tile(params["fe_b"], t)[None, :],         # [1, T*c0]
        "layers": [],
    }
    for i, lp in enumerate(params["layers"]):
        c_in = lp["ga_w"].shape[1]
        c_out = lp["tl_b"].shape[0]
        gak = jnp.stack([jnp.kron(eye_t, lp["ga_w"][j * c_in:(j + 1) * c_in, :])
                         for j in range(3)])                   # [3, T*c_in, T*c_in]
        entry = {
            "diff_table": lp["diff_table"],
            "diff_w1": lp["diff_w1"], "diff_b1": lp["diff_b1"],
            "diff_w2": lp["diff_w2"], "diff_b2": lp["diff_b2"],
            "gak": gak,
            "gab": jnp.tile(lp["ga_b"], t)[None, :],
            "tw": _build_time_mixing_weight(lp["tl_w"], t, 2 ** i),
            "tb": jnp.tile(lp["tl_b"], t)[None, :],
        }
        if i > 0:
            cg = c_out // 4
            ch = jnp.arange(c_out)
            g_cc = (ch[:, None] // cg == ch[None, :] // cg).astype(f32)   # [C, C]
            entry.update({
                "resk": jnp.kron(eye_t, lp["res_w"]),
                "resb": jnp.tile(lp["res_b"], t)[None, :],
                "gn_p": jnp.kron(jnp.ones((t, t), f32), g_cc),  # [T*c_out, T*c_out]
                "gn_gamma": jnp.tile(lp["gn_gamma"], t)[None, :],
                "gn_beta": jnp.tile(lp["gn_beta"], t)[None, :],
            })
        ops["layers"].append(entry)
    return ops


def build_diff_table(num_steps, dim):
    half = dim // 2
    steps = jnp.arange(num_steps, dtype=jnp.float32)[:, None]
    freqs = (10.0 ** (jnp.arange(half, dtype=jnp.float32) / max(half - 1, 1) * 4.0))[None, :]
    table = steps * freqs
    return jnp.concatenate([jnp.sin(table), jnp.cos(table)], axis=1)  # [steps, dim]


# ----------------------------------------------------------------------------
# Parameters (deterministic, in-script)
# ----------------------------------------------------------------------------
def init_params(key, input_dim, emd_channel, tcn_channels, kernel_size, num_steps=100):
    full = [emd_channel] + list(tcn_channels)
    keys = iter(jax.random.split(key, 8 * len(tcn_channels) + 4))

    def dense(shape, fan_in):
        return jax.random.normal(next(keys), shape, jnp.float32) / jnp.sqrt(float(fan_in))

    params = {
        "fe_w": dense((input_dim, emd_channel), input_dim),
        "fe_b": jnp.zeros((emd_channel,), jnp.float32),
        "layers": [],
    }
    for i in range(len(tcn_channels)):
        cin, cout = full[i], full[i + 1]
        params["layers"].append({
            "diff_table": build_diff_table(num_steps, cin),
            "diff_w1": dense((cin, cin), cin), "diff_b1": jnp.zeros((cin,), jnp.float32),
            "diff_w2": dense((cin, cin), cin), "diff_b2": jnp.zeros((cin,), jnp.float32),
            "ga_w": dense((3 * cin, cin), 3 * cin), "ga_b": jnp.zeros((cin,), jnp.float32),
            "tl_w": dense((kernel_size, cin, cout), kernel_size * cin),
            "tl_b": jnp.zeros((cout,), jnp.float32),
            "res_w": dense((cin, cout), cin), "res_b": jnp.zeros((cout,), jnp.float32),
            "gn_gamma": jnp.ones((cout,), jnp.float32),
            "gn_beta": jnp.zeros((cout,), jnp.float32),
        })
    return params


# ----------------------------------------------------------------------------
# DenoiseNetwork.forward
# ----------------------------------------------------------------------------
def denoise_forward(ops, x_context, y_context, x_target, y_target, adj,
                    missing_mask_context, diffusion_step):
    # TODO(synk): empty_token branch (y_target is None) is not implemented;
    #             TConv1d / LSTM / side_encoding / Dropout(eval) unused here.
    b, nn, dy, t = y_context.shape
    nm = y_target.shape[1]
    r_tot = nm + nn

    # channels-last, time-major flattened layout, target rows first
    ht = jnp.transpose(y_target, (0, 1, 3, 2)).reshape(b, nm, t * dy)
    hc = jnp.transpose(y_context, (0, 1, 3, 2)).reshape(b, nn, t * dy)
    h = jnp.concatenate([ht, hc], axis=1)                            # [B, R, T*dy]

    # Layer-invariant graph operators: normalised adjacency + fused two-hop,
    # computed once per call (not per layer / per grid step).
    a_norm = adj / (jnp.sum(adj, axis=1, keepdims=True) + 1e-6)      # [B, Nn, Nm]
    at_norm = jnp.transpose(a_norm, (0, 2, 1))                       # [B, Nm, Nn]
    a2 = jnp.einsum("bmn,bnk->bmk", at_norm, a_norm)                 # [B, Nm, Nm]

    mask_t = jnp.transpose(missing_mask_context, (0, 1, 3, 2))       # [B, Nn, T, 1]
    row_is_target = (jnp.arange(r_tot) < nm).astype(jnp.float32)     # [R]

    d_t, d_c = [], []
    for i, lp in enumerate(ops["layers"]):
        c_in = lp["gak"].shape[-1] // t
        c_out = lp["tw"].shape[-1] // t
        with_post = i > 0

        # DiffusionEmbedding (2-row MLP) in plain XLA; broadcast once to a
        # lane-dense [B, R, T*c_in] add-operand (zeros on context rows).
        e = lp["diff_table"][diffusion_step]                         # [B, c_in]
        e = jax.nn.silu(e @ lp["diff_w1"] + lp["diff_b1"])
        e = jax.nn.silu(e @ lp["diff_w2"] + lp["diff_b2"])
        emb_full = jnp.tile(e, (1, t))[:, None, :] * row_is_target[None, :, None]

        # lane-dense context mask [B, Nn, T*c_in]
        mask_dense = jnp.broadcast_to(mask_t, (b, nn, t, c_in)).reshape(b, nn, t * c_in)

        h = _run_fused_layer(
            h, emb_full, at_norm, a2, mask_dense, lp,
            ops["fe_wk"] if i == 0 else None,
            ops["fe_bt"] if i == 0 else None,
            nm=nm, nn=nn, t=t, c_out=c_out, groups=4, with_post=with_post)

        # back to the PyTorch [B, nodes, C, T] layout only for the returned
        # lists; next-layer input stays in the flattened layout.
        tgt = jnp.transpose(h[:, :nm].reshape(b, nm, t, c_out), (0, 1, 3, 2))
        ctx = jnp.transpose(h[:, nm:].reshape(b, nn, t, c_out), (0, 1, 3, 2))
        d_t.append(tgt)
        d_c.append(ctx)
    return d_c, d_t


# ----------------------------------------------------------------------------
if __name__ == "__main__":
    B, NUM_N, NUM_M, DY, T = 2, 6, 4, 4, 16
    INPUT_DIM = DY
    COVARIANT_DIM = 0
    EMD_CHANNEL = 16
    TCN_CHANNELS = [16, 32]
    KERNEL_SIZE = 3

    key = jax.random.PRNGKey(0)
    k1, k2, k3, k4, kp = jax.random.split(key, 5)

    y_context = jax.random.normal(k1, (B, NUM_N, DY, T), jnp.float32)
    y_target = jax.random.normal(k2, (B, NUM_M, DY, T), jnp.float32)
    adj = jax.random.uniform(k3, (B, NUM_N, NUM_M), jnp.float32)
    missing_mask_context = (jax.random.uniform(k4, (B, NUM_N, 1, T)) > 0.2).astype(jnp.float32)
    diffusion_step = jnp.array([3, 57], dtype=jnp.int32)
    x_context = None  # unused by forward()
    x_target = None   # unused by forward()

    params = init_params(kp, INPUT_DIM, EMD_CHANNEL, TCN_CHANNELS, KERNEL_SIZE)
    ops = prepare_operators(params, T)   # built once, outside jit
    jax.block_until_ready(ops)

    fwd = jax.jit(denoise_forward)
    d_c, d_t = fwd(ops, x_context, y_context, x_target, y_target,
                   adj, missing_mask_context, diffusion_step)
    jax.block_until_ready((d_c, d_t))

    assert d_t[0].shape == (B, NUM_M, 16, T)
    assert d_t[1].shape == (B, NUM_M, 32, T)
    assert d_c[0].shape == (B, NUM_N, 16, T)
    assert d_c[1].shape == (B, NUM_N, 32, T)
    assert all(bool(jnp.all(jnp.isfinite(a))) for a in d_t + d_c)
    print("KERNEL_OK")
</pallas_src>

<mosaic_0001>
module attributes {stable_mosaic.version = 11 : i64} {
  func.func @_fused_layer_kernel(%arg0: i32, %arg1: memref<1x10x256xf32, #tpu.memory_space<vmem>>, %arg2: memref<1x10x256xf32, #tpu.memory_space<vmem>>, %arg3: memref<1x4x6xf32, #tpu.memory_space<vmem>>, %arg4: memref<1x4x4xf32, #tpu.memory_space<vmem>>, %arg5: memref<1x6x256xf32, #tpu.memory_space<vmem>>, %arg6: memref<3x256x256xf32, #tpu.memory_space<vmem>>, %arg7: memref<1x256xf32, #tpu.memory_space<vmem>>, %arg8: memref<256x512xf32, #tpu.memory_space<vmem>>, %arg9: memref<1x512xf32, #tpu.memory_space<vmem>>, %arg10: memref<256x512xf32, #tpu.memory_space<vmem>>, %arg11: memref<1x512xf32, #tpu.memory_space<vmem>>, %arg12: memref<512x512xf32, #tpu.memory_space<vmem>>, %arg13: memref<1x512xf32, #tpu.memory_space<vmem>>, %arg14: memref<1x512xf32, #tpu.memory_space<vmem>>, %arg15: memref<1x10x512xf32, #tpu.memory_space<vmem>>) attributes {dimension_semantics = [#tpu.dimension_semantics<parallel>], iteration_bounds = array<i64: 2>, scalar_prefetch = 0 : i64, scratch_operands = 0 : i64, tpu.core_type = #tpu.core_type<tc>, window_params = [{transform_indices = @transform_0, window_bounds = array<i64: 1, 10, 256>}, {transform_indices = @transform_1, window_bounds = array<i64: 1, 10, 256>}, {transform_indices = @transform_2, window_bounds = array<i64: 1, 4, 6>}, {transform_indices = @transform_3, window_bounds = array<i64: 1, 4, 4>}, {transform_indices = @transform_4, window_bounds = array<i64: 1, 6, 256>}, {pipeline_mode = #tpu.pipeline_mode<synchronous>, transform_indices = @transform_5, window_bounds = array<i64: 3, 256, 256>}, {pipeline_mode = #tpu.pipeline_mode<synchronous>, transform_indices = @transform_6, window_bounds = array<i64: 1, 256>}, {pipeline_mode = #tpu.pipeline_mode<synchronous>, transform_indices = @transform_7, window_bounds = array<i64: 256, 512>}, {pipeline_mode = #tpu.pipeline_mode<synchronous>, transform_indices = @transform_8, window_bounds = array<i64: 1, 512>}, {pipeline_mode = #tpu.pipeline_mode<synchronous>, transform_indices = @transform_9, window_bounds = array<i64: 256, 512>}, {pipeline_mode = #tpu.pipeline_mode<synchronous>, transform_indices = @transform_10, window_bounds = array<i64: 1, 512>}, {pipeline_mode = #tpu.pipeline_mode<synchronous>, transform_indices = @transform_11, window_bounds = array<i64: 512, 512>}, {pipeline_mode = #tpu.pipeline_mode<synchronous>, transform_indices = @transform_12, window_bounds = array<i64: 1, 512>}, {pipeline_mode = #tpu.pipeline_mode<synchronous>, transform_indices = @transform_13, window_bounds = array<i64: 1, 512>}, {transform_indices = @transform_14, window_bounds = array<i64: 1, 10, 512>}]} {
    %c0 = arith.constant 0 : index
    %c0_0 = arith.constant 0 : index
    %c0_1 = arith.constant 0 : index
    %0 = vector.load %arg1[%c0, %c0_0, %c0_1] : memref<1x10x256xf32, #tpu.memory_space<vmem>>, vector<1x10x256xf32>
    %1 = vector.shape_cast %0 : vector<1x10x256xf32> to vector<10x256xf32>
    %c0_2 = arith.constant 0 : index
    %c0_3 = arith.constant 0 : index
    %c0_4 = arith.constant 0 : index
    %2 = vector.load %arg2[%c0_2, %c0_3, %c0_4] : memref<1x10x256xf32, #tpu.memory_space<vmem>>, vector<1x10x256xf32>
    %3 = vector.shape_cast %2 : vector<1x10x256xf32> to vector<10x256xf32>
    %4 = arith.addf %1, %3 : vector<10x256xf32>
    %5 = vector.extract_strided_slice %4 {offsets = [0, 0], sizes = [4, 256], strides = [1, 1]} : vector<10x256xf32> to vector<4x256xf32>
    %6 = vector.extract_strided_slice %4 {offsets = [4, 0], sizes = [6, 256], strides = [1, 1]} : vector<10x256xf32> to vector<6x256xf32>
    %c0_5 = arith.constant 0 : index
    %c0_6 = arith.constant 0 : index
    %c0_7 = arith.constant 0 : index
    %7 = vector.load %arg3[%c0_5, %c0_6, %c0_7] : memref<1x4x6xf32, #tpu.memory_space<vmem>>, vector<1x4x6xf32>
    %8 = vector.shape_cast %7 : vector<1x4x6xf32> to vector<4x6xf32>
    %c0_8 = arith.constant 0 : index
    %c0_9 = arith.constant 0 : index
    %c0_10 = arith.constant 0 : index
    %9 = vector.load %arg5[%c0_8, %c0_9, %c0_10] : memref<1x6x256xf32, #tpu.memory_space<vmem>>, vector<1x6x256xf32>
    %10 = vector.shape_cast %9 : vector<1x6x256xf32> to vector<6x256xf32>
    %11 = arith.mulf %10, %6 : vector<6x256xf32>
    %cst = arith.constant dense<0.000000e+00> : vector<4x256xf32>
    %12 = tpu.matmul %8, %11, %cst {dimension_numbers = #tpu.dot_dimension_numbers<[1], [0], [0], [1], [0, 0, 1, 1], [], []>} : vector<4x6xf32>, vector<6x256xf32>, vector<4x256xf32> -> vector<4x256xf32>
    %c0_11 = arith.constant 0 : index
    %c0_12 = arith.constant 0 : index
    %c0_13 = arith.constant 0 : index
    %13 = vector.load %arg4[%c0_11, %c0_12, %c0_13] : memref<1x4x4xf32, #tpu.memory_space<vmem>>, vector<1x4x4xf32>
    %14 = vector.shape_cast %13 : vector<1x4x4xf32> to vector<4x4xf32>
    %cst_14 = arith.constant dense<0.000000e+00> : vector<4x256xf32>
    %15 = tpu.matmul %14, %12, %cst_14 {dimension_numbers = #tpu.dot_dimension_numbers<[1], [0], [0], [1], [0, 0, 1, 1], [], []>} : vector<4x4xf32>, vector<4x256xf32>, vector<4x256xf32> -> vector<4x256xf32>
    %c0_15 = arith.constant 0 : index
    %c0_16 = arith.constant 0 : index
    %c0_17 = arith.constant 0 : index
    %16 = vector.load %arg6[%c0_15, %c0_16, %c0_17] : memref<3x256x256xf32, #tpu.memory_space<vmem>>, vector<1x256x256xf32>
    %17 = vector.shape_cast %16 : vector<1x256x256xf32> to vector<256x256xf32>
    %cst_18 = arith.constant dense<0.000000e+00> : vector<4x256xf32>
    %18 = tpu.matmul %5, %17, %cst_18 {dimension_numbers = #tpu.dot_dimension_numbers<[1], [0], [0], [1], [0, 0, 1, 1], [], []>} : vector<4x256xf32>, vector<256x256xf32>, vector<4x256xf32> -> vector<4x256xf32>
    %c1 = arith.constant 1 : index
    %c0_19 = arith.constant 0 : index
    %c0_20 = arith.constant 0 : index
    %19 = vector.load %arg6[%c1, %c0_19, %c0_20] : memref<3x256x256xf32, #tpu.memory_space<vmem>>, vector<1x256x256xf32>
    %20 = vector.shape_cast %19 : vector<1x256x256xf32> to vector<256x256xf32>
    %cst_21 = arith.constant dense<0.000000e+00> : vector<4x256xf32>
    %21 = tpu.matmul %12, %20, %cst_21 {dimension_numbers = #tpu.dot_dimension_numbers<[1], [0], [0], [1], [0, 0, 1, 1], [], []>} : vector<4x256xf32>, vector<256x256xf32>, vector<4x256xf32> -> vector<4x256xf32>
    %22 = arith.addf %18, %21 : vector<4x256xf32>
    %c2 = arith.constant 2 : index
    %c0_22 = arith.constant 0 : index
    %c0_23 = arith.constant 0 : index
    %23 = vector.load %arg6[%c2, %c0_22, %c0_23] : memref<3x256x256xf32, #tpu.memory_space<vmem>>, vector<1x256x256xf32>
    %24 = vector.shape_cast %23 : vector<1x256x256xf32> to vector<256x256xf32>
    %cst_24 = arith.constant dense<0.000000e+00> : vector<4x256xf32>
    %25 = tpu.matmul %15, %24, %cst_24 {dimension_numbers = #tpu.dot_dimension_numbers<[1], [0], [0], [1], [0, 0, 1, 1], [], []>} : vector<4x256xf32>, vector<256x256xf32>, vector<4x256xf32> -> vector<4x256xf32>
    %26 = arith.addf %22, %25 : vector<4x256xf32>
    %c0_25 = arith.constant 0 : index
    %c0_26 = arith.constant 0 : index
    %27 = vector.load %arg7[%c0_25, %c0_26] : memref<1x256xf32, #tpu.memory_space<vmem>>, vector<1x256xf32>
    %28 = vector.broadcast %27 : vector<1x256xf32> to vector<4x256xf32>
    %29 = arith.addf %26, %28 : vector<4x256xf32>
    %c0_27 = arith.constant 0 : index
    %c0_28 = arith.constant 0 : index
    %30 = vector.load %arg8[%c0_27, %c0_28] : memref<256x512xf32, #tpu.memory_space<vmem>>, vector<256x512xf32>
    %c0_29 = arith.constant 0 : index
    %c0_30 = arith.constant 0 : index
    %31 = vector.load %arg9[%c0_29, %c0_30] : memref<1x512xf32, #tpu.memory_space<vmem>>, vector<1x512xf32>
    %cst_31 = arith.constant dense<0.000000e+00> : vector<4x512xf32>
    %32 = tpu.matmul %29, %30, %cst_31 {dimension_numbers = #tpu.dot_dimension_numbers<[1], [0], [0], [1], [0, 0, 1, 1], [], []>} : vector<4x256xf32>, vector<256x512xf32>, vector<4x512xf32> -> vector<4x512xf32>
    %33 = vector.broadcast %31 : vector<1x512xf32> to vector<4x512xf32>
    %34 = arith.addf %32, %33 : vector<4x512xf32>
    %cst_32 = arith.constant 0.000000e+00 : f32
    %35 = vector.broadcast %cst_32 : f32 to vector<4x512xf32>
    %36 = arith.maximumf %34, %35 : vector<4x512xf32>
    %cst_33 = arith.constant dense<0.000000e+00> : vector<6x512xf32>
    %37 = tpu.matmul %6, %30, %cst_33 {dimension_numbers = #tpu.dot_dimension_numbers<[1], [0], [0], [1], [0, 0, 1, 1], [], []>} : vector<6x256xf32>, vector<256x512xf32>, vector<6x512xf32> -> vector<6x512xf32>
    %38 = vector.broadcast %31 : vector<1x512xf32> to vector<6x512xf32>
    %39 = arith.addf %37, %38 : vector<6x512xf32>
    %cst_34 = arith.constant 0.000000e+00 : f32
    %40 = vector.broadcast %cst_34 : f32 to vector<6x512xf32>
    %41 = arith.maximumf %39, %40 : vector<6x512xf32>
    %c0_35 = arith.constant 0 : index
    %c0_36 = arith.constant 0 : index
    %42 = vector.load %arg10[%c0_35, %c0_36] : memref<256x512xf32, #tpu.memory_space<vmem>>, vector<256x512xf32>
    %c0_37 = arith.constant 0 : index
    %c0_38 = arith.constant 0 : index
    %43 = vector.load %arg11[%c0_37, %c0_38] : memref<1x512xf32, #tpu.memory_space<vmem>>, vector<1x512xf32>
    %cst_39 = arith.constant dense<0.000000e+00> : vector<4x512xf32>
    %44 = tpu.matmul %5, %42, %cst_39 {dimension_numbers = #tpu.dot_dimension_numbers<[1], [0], [0], [1], [0, 0, 1, 1], [], []>} : vector<4x256xf32>, vector<256x512xf32>, vector<4x512xf32> -> vector<4x512xf32>
    %45 = arith.addf %36, %44 : vector<4x512xf32>
    %46 = vector.broadcast %43 : vector<1x512xf32> to vector<4x512xf32>
    %47 = arith.addf %45, %46 : vector<4x512xf32>
    %cst_40 = arith.constant dense<0.000000e+00> : vector<6x512xf32>
    %48 = tpu.matmul %6, %42, %cst_40 {dimension_numbers = #tpu.dot_dimension_numbers<[1], [0], [0], [1], [0, 0, 1, 1], [], []>} : vector<6x256xf32>, vector<256x512xf32>, vector<6x512xf32> -> vector<6x512xf32>
    %49 = arith.addf %41, %48 : vector<6x512xf32>
    %50 = vector.broadcast %43 : vector<1x512xf32> to vector<6x512xf32>
    %51 = arith.addf %49, %50 : vector<6x512xf32>
    %c0_41 = arith.constant 0 : index
    %c0_42 = arith.constant 0 : index
    %52 = vector.load %arg12[%c0_41, %c0_42] : memref<512x512xf32, #tpu.memory_space<vmem>>, vector<512x512xf32>
    %c0_43 = arith.constant 0 : index
    %c0_44 = arith.constant 0 : index
    %53 = vector.load %arg13[%c0_43, %c0_44] : memref<1x512xf32, #tpu.memory_space<vmem>>, vector<1x512xf32>
    %c0_45 = arith.constant 0 : index
    %c0_46 = arith.constant 0 : index
    %54 = vector.load %arg14[%c0_45, %c0_46] : memref<1x512xf32, #tpu.memory_space<vmem>>, vector<1x512xf32>
    %cst_47 = arith.constant dense<0.000000e+00> : vector<512xf32>
    %55 = vector.multi_reduction <add>, %47, %cst_47 [0] : vector<4x512xf32> to vector<512xf32>
    %56 = vector.shape_cast %55 : vector<512xf32> to vector<1x512xf32>
    %cst_48 = arith.constant dense<0.000000e+00> : vector<1x512xf32>
    %57 = tpu.matmul %56, %52, %cst_48 {dimension_numbers = #tpu.dot_dimension_numbers<[1], [0], [0], [1], [0, 0, 1, 1], [], []>} : vector<1x512xf32>, vector<512x512xf32>, vector<1x512xf32> -> vector<1x512xf32>
    %cst_49 = arith.constant 0.001953125 : f32
    %58 = vector.broadcast %cst_49 : f32 to vector<1x512xf32>
    %59 = arith.mulf %57, %58 : vector<1x512xf32>
    %60 = vector.broadcast %59 : vector<1x512xf32> to vector<4x512xf32>
    %61 = arith.subf %47, %60 : vector<4x512xf32>
    %62 = arith.mulf %61, %61 : vector<4x512xf32>
    %cst_50 = arith.constant dense<0.000000e+00> : vector<512xf32>
    %63 = vector.multi_reduction <add>, %62, %cst_50 [0] : vector<4x512xf32> to vector<512xf32>
    %64 = vector.shape_cast %63 : vector<512xf32> to vector<1x512xf32>
    %cst_51 = arith.constant dense<0.000000e+00> : vector<1x512xf32>
    %65 = tpu.matmul %64, %52, %cst_51 {dimension_numbers = #tpu.dot_dimension_numbers<[1], [0], [0], [1], [0, 0, 1, 1], [], []>} : vector<1x512xf32>, vector<512x512xf32>, vector<1x512xf32> -> vector<1x512xf32>
    %cst_52 = arith.constant 0.001953125 : f32
    %66 = vector.broadcast %cst_52 : f32 to vector<1x512xf32>
    %67 = arith.mulf %65, %66 : vector<1x512xf32>
    %cst_53 = arith.constant 9.99999974E-6 : f32
    %68 = vector.broadcast %cst_53 : f32 to vector<1x512xf32>
    %69 = arith.addf %67, %68 : vector<1x512xf32>
    %70 = math.rsqrt %69 : vector<1x512xf32>
    %71 = vector.broadcast %70 : vector<1x512xf32> to vector<4x512xf32>
    %72 = arith.mulf %61, %71 : vector<4x512xf32>
    %73 = vector.broadcast %53 : vector<1x512xf32> to vector<4x512xf32>
    %74 = arith.mulf %72, %73 : vector<4x512xf32>
    %75 = vector.broadcast %54 : vector<1x512xf32> to vector<4x512xf32>
    %76 = arith.addf %74, %75 : vector<4x512xf32>
    %c0_54 = arith.constant 0 : index
    %c0_55 = arith.constant 0 : index
    %c0_56 = arith.constant 0 : index
    %77 = vector.load %arg15[%c0_54, %c0_55, %c0_56] : memref<1x10x512xf32, #tpu.memory_space<vmem>>, vector<1x4x512xf32>
    %78 = vector.shape_cast %77 : vector<1x4x512xf32> to vector<4x512xf32>
    %79 = vector.shape_cast %76 : vector<4x512xf32> to vector<1x4x512xf32>
    tpu.vector_store %arg15[%c0_54, %c0_55, %c0_56], %79 {strides = array<i32>} : memref<1x10x512xf32, #tpu.memory_space<vmem>>, vector<1x4x512xf32>,
    %cst_57 = arith.constant dense<0.000000e+00> : vector<512xf32>
    %80 = vector.multi_reduction <add>, %51, %cst_57 [0] : vector<6x512xf32> to vector<512xf32>
    %81 = vector.shape_cast %80 : vector<512xf32> to vector<1x512xf32>
    %cst_58 = arith.constant dense<0.000000e+00> : vector<1x512xf32>
    %82 = tpu.matmul %81, %52, %cst_58 {dimension_numbers = #tpu.dot_dimension_numbers<[1], [0], [0], [1], [0, 0, 1, 1], [], []>} : vector<1x512xf32>, vector<512x512xf32>, vector<1x512xf32> -> vector<1x512xf32>
    %cst_59 = arith.constant 0.00130208337 : f32
    %83 = vector.broadcast %cst_59 : f32 to vector<1x512xf32>
    %84 = arith.mulf %82, %83 : vector<1x512xf32>
    %85 = vector.broadcast %84 : vector<1x512xf32> to vector<6x512xf32>
    %86 = arith.subf %51, %85 : vector<6x512xf32>
    %87 = arith.mulf %86, %86 : vector<6x512xf32>
    %cst_60 = arith.constant dense<0.000000e+00> : vector<512xf32>
    %88 = vector.multi_reduction <add>, %87, %cst_60 [0] : vector<6x512xf32> to vector<512xf32>
    %89 = vector.shape_cast %88 : vector<512xf32> to vector<1x512xf32>
    %cst_61 = arith.constant dense<0.000000e+00> : vector<1x512xf32>
    %90 = tpu.matmul %89, %52, %cst_61 {dimension_numbers = #tpu.dot_dimension_numbers<[1], [0], [0], [1], [0, 0, 1, 1], [], []>} : vector<1x512xf32>, vector<512x512xf32>, vector<1x512xf32> -> vector<1x512xf32>
    %cst_62 = arith.constant 0.00130208337 : f32
    %91 = vector.broadcast %cst_62 : f32 to vector<1x512xf32>
    %92 = arith.mulf %90, %91 : vector<1x512xf32>
    %cst_63 = arith.constant 9.99999974E-6 : f32
    %93 = vector.broadcast %cst_63 : f32 to vector<1x512xf32>
    %94 = arith.addf %92, %93 : vector<1x512xf32>
    %95 = math.rsqrt %94 : vector<1x512xf32>
    %96 = vector.broadcast %95 : vector<1x512xf32> to vector<6x512xf32>
    %97 = arith.mulf %86, %96 : vector<6x512xf32>
    %98 = vector.broadcast %53 : vector<1x512xf32> to vector<6x512xf32>
    %99 = arith.mulf %97, %98 : vector<6x512xf32>
    %100 = vector.broadcast %54 : vector<1x512xf32> to vector<6x512xf32>
    %101 = arith.addf %99, %100 : vector<6x512xf32>
    %c0_64 = arith.constant 0 : index
    %c4 = arith.constant 4 : index
    %c0_65 = arith.constant 0 : index
    %102 = vector.load %arg15[%c0_64, %c4, %c0_65] : memref<1x10x512xf32, #tpu.memory_space<vmem>>, vector<1x6x512xf32>
    %103 = vector.shape_cast %102 : vector<1x6x512xf32> to vector<6x512xf32>
    %104 = vector.shape_cast %101 : vector<6x512xf32> to vector<1x6x512xf32>
    tpu.vector_store %arg15[%c0_64, %c4, %c0_65], %104 {strides = array<i32>} : memref<1x10x512xf32, #tpu.memory_space<vmem>>, vector<1x6x512xf32>,
    return
  }
  func.func @transform_0(%arg0: i32) -> (i32, i32, i32) {
    %c0_i32 = arith.constant 0 : i32
    %c0_i32_0 = arith.constant 0 : i32
    %c0_i32_1 = arith.constant 0 : i32
    return %arg0, %c0_i32, %c0_i32_0 : i32, i32, i32
  }
  func.func @transform_1(%arg0: i32) -> (i32, i32, i32) {
    %c0_i32 = arith.constant 0 : i32
    %c0_i32_0 = arith.constant 0 : i32
    %c0_i32_1 = arith.constant 0 : i32
    return %arg0, %c0_i32, %c0_i32_0 : i32, i32, i32
  }
  func.func @transform_2(%arg0: i32) -> (i32, i32, i32) {
    %c0_i32 = arith.constant 0 : i32
    %c0_i32_0 = arith.constant 0 : i32
    %c0_i32_1 = arith.constant 0 : i32
    return %arg0, %c0_i32, %c0_i32_0 : i32, i32, i32
  }
  func.func @transform_3(%arg0: i32) -> (i32, i32, i32) {
    %c0_i32 = arith.constant 0 : i32
    %c0_i32_0 = arith.constant 0 : i32
    %c0_i32_1 = arith.constant 0 : i32
    return %arg0, %c0_i32, %c0_i32_0 : i32, i32, i32
  }
  func.func @transform_4(%arg0: i32) -> (i32, i32, i32) {
    %c0_i32 = arith.constant 0 : i32
    %c0_i32_0 = arith.constant 0 : i32
    %c0_i32_1 = arith.constant 0 : i32
    return %arg0, %c0_i32, %c0_i32_0 : i32, i32, i32
  }
  func.func @transform_5(%arg0: i32) -> (i32, i32, i32) {
    %c0_i32 = arith.constant 0 : i32
    %c0_i32_0 = arith.constant 0 : i32
    %c0_i32_1 = arith.constant 0 : i32
    %c0_i32_2 = arith.constant 0 : i32
    return %c0_i32, %c0_i32_0, %c0_i32_1 : i32, i32, i32
  }
  func.func @transform_6(%arg0: i32) -> (i32, i32) {
    %c0_i32 = arith.constant 0 : i32
    %c0_i32_0 = arith.constant 0 : i32
    %c0_i32_1 = arith.constant 0 : i32
    return %c0_i32, %c0_i32_0 : i32, i32
  }
  func.func @transform_7(%arg0: i32) -> (i32, i32) {
    %c0_i32 = arith.constant 0 : i32
    %c0_i32_0 = arith.constant 0 : i32
    %c0_i32_1 = arith.constant 0 : i32
    return %c0_i32, %c0_i32_0 : i32, i32
  }
  func.func @transform_8(%arg0: i32) -> (i32, i32) {
    %c0_i32 = arith.constant 0 : i32
    %c0_i32_0 = arith.constant 0 : i32
    %c0_i32_1 = arith.constant 0 : i32
    return %c0_i32, %c0_i32_0 : i32, i32
  }
  func.func @transform_9(%arg0: i32) -> (i32, i32) {
    %c0_i32 = arith.constant 0 : i32
    %c0_i32_0 = arith.constant 0 : i32
    %c0_i32_1 = arith.constant 0 : i32
    return %c0_i32, %c0_i32_0 : i32, i32
  }
  func.func @transform_10(%arg0: i32) -> (i32, i32) {
    %c0_i32 = arith.constant 0 : i32
    %c0_i32_0 = arith.constant 0 : i32
    %c0_i32_1 = arith.constant 0 : i32
    return %c0_i32, %c0_i32_0 : i32, i32
  }
  func.func @transform_11(%arg0: i32) -> (i32, i32) {
    %c0_i32 = arith.constant 0 : i32
    %c0_i32_0 = arith.constant 0 : i32
    %c0_i32_1 = arith.constant 0 : i32
    return %c0_i32, %c0_i32_0 : i32, i32
  }
  func.func @transform_12(%arg0: i32) -> (i32, i32) {
    %c0_i32 = arith.constant 0 : i32
    %c0_i32_0 = arith.constant 0 : i32
    %c0_i32_1 = arith.constant 0 : i32
    return %c0_i32, %c0_i32_0 : i32, i32
  }
  func.func @transform_13(%arg0: i32) -> (i32, i32) {
    %c0_i32 = arith.constant 0 : i32
    %c0_i32_0 = arith.constant 0 : i32
    %c0_i32_1 = arith.constant 0 : i32
    return %c0_i32, %c0_i32_0 : i32, i32
  }
  func.func @transform_14(%arg0: i32) -> (i32, i32, i32) {
    %c0_i32 = arith.constant 0 : i32
    %c0_i32_0 = arith.constant 0 : i32
    %c0_i32_1 = arith.constant 0 : i32
    return %arg0, %c0_i32, %c0_i32_0 : i32, i32, i32
  }
}

module attributes {stable_mosaic.version = 11 : i64} {
  func.func @_fused_layer_kernel(%arg0: i32, %arg1: memref<1x10x64xf32, #tpu.memory_space<vmem>>, %arg2: memref<1x10x256xf32, #tpu.memory_space<vmem>>, %arg3: memref<1x4x6xf32, #tpu.memory_space<vmem>>, %arg4: memref<1x4x4xf32, #tpu.memory_space<vmem>>, %arg5: memref<1x6x256xf32, #tpu.memory_space<vmem>>, %arg6: memref<64x256xf32, #tpu.memory_space<vmem>>, %arg7: memref<1x256xf32, #tpu.memory_space<vmem>>, %arg8: memref<3x256x256xf32, #tpu.memory_space<vmem>>, %arg9: memref<1x256xf32, #tpu.memory_space<vmem>>, %arg10: memref<256x256xf32, #tpu.memory_space<vmem>>, %arg11: memref<1x256xf32, #tpu.memory_space<vmem>>, %arg12: memref<1x10x256xf32, #tpu.memory_space<vmem>>) attributes {dimension_semantics = [#tpu.dimension_semantics<parallel>], iteration_bounds = array<i64: 2>, scalar_prefetch = 0 : i64, scratch_operands = 0 : i64, tpu.core_type = #tpu.core_type<tc>, window_params = [{transform_indices = @transform_0, window_bounds = array<i64: 1, 10, 64>}, {transform_indices = @transform_1, window_bounds = array<i64: 1, 10, 256>}, {transform_indices = @transform_2, window_bounds = array<i64: 1, 4, 6>}, {transform_indices = @transform_3, window_bounds = array<i64: 1, 4, 4>}, {transform_indices = @transform_4, window_bounds = array<i64: 1, 6, 256>}, {pipeline_mode = #tpu.pipeline_mode<synchronous>, transform_indices = @transform_5, window_bounds = array<i64: 64, 256>}, {pipeline_mode = #tpu.pipeline_mode<synchronous>, transform_indices = @transform_6, window_bounds = array<i64: 1, 256>}, {pipeline_mode = #tpu.pipeline_mode<synchronous>, transform_indices = @transform_7, window_bounds = array<i64: 3, 256, 256>}, {pipeline_mode = #tpu.pipeline_mode<synchronous>, transform_indices = @transform_8, window_bounds = array<i64: 1, 256>}, {pipeline_mode = #tpu.pipeline_mode<synchronous>, transform_indices = @transform_9, window_bounds = array<i64: 256, 256>}, {pipeline_mode = #tpu.pipeline_mode<synchronous>, transform_indices = @transform_10, window_bounds = array<i64: 1, 256>}, {transform_indices = @transform_11, window_bounds = array<i64: 1, 10, 256>}]} {
    %c0 = arith.constant 0 : index
    %c0_0 = arith.constant 0 : index
    %c0_1 = arith.constant 0 : index
    %0 = vector.load %arg1[%c0, %c0_0, %c0_1] : memref<1x10x64xf32, #tpu.memory_space<vmem>>, vector<1x10x64xf32>
    %1 = vector.shape_cast %0 : vector<1x10x64xf32> to vector<10x64xf32>
    %c0_2 = arith.constant 0 : index
    %c0_3 = arith.constant 0 : index
    %2 = vector.load %arg6[%c0_2, %c0_3] : memref<64x256xf32, #tpu.memory_space<vmem>>, vector<64x256xf32>
    %cst = arith.constant dense<0.000000e+00> : vector<10x256xf32>
    %3 = tpu.matmul %1, %2, %cst {dimension_numbers = #tpu.dot_dimension_numbers<[1], [0], [0], [1], [0, 0, 1, 1], [], []>} : vector<10x64xf32>, vector<64x256xf32>, vector<10x256xf32> -> vector<10x256xf32>
    %c0_4 = arith.constant 0 : index
    %c0_5 = arith.constant 0 : index
    %4 = vector.load %arg7[%c0_4, %c0_5] : memref<1x256xf32, #tpu.memory_space<vmem>>, vector<1x256xf32>
    %5 = vector.broadcast %4 : vector<1x256xf32> to vector<10x256xf32>
    %6 = arith.addf %3, %5 : vector<10x256xf32>
    %c0_6 = arith.constant 0 : index
    %c0_7 = arith.constant 0 : index
    %c0_8 = arith.constant 0 : index
    %7 = vector.load %arg2[%c0_6, %c0_7, %c0_8] : memref<1x10x256xf32, #tpu.memory_space<vmem>>, vector<1x10x256xf32>
    %8 = vector.shape_cast %7 : vector<1x10x256xf32> to vector<10x256xf32>
    %9 = arith.addf %6, %8 : vector<10x256xf32>
    %10 = vector.extract_strided_slice %9 {offsets = [0, 0], sizes = [4, 256], strides = [1, 1]} : vector<10x256xf32> to vector<4x256xf32>
    %11 = vector.extract_strided_slice %9 {offsets = [4, 0], sizes = [6, 256], strides = [1, 1]} : vector<10x256xf32> to vector<6x256xf32>
    %c0_9 = arith.constant 0 : index
    %c0_10 = arith.constant 0 : index
    %c0_11 = arith.constant 0 : index
    %12 = vector.load %arg3[%c0_9, %c0_10, %c0_11] : memref<1x4x6xf32, #tpu.memory_space<vmem>>, vector<1x4x6xf32>
    %13 = vector.shape_cast %12 : vector<1x4x6xf32> to vector<4x6xf32>
    %c0_12 = arith.constant 0 : index
    %c0_13 = arith.constant 0 : index
    %c0_14 = arith.constant 0 : index
    %14 = vector.load %arg5[%c0_12, %c0_13, %c0_14] : memref<1x6x256xf32, #tpu.memory_space<vmem>>, vector<1x6x256xf32>
    %15 = vector.shape_cast %14 : vector<1x6x256xf32> to vector<6x256xf32>
    %16 = arith.mulf %15, %11 : vector<6x256xf32>
    %cst_15 = arith.constant dense<0.000000e+00> : vector<4x256xf32>
    %17 = tpu.matmul %13, %16, %cst_15 {dimension_numbers = #tpu.dot_dimension_numbers<[1], [0], [0], [1], [0, 0, 1, 1], [], []>} : vector<4x6xf32>, vector<6x256xf32>, vector<4x256xf32> -> vector<4x256xf32>
    %c0_16 = arith.constant 0 : index
    %c0_17 = arith.constant 0 : index
    %c0_18 = arith.constant 0 : index
    %18 = vector.load %arg4[%c0_16, %c0_17, %c0_18] : memref<1x4x4xf32, #tpu.memory_space<vmem>>, vector<1x4x4xf32>
    %19 = vector.shape_cast %18 : vector<1x4x4xf32> to vector<4x4xf32>
    %cst_19 = arith.constant dense<0.000000e+00> : vector<4x256xf32>
    %20 = tpu.matmul %19, %17, %cst_19 {dimension_numbers = #tpu.dot_dimension_numbers<[1], [0], [0], [1], [0, 0, 1, 1], [], []>} : vector<4x4xf32>, vector<4x256xf32>, vector<4x256xf32> -> vector<4x256xf32>
    %c0_20 = arith.constant 0 : index
    %c0_21 = arith.constant 0 : index
    %c0_22 = arith.constant 0 : index
    %21 = vector.load %arg8[%c0_20, %c0_21, %c0_22] : memref<3x256x256xf32, #tpu.memory_space<vmem>>, vector<1x256x256xf32>
    %22 = vector.shape_cast %21 : vector<1x256x256xf32> to vector<256x256xf32>
    %cst_23 = arith.constant dense<0.000000e+00> : vector<4x256xf32>
    %23 = tpu.matmul %10, %22, %cst_23 {dimension_numbers = #tpu.dot_dimension_numbers<[1], [0], [0], [1], [0, 0, 1, 1], [], []>} : vector<4x256xf32>, vector<256x256xf32>, vector<4x256xf32> -> vector<4x256xf32>
    %c1 = arith.constant 1 : index
    %c0_24 = arith.constant 0 : index
    %c0_25 = arith.constant 0 : index
    %24 = vector.load %arg8[%c1, %c0_24, %c0_25] : memref<3x256x256xf32, #tpu.memory_space<vmem>>, vector<1x256x256xf32>
    %25 = vector.shape_cast %24 : vector<1x256x256xf32> to vector<256x256xf32>
    %cst_26 = arith.constant dense<0.000000e+00> : vector<4x256xf32>
    %26 = tpu.matmul %17, %25, %cst_26 {dimension_numbers = #tpu.dot_dimension_numbers<[1], [0], [0], [1], [0, 0, 1, 1], [], []>} : vector<4x256xf32>, vector<256x256xf32>, vector<4x256xf32> -> vector<4x256xf32>
    %27 = arith.addf %23, %26 : vector<4x256xf32>
    %c2 = arith.constant 2 : index
    %c0_27 = arith.constant 0 : index
    %c0_28 = arith.constant 0 : index
    %28 = vector.load %arg8[%c2, %c0_27, %c0_28] : memref<3x256x256xf32, #tpu.memory_space<vmem>>, vector<1x256x256xf32>
    %29 = vector.shape_cast %28 : vector<1x256x256xf32> to vector<256x256xf32>
    %cst_29 = arith.constant dense<0.000000e+00> : vector<4x256xf32>
    %30 = tpu.matmul %20, %29, %cst_29 {dimension_numbers = #tpu.dot_dimension_numbers<[1], [0], [0], [1], [0, 0, 1, 1], [], []>} : vector<4x256xf32>, vector<256x256xf32>, vector<4x256xf32> -> vector<4x256xf32>
    %31 = arith.addf %27, %30 : vector<4x256xf32>
    %c0_30 = arith.constant 0 : index
    %c0_31 = arith.constant 0 : index
    %32 = vector.load %arg9[%c0_30, %c0_31] : memref<1x256xf32, #tpu.memory_space<vmem>>, vector<1x256xf32>
    %33 = vector.broadcast %32 : vector<1x256xf32> to vector<4x256xf32>
    %34 = arith.addf %31, %33 : vector<4x256xf32>
    %c0_32 = arith.constant 0 : index
    %c0_33 = arith.constant 0 : index
    %35 = vector.load %arg10[%c0_32, %c0_33] : memref<256x256xf32, #tpu.memory_space<vmem>>, vector<256x256xf32>
    %c0_34 = arith.constant 0 : index
    %c0_35 = arith.constant 0 : index
    %36 = vector.load %arg11[%c0_34, %c0_35] : memref<1x256xf32, #tpu.memory_space<vmem>>, vector<1x256xf32>
    %cst_36 = arith.constant dense<0.000000e+00> : vector<4x256xf32>
    %37 = tpu.matmul %34, %35, %cst_36 {dimension_numbers = #tpu.dot_dimension_numbers<[1], [0], [0], [1], [0, 0, 1, 1], [], []>} : vector<4x256xf32>, vector<256x256xf32>, vector<4x256xf32> -> vector<4x256xf32>
    %38 = vector.broadcast %36 : vector<1x256xf32> to vector<4x256xf32>
    %39 = arith.addf %37, %38 : vector<4x256xf32>
    %cst_37 = arith.constant 0.000000e+00 : f32
    %40 = vector.broadcast %cst_37 : f32 to vector<4x256xf32>
    %41 = arith.maximumf %39, %40 : vector<4x256xf32>
    %cst_38 = arith.constant dense<0.000000e+00> : vector<6x256xf32>
    %42 = tpu.matmul %11, %35, %cst_38 {dimension_numbers = #tpu.dot_dimension_numbers<[1], [0], [0], [1], [0, 0, 1, 1], [], []>} : vector<6x256xf32>, vector<256x256xf32>, vector<6x256xf32> -> vector<6x256xf32>
    %43 = vector.broadcast %36 : vector<1x256xf32> to vector<6x256xf32>
    %44 = arith.addf %42, %43 : vector<6x256xf32>
    %cst_39 = arith.constant 0.000000e+00 : f32
    %45 = vector.broadcast %cst_39 : f32 to vector<6x256xf32>
    %46 = arith.maximumf %44, %45 : vector<6x256xf32>
    %c0_40 = arith.constant 0 : index
    %c0_41 = arith.constant 0 : index
    %c0_42 = arith.constant 0 : index
    %47 = vector.load %arg12[%c0_40, %c0_41, %c0_42] : memref<1x10x256xf32, #tpu.memory_space<vmem>>, vector<1x4x256xf32>
    %48 = vector.shape_cast %47 : vector<1x4x256xf32> to vector<4x256xf32>
    %49 = vector.shape_cast %41 : vector<4x256xf32> to vector<1x4x256xf32>
    tpu.vector_store %arg12[%c0_40, %c0_41, %c0_42], %49 {strides = array<i32>} : memref<1x10x256xf32, #tpu.memory_space<vmem>>, vector<1x4x256xf32>,
    %c0_43 = arith.constant 0 : index
    %c4 = arith.constant 4 : index
    %c0_44 = arith.constant 0 : index
    %50 = vector.load %arg12[%c0_43, %c4, %c0_44] : memref<1x10x256xf32, #tpu.memory_space<vmem>>, vector<1x6x256xf32>
    %51 = vector.shape_cast %50 : vector<1x6x256xf32> to vector<6x256xf32>
    %52 = vector.shape_cast %46 : vector<6x256xf32> to vector<1x6x256xf32>
    tpu.vector_store %arg12[%c0_43, %c4, %c0_44], %52 {strides = array<i32>} : memref<1x10x256xf32, #tpu.memory_space<vmem>>, vector<1x6x256xf32>,
    return
  }
  func.func @transform_0(%arg0: i32) -> (i32, i32, i32) {
    %c0_i32 = arith.constant 0 : i32
    %c0_i32_0 = arith.constant 0 : i32
    %c0_i32_1 = arith.constant 0 : i32
    return %arg0, %c0_i32, %c0_i32_0 : i32, i32, i32
  }
  func.func @transform_1(%arg0: i32) -> (i32, i32, i32) {
    %c0_i32 = arith.constant 0 : i32
    %c0_i32_0 = arith.constant 0 : i32
    %c0_i32_1 = arith.constant 0 : i32
    return %arg0, %c0_i32, %c0_i32_0 : i32, i32, i32
  }
  func.func @transform_2(%arg0: i32) -> (i32, i32, i32) {
    %c0_i32 = arith.constant 0 : i32
    %c0_i32_0 = arith.constant 0 : i32
    %c0_i32_1 = arith.constant 0 : i32
    return %arg0, %c0_i32, %c0_i32_0 : i32, i32, i32
  }
  func.func @transform_3(%arg0: i32) -> (i32, i32, i32) {
    %c0_i32 = arith.constant 0 : i32
    %c0_i32_0 = arith.constant 0 : i32
    %c0_i32_1 = arith.constant 0 : i32
    return %arg0, %c0_i32, %c0_i32_0 : i32, i32, i32
  }
  func.func @transform_4(%arg0: i32) -> (i32, i32, i32) {
    %c0_i32 = arith.constant 0 : i32
    %c0_i32_0 = arith.constant 0 : i32
    %c0_i32_1 = arith.constant 0 : i32
    return %arg0, %c0_i32, %c0_i32_0 : i32, i32, i32
  }
  func.func @transform_5(%arg0: i32) -> (i32, i32) {
    %c0_i32 = arith.constant 0 : i32
    %c0_i32_0 = arith.constant 0 : i32
    %c0_i32_1 = arith.constant 0 : i32
    return %c0_i32, %c0_i32_0 : i32, i32
  }
  func.func @transform_6(%arg0: i32) -> (i32, i32) {
    %c0_i32 = arith.constant 0 : i32
    %c0_i32_0 = arith.constant 0 : i32
    %c0_i32_1 = arith.constant 0 : i32
    return %c0_i32, %c0_i32_0 : i32, i32
  }
  func.func @transform_7(%arg0: i32) -> (i32, i32, i32) {
    %c0_i32 = arith.constant 0 : i32
    %c0_i32_0 = arith.constant 0 : i32
    %c0_i32_1 = arith.constant 0 : i32
    %c0_i32_2 = arith.constant 0 : i32
    return %c0_i32, %c0_i32_0, %c0_i32_1 : i32, i32, i32
  }
  func.func @transform_8(%arg0: i32) -> (i32, i32) {
    %c0_i32 = arith.constant 0 : i32
    %c0_i32_0 = arith.constant 0 : i32
    %c0_i32_1 = arith.constant 0 : i32
    return %c0_i32, %c0_i32_0 : i32, i32
  }
  func.func @transform_9(%arg0: i32) -> (i32, i32) {
    %c0_i32 = arith.constant 0 : i32
    %c0_i32_0 = arith.constant 0 : i32
    %c0_i32_1 = arith.constant 0 : i32
    return %c0_i32, %c0_i32_0 : i32, i32
  }
  func.func @transform_10(%arg0: i32) -> (i32, i32) {
    %c0_i32 = arith.constant 0 : i32
    %c0_i32_0 = arith.constant 0 : i32
    %c0_i32_1 = arith.constant 0 : i32
    return %c0_i32, %c0_i32_0 : i32, i32
  }
  func.func @transform_11(%arg0: i32) -> (i32, i32, i32) {
    %c0_i32 = arith.constant 0 : i32
    %c0_i32_0 = arith.constant 0 : i32
    %c0_i32_1 = arith.constant 0 : i32
    return %arg0, %c0_i32, %c0_i32_0 : i32, i32, i32
  }
}

</mosaic_0001>

<bundles_post_ra>
// kernel: denoise_forward.2
= control target key start
LH: loop header
LB: loop body
LE: loop exit
PB: predicated region body
PF: predicated region fallthrough
CT: control target
= control target key end

     0   :  { %16 = vsyncpa [#allocation3], 0  ;;  %s1649_s17 = smov 0   ;;  %s2237_s0 = inlined_call_operand.vmem [shape: f32[2,10,64], index: 0, kind: input, shape index: {}]   ;;  %s2238_s1 = inlined_call_operand.vmem [shape: f32[2,10,256], index: 1, kind: input, shape index: {}]   ;;  %s2239_s2 = inlined_call_operand.vmem [shape: f32[2,4,6], index: 2, kind: input, shape index: {}]   ;;  %s2240_s3 = inlined_call_operand.vmem [shape: f32[2,4,4], index: 3, kind: input, shape index: {}]   ;;  %s2241_s4 = inlined_call_operand.vmem [shape: f32[2,6,256], index: 4, kind: input, shape index: {}]   ;;  %s2242_s5 = inlined_call_operand.vmem [shape: f32[64,256], index: 5, kind: input, shape index: {}]   ;;  %s2243_s6 = inlined_call_operand.vmem [shape: f32[1,256], index: 6, kind: input, shape index: {}]   ;;  %s2244_s7 = inlined_call_operand.hbm [shape: f32[3,256,256], index: 7, kind: input, shape index: {}]   ;;  %s2245_s8 = inlined_call_operand.vmem [shape: f32[1,256], index: 8, kind: input, shape index: {}]   ;;  %s2246_s9 = inlined_call_operand.vmem [shape: f32[256,256], index: 9, kind: input, shape index: {}]   ;;  %s2247_s10 = inlined_call_operand.vmem [shape: f32[1,256], index: 10, kind: input, shape index: {}]   ;;  %s2248_s11 = inlined_call_operand.vmem [shape: f32[2,10,256], index: 11, kind: output, shape index: {}]  }
   0x1 LB: > { %s326_s20 = sshll.u32 %s2244_s7, 4  ;;  %s1488_s21 = sadd.s32 4294967295, %s1584_s17   ;;  %s1584_s17 = sphi %s1649_s17, %s22_s17   ;;  %s327_s20 = int_to_ptr.hbm [resolvable:$true] %s326_s20 }
   0x2   : > { %p1490_p0 = scmp.ge.s32.totalorder %s1584_s17, 1  ;;  %p309_p1 = scmp.lt.s32.totalorder %s1584_s17, 3 }
   0x3   : > { %p1531_p2 = scmp.eq.s32.totalorder %s1488_s21, 0  ;;  %s1586_s22 = smov [#allocation2]  }
   0x4   : > { %p310_p3 = pnand %p1490_p0, %p309_p1  ;;  %s328_s23 = sshll.u32 %s1586_s22, 4  ;;  %s329_s23 = int_to_ptr.vmem [resolvable:$true] %s328_s23 }
   0x5   : > { %s1587_s24 = smov 256   ;;  %s1588_s25 = smov 16  }
   0x6   : > { %p1527_p4 = pneg %p310_p3  ;;  %391 = sbr.rel (%p310_p3) target bundleno = 726 (0x2d6), region = 64 }
   0x8   : > { %p1528_p5 = pnand %p1531_p2, %p1527_p4 }
   0xa   : > { %1530 = dma.hbm_to_vmem [thread:$0]  (!%p1528_p5), %s327_s20, 24576, %s329_s23, [#allocation3], %s1587_s24, %s1587_s24, %s1588_s25  }
   0xb   : > { %1579 = dma.done.wait (%p1531_p2), [#allocation3], 24576  }
   0xc   : > { %1581 = vsyncadd (%p1531_p2), [#allocation3], 4294942720  ;;  %p450_p6 = scmp.lt.s32.totalorder %s1488_s21, 1  ;;  %v494_v0 = vld [vmem:[%s2242_s5 + $0x70] sm:$0xff]  ;;  %v495_v1 = vld [vmem:[%s2242_s5 + $0x78] sm:$0xff]  ;;  %vm502_vm0 = vcmask 523264  }
   0xd   : > { %v492_v2 = vld [vmem:[%s2242_s5 + $0x60] sm:$0xff]  ;;  %517 = vmatpush.msra.mxu0 %v494_v0  ;;  %540 = vmatpush.msra.mxu1 %v495_v1  ;;  %v493_v3 = vld [vmem:[%s2242_s5 + $0x68] sm:$0xff]  ;;  %v490_v4 = vld [vmem:[%s2242_s5 + $0x50] sm:$0xff]  ;;  %vm570_vm1 = vcmask 1043456   ;;  %vm585_vm2 = vcmask 1045504   ;;  %vm581_vm3 = vcmask 48128  }
   0xe   : > { %v491_v5 = vld [vmem:[%s2242_s5 + $0x58] sm:$0xff]  ;;  %s2258_s21 = smov (!%p450_p6, %s1488_s21), 1  ;;  %v488_v6 = vld [vmem:[%s2242_s5 + $0x40] sm:$0xff]  ;;  %v489_v7 = vld [vmem:[%s2242_s5 + $0x48] sm:$0xff]  ;;  %vm633_vm4 = vcmask 31744  }
   0xf   : > { %518 = vmatpush.msra.mxu0 %v492_v2  ;;  %541 = vmatpush.msra.mxu1 %v493_v3  ;;  %v486_v8 = vld [vmem:[%s2242_s5 + $0x30] sm:$0xff]  ;;  %v487_v9 = vld [vmem:[%s2242_s5 + $0x38] sm:$0xff]  ;;  %s1519_s29 = sshll.u32 %s2258_s21, 4  ;;  %v484_v10 = vld [vmem:[%s2242_s5 + $0x20] sm:$0xff]  ;;  %s1520_s12 = sshll.u32 %s2258_s21, 5 }
  0x10   : > { %v485_v11 = vld [vmem:[%s2242_s5 + $0x28] sm:$0xff]  ;;  %v482_v12 = vld [vmem:[%s2242_s5 + $0x10] sm:$0xff]  ;;  %v483_v13 = vld [vmem:[%s2242_s5 + $0x18] sm:$0xff]  ;;  %s454_s23 = scalar_lea.vmem %s2237_s0, %s1519_s29  ;;  %s459_s15 = scalar_lea.vmem %s2238_s1, %s1520_s12 }
  0x11   : > { %519 = vmatpush.msra.mxu0 %v490_v4  ;;  %542 = vmatpush.msra.mxu1 %v491_v5  ;;  %v480_v14 = vld [vmem:[%s2242_s5] sm:$0xff]  ;;  %v481_v15 = vld [vmem:[%s2242_s5 + $0x8] sm:$0xff]  ;;  %v779_v18 = vld [vmem:[#allocation2 + $0x2f8] sm:$0xff]  ;;  %s472_s19 = scalar_lea.vmem %s2241_s4, %s1519_s29  ;;  %s1499_s20 = sshll.u32 %s2258_s21, 2 }
  0x12   : > { %v478_v16 = vld [vmem:[%s454_s23] sm:$0xff]  ;;  %v479_v17 = vld [vmem:[%s454_s23 + $0x8] sm:$0x3]  ;;  %v811_v19 = vld [vmem:[#allocation2 + $0x3f8] sm:$0xff]  ;;  %s463_s23 = scalar_lea.vmem %s2239_s2, %s1499_s20  ;;  %s467_s26 = scalar_lea.vmem %s2240_s3, %s1499_s20 }
  0x13   : > { %520 = vmatpush.msra.mxu0 %v488_v6  ;;  %543 = vmatpush.msra.mxu1 %v489_v7  ;;  %v777_v20 = vld [vmem:[#allocation2 + $0x2e8] sm:$0xff]  ;;  %v775_v22 = vld [vmem:[#allocation2 + $0x2d8] sm:$0xff]  ;;  %v496_v32 = vld [vmem:[%s2243_s6] sm:$0x3]  ;;  %s477_s16 = scalar_lea.vmem %s2248_s11, %s1520_s12 }
  0x14   : > { %v809_v21 = vld [vmem:[#allocation2 + $0x3e8] sm:$0xff]  ;;  %v807_v23 = vld [vmem:[#allocation2 + $0x3d8] sm:$0xff]  ;;  %v498_v37 = vperm.slane %v496_v32, 0  ;;  %v499_v38 = vperm.slane %v496_v32, 1  ;;  %v555_v47 = vld [vmem:[%s459_s15] sm:$0xff] }
  0x15   : > { %521 = vmatpush.msra.mxu0 %v486_v8  ;;  %544 = vmatpush.msra.mxu1 %v487_v9  ;;  %v773_v24 = vld [vmem:[#allocation2 + $0x2c8] sm:$0xff]  ;;  %v771_v26 = vld [vmem:[#allocation2 + $0x2b8] sm:$0xff]  ;;  %v557_v52 = vld [vmem:[%s459_s15 + $0x10] sm:$0x3] }
  0x16   : > { %v805_v25 = vld [vmem:[#allocation2 + $0x3c8] sm:$0xff]  ;;  %v803_v27 = vld [vmem:[#allocation2 + $0x3b8] sm:$0xff]  ;;  %v564_v1 = vld [vmem:[%s472_s19] sm:$0x3f] }
  0x17   : > { %522 = vmatpush.msra.mxu0 %v484_v10  ;;  %545 = vmatpush.msra.mxu1 %v485_v11  ;;  %v769_v28 = vld [vmem:[#allocation2 + $0x2a8] sm:$0xff]  ;;  %v767_v30 = vld [vmem:[#allocation2 + $0x298] sm:$0xff] }
  0x18   : > { %v801_v29 = vld [vmem:[#allocation2 + $0x3a8] sm:$0xff]  ;;  %v799_v31 = vld [vmem:[#allocation2 + $0x398] sm:$0xff] }
  0x19   : > { %523 = vmatpush.msra.mxu0 %v482_v12  ;;  %546 = vmatpush.msra.mxu1 %v483_v13  ;;  %v765_v33 = vld [vmem:[#allocation2 + $0x288] sm:$0xff]  ;;  %v763_v39 = vld [vmem:[#allocation2 + $0x278] sm:$0xff]  ;;  %v563_v13 = vld [vmem:[%s463_s23] sm:$0xf] }
  0x1a   : > { %v797_v34 = vld [vmem:[#allocation2 + $0x388] sm:$0xff]  ;;  %v795_v40 = vld [vmem:[#allocation2 + $0x378] sm:$0xff] }
  0x1b   : > { %524 = vmatpush.msra.mxu0 %v480_v14  ;;  %547 = vmatpush.msra.mxu1 %v481_v15  ;;  %v761_v41 = vld [vmem:[#allocation2 + $0x268] sm:$0xff]  ;;  %v759_v45 = vld [vmem:[#allocation2 + $0x258] sm:$0xff] }
  0x1c   : > { %1505 = vmatmul.msk.f32.vlgmr.msra.gmra.mxu0 %vm502_vm0, %v478_v16  ;;  %1507 = vmatmul.msk.f32.vlgmr.msra.gmra.mxu1 %vm502_vm0, %v478_v16  ;;  %v793_v42 = vld [vmem:[#allocation2 + $0x368] sm:$0xff]  ;;  %v791_v46 = vld [vmem:[#allocation2 + $0x358] sm:$0xff] }
  0x1d   : > { %852 = vmatpush.msrb.mxu0 %v779_v18  ;;  %872 = vmatpush.msrb.mxu1 %v811_v19  ;;  %v556_v48 = vld [vmem:[%s459_s15 + $0x8] sm:$0xff]  ;;  %v558_v54 = vld [vmem:[%s459_s15 + $0x18] sm:$0x3] }
  0x1e   : > { %v757_v49 = vld [vmem:[#allocation2 + $0x248] sm:$0xff]  ;;  %v755_v59 = vld [vmem:[#allocation2 + $0x238] sm:$0xff] }
  0x1f   : > { %853 = vmatpush.msrb.mxu0 %v777_v20  ;;  %873 = vmatpush.msrb.mxu1 %v809_v21  ;;  %v789_v50 = vld [vmem:[#allocation2 + $0x348] sm:$0xff]  ;;  %v787_v60 = vld [vmem:[#allocation2 + $0x338] sm:$0xff] }
  0x20   : > { %v753_v63 = vld [vmem:[#allocation2 + $0x228] sm:$0xff]  ;;  %v751_v7 = vld [vmem:[#allocation2 + $0x218] sm:$0xff] }
  0x21   : > { %854 = vmatpush.msrb.mxu0 %v775_v22  ;;  %874 = vmatpush.msrb.mxu1 %v807_v23  ;;  %v785_v0 = vld [vmem:[#allocation2 + $0x328] sm:$0xff]  ;;  %v783_v8 = vld [vmem:[#allocation2 + $0x318] sm:$0xff] }
  0x22   : > { %v565_v2 = vld [vmem:[%s472_s19 + $0x8] sm:$0x3f]  ;;  %v714_v16 = vld [vmem:[#allocation2 + $0xf8] sm:$0xff] }
  0x23   : > { %855 = vmatpush.msrb.mxu0 %v773_v24  ;;  %875 = vmatpush.msrb.mxu1 %v805_v25  ;;  %v749_v14 = vld [vmem:[#allocation2 + $0x208] sm:$0xff]  ;;  %v710_v20 = vld [vmem:[#allocation2 + $0xd8] sm:$0xff] }
  0x24   : > { %1506 = vmatmul.msk.f32.gmra.mxu0 %vm502_vm0, %v479_v17  ;;  %1508 = vmatmul.msk.f32.gmra.mxu1 %vm502_vm0, %v479_v17  ;;  %v781_v15 = vld [vmem:[#allocation2 + $0x308] sm:$0xff]  ;;  %v746_v17 = vld [vmem:[#allocation2 + $0x1f8] sm:$0xff] }
  0x25   : > { %856 = vmatpush.msrb.mxu0 %v771_v26  ;;  %876 = vmatpush.msrb.mxu1 %v803_v27  ;;  %v712_v18 = vld [vmem:[#allocation2 + $0xe8] sm:$0xff]  ;;  %v742_v21 = vld [vmem:[#allocation2 + $0x1d8] sm:$0xff] }
  0x26   : > { %v744_v19 = vld [vmem:[#allocation2 + $0x1e8] sm:$0xff]  ;;  %v706_v24 = vld [vmem:[#allocation2 + $0xb8] sm:$0xff] }
  0x27   : > { %857 = vmatpush.msrb.mxu0 %v769_v28  ;;  %877 = vmatpush.msrb.mxu1 %v801_v29  ;;  %v708_v22 = vld [vmem:[#allocation2 + $0xc8] sm:$0xff]  ;;  %v738_v25 = vld [vmem:[#allocation2 + $0x1b8] sm:$0xff] }
  0x28   : > { %v740_v23 = vld [vmem:[#allocation2 + $0x1c8] sm:$0xff]  ;;  %v702_v28 = vld [vmem:[#allocation2 + $0x98] sm:$0xff] }
  0x29   : > { %858 = vmatpush.msrb.mxu0 %v767_v30  ;;  %878 = vmatpush.msrb.mxu1 %v799_v31  ;;  %v704_v26 = vld [vmem:[#allocation2 + $0xa8] sm:$0xff]  ;;  %v734_v29 = vld [vmem:[#allocation2 + $0x198] sm:$0xff] }
  0x2a   : > { %v736_v27 = vld [vmem:[#allocation2 + $0x1a8] sm:$0xff]  ;;  %v698_v32 = vld [vmem:[#allocation2 + $0x78] sm:$0xff] }
  0x2b   : > { %859 = vmatpush.msrb.mxu0 %v765_v33  ;;  %879 = vmatpush.msrb.mxu1 %v797_v34  ;;  %v700_v30 = vld [vmem:[#allocation2 + $0x88] sm:$0xff]  ;;  %v730_v33 = vld [vmem:[#allocation2 + $0x178] sm:$0xff] }
  0x2c   : > { %v732_v31 = vld [vmem:[#allocation2 + $0x188] sm:$0xff] }
  0x2d   : > { %860 = vmatpush.msrb.mxu0 %v763_v39  ;;  %880 = vmatpush.msrb.mxu1 %v795_v40  ;;  %v696_v34 = vld [vmem:[#allocation2 + $0x68] sm:$0xff]  ;;  %v690_v40 = vld [vmem:[#allocation2 + $0x38] sm:$0xff] }
  0x2e   : > { %v724_v39 = vld [vmem:[#allocation2 + $0x148] sm:$0xff] }
  0x2f   : > { %861 = vmatpush.msrb.mxu0 %v761_v41  ;;  %881 = vmatpush.msrb.mxu1 %v793_v42  ;;  %v722_v41 = vld [vmem:[#allocation2 + $0x138] sm:$0xff]  ;;  %v688_v42 = vld [vmem:[#allocation2 + $0x28] sm:$0xff] }
  0x31   : > { %862 = vmatpush.msrb.mxu0 %v759_v45  ;;  %882 = vmatpush.msrb.mxu1 %v791_v46  ;;  %v718_v45 = vld [vmem:[#allocation2 + $0x118] sm:$0xff]  ;;  %v684_v46 = vld [vmem:[#allocation2 + $0x8] sm:$0xff] }
  0x33   : > { %863 = vmatpush.msrb.mxu0 %v757_v49  ;;  %883 = vmatpush.msrb.mxu1 %v789_v50  ;;  %v632_v50 = vld [vmem:[%s467_s26] sm:$0xf] }
  0x35   : > { %864 = vmatpush.msrb.mxu0 %v755_v59  ;;  %884 = vmatpush.msrb.mxu1 %v787_v60  ;;  %v772_v59 = vld [vmem:[#allocation2 + $0x2c0] sm:$0xff] }
  0x36   : > { %v804_v60 = vld [vmem:[#allocation2 + $0x3c0] sm:$0xff] }
  0x37   : > { %865 = vmatpush.msrb.mxu0 %v753_v63  ;;  %885 = vmatpush.msrb.mxu1 %v785_v0  ;;  %v768_v63 = vld [vmem:[#allocation2 + $0x2a0] sm:$0xff] }
  0x38   : > { %v800_v0 = vld [vmem:[#allocation2 + $0x3a0] sm:$0xff] }
  0x39   : > { %866 = vmatpush.msrb.mxu0 %v751_v7  ;;  %886 = vmatpush.msrb.mxu1 %v783_v8  ;;  %v760_v7 = vld [vmem:[#allocation2 + $0x260] sm:$0xff] }
  0x3a   : > { %v792_v8 = vld [vmem:[#allocation2 + $0x360] sm:$0xff] }
  0x3b   : > { %867 = vmatpush.msrb.mxu0 %v749_v14  ;;  %887 = vmatpush.msrb.mxu1 %v781_v15  ;;  %v788_v14 = vld [vmem:[#allocation2 + $0x340] sm:$0xff]  ;;  %v754_v15 = vld [vmem:[#allocation2 + $0x230] sm:$0xff] }
  0x3d   : > { %932 = vmatpush.msra.mxu0 %v714_v16  ;;  %952 = vmatpush.msra.mxu1 %v746_v17  ;;  %v786_v16 = vld [vmem:[#allocation2 + $0x330] sm:$0xff]  ;;  %v752_v17 = vld [vmem:[#allocation2 + $0x220] sm:$0xff] }
  0x3f   : > { %933 = vmatpush.msra.mxu0 %v712_v18  ;;  %953 = vmatpush.msra.mxu1 %v744_v19  ;;  %v784_v18 = vld [vmem:[#allocation2 + $0x320] sm:$0xff]  ;;  %v750_v19 = vld [vmem:[#allocation2 + $0x210] sm:$0xff] }
  0x41   : > { %934 = vmatpush.msra.mxu0 %v710_v20  ;;  %954 = vmatpush.msra.mxu1 %v742_v21  ;;  %v782_v20 = vld [vmem:[#allocation2 + $0x310] sm:$0xff]  ;;  %v748_v21 = vld [vmem:[#allocation2 + $0x200] sm:$0xff] }
  0x43   : > { %935 = vmatpush.msra.mxu0 %v708_v22  ;;  %955 = vmatpush.msra.mxu1 %v740_v23  ;;  %v780_v22 = vld [vmem:[#allocation2 + $0x300] sm:$0xff]  ;;  %v713_v23 = vld [vmem:[#allocation2 + $0xf0] sm:$0xff] }
  0x45   : > { %936 = vmatpush.msra.mxu0 %v706_v24  ;;  %956 = vmatpush.msra.mxu1 %v738_v25  ;;  %v745_v24 = vld [vmem:[#allocation2 + $0x1f0] sm:$0xff]  ;;  %v711_v25 = vld [vmem:[#allocation2 + $0xe0] sm:$0xff] }
  0x47   : > { %937 = vmatpush.msra.mxu0 %v704_v26  ;;  %957 = vmatpush.msra.mxu1 %v736_v27  ;;  %v743_v26 = vld [vmem:[#allocation2 + $0x1e0] sm:$0xff]  ;;  %v1004_v27 = vld [vmem:[#allocation2 + $0x4f8] sm:$0xff] }
  0x49   : > { %938 = vmatpush.msra.mxu0 %v702_v28  ;;  %958 = vmatpush.msra.mxu1 %v734_v29  ;;  %v1036_v28 = vld [vmem:[#allocation2 + $0x5f8] sm:$0xff]  ;;  %v709_v29 = vld [vmem:[#allocation2 + $0xd0] sm:$0xff] }
  0x4b   : > { %939 = vmatpush.msra.mxu0 %v700_v30  ;;  %959 = vmatpush.msra.mxu1 %v732_v31  ;;  %v741_v30 = vld [vmem:[#allocation2 + $0x1d0] sm:$0xff]  ;;  %v1002_v31 = vld [vmem:[#allocation2 + $0x4e8] sm:$0xff] }
  0x4d   : > { %940 = vmatpush.msra.mxu0 %v698_v32  ;;  %960 = vmatpush.msra.mxu1 %v730_v33  ;;  %v1034_v32 = vld [vmem:[#allocation2 + $0x5e8] sm:$0xff]  ;;  %v707_v33 = vld [vmem:[#allocation2 + $0xc0] sm:$0xff] }
  0x4f   : > { %941 = vmatpush.msra.mxu0 %v696_v34  ;;  %v739_v34 = vld [vmem:[#allocation2 + $0x1c0] sm:$0xff] }
  0x99   : > { %v526_v35 = vpop.f32.mrf.mxu0  ;;  %v549_v36 = vpop.f32.mrf.mxu1 }
  0x9a   : > { %v527_v43 = vadd.f32 %v526_v35, %v498_v37  ;;  %v550_v44 = vadd.f32 %v549_v36, %v499_v38  ;;  %v728_v35 = vld [vmem:[#allocation2 + $0x168] sm:$0xff]  ;;  %v694_v36 = vld [vmem:[#allocation2 + $0x58] sm:$0xff] }
  0x9b   : > { %961 = vmatpush.msra.mxu1 %v728_v35  ;;  %942 = vmatpush.msra.mxu0 %v694_v36  ;;  %v1000_v35 = vld [vmem:[#allocation2 + $0x4d8] sm:$0xff] }
  0x9c   : > { %v1725_v55 = vadd.f32 %v555_v47, %v527_v43  ;;  %v1727_v56 = vadd.f32 %v556_v48, %v550_v44  ;;  %v720_v43 = vld [vmem:[#allocation2 + $0x128] sm:$0xff]  ;;  %v686_v44 = vld [vmem:[#allocation2 + $0x18] sm:$0xff] }
  0x9d   : > { %v716_v47 = vld [vmem:[#allocation2 + $0x108] sm:$0xff]  ;;  %v1032_v36 = vld [vmem:[#allocation2 + $0x5d8] sm:$0xff] }
  0x9e   : > { %v571_v3 = vrot.slane %v1725_v55, 4  ;;  %v574_v4 = vrot.slane %v1727_v56, 4 }
  0xa1   : > { %v529_v51 = vpop.f32.mrf.mxu0  ;;  %v552_v53 = vpop.f32.mrf.mxu1 }
  0xa2   : > { %v530_v57 = vadd.f32 %v529_v51, %v498_v37  ;;  %v553_v58 = vadd.f32 %v552_v53, %v499_v38  ;;  %v726_v37 = vld [vmem:[#allocation2 + $0x158] sm:$0xff]  ;;  %v692_v38 = vld [vmem:[#allocation2 + $0x48] sm:$0xff]  ;;  %v778_v51 = vld [vmem:[#allocation2 + $0x2f0] sm:$0xff] }
  0xa3   : > { %962 = vmatpush.msra.mxu1 %v726_v37  ;;  %943 = vmatpush.msra.mxu0 %v692_v38  ;;  %v776_v53 = vld [vmem:[#allocation2 + $0x2e0] sm:$0xff]  ;;  %v705_v37 = vld [vmem:[#allocation2 + $0xb0] sm:$0xff] }
  0xa4   : > { %v561_v61 = vadd.f32 %v557_v52, %v530_v57  ;;  %v562_v62 = vadd.f32 %v558_v54, %v553_v58  ;;  %v810_v52 = vld [vmem:[#allocation2 + $0x3f0] sm:$0xff]  ;;  %v808_v54 = vld [vmem:[#allocation2 + $0x3e0] sm:$0xff] }
  0xa5   : > { %963 = vmatpush.msra.mxu1 %v724_v39  ;;  %944 = vmatpush.msra.mxu0 %v690_v40  ;;  %v774_v57 = vld [vmem:[#allocation2 + $0x2d0] sm:$0xff]  ;;  %v998_v39 = vld [vmem:[#allocation2 + $0x4c8] sm:$0xff] }
  0xa6   : > { %v572_v5 = vrot.slane %v561_v61, 4  ;;  %v575_v6 = vrot.slane %v562_v62, 4  ;;  %v806_v58 = vld [vmem:[#allocation2 + $0x3d0] sm:$0xff]  ;;  %v1030_v40 = vld [vmem:[#allocation2 + $0x5c8] sm:$0xff] }
  0xa7   : > { %964 = vmatpush.msra.mxu1 %v722_v41  ;;  %945 = vmatpush.msra.mxu0 %v688_v42  ;;  %v770_v61 = vld [vmem:[#allocation2 + $0x2b0] sm:$0xff]  ;;  %v703_v41 = vld [vmem:[#allocation2 + $0xa0] sm:$0xff] }
  0xa8   : > { %v1743_v9 = vsel %vm570_vm1, %v571_v3, %v572_v5  ;;  %v1746_v10 = vsel %vm570_vm1, %v574_v4, %v575_v6  ;;  %v802_v62 = vld [vmem:[#allocation2 + $0x3b0] sm:$0xff]  ;;  %v764_v3 = vld [vmem:[#allocation2 + $0x280] sm:$0xff] }
  0xa9   : > { %2253 = vst [vmem:[#allocation5_spill] sm:$0xff] %v1743_v9  ;;  %v579_v11 = vmul.f32 %v1743_v9, %v564_v1  ;;  %v580_v12 = vmul.f32 %v1746_v10, %v565_v2  ;;  %965 = vmatpush.msra.mxu1 %v720_v43  ;;  %946 = vmatpush.msra.mxu0 %v686_v44  ;;  %v766_v1 = vld [vmem:[#allocation2 + $0x290] sm:$0xff]  ;;  %v796_v4 = vld [vmem:[#allocation2 + $0x380] sm:$0xff]  ;;  %v996_v43 = vld [vmem:[#allocation2 + $0x4b8] sm:$0xff] }
  0xaa   : > { %2254 = vst [vmem:[#allocation6_spill] sm:$0xff] %v1746_v10  ;;  %v798_v2 = vld [vmem:[#allocation2 + $0x390] sm:$0xff]  ;;  %v735_v42 = vld [vmem:[#allocation2 + $0x1a0] sm:$0xff]  ;;  %v1028_v44 = vld [vmem:[#allocation2 + $0x5b8] sm:$0xff] }
  0xab   : > { %1509 = vmatpush.msk.msra.mxu2 %vm585_vm2, %v579_v11  ;;  %1511 = vmatpush.msk.msra.mxu3 %vm585_vm2, %v580_v12  ;;  %v762_v5 = vld [vmem:[#allocation2 + $0x270] sm:$0xff]  ;;  %v2146_v9 = vld [vmem:[%s2246_s9] sm:$0xff]  ;;  %v2151_v10 = vld [vmem:[%s2246_s9 + $0x8] sm:$0xff] }
  0xac   : > { %1510 = vmatmul.msk.f32.vlgmr.msra.gmra.mxu2 %vm581_vm3, %v563_v13  ;;  %1512 = vmatmul.msk.f32.vlgmr.msra.gmra.mxu3 %vm581_vm3, %v563_v13  ;;  %v794_v6 = vld [vmem:[#allocation2 + $0x370] sm:$0xff]  ;;  %v756_v13 = vld [vmem:[#allocation2 + $0x240] sm:$0xff] }
  0xad   : > { %966 = vmatpush.msra.mxu1 %v718_v45  ;;  %947 = vmatpush.msra.mxu0 %v684_v46  ;;  %v758_v11 = vld [vmem:[#allocation2 + $0x250] sm:$0xff] }
  0xae   : > { %v790_v12 = vld [vmem:[#allocation2 + $0x350] sm:$0xff] }
  0xaf   : > { %967 = vmatpush.msra.mxu1 %v716_v47  ;;  %v737_v38 = vld [vmem:[#allocation2 + $0x1b0] sm:$0xff]  ;;  %v994_v47 = vld [vmem:[#allocation2 + $0x4a8] sm:$0xff] }
  0xb0   : > { %v701_v45 = vld [vmem:[#allocation2 + $0x90] sm:$0xff] }
  0xb1   : > { %v733_v46 = vld [vmem:[#allocation2 + $0x190] sm:$0xff] }
 0x12f   : > { %v1755_v48 = vpop.f32.mrf.mxu2  ;;  %v1757_v49 = vpop.f32.mrf.mxu3 }
 0x130   : > { %1513 = vmatpush.msk.msrb.mxu2 %vm570_vm1, %v1755_v48  ;;  %1515 = vmatpush.msk.msrb.mxu3 %vm570_vm1, %v1757_v49 }
 0x131   : > { %868 = vmatmul.f32.vlgmr.msrb.gmra.mxu0 %v1755_v48  ;;  %888 = vmatmul.f32.vlgmr.msrb.gmra.mxu1 %v1757_v49 }
 0x132   : > { %1514 = vmatmul.msk.f32.vlgmr.msrb.gmra.mxu2 %vm633_vm4, %v632_v50  ;;  %1516 = vmatmul.msk.f32.vlgmr.msrb.gmra.mxu3 %vm633_vm4, %v632_v50  ;;  %v731_v50 = vld [vmem:[#allocation2 + $0x180] sm:$0xff] }
 0x133   : > { %812 = vmatpush.msra.mxu2 %v778_v51  ;;  %832 = vmatpush.msra.mxu3 %v810_v52  ;;  %v992_v51 = vld [vmem:[#allocation2 + $0x498] sm:$0xff] }
 0x134   : > { %1077 = vmatpush.msrb.mxu0 %v1004_v27  ;;  %1097 = vmatpush.msrb.mxu1 %v1036_v28  ;;  %v1024_v52 = vld [vmem:[#allocation2 + $0x598] sm:$0xff]  ;;  %v995_v27 = vld [vmem:[#allocation2 + $0x4b0] sm:$0xff] }
 0x135   : > { %813 = vmatpush.msra.mxu2 %v776_v53  ;;  %833 = vmatpush.msra.mxu3 %v808_v54  ;;  %v697_v53 = vld [vmem:[#allocation2 + $0x70] sm:$0xff] }
 0x136   : > { %1078 = vmatpush.msrb.mxu0 %v1002_v31  ;;  %1098 = vmatpush.msrb.mxu1 %v1034_v32  ;;  %v729_v54 = vld [vmem:[#allocation2 + $0x170] sm:$0xff]  ;;  %v989_v31 = vld [vmem:[#allocation2 + $0x480] sm:$0xff] }
 0x137   : > { %814 = vmatpush.msra.mxu2 %v774_v57  ;;  %834 = vmatpush.msra.mxu3 %v806_v58  ;;  %v990_v57 = vld [vmem:[#allocation2 + $0x488] sm:$0xff]  ;;  %v1027_v28 = vld [vmem:[#allocation2 + $0x5b0] sm:$0xff]  ;;  %v1021_v32 = vld [vmem:[#allocation2 + $0x580] sm:$0xff] }
 0x138   : > { %1079 = vmatpush.msrb.mxu0 %v1000_v35  ;;  %1099 = vmatpush.msrb.mxu1 %v1032_v36  ;;  %v1022_v58 = vld [vmem:[#allocation2 + $0x588] sm:$0xff]  ;;  %v985_v35 = vld [vmem:[#allocation2 + $0x460] sm:$0xff] }
 0x139   : > { %815 = vmatpush.msra.mxu2 %v772_v59  ;;  %835 = vmatpush.msra.mxu3 %v804_v60  ;;  %v695_v59 = vld [vmem:[#allocation2 + $0x60] sm:$0xff] }
 0x13a   : > { %948 = vmatmul.f32.vlgmr.msra.gmra.mxu0 %v1725_v55  ;;  %968 = vmatmul.f32.vlgmr.msra.gmra.mxu1 %v1727_v56  ;;  %v727_v60 = vld [vmem:[#allocation2 + $0x160] sm:$0xff] }
 0x13b   : > { %816 = vmatpush.msra.mxu2 %v770_v61  ;;  %836 = vmatpush.msra.mxu3 %v802_v62  ;;  %v988_v61 = vld [vmem:[#allocation2 + $0x478] sm:$0xff]  ;;  %v1017_v36 = vld [vmem:[#allocation2 + $0x560] sm:$0xff] }
 0x13c   : > { %1080 = vmatpush.msrb.mxu0 %v998_v39  ;;  %1100 = vmatpush.msrb.mxu1 %v1030_v40  ;;  %v1020_v62 = vld [vmem:[#allocation2 + $0x578] sm:$0xff]  ;;  %v981_v39 = vld [vmem:[#allocation2 + $0x440] sm:$0xff] }
 0x13d   : > { %817 = vmatpush.msra.mxu2 %v768_v63  ;;  %837 = vmatpush.msra.mxu3 %v800_v0  ;;  %v693_v63 = vld [vmem:[#allocation2 + $0x50] sm:$0xff]  ;;  %v1013_v40 = vld [vmem:[#allocation2 + $0x540] sm:$0xff] }
 0x13e   : > { %1081 = vmatpush.msrb.mxu0 %v996_v43  ;;  %1101 = vmatpush.msrb.mxu1 %v1028_v44  ;;  %v725_v0 = vld [vmem:[#allocation2 + $0x150] sm:$0xff]  ;;  %v980_v43 = vld [vmem:[#allocation2 + $0x438] sm:$0xff] }
 0x13f   : > { %818 = vmatpush.msra.mxu2 %v766_v1  ;;  %838 = vmatpush.msra.mxu3 %v798_v2  ;;  %v986_v1 = vld [vmem:[#allocation2 + $0x468] sm:$0xff]  ;;  %v1012_v44 = vld [vmem:[#allocation2 + $0x538] sm:$0xff] }
 0x140   : > { %1082 = vmatpush.msrb.mxu0 %v994_v47  ;;  %v1018_v2 = vld [vmem:[#allocation2 + $0x568] sm:$0xff] }
 0x141   : > { %819 = vmatpush.msra.mxu2 %v764_v3  ;;  %839 = vmatpush.msra.mxu3 %v796_v4  ;;  %v691_v3 = vld [vmem:[#allocation2 + $0x40] sm:$0xff]  ;;  %v978_v47 = vld [vmem:[#allocation2 + $0x428] sm:$0xff] }
 0x142   : > { %1083 = vmatpush.msrb.mxu0 %v992_v51  ;;  %v723_v4 = vld [vmem:[#allocation2 + $0x140] sm:$0xff]  ;;  %v976_v51 = vld [vmem:[#allocation2 + $0x418] sm:$0xff] }
 0x143   : > { %820 = vmatpush.msra.mxu2 %v762_v5  ;;  %840 = vmatpush.msra.mxu3 %v794_v6  ;;  %v984_v5 = vld [vmem:[#allocation2 + $0x458] sm:$0xff] }
 0x144   : > { %1084 = vmatpush.msrb.mxu0 %v990_v57  ;;  %v1016_v6 = vld [vmem:[#allocation2 + $0x558] sm:$0xff]  ;;  %v974_v57 = vld [vmem:[#allocation2 + $0x408] sm:$0xff] }
 0x145   : > { %821 = vmatpush.msra.mxu2 %v760_v7  ;;  %841 = vmatpush.msra.mxu3 %v792_v8  ;;  %v689_v7 = vld [vmem:[#allocation2 + $0x30] sm:$0xff] }
 0x146   : > { %1085 = vmatpush.msrb.mxu0 %v988_v61  ;;  %v721_v8 = vld [vmem:[#allocation2 + $0x130] sm:$0xff] }
 0x147   : > { %822 = vmatpush.msra.mxu2 %v758_v11  ;;  %842 = vmatpush.msra.mxu3 %v790_v12  ;;  %v982_v11 = vld [vmem:[#allocation2 + $0x448] sm:$0xff]  ;;  %v1774_v61 = vld [vmem:[%s2246_s9 + $0x1f0] sm:$0xff] }
 0x148   : > { %1086 = vmatpush.msrb.mxu0 %v986_v1  ;;  %v1014_v12 = vld [vmem:[#allocation2 + $0x548] sm:$0xff]  ;;  %v1796_v1 = vld [vmem:[%s2246_s9 + $0x1d0] sm:$0xff] }
 0x149   : > { %823 = vmatpush.msra.mxu2 %v756_v13  ;;  %843 = vmatpush.msra.mxu3 %v788_v14  ;;  %v687_v13 = vld [vmem:[#allocation2 + $0x20] sm:$0xff] }
 0x14a   : > { %1087 = vmatpush.msrb.mxu0 %v984_v5  ;;  %v719_v14 = vld [vmem:[#allocation2 + $0x120] sm:$0xff] }
 0x14b   : > { %824 = vmatpush.msra.mxu2 %v754_v15  ;;  %844 = vmatpush.msra.mxu3 %v786_v16  ;;  %v685_v15 = vld [vmem:[#allocation2 + $0x10] sm:$0xff]  ;;  %v1818_v5 = vld [vmem:[%s2246_s9 + $0xe0] sm:$0xff] }
 0x14c   : > { %1088 = vmatpush.msrb.mxu0 %v982_v11  ;;  %v717_v16 = vld [vmem:[#allocation2 + $0x110] sm:$0xff] }
 0x14d   : > { %825 = vmatpush.msra.mxu2 %v752_v17  ;;  %845 = vmatpush.msra.mxu3 %v784_v18  ;;  %v683_v17 = vld [vmem:[#allocation2] sm:$0xff]  ;;  %v1842_v11 = vld [vmem:[%s2246_s9 + $0xd0] sm:$0xff] }
 0x14e   : > { %v715_v18 = vld [vmem:[#allocation2 + $0x100] sm:$0xff]  ;;  %1089 = vmatpush.msrb.mxu0 %v980_v43  ;;  %v2045_v43 = vld [vmem:[%s2246_s9 + $0x130] sm:$0xff] }
 0x14f   : > { %826 = vmatpush.msra.mxu2 %v750_v19  ;;  %846 = vmatpush.msra.mxu3 %v782_v20  ;;  %v1003_v19 = vld [vmem:[#allocation2 + $0x4f0] sm:$0xff] }
 0x150   : > { %v1035_v20 = vld [vmem:[#allocation2 + $0x5f0] sm:$0xff]  ;;  %1090 = vmatpush.msrb.mxu0 %v978_v47  ;;  %v2069_v47 = vld [vmem:[%s2246_s9 + $0x120] sm:$0xff] }
 0x151   : > { %827 = vmatpush.msra.mxu2 %v748_v21  ;;  %847 = vmatpush.msra.mxu3 %v780_v22  ;;  %v1001_v21 = vld [vmem:[#allocation2 + $0x4e0] sm:$0xff] }
 0x152   : > { %828 = vmatmul.f32.vlgmr.msra.gmra.mxu2 %v1755_v48  ;;  %848 = vmatmul.f32.vlgmr.msra.gmra.mxu3 %v1757_v49  ;;  %v1026_v48 = vld [vmem:[#allocation2 + $0x5a8] sm:$0xff]  ;;  %v699_v49 = vld [vmem:[#allocation2 + $0x80] sm:$0xff] }
 0x153   : > { %892 = vmatpush.msrb.mxu2 %v713_v23  ;;  %912 = vmatpush.msrb.mxu3 %v745_v24  ;;  %v1033_v22 = vld [vmem:[#allocation2 + $0x5e0] sm:$0xff]  ;;  %v999_v23 = vld [vmem:[#allocation2 + $0x4d0] sm:$0xff] }
 0x154   : > { %1102 = vmatpush.msrb.mxu1 %v1026_v48  ;;  %v1031_v24 = vld [vmem:[#allocation2 + $0x5d0] sm:$0xff]  ;;  %v1010_v48 = vld [vmem:[#allocation2 + $0x528] sm:$0xff]  ;;  %1091 = vmatpush.msrb.mxu0 %v976_v51 }
 0x155   : > { %893 = vmatpush.msrb.mxu2 %v711_v25  ;;  %913 = vmatpush.msrb.mxu3 %v743_v26  ;;  %v997_v25 = vld [vmem:[#allocation2 + $0x4c0] sm:$0xff]  ;;  %v2093_v51 = vld [vmem:[%s2246_s9 + $0x110] sm:$0xff] }
 0x156   : > { %1103 = vmatpush.msrb.mxu1 %v1024_v52  ;;  %v1029_v26 = vld [vmem:[#allocation2 + $0x5c0] sm:$0xff]  ;;  %v1008_v52 = vld [vmem:[#allocation2 + $0x518] sm:$0xff]  ;;  %1092 = vmatpush.msrb.mxu0 %v974_v57 }
 0x157   : > { %894 = vmatpush.msrb.mxu2 %v709_v29  ;;  %914 = vmatpush.msrb.mxu3 %v741_v30  ;;  %v993_v29 = vld [vmem:[#allocation2 + $0x4a0] sm:$0xff]  ;;  %v1023_v30 = vld [vmem:[#allocation2 + $0x590] sm:$0xff] }
 0x158   : > { %1104 = vmatpush.msrb.mxu1 %v1022_v58  ;;  %v1006_v58 = vld [vmem:[#allocation2 + $0x508] sm:$0xff]  ;;  %v2117_v57 = vld [vmem:[%s2246_s9 + $0x100] sm:$0xff] }
 0x159   : > { %895 = vmatpush.msrb.mxu2 %v707_v33  ;;  %915 = vmatpush.msrb.mxu3 %v739_v34  ;;  %v987_v33 = vld [vmem:[#allocation2 + $0x470] sm:$0xff] }
 0x15a   : > { %1105 = vmatpush.msrb.mxu1 %v1020_v62  ;;  %v1019_v34 = vld [vmem:[#allocation2 + $0x570] sm:$0xff]  ;;  %v1779_v62 = vld [vmem:[%s2246_s9 + $0x1f8] sm:$0xff] }
 0x15b   : > { %896 = vmatpush.msrb.mxu2 %v705_v37  ;;  %916 = vmatpush.msrb.mxu3 %v737_v38  ;;  %v983_v37 = vld [vmem:[#allocation2 + $0x450] sm:$0xff] }
 0x15c   : > { %1106 = vmatpush.msrb.mxu1 %v1018_v2  ;;  %v1015_v38 = vld [vmem:[#allocation2 + $0x550] sm:$0xff]  ;;  %v1801_v2 = vld [vmem:[%s2246_s9 + $0x1d8] sm:$0xff] }
 0x15d   : > { %897 = vmatpush.msrb.mxu2 %v703_v41  ;;  %917 = vmatpush.msrb.mxu3 %v735_v42  ;;  %v979_v41 = vld [vmem:[#allocation2 + $0x430] sm:$0xff] }
 0x15e   : > { %1107 = vmatpush.msrb.mxu1 %v1016_v6  ;;  %v1011_v42 = vld [vmem:[#allocation2 + $0x530] sm:$0xff]  ;;  %v1824_v6 = vld [vmem:[%s2246_s9 + $0x1c0] sm:$0xff] }
 0x15f   : > { %898 = vmatpush.msrb.mxu2 %v701_v45  ;;  %918 = vmatpush.msrb.mxu3 %v733_v46  ;;  %v977_v45 = vld [vmem:[#allocation2 + $0x420] sm:$0xff] }
 0x160   : > { %1108 = vmatpush.msrb.mxu1 %v1014_v12  ;;  %v1009_v46 = vld [vmem:[#allocation2 + $0x520] sm:$0xff]  ;;  %v1847_v12 = vld [vmem:[%s2246_s9 + $0xd8] sm:$0xff] }
 0x161   : > { %899 = vmatpush.msrb.mxu2 %v699_v49  ;;  %919 = vmatpush.msrb.mxu3 %v731_v50  ;;  %v975_v49 = vld [vmem:[#allocation2 + $0x410] sm:$0xff] }
 0x162   : > { %1109 = vmatpush.msrb.mxu1 %v1012_v44  ;;  %v1007_v50 = vld [vmem:[#allocation2 + $0x510] sm:$0xff]  ;;  %v2051_v44 = vld [vmem:[%s2246_s9 + $0x138] sm:$0xff] }
 0x163   : > { %900 = vmatpush.msrb.mxu2 %v697_v53  ;;  %920 = vmatpush.msrb.mxu3 %v729_v54  ;;  %v973_v53 = vld [vmem:[#allocation2 + $0x400] sm:$0xff] }
 0x164   : > { %1110 = vmatpush.msrb.mxu1 %v1010_v48  ;;  %v1005_v54 = vld [vmem:[#allocation2 + $0x500] sm:$0xff]  ;;  %v2075_v48 = vld [vmem:[%s2246_s9 + $0x128] sm:$0xff] }
 0x165   : > { %901 = vmatpush.msrb.mxu2 %v695_v59  ;;  %921 = vmatpush.msrb.mxu3 %v727_v60 }
 0x166   : > { %1111 = vmatpush.msrb.mxu1 %v1008_v52  ;;  %v2099_v52 = vld [vmem:[%s2246_s9 + $0x118] sm:$0xff] }
 0x167   : > { %902 = vmatpush.msrb.mxu2 %v693_v63  ;;  %922 = vmatpush.msrb.mxu3 %v725_v0  ;;  %v1784_v63 = vld [vmem:[%s2246_s9 + $0x1e0] sm:$0xff]  ;;  %v1791_v0 = vld [vmem:[%s2246_s9 + $0x1e8] sm:$0xff] }
 0x168   : > { %1112 = vmatpush.msrb.mxu1 %v1006_v58  ;;  %v2123_v58 = vld [vmem:[%s2246_s9 + $0x108] sm:$0xff] }
 0x169   : > { %903 = vmatpush.msrb.mxu2 %v691_v3  ;;  %923 = vmatpush.msrb.mxu3 %v723_v4  ;;  %v1806_v3 = vld [vmem:[%s2246_s9 + $0xf0] sm:$0xff]  ;;  %v1811_v4 = vld [vmem:[%s2246_s9 + $0xf8] sm:$0xff] }
 0x16a   : > { %1257 = vmatpush.msra.mxu1 %v1779_v62  ;;  %1237 = vmatpush.msra.mxu0 %v1811_v4 }
 0x16b   : > { %904 = vmatpush.msrb.mxu2 %v689_v7  ;;  %924 = vmatpush.msrb.mxu3 %v721_v8  ;;  %v1830_v7 = vld [vmem:[%s2246_s9 + $0x1c8] sm:$0xff] }
 0x16c   : > { %1258 = vmatpush.msra.mxu1 %v1791_v0  ;;  %v1835_v8 = vld [vmem:[%s2246_s9 + $0xe8] sm:$0xff] }
 0x16d   : > { %905 = vmatpush.msrb.mxu2 %v687_v13  ;;  %925 = vmatpush.msrb.mxu3 %v719_v14  ;;  %v1853_v13 = vld [vmem:[%s2246_s9 + $0x1b0] sm:$0xff]  ;;  %v1859_v14 = vld [vmem:[%s2246_s9 + $0x1b8] sm:$0xff] }
 0x16e   : > { %1259 = vmatpush.msra.mxu1 %v1801_v2  ;;  %1238 = vmatpush.msra.mxu0 %v1835_v8 }
 0x16f   : > { %906 = vmatpush.msrb.mxu2 %v685_v15  ;;  %926 = vmatpush.msrb.mxu3 %v717_v16  ;;  %v1866_v15 = vld [vmem:[%s2246_s9 + $0xc0] sm:$0xff]  ;;  %v1871_v16 = vld [vmem:[%s2246_s9 + $0xc8] sm:$0xff] }
 0x170   : > { %1260 = vmatpush.msra.mxu1 %v1830_v7  ;;  %1239 = vmatpush.msra.mxu0 %v1847_v12 }
 0x171   : > { %907 = vmatpush.msrb.mxu2 %v683_v17  ;;  %927 = vmatpush.msrb.mxu3 %v715_v18  ;;  %v1877_v17 = vld [vmem:[%s2246_s9 + $0x1a0] sm:$0xff]  ;;  %v1883_v18 = vld [vmem:[%s2246_s9 + $0x1a8] sm:$0xff] }
 0x172   : > { %908 = vmatmul.f32.vlgmr.msrb.gmra.mxu2 %v1725_v55  ;;  %928 = vmatmul.f32.vlgmr.msrb.gmra.mxu3 %v1727_v56  ;;  %v1025_v55 = vld [vmem:[#allocation2 + $0x5a0] sm:$0xff]  ;;  %v991_v56 = vld [vmem:[#allocation2 + $0x490] sm:$0xff] }
 0x173   : > { %1037 = vmatpush.msra.mxu2 %v1003_v19  ;;  %1057 = vmatpush.msra.mxu3 %v1035_v20  ;;  %v1890_v19 = vld [vmem:[%s2246_s9 + $0xb0] sm:$0xff]  ;;  %v1895_v20 = vld [vmem:[%s2246_s9 + $0xb8] sm:$0xff] }
 0x174   : > { %1261 = vmatpush.msra.mxu1 %v1859_v14  ;;  %1240 = vmatpush.msra.mxu0 %v1871_v16 }
 0x175   : > { %1038 = vmatpush.msra.mxu2 %v1001_v21  ;;  %1058 = vmatpush.msra.mxu3 %v1033_v22  ;;  %v1901_v21 = vld [vmem:[%s2246_s9 + $0x190] sm:$0xff]  ;;  %v1907_v22 = vld [vmem:[%s2246_s9 + $0x198] sm:$0xff] }
 0x176   : > { %1262 = vmatpush.msra.mxu1 %v1883_v18  ;;  %1241 = vmatpush.msra.mxu0 %v1895_v20 }
 0x177   : > { %1039 = vmatpush.msra.mxu2 %v999_v23  ;;  %1059 = vmatpush.msra.mxu3 %v1031_v24  ;;  %v1914_v23 = vld [vmem:[%s2246_s9 + $0xa0] sm:$0xff]  ;;  %v1919_v24 = vld [vmem:[%s2246_s9 + $0xa8] sm:$0xff] }
 0x178   : > { %1263 = vmatpush.msra.mxu1 %v1907_v22  ;;  %1242 = vmatpush.msra.mxu0 %v1919_v24 }
 0x179   : > { %1040 = vmatpush.msra.mxu2 %v997_v25  ;;  %1060 = vmatpush.msra.mxu3 %v1029_v26  ;;  %v1925_v25 = vld [vmem:[%s2246_s9 + $0x180] sm:$0xff]  ;;  %v1931_v26 = vld [vmem:[%s2246_s9 + $0x188] sm:$0xff] }
 0x17a   : > { %1264 = vmatpush.msra.mxu1 %v1931_v26 }
 0x17b   : > { %1041 = vmatpush.msra.mxu2 %v995_v27  ;;  %1061 = vmatpush.msra.mxu3 %v1027_v28  ;;  %v1938_v27 = vld [vmem:[%s2246_s9 + $0x90] sm:$0xff]  ;;  %v1943_v28 = vld [vmem:[%s2246_s9 + $0x98] sm:$0xff] }
 0x17c   : > { %1243 = vmatpush.msra.mxu0 %v1943_v28 }
 0x17d   : > { %1042 = vmatpush.msra.mxu2 %v993_v29  ;;  %1062 = vmatpush.msra.mxu3 %v1025_v55  ;;  %v1949_v29 = vld [vmem:[%s2246_s9 + $0x170] sm:$0xff]  ;;  %v1955_v55 = vld [vmem:[%s2246_s9 + $0x178] sm:$0xff] }
 0x17e   : > { %1265 = vmatpush.msra.mxu1 %v1955_v55 }
 0x17f   : > { %1043 = vmatpush.msra.mxu2 %v991_v56  ;;  %1063 = vmatpush.msra.mxu3 %v1023_v30  ;;  %v1962_v56 = vld [vmem:[%s2246_s9 + $0x80] sm:$0xff]  ;;  %v1967_v30 = vld [vmem:[%s2246_s9 + $0x88] sm:$0xff] }
 0x180   : > { %1244 = vmatpush.msra.mxu0 %v1967_v30 }
 0x181   : > { %1044 = vmatpush.msra.mxu2 %v989_v31  ;;  %1064 = vmatpush.msra.mxu3 %v1021_v32  ;;  %v1973_v31 = vld [vmem:[%s2246_s9 + $0x160] sm:$0xff]  ;;  %v1979_v32 = vld [vmem:[%s2246_s9 + $0x168] sm:$0xff] }
 0x182   : > { %1266 = vmatpush.msra.mxu1 %v1979_v32 }
 0x183   : > { %1045 = vmatpush.msra.mxu2 %v987_v33  ;;  %1065 = vmatpush.msra.mxu3 %v1019_v34  ;;  %v1986_v33 = vld [vmem:[%s2246_s9 + $0x70] sm:$0xff]  ;;  %v1991_v34 = vld [vmem:[%s2246_s9 + $0x78] sm:$0xff] }
 0x184   : > { %1245 = vmatpush.msra.mxu0 %v1991_v34 }
 0x185   : > { %1046 = vmatpush.msra.mxu2 %v985_v35  ;;  %1066 = vmatpush.msra.mxu3 %v1017_v36  ;;  %v1997_v35 = vld [vmem:[%s2246_s9 + $0x150] sm:$0xff]  ;;  %v2003_v36 = vld [vmem:[%s2246_s9 + $0x158] sm:$0xff] }
 0x186   : > { %1267 = vmatpush.msra.mxu1 %v2003_v36 }
 0x187   : > { %1047 = vmatpush.msra.mxu2 %v983_v37  ;;  %1067 = vmatpush.msra.mxu3 %v1015_v38  ;;  %v2010_v37 = vld [vmem:[%s2246_s9 + $0x60] sm:$0xff]  ;;  %v2015_v38 = vld [vmem:[%s2246_s9 + $0x68] sm:$0xff] }
 0x188   : > { %1246 = vmatpush.msra.mxu0 %v2015_v38 }
 0x189   : > { %1048 = vmatpush.msra.mxu2 %v981_v39  ;;  %1068 = vmatpush.msra.mxu3 %v1013_v40  ;;  %v2021_v39 = vld [vmem:[%s2246_s9 + $0x140] sm:$0xff]  ;;  %v2027_v40 = vld [vmem:[%s2246_s9 + $0x148] sm:$0xff] }
 0x18a   : > { %1268 = vmatpush.msra.mxu1 %v2027_v40 }
 0x18b   : > { %1049 = vmatpush.msra.mxu2 %v979_v41  ;;  %1069 = vmatpush.msra.mxu3 %v1011_v42  ;;  %v2034_v41 = vld [vmem:[%s2246_s9 + $0x50] sm:$0xff]  ;;  %v2039_v42 = vld [vmem:[%s2246_s9 + $0x58] sm:$0xff] }
 0x18c   : > { %1247 = vmatpush.msra.mxu0 %v2039_v42  ;;  %1269 = vmatpush.msra.mxu1 %v2051_v44 }
 0x18d   : > { %1050 = vmatpush.msra.mxu2 %v977_v45  ;;  %1070 = vmatpush.msra.mxu3 %v1009_v46  ;;  %v2058_v45 = vld [vmem:[%s2246_s9 + $0x40] sm:$0xff]  ;;  %v2063_v46 = vld [vmem:[%s2246_s9 + $0x48] sm:$0xff] }
 0x18e   : > { %1248 = vmatpush.msra.mxu0 %v2063_v46  ;;  %1270 = vmatpush.msra.mxu1 %v2075_v48 }
 0x18f   : > { %1051 = vmatpush.msra.mxu2 %v975_v49  ;;  %1071 = vmatpush.msra.mxu3 %v1007_v50  ;;  %v2082_v49 = vld [vmem:[%s2246_s9 + $0x30] sm:$0xff]  ;;  %v2087_v50 = vld [vmem:[%s2246_s9 + $0x38] sm:$0xff] }
 0x190   : > { %1249 = vmatpush.msra.mxu0 %v2087_v50  ;;  %1271 = vmatpush.msra.mxu1 %v2099_v52 }
 0x191   : > { %1052 = vmatpush.msra.mxu2 %v973_v53  ;;  %1072 = vmatpush.msra.mxu3 %v1005_v54  ;;  %v2106_v53 = vld [vmem:[%s2246_s9 + $0x20] sm:$0xff]  ;;  %v2111_v54 = vld [vmem:[%s2246_s9 + $0x28] sm:$0xff] }
 0x192   : > { %1250 = vmatpush.msra.mxu0 %v2111_v54  ;;  %1272 = vmatpush.msra.mxu1 %v2123_v58 }
 0x193   : > { %1217 = vmatpush.msrb.mxu3 %v1774_v61  ;;  %1197 = vmatpush.msrb.mxu2 %v1806_v3 }
 0x195   : > { %1218 = vmatpush.msrb.mxu3 %v1784_v63  ;;  %1198 = vmatpush.msrb.mxu2 %v1818_v5 }
 0x197   : > { %1219 = vmatpush.msrb.mxu3 %v1796_v1  ;;  %1199 = vmatpush.msrb.mxu2 %v1842_v11 }
 0x199   : > { %1220 = vmatpush.msrb.mxu3 %v1824_v6  ;;  %1200 = vmatpush.msrb.mxu2 %v1866_v15 }
 0x19b   : > { %1221 = vmatpush.msrb.mxu3 %v1853_v13  ;;  %1201 = vmatpush.msrb.mxu2 %v1890_v19 }
 0x19d   : > { %1222 = vmatpush.msrb.mxu3 %v1877_v17  ;;  %1202 = vmatpush.msrb.mxu2 %v1914_v23 }
 0x19f   : > { %1223 = vmatpush.msrb.mxu3 %v1901_v21  ;;  %1203 = vmatpush.msrb.mxu2 %v1938_v27 }
 0x1a1   : > { %1224 = vmatpush.msrb.mxu3 %v1925_v25  ;;  %1204 = vmatpush.msrb.mxu2 %v1962_v56 }
 0x1a3   : > { %1225 = vmatpush.msrb.mxu3 %v1949_v29  ;;  %1205 = vmatpush.msrb.mxu2 %v1986_v33 }
 0x1a5   : > { %1226 = vmatpush.msrb.mxu3 %v1973_v31  ;;  %1206 = vmatpush.msrb.mxu2 %v2010_v37 }
 0x1a7   : > { %1227 = vmatpush.msrb.mxu3 %v1997_v35  ;;  %1207 = vmatpush.msrb.mxu2 %v2034_v41 }
 0x1a9   : > { %1228 = vmatpush.msrb.mxu3 %v2021_v39  ;;  %1208 = vmatpush.msrb.mxu2 %v2058_v45 }
 0x1ab   : > { %1229 = vmatpush.msrb.mxu3 %v2045_v43  ;;  %1209 = vmatpush.msrb.mxu2 %v2082_v49 }
 0x1ad   : > { %1230 = vmatpush.msrb.mxu3 %v2069_v47  ;;  %1210 = vmatpush.msrb.mxu2 %v2106_v53 }
 0x1af   : > { %1231 = vmatpush.msrb.mxu3 %v2093_v51 }
 0x1b1   : > { %1232 = vmatpush.msrb.mxu3 %v2117_v57 }
 0x1b5   : > { %v660_v59 = vpop.f32.mrf.mxu2  ;;  %v680_v60 = vpop.f32.mrf.mxu3 }
 0x1b6   : > { %1053 = vmatmul.f32.vlgmr.msra.gmra.mxu2 %v660_v59  ;;  %1073 = vmatmul.f32.vlgmr.msra.gmra.mxu3 %v680_v60 }
 0x1b7   : > { %1093 = vmatmul.f32.vlgmr.msrb.gmra.mxu0 %v660_v59  ;;  %1113 = vmatmul.f32.vlgmr.msrb.gmra.mxu1 %v680_v60  ;;  %v2132_v59 = vld [vmem:[%s2246_s9 + $0x10] sm:$0xff]  ;;  %v2137_v60 = vld [vmem:[%s2246_s9 + $0x18] sm:$0xff] }
 0x1b8   : > { %1299 = vmatpush.msra.mxu3 %v1774_v61  ;;  %1339 = vmatpush.msrb.mxu1 %v1779_v62  ;;  %v869_v61 = vpop.f32.mrf.mxu0  ;;  %v889_v62 = vpop.f32.mrf.mxu1 }
 0x1b9   : > { %1211 = vmatpush.msrb.mxu2 %v2132_v59  ;;  %1251 = vmatpush.msra.mxu0 %v2137_v60 }
 0x1ba   : > { %1300 = vmatpush.msra.mxu3 %v1784_v63  ;;  %1340 = vmatpush.msrb.mxu1 %v1791_v0 }
 0x1bb   : > { %1212 = vmatpush.msrb.mxu2 %v2146_v9  ;;  %1252 = vmatpush.msra.mxu0 %v2151_v10 }
 0x1bc   : > { %1301 = vmatpush.msra.mxu3 %v1796_v1  ;;  %1341 = vmatpush.msrb.mxu1 %v1801_v2 }
 0x1bd   : > { %1279 = vmatpush.msra.mxu2 %v1806_v3  ;;  %1319 = vmatpush.msrb.mxu0 %v1811_v4  ;;  %v890_v3 = vadd.f32 %v889_v62, %v869_v61 }
 0x1be   : > { %1302 = vmatpush.msra.mxu3 %v1824_v6  ;;  %1342 = vmatpush.msrb.mxu1 %v1830_v7  ;;  %v1119_v7 = vld [vmem:[%s2245_s8] sm:$0x3] }
 0x1bf   : > { %1280 = vmatpush.msra.mxu2 %v1818_v5  ;;  %1320 = vmatpush.msrb.mxu0 %v1835_v8 }
 0x1c0   : > { %1303 = vmatpush.msra.mxu3 %v1853_v13  ;;  %1343 = vmatpush.msrb.mxu1 %v1859_v14  ;;  %v949_v1 = vpop.f32.mrf.mxu0  ;;  %v969_v2 = vpop.f32.mrf.mxu1 }
 0x1c1   : > { %1281 = vmatpush.msra.mxu2 %v1842_v11  ;;  %1321 = vmatpush.msrb.mxu0 %v1847_v12  ;;  %v950_v4 = vadd.f32 %v949_v1, %v890_v3 }
 0x1c2   : > { %1304 = vmatpush.msra.mxu3 %v1877_v17  ;;  %1344 = vmatpush.msrb.mxu1 %v1883_v18 }
 0x1c3   : > { %1282 = vmatpush.msra.mxu2 %v1866_v15  ;;  %1322 = vmatpush.msrb.mxu0 %v1871_v16 }
 0x1c4   : > { %1305 = vmatpush.msra.mxu3 %v1901_v21  ;;  %1345 = vmatpush.msrb.mxu1 %v1907_v22  ;;  %v1121_v21 = vperm.slane %v1119_v7, 0 }
 0x1c5   : > { %1283 = vmatpush.msra.mxu2 %v1890_v19  ;;  %1323 = vmatpush.msrb.mxu0 %v1895_v20 }
 0x1c6   : > { %1306 = vmatpush.msra.mxu3 %v1925_v25  ;;  %1346 = vmatpush.msrb.mxu1 %v1931_v26  ;;  %v2256_v25 = vld [vmem:[#allocation5_spill] sm:$0xff] }
 0x1c7   : > { %1284 = vmatpush.msra.mxu2 %v1914_v23  ;;  %1324 = vmatpush.msrb.mxu0 %v1919_v24  ;;  %v2255_v24 = vld [vmem:[#allocation6_spill] sm:$0xff]  ;;  %v1191_v26 = vld [vmem:[%s2247_s10] sm:$0x3] }
 0x1c8   : > { %1307 = vmatpush.msra.mxu3 %v1949_v29  ;;  %1347 = vmatpush.msrb.mxu1 %v1955_v55 }
 0x1c9   : > { %1285 = vmatpush.msra.mxu2 %v1938_v27  ;;  %1325 = vmatpush.msrb.mxu0 %v1943_v28  ;;  %v1194_v27 = vperm.slane %v1191_v26, 1 }
 0x1ca   : > { %1308 = vmatpush.msra.mxu3 %v1973_v31  ;;  %1348 = vmatpush.msrb.mxu1 %v1979_v32 }
 0x1cb   : > { %1286 = vmatpush.msra.mxu2 %v1962_v56  ;;  %1326 = vmatpush.msrb.mxu0 %v1967_v30  ;;  %v1193_v30 = vperm.slane %v1191_v26, 0 }
 0x1cc   : > { %1309 = vmatpush.msra.mxu3 %v1997_v35  ;;  %1349 = vmatpush.msrb.mxu1 %v2003_v36 }
 0x1cd   : > { %1287 = vmatpush.msra.mxu2 %v1986_v33  ;;  %1327 = vmatpush.msrb.mxu0 %v1991_v34 }
 0x1ce   : > { %1310 = vmatpush.msra.mxu3 %v2021_v39  ;;  %1350 = vmatpush.msrb.mxu1 %v2027_v40 }
 0x1cf   : > { %1288 = vmatpush.msra.mxu2 %v2010_v37  ;;  %1328 = vmatpush.msrb.mxu0 %v2015_v38 }
 0x1d0   : > { %1311 = vmatpush.msra.mxu3 %v2045_v43  ;;  %1351 = vmatpush.msrb.mxu1 %v2051_v44 }
 0x1d1   : > { %1289 = vmatpush.msra.mxu2 %v2034_v41  ;;  %1329 = vmatpush.msrb.mxu0 %v2039_v42 }
 0x1d2   : > { %1312 = vmatpush.msra.mxu3 %v2069_v47  ;;  %1352 = vmatpush.msrb.mxu1 %v2075_v48 }
 0x1d3   : > { %1290 = vmatpush.msra.mxu2 %v2058_v45  ;;  %1330 = vmatpush.msrb.mxu0 %v2063_v46 }
 0x1d4   : > { %1313 = vmatpush.msra.mxu3 %v2093_v51  ;;  %1353 = vmatpush.msrb.mxu1 %v2099_v52 }
 0x1d5   : > { %1291 = vmatpush.msra.mxu2 %v2082_v49  ;;  %1331 = vmatpush.msrb.mxu0 %v2087_v50  ;;  %v829_v63 = vpop.f32.mrf.mxu2  ;;  %v849_v0 = vpop.f32.mrf.mxu3 }
 0x1d6   : > { %1314 = vmatpush.msra.mxu3 %v2117_v57  ;;  %1354 = vmatpush.msrb.mxu1 %v2123_v58  ;;  %v850_v8 = vadd.f32 %v849_v0, %v829_v63 }
 0x1d7   : > { %1292 = vmatpush.msra.mxu2 %v2106_v53  ;;  %1332 = vmatpush.msrb.mxu0 %v2111_v54 }
 0x1d9   : > { %1293 = vmatpush.msra.mxu2 %v2132_v59  ;;  %1333 = vmatpush.msrb.mxu0 %v2137_v60 }
 0x1db   : > { %1294 = vmatpush.msra.mxu2 %v2146_v9  ;;  %1334 = vmatpush.msrb.mxu0 %v2151_v10  ;;  %v970_v9 = vadd.f32 %v969_v2, %v950_v4  ;;  %v1122_v10 = vperm.slane %v1119_v7, 1 }
 0x1f5   : > { %v909_v5 = vpop.f32.mrf.mxu2  ;;  %v929_v6 = vpop.f32.mrf.mxu3 }
 0x1f6   : > { %v910_v14 = vadd.f32 %v909_v5, %v850_v8 }
 0x1f8   : > { %v930_v19 = vadd.f32 %v929_v6, %v910_v14 }
 0x234   : > { %v1094_v11 = vpop.f32.mrf.mxu0  ;;  %v1114_v12 = vpop.f32.mrf.mxu1 }
 0x235   : > { %v1115_v13 = vadd.f32 %v1114_v12, %v1094_v11 }
 0x237   : > { %v1118_v15 = vadd.f32 %v1115_v13, %v970_v9 }
 0x239   : > { %v1126_v16 = vadd.f32 %v1122_v10, %v1118_v15  ;;  %v1054_v17 = vpop.f32.mrf.mxu2  ;;  %v1074_v18 = vpop.f32.mrf.mxu3 }
 0x23a   : > { %v1075_v20 = vadd.f32 %v1074_v18, %v1054_v17 }
 0x23b   : > { %1233 = vmatmul.f32.vlgmr.msrb.gmra.mxu3 %v1126_v16  ;;  %1273 = vmatmul.f32.vlgmr.msra.gmra.mxu1 %v1126_v16 }
 0x23c   : > { %v1117_v22 = vadd.f32 %v1075_v20, %v930_v19 }
 0x23e   : > { %v1125_v23 = vadd.f32 %v1121_v21, %v1117_v22 }
 0x240   : > { %1213 = vmatmul.f32.vlgmr.msrb.gmra.mxu2 %v1125_v23  ;;  %1253 = vmatmul.f32.vlgmr.msra.gmra.mxu0 %v1125_v23 }
 0x243   : > { %1315 = vmatmul.f32.vlgmr.msra.gmra.mxu3 %v2255_v24  ;;  %1355 = vmatmul.f32.vlgmr.msrb.gmra.mxu1 %v2255_v24 }
 0x248   : > { %1295 = vmatmul.f32.vlgmr.msra.gmra.mxu2 %v2256_v25  ;;  %1335 = vmatmul.f32.vlgmr.msrb.gmra.mxu0 %v2256_v25 }
 0x2b8   : > { %v1274_v28 = vpop.f32.mrf.mxu1 }
 0x2bd   : > { %v1254_v29 = vpop.f32.mrf.mxu0 }
 0x2be   : > { %v1255_v55 = vadd.f32 %v1254_v29, %v1194_v27  ;;  %v1234_v32 = vpop.f32.mrf.mxu3 }
 0x2c0   : > { %v1275_v56 = vadd.f32 %v1274_v28, %v1255_v55  ;;  %v1356_v38 = vpop.f32.mrf.mxu1 }
 0x2c2   : > { %v1278_v31 = vmax.f32 %v1275_v56, 0.0 }
 0x2c3   : > { %v1214_v33 = vpop.f32.mrf.mxu2 }
 0x2c4   : > { %1362 = vst [vmem:[%s477_s16 + $0x8] sm:$0xf] %v1278_v31  ;;  %v1215_v34 = vadd.f32 %v1214_v33, %v1193_v30 }
 0x2c5   : > { %v1336_v35 = vpop.f32.mrf.mxu0 }
 0x2c6   : > { %v1235_v36 = vadd.f32 %v1234_v32, %v1215_v34  ;;  %v1337_v37 = vadd.f32 %v1336_v35, %v1194_v27  ;;  %v1316_v45 = vpop.f32.mrf.mxu3 }
 0x2c8   : > { %v1277_v39 = vmax.f32 %v1235_v36, 0.0  ;;  %v1357_v40 = vadd.f32 %v1356_v38, %v1337_v37 }
 0x2ca   : > { %1361 = vst [vmem:[%s477_s16] sm:$0xf] %v1277_v39  ;;  %v1360_v41 = vmax.f32 %v1357_v40, 0.0 }
 0x2cb   : > { %v1296_v42 = vpop.f32.mrf.mxu2 }
 0x2cc   : > { %v1366_v43 = vrot.slane %v1360_v41, 4  ;;  %v1297_v44 = vadd.f32 %v1296_v42, %v1193_v30 }
 0x2ce   : > { %1370 = vst [vmem:[%s477_s16 + $0x8] sm:$0xf0] %v1366_v43  ;;  %v1317_v46 = vadd.f32 %v1316_v45, %v1297_v44 }
 0x2cf   : > { %1372 = vst [vmem:[%s477_s16 + $0x18] sm:$0x3] %v1366_v43 }
 0x2d0   : > { %v1359_v47 = vmax.f32 %v1317_v46, 0.0 }
 0x2d2   : > { %v1365_v48 = vrot.slane %v1359_v47, 4 }
 0x2d4   : > { %1369 = vst [vmem:[%s477_s16] sm:$0xf0] %v1365_v48 }
 0x2d5   : > { %1371 = vst [vmem:[%s477_s16 + $0x10] sm:$0x3] %v1365_v48 }
 0x2d6 PF: > { %s22_s17 = sadd.s32 1, %s1584_s17  }
 0x2d7   : > { %p19_p7 = scmp.ge.s32.totalorder %s22_s17, 4  }
 0x2d9   :  { %21 = sbr.rel (!%p19_p7) target bundleno = 1 (0x1), region = 113 }
 0x2de   :  { %1394 = vsyncpa [#allocation3], 1 }
 0x2df   :  { %1396 = vsyncpa [#allocation3 + $0x1], 1 }

// kernel: denoise_forward.3
= control target key start
LH: loop header
LB: loop body
LE: loop exit
PB: predicated region body
PF: predicated region fallthrough
CT: control target
= control target key end

     0   :  { %s8069_s0 = inlined_call_operand.vmem [shape: f32[2,10,256], index: 0, kind: input, shape index: {}]   ;;  %s8070_s1 = inlined_call_operand.vmem [shape: f32[2,10,256], index: 1, kind: input, shape index: {}]   ;;  %s8071_s2 = inlined_call_operand.vmem [shape: f32[2,4,6], index: 2, kind: input, shape index: {}]   ;;  %s8072_s3 = inlined_call_operand.vmem [shape: f32[2,4,4], index: 3, kind: input, shape index: {}]   ;;  %s8073_s4 = inlined_call_operand.vmem [shape: f32[2,6,256], index: 4, kind: input, shape index: {}]   ;;  %s8074_s5 = inlined_call_operand.hbm [shape: f32[3,256,256], index: 5, kind: input, shape index: {}]   ;;  %s8075_s6 = inlined_call_operand.vmem [shape: f32[1,256], index: 6, kind: input, shape index: {}]   ;;  %s8076_s7 = inlined_call_operand.hbm [shape: f32[256,512], index: 7, kind: input, shape index: {}]   ;;  %s8077_s8 = inlined_call_operand.vmem [shape: f32[1,512], index: 8, kind: input, shape index: {}]   ;;  %s8078_s9 = inlined_call_operand.hbm [shape: f32[256,512], index: 9, kind: input, shape index: {}]   ;;  %s8079_s10 = inlined_call_operand.vmem [shape: f32[1,512], index: 10, kind: input, shape index: {}]   ;;  %s8080_s11 = inlined_call_operand.hbm [shape: f32[512,512], index: 11, kind: input, shape index: {}]   ;;  %s8081_s12 = inlined_call_operand.vmem [shape: f32[1,512], index: 12, kind: input, shape index: {}]   ;;  %s8082_s13 = inlined_call_operand.vmem [shape: f32[1,512], index: 13, kind: input, shape index: {}]   ;;  %s8083_s14 = inlined_call_operand.vmem [shape: f32[2,10,512], index: 14, kind: output, shape index: {}]  }
   0x1   :  { %8551 = sst [smem:[#allocation190_spill]] %s8074_s5 }
   0x2   :  { %8552 = sst [smem:[#allocation191_spill]] %s8076_s7 }
   0x3   :  { %8553 = sst [smem:[#allocation192_spill]] %s8083_s14 }
   0x4   :  { %19 = vsyncpa [#allocation3], 0 }
   0x5   :  { %20 = vsyncpa [#allocation5], 0 }
   0x6   :  { %21 = vsyncpa [#allocation8], 0  ;;  %s4784_s29 = smov 0  }
   0x7 LB: > { %8554 = sst [smem:[#allocation12_spill]] %s4699_s29  ;;  %s4793_s17 = sadd.s32 4294967295, %s4699_s29   ;;  %s4699_s29 = sphi %s4784_s29, %s27_s29  }
   0x8   : > { %s8555_s7 = sld [smem:[#allocation191_spill]]  ;;  %p4123_p0 = scmp.ge.s32.totalorder %s4699_s29, 1 }
   0x9   : > { %p377_p1 = scmp.lt.s32.totalorder %s4699_s29, 3  ;;  %p4187_p2 = scmp.eq.s32.totalorder %s4793_s17, 0 }
   0xa   : > { %s4701_s19 = smov [#allocation4]   ;;  %s8557_s5 = sld [smem:[#allocation190_spill]] }
   0xb   : > { %p4798_p3 = pnand %p4123_p0, %p377_p1  ;;  %s407_s20 = sshll.u32 %s4701_s19, 4  ;;  %s408_s20 = int_to_ptr.vmem [resolvable:$true] %s407_s20 }
   0xc   : > { %s4702_s25 = smov [#allocation2]   ;;  %s4703_s27 = smov 512  }
   0xd   : > { %p4174_p4 = pneg %p4798_p3  ;;  %s390_s26 = sshll.u32 %s4702_s25, 4  ;;  %s391_s26 = int_to_ptr.vmem [resolvable:$true] %s390_s26 }
   0xe   : > { %s405_s16 = sshll.u32 %s8555_s7, 4  ;;  %s4704_s28 = smov 32   ;;  %s406_s16 = int_to_ptr.hbm [resolvable:$true] %s405_s16 }
   0xf   : > { %p4809_p5 = pnand %p4187_p2, %p4174_p4  ;;  %s422_s19 = sshll.u32 %s8078_s9, 4  ;;  %s423_s19 = int_to_ptr.hbm [resolvable:$true] %s422_s19 }
  0x10   : > { %s388_s23 = sshll.u32 %s8557_s5, 4  ;;  %s4705_s21 = smov 256   ;;  %s389_s23 = int_to_ptr.hbm [resolvable:$true] %s388_s23 }
  0x11   : > { %4180 = dma.hbm_to_vmem [thread:$0]  (!%p4809_p5), %s406_s16, 16384, %s408_s20, [#allocation5], %s4703_s27, %s4703_s27, %s4704_s28  }
  0x12   : > { %s4706_s22 = smov 16   ;;  %s4707_s5 = smov [#allocation6]  }
  0x13   : > { %4177 = dma.hbm_to_vmem [thread:$0]  (!%p4809_p5), %s389_s23, 24576, %s391_s26, [#allocation3], %s4705_s21, %s4705_s21, %s4706_s22  }
  0x14   : > { %s424_s7 = sshll.u32 %s4707_s5, 4  ;;  %s439_s25 = sshll.u32 %s8080_s11, 4  ;;  %s425_s7 = int_to_ptr.vmem [resolvable:$true] %s424_s7  ;;  %s440_s25 = int_to_ptr.hbm [resolvable:$true] %s439_s25 }
  0x15   : > { %4183 = dma.hbm_to_vmem [thread:$0]  (!%p4809_p5), %s423_s19, 16384, %s425_s7, [#allocation5], %s4703_s27, %s4703_s27, %s4704_s28  }
  0x16   : > { %s4708_s16 = smov [#allocation7]   ;;  %501 = sbr.rel (%p4798_p3) target bundleno = 1621 (0x655), region = 76 }
  0x17   : > { %s441_s20 = sshll.u32 %s4708_s16, 4  ;;  %s442_s20 = int_to_ptr.vmem [resolvable:$true] %s441_s20 }
  0x18   : > { %4186 = dma.hbm_to_vmem [thread:$0]  (!%p4809_p5), %s440_s25, 32768, %s442_s20, [#allocation8], %s4703_s27, %s4703_s27, %s4704_s28  }
  0x1b   : > { %4686 = dma.done.wait (%p4187_p2), [#allocation3], 24576  }
  0x1c   : > { %4688 = vsyncadd (%p4187_p2), [#allocation3], 4294942720 }
  0x1d   : > { %4690 = dma.done.wait (%p4187_p2), [#allocation5], 32768  }
  0x1e   : > { %4692 = vsyncadd (%p4187_p2), [#allocation5], 4294934528 }
  0x1f   : > { %4694 = dma.done.wait (%p4187_p2), [#allocation8], 32768  }
  0x20   : > { %4696 = vsyncadd (%p4187_p2), [#allocation8], 4294934528  ;;  %p581_p6 = scmp.lt.s32.totalorder %s4793_s17, 1  ;;  %vm628_vm0 = vcmask 1043456   ;;  %vm643_vm1 = vcmask 1045504   ;;  %vm639_vm2 = vcmask 48128  }
  0x21   : > { %v836_v23 = vld [vmem:[#allocation2 + $0x2f0] sm:$0xff]  ;;  %v834_v25 = vld [vmem:[#allocation2 + $0x2e0] sm:$0xff]  ;;  %vm691_vm3 = vcmask 31744   ;;  %s9349_s19 = sld [smem:[#allocation192_spill]] }
  0x22   : > { %s9488_s17 = smov (!%p581_p6, %s4793_s17), 1  ;;  %v868_v24 = vld [vmem:[#allocation2 + $0x3f0] sm:$0xff]  ;;  %v866_v26 = vld [vmem:[#allocation2 + $0x3e0] sm:$0xff] }
  0x23   : > { %s4154_s5 = sshll.u32 %s9488_s17, 5  ;;  %s4156_s26 = sshll.u32 %s9488_s17, 4  ;;  %v832_v27 = vld [vmem:[#allocation2 + $0x2d0] sm:$0xff]  ;;  %v830_v29 = vld [vmem:[#allocation2 + $0x2c0] sm:$0xff] }
  0x24   : > { %s585_s29 = scalar_lea.vmem %s8069_s0, %s4154_s5  ;;  %s590_s24 = scalar_lea.vmem %s8070_s1, %s4154_s5  ;;  %v864_v28 = vld [vmem:[#allocation2 + $0x3d0] sm:$0xff]  ;;  %v862_v30 = vld [vmem:[#allocation2 + $0x3c0] sm:$0xff] }
  0x25   : > { %v609_v0 = vld [vmem:[%s585_s29] sm:$0xff]  ;;  %v610_v1 = vld [vmem:[%s585_s29 + $0x8] sm:$0xff]  ;;  %v611_v2 = vld [vmem:[%s585_s29 + $0x10] sm:$0x3]  ;;  %s603_s30 = scalar_lea.vmem %s8073_s4, %s4156_s26  ;;  %s4138_s15 = sshll.u32 %s9488_s17, 2 }
  0x26   : > { %v612_v3 = vld [vmem:[%s585_s29 + $0x18] sm:$0x3]  ;;  %v613_v4 = vld [vmem:[%s590_s24] sm:$0xff]  ;;  %v614_v5 = vld [vmem:[%s590_s24 + $0x8] sm:$0xff]  ;;  %s594_s22 = scalar_lea.vmem %s8071_s2, %s4138_s15  ;;  %s598_s20 = scalar_lea.vmem %s8072_s3, %s4138_s15 }
  0x27   : > { %v615_v6 = vld [vmem:[%s590_s24 + $0x10] sm:$0x3]  ;;  %v616_v7 = vld [vmem:[%s590_s24 + $0x18] sm:$0x3]  ;;  %v4856_v8 = vadd.f32 %v613_v4, %v609_v0  ;;  %v4858_v9 = vadd.f32 %v614_v5, %v610_v1  ;;  %v622_v14 = vld [vmem:[%s603_s30] sm:$0x3f] }
  0x28   : > { %v619_v10 = vadd.f32 %v615_v6, %v611_v2  ;;  %v620_v11 = vadd.f32 %v616_v7, %v612_v3  ;;  %v623_v16 = vld [vmem:[%s603_s30 + $0x8] sm:$0x3f]  ;;  %v621_v22 = vld [vmem:[%s594_s22] sm:$0xf]  ;;  %v828_v31 = vld [vmem:[#allocation2 + $0x2b0] sm:$0xff]  ;;  %s4157_s30 = sshll.u32 %s9488_s17, 6 }
  0x29   : > { %8559 = vst [vmem:[#allocation13_spill] sm:$0xff] %v4856_v8  ;;  %v629_v12 = vrot.slane %v4856_v8, 4  ;;  %v632_v13 = vrot.slane %v4858_v9, 4  ;;  %v860_v32 = vld [vmem:[#allocation2 + $0x3b0] sm:$0xff]  ;;  %v826_v33 = vld [vmem:[#allocation2 + $0x2a0] sm:$0xff]  ;;  %s7710_s21 = scalar_lea.vmem %s9349_s19, %s4157_s30 }
  0x2a   : > { %8560 = vst [vmem:[#allocation14_spill] sm:$0xff] %v4858_v9  ;;  %v630_v15 = vrot.slane %v619_v10, 4  ;;  %v633_v17 = vrot.slane %v620_v11, 4  ;;  %v858_v34 = vld [vmem:[#allocation2 + $0x3a0] sm:$0xff]  ;;  %v824_v35 = vld [vmem:[#allocation2 + $0x290] sm:$0xff] }
  0x2b   : > { %v856_v36 = vld [vmem:[#allocation2 + $0x390] sm:$0xff]  ;;  %v822_v37 = vld [vmem:[#allocation2 + $0x280] sm:$0xff] }
  0x2c   : > { %v4869_v18 = vsel %vm628_vm0, %v629_v12, %v630_v15  ;;  %v4872_v19 = vsel %vm628_vm0, %v632_v13, %v633_v17  ;;  %v854_v38 = vld [vmem:[#allocation2 + $0x380] sm:$0xff]  ;;  %v820_v39 = vld [vmem:[#allocation2 + $0x270] sm:$0xff] }
  0x2d   : > { %8561 = vst [vmem:[#allocation15_spill] sm:$0xff] %v4869_v18  ;;  %v637_v20 = vmul.f32 %v4869_v18, %v622_v14  ;;  %v638_v21 = vmul.f32 %v4872_v19, %v623_v16  ;;  %v852_v40 = vld [vmem:[#allocation2 + $0x370] sm:$0xff]  ;;  %v818_v41 = vld [vmem:[#allocation2 + $0x260] sm:$0xff]  ;;  %v5084_v18 = vld [vmem:[#allocation4 + $0x8] sm:$0xff] }
  0x2e   : > { %8562 = vst [vmem:[#allocation16_spill] sm:$0xff] %v4872_v19  ;;  %v850_v42 = vld [vmem:[#allocation2 + $0x360] sm:$0xff]  ;;  %v816_v43 = vld [vmem:[#allocation2 + $0x250] sm:$0xff] }
  0x2f   : > { %4144 = vmatpush.msk.msra.mxu0 %vm643_vm1, %v637_v20  ;;  %4146 = vmatpush.msk.msra.mxu1 %vm643_vm1, %v638_v21  ;;  %v848_v44 = vld [vmem:[#allocation2 + $0x350] sm:$0xff]  ;;  %v814_v45 = vld [vmem:[#allocation2 + $0x240] sm:$0xff]  ;;  %8584 = vst [vmem:[#allocation38_spill] sm:$0xff] %v5084_v18 }
  0x30   : > { %4145 = vmatmul.msk.f32.vlgmr.msra.gmra.mxu0 %vm639_vm2, %v621_v22  ;;  %4147 = vmatmul.msk.f32.vlgmr.msra.gmra.mxu1 %vm639_vm2, %v621_v22  ;;  %v846_v46 = vld [vmem:[#allocation2 + $0x340] sm:$0xff]  ;;  %v812_v47 = vld [vmem:[#allocation2 + $0x230] sm:$0xff] }
  0x31   : > { %870 = vmatpush.msrb.mxu0 %v836_v23  ;;  %890 = vmatpush.msrb.mxu1 %v868_v24  ;;  %v844_v48 = vld [vmem:[#allocation2 + $0x330] sm:$0xff]  ;;  %v810_v49 = vld [vmem:[#allocation2 + $0x220] sm:$0xff] }
  0x32   : > { %v842_v50 = vld [vmem:[#allocation2 + $0x320] sm:$0xff]  ;;  %v808_v51 = vld [vmem:[#allocation2 + $0x210] sm:$0xff] }
  0x33   : > { %871 = vmatpush.msrb.mxu0 %v834_v25  ;;  %891 = vmatpush.msrb.mxu1 %v866_v26  ;;  %v840_v52 = vld [vmem:[#allocation2 + $0x310] sm:$0xff]  ;;  %v806_v53 = vld [vmem:[#allocation2 + $0x200] sm:$0xff] }
  0x34   : > { %v838_v54 = vld [vmem:[#allocation2 + $0x300] sm:$0xff]  ;;  %v771_v55 = vld [vmem:[#allocation2 + $0xf0] sm:$0xff] }
  0x35   : > { %872 = vmatpush.msrb.mxu0 %v832_v27  ;;  %892 = vmatpush.msrb.mxu1 %v864_v28  ;;  %v803_v56 = vld [vmem:[#allocation2 + $0x1f0] sm:$0xff]  ;;  %v769_v57 = vld [vmem:[#allocation2 + $0xe0] sm:$0xff] }
  0x36   : > { %v801_v58 = vld [vmem:[#allocation2 + $0x1e0] sm:$0xff]  ;;  %v767_v59 = vld [vmem:[#allocation2 + $0xd0] sm:$0xff] }
  0x37   : > { %873 = vmatpush.msrb.mxu0 %v830_v29  ;;  %893 = vmatpush.msrb.mxu1 %v862_v30  ;;  %v799_v60 = vld [vmem:[#allocation2 + $0x1d0] sm:$0xff]  ;;  %v765_v61 = vld [vmem:[#allocation2 + $0xc0] sm:$0xff]  ;;  %v837_v30 = vld [vmem:[#allocation2 + $0x2f8] sm:$0xff] }
  0x38   : > { %v797_v62 = vld [vmem:[#allocation2 + $0x1c0] sm:$0xff]  ;;  %v763_v63 = vld [vmem:[#allocation2 + $0xb0] sm:$0xff] }
  0x39   : > { %874 = vmatpush.msrb.mxu0 %v828_v31  ;;  %894 = vmatpush.msrb.mxu1 %v860_v32  ;;  %v795_v0 = vld [vmem:[#allocation2 + $0x1b0] sm:$0xff]  ;;  %v761_v1 = vld [vmem:[#allocation2 + $0xa0] sm:$0xff]  ;;  %v869_v31 = vld [vmem:[#allocation2 + $0x3f8] sm:$0xff] }
  0x3a   : > { %v793_v2 = vld [vmem:[#allocation2 + $0x1a0] sm:$0xff]  ;;  %v759_v3 = vld [vmem:[#allocation2 + $0x90] sm:$0xff]  ;;  %v835_v32 = vld [vmem:[#allocation2 + $0x2e8] sm:$0xff] }
  0x3b   : > { %875 = vmatpush.msrb.mxu0 %v826_v33  ;;  %895 = vmatpush.msrb.mxu1 %v858_v34  ;;  %v791_v4 = vld [vmem:[#allocation2 + $0x190] sm:$0xff]  ;;  %v757_v5 = vld [vmem:[#allocation2 + $0x80] sm:$0xff]  ;;  %v867_v33 = vld [vmem:[#allocation2 + $0x3e8] sm:$0xff] }
  0x3c   : > { %v789_v6 = vld [vmem:[#allocation2 + $0x180] sm:$0xff]  ;;  %v755_v7 = vld [vmem:[#allocation2 + $0x70] sm:$0xff]  ;;  %v833_v34 = vld [vmem:[#allocation2 + $0x2d8] sm:$0xff] }
  0x3d   : > { %876 = vmatpush.msrb.mxu0 %v824_v35  ;;  %896 = vmatpush.msrb.mxu1 %v856_v36  ;;  %v787_v10 = vld [vmem:[#allocation2 + $0x170] sm:$0xff]  ;;  %v753_v11 = vld [vmem:[#allocation2 + $0x60] sm:$0xff]  ;;  %v865_v35 = vld [vmem:[#allocation2 + $0x3d8] sm:$0xff] }
  0x3e   : > { %v785_v12 = vld [vmem:[#allocation2 + $0x160] sm:$0xff]  ;;  %v751_v13 = vld [vmem:[#allocation2 + $0x50] sm:$0xff]  ;;  %v831_v36 = vld [vmem:[#allocation2 + $0x2c8] sm:$0xff] }
  0x3f   : > { %877 = vmatpush.msrb.mxu0 %v822_v37  ;;  %897 = vmatpush.msrb.mxu1 %v854_v38  ;;  %v749_v14 = vld [vmem:[#allocation2 + $0x40] sm:$0xff]  ;;  %v783_v15 = vld [vmem:[#allocation2 + $0x150] sm:$0xff]  ;;  %v863_v37 = vld [vmem:[#allocation2 + $0x3c8] sm:$0xff] }
  0x40   : > { %v747_v16 = vld [vmem:[#allocation2 + $0x30] sm:$0xff]  ;;  %v781_v17 = vld [vmem:[#allocation2 + $0x140] sm:$0xff]  ;;  %v829_v38 = vld [vmem:[#allocation2 + $0x2b8] sm:$0xff] }
  0x41   : > { %878 = vmatpush.msrb.mxu0 %v820_v39  ;;  %898 = vmatpush.msrb.mxu1 %v852_v40  ;;  %v745_v20 = vld [vmem:[#allocation2 + $0x20] sm:$0xff]  ;;  %v779_v21 = vld [vmem:[#allocation2 + $0x130] sm:$0xff]  ;;  %v861_v39 = vld [vmem:[#allocation2 + $0x3b8] sm:$0xff] }
  0x42   : > { %v743_v22 = vld [vmem:[#allocation2 + $0x10] sm:$0xff]  ;;  %v777_v23 = vld [vmem:[#allocation2 + $0x120] sm:$0xff]  ;;  %v827_v40 = vld [vmem:[#allocation2 + $0x2a8] sm:$0xff] }
  0x43   : > { %879 = vmatpush.msrb.mxu0 %v818_v41  ;;  %899 = vmatpush.msrb.mxu1 %v850_v42  ;;  %v741_v24 = vld [vmem:[#allocation2] sm:$0xff]  ;;  %v775_v25 = vld [vmem:[#allocation2 + $0x110] sm:$0xff]  ;;  %v859_v41 = vld [vmem:[#allocation2 + $0x3a8] sm:$0xff] }
  0x44   : > { %v773_v26 = vld [vmem:[#allocation2 + $0x100] sm:$0xff]  ;;  %v825_v42 = vld [vmem:[#allocation2 + $0x298] sm:$0xff] }
  0x45   : > { %880 = vmatpush.msrb.mxu0 %v816_v43  ;;  %900 = vmatpush.msrb.mxu1 %v848_v44  ;;  %v690_v29 = vld [vmem:[%s598_s20] sm:$0xf]  ;;  %v857_v43 = vld [vmem:[#allocation2 + $0x398] sm:$0xff]  ;;  %v823_v44 = vld [vmem:[#allocation2 + $0x288] sm:$0xff] }
  0x46   : > { %v5080_v19 = vld [vmem:[#allocation4 + $0x200] sm:$0xff] }
  0x47   : > { %881 = vmatpush.msrb.mxu0 %v814_v45  ;;  %901 = vmatpush.msrb.mxu1 %v846_v46  ;;  %v855_v45 = vld [vmem:[#allocation2 + $0x388] sm:$0xff]  ;;  %v821_v46 = vld [vmem:[#allocation2 + $0x278] sm:$0xff]  ;;  %8583 = vst [vmem:[#allocation37_spill] sm:$0xff] %v5080_v19 }
  0x49   : > { %882 = vmatpush.msrb.mxu0 %v812_v47  ;;  %902 = vmatpush.msrb.mxu1 %v844_v48  ;;  %v853_v47 = vld [vmem:[#allocation2 + $0x378] sm:$0xff]  ;;  %v819_v48 = vld [vmem:[#allocation2 + $0x268] sm:$0xff] }
  0x4b   : > { %883 = vmatpush.msrb.mxu0 %v810_v49  ;;  %903 = vmatpush.msrb.mxu1 %v842_v50  ;;  %v851_v49 = vld [vmem:[#allocation2 + $0x368] sm:$0xff]  ;;  %v817_v50 = vld [vmem:[#allocation2 + $0x258] sm:$0xff] }
  0x4d   : > { %884 = vmatpush.msrb.mxu0 %v808_v51  ;;  %904 = vmatpush.msrb.mxu1 %v840_v52  ;;  %v849_v51 = vld [vmem:[#allocation2 + $0x358] sm:$0xff]  ;;  %v815_v52 = vld [vmem:[#allocation2 + $0x248] sm:$0xff] }
  0x4f   : > { %885 = vmatpush.msrb.mxu0 %v806_v53  ;;  %905 = vmatpush.msrb.mxu1 %v838_v54  ;;  %v847_v53 = vld [vmem:[#allocation2 + $0x348] sm:$0xff]  ;;  %v813_v54 = vld [vmem:[#allocation2 + $0x238] sm:$0xff] }
  0x51   : > { %950 = vmatpush.msra.mxu0 %v771_v55  ;;  %970 = vmatpush.msra.mxu1 %v803_v56  ;;  %v845_v55 = vld [vmem:[#allocation2 + $0x338] sm:$0xff]  ;;  %v811_v56 = vld [vmem:[#allocation2 + $0x228] sm:$0xff] }
  0x53   : > { %951 = vmatpush.msra.mxu0 %v769_v57  ;;  %971 = vmatpush.msra.mxu1 %v801_v58  ;;  %v843_v57 = vld [vmem:[#allocation2 + $0x328] sm:$0xff]  ;;  %v809_v58 = vld [vmem:[#allocation2 + $0x218] sm:$0xff] }
  0x55   : > { %952 = vmatpush.msra.mxu0 %v767_v59  ;;  %972 = vmatpush.msra.mxu1 %v799_v60  ;;  %v841_v59 = vld [vmem:[#allocation2 + $0x318] sm:$0xff]  ;;  %v807_v60 = vld [vmem:[#allocation2 + $0x208] sm:$0xff] }
  0x57   : > { %953 = vmatpush.msra.mxu0 %v765_v61  ;;  %973 = vmatpush.msra.mxu1 %v797_v62  ;;  %v839_v61 = vld [vmem:[#allocation2 + $0x308] sm:$0xff]  ;;  %v772_v62 = vld [vmem:[#allocation2 + $0xf8] sm:$0xff] }
  0x59   : > { %954 = vmatpush.msra.mxu0 %v763_v63  ;;  %974 = vmatpush.msra.mxu1 %v795_v0  ;;  %v804_v63 = vld [vmem:[#allocation2 + $0x1f8] sm:$0xff]  ;;  %v770_v0 = vld [vmem:[#allocation2 + $0xe8] sm:$0xff] }
  0x5b   : > { %955 = vmatpush.msra.mxu0 %v761_v1  ;;  %975 = vmatpush.msra.mxu1 %v793_v2  ;;  %v802_v1 = vld [vmem:[#allocation2 + $0x1e8] sm:$0xff]  ;;  %v1061_v2 = vld [vmem:[#allocation2 + $0x4f0] sm:$0xff] }
  0x5d   : > { %956 = vmatpush.msra.mxu0 %v759_v3  ;;  %976 = vmatpush.msra.mxu1 %v791_v4  ;;  %v1093_v3 = vld [vmem:[#allocation2 + $0x5f0] sm:$0xff]  ;;  %v1059_v4 = vld [vmem:[#allocation2 + $0x4e0] sm:$0xff] }
  0x5f   : > { %957 = vmatpush.msra.mxu0 %v757_v5  ;;  %977 = vmatpush.msra.mxu1 %v789_v6  ;;  %v768_v5 = vld [vmem:[#allocation2 + $0xd8] sm:$0xff] }
  0x60   : > { %v800_v6 = vld [vmem:[#allocation2 + $0x1d8] sm:$0xff] }
  0x61   : > { %958 = vmatpush.msra.mxu0 %v755_v7  ;;  %978 = vmatpush.msra.mxu1 %v787_v10  ;;  %v1091_v7 = vld [vmem:[#allocation2 + $0x5e0] sm:$0xff]  ;;  %v1057_v10 = vld [vmem:[#allocation2 + $0x4d0] sm:$0xff] }
  0x63   : > { %959 = vmatpush.msra.mxu0 %v753_v11  ;;  %979 = vmatpush.msra.mxu1 %v785_v12  ;;  %v1089_v11 = vld [vmem:[#allocation2 + $0x5d0] sm:$0xff]  ;;  %v766_v12 = vld [vmem:[#allocation2 + $0xc8] sm:$0xff] }
  0x65   : > { %960 = vmatpush.msra.mxu0 %v751_v13  ;;  %980 = vmatpush.msra.mxu1 %v783_v15  ;;  %v798_v13 = vld [vmem:[#allocation2 + $0x1c8] sm:$0xff]  ;;  %v1087_v15 = vld [vmem:[#allocation2 + $0x5c0] sm:$0xff] }
  0x67   : > { %961 = vmatpush.msra.mxu0 %v749_v14  ;;  %981 = vmatpush.msra.mxu1 %v781_v17  ;;  %v1055_v14 = vld [vmem:[#allocation2 + $0x4c0] sm:$0xff]  ;;  %v796_v17 = vld [vmem:[#allocation2 + $0x1b8] sm:$0xff] }
  0x69   : > { %962 = vmatpush.msra.mxu0 %v747_v16  ;;  %982 = vmatpush.msra.mxu1 %v779_v21  ;;  %v764_v16 = vld [vmem:[#allocation2 + $0xb8] sm:$0xff]  ;;  %v1085_v21 = vld [vmem:[#allocation2 + $0x5b0] sm:$0xff] }
  0x6b   : > { %963 = vmatpush.msra.mxu0 %v745_v20  ;;  %983 = vmatpush.msra.mxu1 %v777_v23  ;;  %v1053_v20 = vld [vmem:[#allocation2 + $0x4b0] sm:$0xff]  ;;  %v794_v23 = vld [vmem:[#allocation2 + $0x1a8] sm:$0xff] }
  0x6d   : > { %964 = vmatpush.msra.mxu0 %v743_v22  ;;  %984 = vmatpush.msra.mxu1 %v775_v25  ;;  %v762_v22 = vld [vmem:[#allocation2 + $0xa8] sm:$0xff]  ;;  %v1083_v25 = vld [vmem:[#allocation2 + $0x5a0] sm:$0xff] }
  0x6f   : > { %965 = vmatpush.msra.mxu0 %v741_v24  ;;  %985 = vmatpush.msra.mxu1 %v773_v26  ;;  %v1051_v24 = vld [vmem:[#allocation2 + $0x4a0] sm:$0xff]  ;;  %v760_v26 = vld [vmem:[#allocation2 + $0x98] sm:$0xff] }
  0xad   : > { %v4883_v27 = vpop.f32.mrf.mxu0  ;;  %v4885_v28 = vpop.f32.mrf.mxu1 }
  0xae   : > { %4148 = vmatpush.msk.msra.mxu2 %vm628_vm0, %v4883_v27  ;;  %4150 = vmatpush.msk.msra.mxu3 %vm628_vm0, %v4885_v28 }
  0xaf   : > { %886 = vmatmul.f32.vlgmr.msrb.gmra.mxu0 %v4883_v27  ;;  %906 = vmatmul.f32.vlgmr.msrb.gmra.mxu1 %v4885_v28 }
  0xb0   : > { %4149 = vmatmul.msk.f32.vlgmr.msra.gmra.mxu2 %vm691_vm3, %v690_v29  ;;  %4151 = vmatmul.msk.f32.vlgmr.msra.gmra.mxu3 %vm691_vm3, %v690_v29  ;;  %v1081_v29 = vld [vmem:[#allocation2 + $0x590] sm:$0xff] }
  0xb1   : > { %910 = vmatpush.msrb.mxu2 %v837_v30  ;;  %930 = vmatpush.msrb.mxu3 %v869_v31  ;;  %v758_v30 = vld [vmem:[#allocation2 + $0x88] sm:$0xff] }
  0xb2   : > { %1095 = vmatpush.msrb.mxu0 %v1061_v2  ;;  %1115 = vmatpush.msrb.mxu1 %v1093_v3  ;;  %v790_v31 = vld [vmem:[#allocation2 + $0x188] sm:$0xff]  ;;  %v1054_v2 = vld [vmem:[#allocation2 + $0x4b8] sm:$0xff] }
  0xb3   : > { %911 = vmatpush.msrb.mxu2 %v835_v32  ;;  %931 = vmatpush.msrb.mxu3 %v867_v33  ;;  %v1047_v32 = vld [vmem:[#allocation2 + $0x480] sm:$0xff]  ;;  %v1086_v3 = vld [vmem:[#allocation2 + $0x5b8] sm:$0xff] }
  0xb4   : > { %1096 = vmatpush.msrb.mxu0 %v1059_v4  ;;  %1116 = vmatpush.msrb.mxu1 %v1091_v7  ;;  %v1079_v33 = vld [vmem:[#allocation2 + $0x580] sm:$0xff]  ;;  %v1052_v4 = vld [vmem:[#allocation2 + $0x4a8] sm:$0xff]  ;;  %v1082_v7 = vld [vmem:[#allocation2 + $0x598] sm:$0xff] }
  0xb5   : > { %912 = vmatpush.msrb.mxu2 %v833_v34  ;;  %932 = vmatpush.msrb.mxu3 %v865_v35  ;;  %v756_v34 = vld [vmem:[#allocation2 + $0x78] sm:$0xff] }
  0xb6   : > { %1097 = vmatpush.msrb.mxu0 %v1057_v10  ;;  %1117 = vmatpush.msrb.mxu1 %v1089_v11  ;;  %v788_v35 = vld [vmem:[#allocation2 + $0x178] sm:$0xff]  ;;  %v1048_v10 = vld [vmem:[#allocation2 + $0x488] sm:$0xff] }
  0xb7   : > { %913 = vmatpush.msrb.mxu2 %v831_v36  ;;  %933 = vmatpush.msrb.mxu3 %v863_v37  ;;  %v1045_v36 = vld [vmem:[#allocation2 + $0x470] sm:$0xff]  ;;  %v1080_v11 = vld [vmem:[#allocation2 + $0x588] sm:$0xff] }
  0xb8   : > { %966 = vmatmul.f32.vlgmr.msra.gmra.mxu0 %v4856_v8  ;;  %986 = vmatmul.f32.vlgmr.msra.gmra.mxu1 %v4858_v9  ;;  %v1077_v37 = vld [vmem:[#allocation2 + $0x570] sm:$0xff] }
  0xb9   : > { %914 = vmatpush.msrb.mxu2 %v829_v38  ;;  %934 = vmatpush.msrb.mxu3 %v861_v39  ;;  %v754_v38 = vld [vmem:[#allocation2 + $0x68] sm:$0xff] }
  0xba   : > { %1098 = vmatpush.msrb.mxu0 %v1055_v14  ;;  %1118 = vmatpush.msrb.mxu1 %v1087_v15  ;;  %v786_v39 = vld [vmem:[#allocation2 + $0x168] sm:$0xff] }
  0xbb   : > { %915 = vmatpush.msrb.mxu2 %v827_v40  ;;  %935 = vmatpush.msrb.mxu3 %v859_v41  ;;  %v1043_v40 = vld [vmem:[#allocation2 + $0x460] sm:$0xff]  ;;  %v1044_v14 = vld [vmem:[#allocation2 + $0x468] sm:$0xff] }
  0xbc   : > { %1099 = vmatpush.msrb.mxu0 %v1053_v20  ;;  %1119 = vmatpush.msrb.mxu1 %v1085_v21  ;;  %v1075_v41 = vld [vmem:[#allocation2 + $0x560] sm:$0xff]  ;;  %v1076_v15 = vld [vmem:[#allocation2 + $0x568] sm:$0xff] }
  0xbd   : > { %916 = vmatpush.msrb.mxu2 %v825_v42  ;;  %936 = vmatpush.msrb.mxu3 %v857_v43  ;;  %v752_v42 = vld [vmem:[#allocation2 + $0x58] sm:$0xff]  ;;  %v1040_v20 = vld [vmem:[#allocation2 + $0x448] sm:$0xff] }
  0xbe   : > { %1100 = vmatpush.msrb.mxu0 %v1051_v24  ;;  %1120 = vmatpush.msrb.mxu1 %v1083_v25  ;;  %v784_v43 = vld [vmem:[#allocation2 + $0x158] sm:$0xff]  ;;  %v1072_v21 = vld [vmem:[#allocation2 + $0x548] sm:$0xff] }
  0xbf   : > { %917 = vmatpush.msrb.mxu2 %v823_v44  ;;  %937 = vmatpush.msrb.mxu3 %v855_v45  ;;  %v1041_v44 = vld [vmem:[#allocation2 + $0x450] sm:$0xff]  ;;  %v1038_v24 = vld [vmem:[#allocation2 + $0x438] sm:$0xff] }
  0xc0   : > { %1121 = vmatpush.msrb.mxu1 %v1081_v29  ;;  %v1073_v45 = vld [vmem:[#allocation2 + $0x550] sm:$0xff]  ;;  %v1070_v25 = vld [vmem:[#allocation2 + $0x538] sm:$0xff]  ;;  %v1068_v29 = vld [vmem:[#allocation2 + $0x528] sm:$0xff] }
  0xc1   : > { %918 = vmatpush.msrb.mxu2 %v821_v46  ;;  %938 = vmatpush.msrb.mxu3 %v853_v47  ;;  %v750_v46 = vld [vmem:[#allocation2 + $0x48] sm:$0xff] }
  0xc2   : > { %1122 = vmatpush.msrb.mxu1 %v1079_v33  ;;  %v782_v47 = vld [vmem:[#allocation2 + $0x148] sm:$0xff]  ;;  %v1066_v33 = vld [vmem:[#allocation2 + $0x518] sm:$0xff] }
  0xc3   : > { %919 = vmatpush.msrb.mxu2 %v819_v48  ;;  %939 = vmatpush.msrb.mxu3 %v851_v49  ;;  %v1039_v48 = vld [vmem:[#allocation2 + $0x440] sm:$0xff] }
  0xc4   : > { %1123 = vmatpush.msrb.mxu1 %v1077_v37  ;;  %v1071_v49 = vld [vmem:[#allocation2 + $0x540] sm:$0xff]  ;;  %v1064_v37 = vld [vmem:[#allocation2 + $0x508] sm:$0xff] }
  0xc5   : > { %920 = vmatpush.msrb.mxu2 %v817_v50  ;;  %940 = vmatpush.msrb.mxu3 %v849_v51  ;;  %v748_v50 = vld [vmem:[#allocation2 + $0x38] sm:$0xff] }
  0xc6   : > { %1124 = vmatpush.msrb.mxu1 %v1075_v41  ;;  %v780_v51 = vld [vmem:[#allocation2 + $0x138] sm:$0xff]  ;;  %v4901_v41 = vld [vmem:[#allocation4 + $0x1c0] sm:$0xff] }
  0xc7   : > { %921 = vmatpush.msrb.mxu2 %v815_v52  ;;  %941 = vmatpush.msrb.mxu3 %v847_v53  ;;  %v746_v52 = vld [vmem:[#allocation2 + $0x28] sm:$0xff] }
  0xc8   : > { %1125 = vmatpush.msrb.mxu1 %v1073_v45  ;;  %v778_v53 = vld [vmem:[#allocation2 + $0x128] sm:$0xff] }
  0xc9   : > { %922 = vmatpush.msrb.mxu2 %v813_v54  ;;  %942 = vmatpush.msrb.mxu3 %v845_v55  ;;  %v744_v54 = vld [vmem:[#allocation2 + $0x18] sm:$0xff]  ;;  %v4912_v45 = vld [vmem:[#allocation4 + $0x3e8] sm:$0xff] }
  0xca   : > { %1126 = vmatpush.msrb.mxu1 %v1071_v49  ;;  %v776_v55 = vld [vmem:[#allocation2 + $0x118] sm:$0xff]  ;;  %v4922_v49 = vld [vmem:[#allocation4 + $0x3c8] sm:$0xff] }
  0xcb   : > { %923 = vmatpush.msrb.mxu2 %v811_v56  ;;  %943 = vmatpush.msrb.mxu3 %v843_v57  ;;  %v742_v56 = vld [vmem:[#allocation2 + $0x8] sm:$0xff] }
  0xcc   : > { %v774_v57 = vld [vmem:[#allocation2 + $0x108] sm:$0xff] }
  0xcd   : > { %924 = vmatpush.msrb.mxu2 %v809_v58  ;;  %944 = vmatpush.msrb.mxu3 %v841_v59  ;;  %v1062_v58 = vld [vmem:[#allocation2 + $0x4f8] sm:$0xff] }
  0xce   : > { %v1094_v59 = vld [vmem:[#allocation2 + $0x5f8] sm:$0xff] }
  0xcf   : > { %925 = vmatpush.msrb.mxu2 %v807_v60  ;;  %945 = vmatpush.msrb.mxu3 %v839_v61  ;;  %v1060_v60 = vld [vmem:[#allocation2 + $0x4e8] sm:$0xff] }
  0xd0   : > { %926 = vmatmul.f32.vlgmr.msrb.gmra.mxu2 %v4883_v27  ;;  %946 = vmatmul.f32.vlgmr.msrb.gmra.mxu3 %v4885_v28  ;;  %v792_v27 = vld [vmem:[#allocation2 + $0x198] sm:$0xff]  ;;  %v1049_v28 = vld [vmem:[#allocation2 + $0x490] sm:$0xff]  ;;  %v1092_v61 = vld [vmem:[#allocation2 + $0x5e8] sm:$0xff] }
  0xd1   : > { %990 = vmatpush.msra.mxu2 %v772_v62  ;;  %1010 = vmatpush.msra.mxu3 %v804_v63  ;;  %v1058_v62 = vld [vmem:[#allocation2 + $0x4d8] sm:$0xff] }
  0xd2   : > { %1101 = vmatpush.msrb.mxu0 %v1049_v28  ;;  %v1090_v63 = vld [vmem:[#allocation2 + $0x5d8] sm:$0xff]  ;;  %v1036_v28 = vld [vmem:[#allocation2 + $0x428] sm:$0xff] }
  0xd3   : > { %991 = vmatpush.msra.mxu2 %v770_v0  ;;  %1011 = vmatpush.msra.mxu3 %v802_v1  ;;  %v1056_v0 = vld [vmem:[#allocation2 + $0x4c8] sm:$0xff] }
  0xd4   : > { %1102 = vmatpush.msrb.mxu0 %v1047_v32  ;;  %v1088_v1 = vld [vmem:[#allocation2 + $0x5c8] sm:$0xff]  ;;  %v1034_v32 = vld [vmem:[#allocation2 + $0x418] sm:$0xff] }
  0xd5   : > { %992 = vmatpush.msra.mxu2 %v768_v5  ;;  %1012 = vmatpush.msra.mxu3 %v800_v6  ;;  %v1084_v5 = vld [vmem:[#allocation2 + $0x5a8] sm:$0xff]  ;;  %v1050_v6 = vld [vmem:[#allocation2 + $0x498] sm:$0xff] }
  0xd6   : > { %1103 = vmatpush.msrb.mxu0 %v1045_v36  ;;  %v1032_v36 = vld [vmem:[#allocation2 + $0x408] sm:$0xff] }
  0xd7   : > { %993 = vmatpush.msra.mxu2 %v766_v12  ;;  %1013 = vmatpush.msra.mxu3 %v798_v13  ;;  %v1046_v12 = vld [vmem:[#allocation2 + $0x478] sm:$0xff] }
  0xd8   : > { %1104 = vmatpush.msrb.mxu0 %v1043_v40  ;;  %v1078_v13 = vld [vmem:[#allocation2 + $0x578] sm:$0xff]  ;;  %v4899_v40 = vld [vmem:[#allocation4 + $0x1e0] sm:$0xff] }
  0xd9   : > { %994 = vmatpush.msra.mxu2 %v764_v16  ;;  %1014 = vmatpush.msra.mxu3 %v796_v17  ;;  %v1042_v16 = vld [vmem:[#allocation2 + $0x458] sm:$0xff] }
  0xda   : > { %1105 = vmatpush.msrb.mxu0 %v1041_v44  ;;  %v1074_v17 = vld [vmem:[#allocation2 + $0x558] sm:$0xff]  ;;  %v4908_v44 = vld [vmem:[#allocation4 + $0x1a0] sm:$0xff] }
  0xdb   : > { %995 = vmatpush.msra.mxu2 %v762_v22  ;;  %1015 = vmatpush.msra.mxu3 %v794_v23  ;;  %v1037_v22 = vld [vmem:[#allocation2 + $0x430] sm:$0xff] }
  0xdc   : > { %1106 = vmatpush.msrb.mxu0 %v1039_v48  ;;  %v1069_v23 = vld [vmem:[#allocation2 + $0x530] sm:$0xff]  ;;  %v4920_v48 = vld [vmem:[#allocation4 + $0x1c8] sm:$0xff] }
  0xdd   : > { %996 = vmatpush.msra.mxu2 %v760_v26  ;;  %1016 = vmatpush.msra.mxu3 %v792_v27  ;;  %v1035_v26 = vld [vmem:[#allocation2 + $0x420] sm:$0xff] }
  0xde   : > { %1107 = vmatpush.msrb.mxu0 %v1037_v22  ;;  %1127 = vmatpush.msrb.mxu1 %v1069_v23  ;;  %v1067_v27 = vld [vmem:[#allocation2 + $0x520] sm:$0xff]  ;;  %v5020_v22 = vld [vmem:[#allocation4 + $0xa8] sm:$0xff] }
  0xdf   : > { %997 = vmatpush.msra.mxu2 %v758_v30  ;;  %1017 = vmatpush.msra.mxu3 %v790_v31  ;;  %v1033_v30 = vld [vmem:[#allocation2 + $0x410] sm:$0xff]  ;;  %8565 = vst [vmem:[#allocation19_spill] sm:$0xff] %v5020_v22  ;;  %v5022_v23 = vld [vmem:[#allocation4 + $0x80] sm:$0xff] }
  0xe0   : > { %1108 = vmatpush.msrb.mxu0 %v1035_v26  ;;  %1128 = vmatpush.msrb.mxu1 %v1067_v27  ;;  %v1065_v31 = vld [vmem:[#allocation2 + $0x510] sm:$0xff]  ;;  %v5032_v26 = vld [vmem:[#allocation4 + $0x88] sm:$0xff]  ;;  %v5034_v27 = vld [vmem:[#allocation4 + $0x60] sm:$0xff] }
  0xe1   : > { %998 = vmatpush.msra.mxu2 %v756_v34  ;;  %1018 = vmatpush.msra.mxu3 %v788_v35  ;;  %v1031_v34 = vld [vmem:[#allocation2 + $0x400] sm:$0xff]  ;;  %8568 = vst [vmem:[#allocation22_spill] sm:$0xff] %v5032_v26 }
  0xe2   : > { %1109 = vmatpush.msrb.mxu0 %v1033_v30  ;;  %1129 = vmatpush.msrb.mxu1 %v1065_v31  ;;  %v1063_v35 = vld [vmem:[#allocation2 + $0x500] sm:$0xff]  ;;  %v5044_v30 = vld [vmem:[#allocation4 + $0x68] sm:$0xff] }
  0xe3   : > { %999 = vmatpush.msra.mxu2 %v754_v38  ;;  %1019 = vmatpush.msra.mxu3 %v786_v39  ;;  %8571 = vst [vmem:[#allocation25_spill] sm:$0xff] %v5044_v30  ;;  %v5046_v31 = vld [vmem:[#allocation4 + $0x40] sm:$0xff] }
  0xe4   : > { %1110 = vmatpush.msrb.mxu0 %v1031_v34  ;;  %1130 = vmatpush.msrb.mxu1 %v1063_v35  ;;  %8572 = vst [vmem:[#allocation26_spill] sm:$0xff] %v5046_v31  ;;  %v5056_v34 = vld [vmem:[#allocation4 + $0x48] sm:$0xff]  ;;  %v5058_v35 = vld [vmem:[#allocation4 + $0x20] sm:$0xff] }
  0xe5   : > { %1000 = vmatpush.msra.mxu2 %v752_v42  ;;  %1020 = vmatpush.msra.mxu3 %v784_v43  ;;  %v4904_v42 = vld [vmem:[#allocation4 + $0x3e0] sm:$0xff]  ;;  %v4906_v43 = vld [vmem:[#allocation4 + $0x1e8] sm:$0xff]  ;;  %8575 = vst [vmem:[#allocation29_spill] sm:$0xff] %v5056_v34 }
  0xe6   : > { %1323 = vmatpush.msra.mxu0 %v4899_v40  ;;  %1343 = vmatpush.msra.mxu1 %v4904_v42  ;;  %8576 = vst [vmem:[#allocation30_spill] sm:$0xff] %v5058_v35 }
  0xe7   : > { %1001 = vmatpush.msra.mxu2 %v750_v46  ;;  %1021 = vmatpush.msra.mxu3 %v782_v47  ;;  %v4914_v46 = vld [vmem:[#allocation4 + $0x3c0] sm:$0xff] }
  0xe8   : > { %1324 = vmatpush.msra.mxu0 %v4901_v41  ;;  %v4917_v47 = vld [vmem:[#allocation4 + $0x180] sm:$0xff]  ;;  %1344 = vmatpush.msra.mxu1 %v4914_v46 }
  0xe9   : > { %1002 = vmatpush.msra.mxu2 %v748_v50  ;;  %1022 = vmatpush.msra.mxu3 %v780_v51  ;;  %v4926_v50 = vld [vmem:[#allocation4 + $0x3a0] sm:$0xff]  ;;  %v4928_v51 = vld [vmem:[#allocation4 + $0x1a8] sm:$0xff] }
  0xea   : > { %1325 = vmatpush.msra.mxu0 %v4908_v44  ;;  %1345 = vmatpush.msra.mxu1 %v4926_v50 }
  0xeb   : > { %1003 = vmatpush.msra.mxu2 %v746_v52  ;;  %1023 = vmatpush.msra.mxu3 %v778_v53  ;;  %v4930_v52 = vld [vmem:[#allocation4 + $0x3a8] sm:$0xff]  ;;  %v4934_v53 = vld [vmem:[#allocation4 + $0x380] sm:$0xff] }
  0xec   : > { %1326 = vmatpush.msra.mxu0 %v4917_v47  ;;  %1346 = vmatpush.msra.mxu1 %v4934_v53 }
  0xed   : > { %1004 = vmatpush.msra.mxu2 %v744_v54  ;;  %1024 = vmatpush.msra.mxu3 %v776_v55  ;;  %v4936_v54 = vld [vmem:[#allocation4 + $0x188] sm:$0xff]  ;;  %v4938_v55 = vld [vmem:[#allocation4 + $0x160] sm:$0xff] }
  0xee   : > { %1327 = vmatpush.msra.mxu0 %v4938_v55 }
  0xef   : > { %1005 = vmatpush.msra.mxu2 %v742_v56  ;;  %1025 = vmatpush.msra.mxu3 %v774_v57  ;;  %v4942_v56 = vld [vmem:[#allocation4 + $0x388] sm:$0xff]  ;;  %v4946_v57 = vld [vmem:[#allocation4 + $0x360] sm:$0xff] }
  0xf0   : > { %1006 = vmatmul.f32.vlgmr.msra.gmra.mxu2 %v4856_v8  ;;  %1026 = vmatmul.f32.vlgmr.msra.gmra.mxu3 %v4858_v9  ;;  %v5074_v9 = vld [vmem:[#allocation4 + $0x228] sm:$0xff]  ;;  %v5077_v8 = vld [vmem:[#allocation4 + $0x1f0] sm:$0xff] }
  0xf1   : > { %1135 = vmatpush.msrb.mxu2 %v1062_v58  ;;  %1155 = vmatpush.msrb.mxu3 %v1094_v59  ;;  %v4948_v58 = vld [vmem:[#allocation4 + $0x168] sm:$0xff]  ;;  %v4950_v59 = vld [vmem:[#allocation4 + $0x140] sm:$0xff]  ;;  %8581 = vst [vmem:[#allocation35_spill] sm:$0xff] %v5074_v9 }
  0xf2   : > { %1347 = vmatpush.msra.mxu1 %v4946_v57  ;;  %1328 = vmatpush.msra.mxu0 %v4950_v59  ;;  %8582 = vst [vmem:[#allocation36_spill] sm:$0xff] %v5077_v8 }
  0xf3   : > { %1136 = vmatpush.msrb.mxu2 %v1060_v60  ;;  %1156 = vmatpush.msrb.mxu3 %v1092_v61  ;;  %v4954_v60 = vld [vmem:[#allocation4 + $0x368] sm:$0xff]  ;;  %v4958_v61 = vld [vmem:[#allocation4 + $0x340] sm:$0xff] }
  0xf4   : > { %1348 = vmatpush.msra.mxu1 %v4958_v61 }
  0xf5   : > { %1137 = vmatpush.msrb.mxu2 %v1058_v62  ;;  %1157 = vmatpush.msrb.mxu3 %v1090_v63  ;;  %v4960_v62 = vld [vmem:[#allocation4 + $0x148] sm:$0xff]  ;;  %v4962_v63 = vld [vmem:[#allocation4 + $0x120] sm:$0xff] }
  0xf6   : > { %1329 = vmatpush.msra.mxu0 %v4962_v63 }
  0xf7   : > { %1138 = vmatpush.msrb.mxu2 %v1056_v0  ;;  %1158 = vmatpush.msrb.mxu3 %v1088_v1  ;;  %v4966_v0 = vld [vmem:[#allocation4 + $0x348] sm:$0xff]  ;;  %v4970_v1 = vld [vmem:[#allocation4 + $0x320] sm:$0xff] }
  0xf8   : > { %1349 = vmatpush.msra.mxu1 %v4970_v1 }
  0xf9   : > { %1139 = vmatpush.msrb.mxu2 %v1054_v2  ;;  %1159 = vmatpush.msrb.mxu3 %v1086_v3  ;;  %v4972_v2 = vld [vmem:[#allocation4 + $0x128] sm:$0xff]  ;;  %v4974_v3 = vld [vmem:[#allocation4 + $0x100] sm:$0xff] }
  0xfa   : > { %1330 = vmatpush.msra.mxu0 %v4974_v3 }
  0xfb   : > { %1140 = vmatpush.msrb.mxu2 %v1052_v4  ;;  %1160 = vmatpush.msrb.mxu3 %v1084_v5  ;;  %v4978_v4 = vld [vmem:[#allocation4 + $0x328] sm:$0xff]  ;;  %v4982_v5 = vld [vmem:[#allocation4 + $0x300] sm:$0xff] }
  0xfc   : > { %1350 = vmatpush.msra.mxu1 %v4982_v5 }
  0xfd   : > { %1141 = vmatpush.msrb.mxu2 %v1050_v6  ;;  %1161 = vmatpush.msrb.mxu3 %v1082_v7  ;;  %v4984_v6 = vld [vmem:[#allocation4 + $0x108] sm:$0xff]  ;;  %v4986_v7 = vld [vmem:[#allocation4 + $0xe0] sm:$0xff] }
  0xfe   : > { %1331 = vmatpush.msra.mxu0 %v4986_v7 }
  0xff   : > { %1142 = vmatpush.msrb.mxu2 %v1048_v10  ;;  %1162 = vmatpush.msrb.mxu3 %v1080_v11  ;;  %v4990_v10 = vld [vmem:[#allocation4 + $0x308] sm:$0xff]  ;;  %v4994_v11 = vld [vmem:[#allocation4 + $0x2e0] sm:$0xff] }
 0x100   : > { %1351 = vmatpush.msra.mxu1 %v4994_v11 }
 0x101   : > { %1143 = vmatpush.msrb.mxu2 %v1046_v12  ;;  %1163 = vmatpush.msrb.mxu3 %v1078_v13  ;;  %v4996_v12 = vld [vmem:[#allocation4 + $0xe8] sm:$0xff]  ;;  %v4998_v13 = vld [vmem:[#allocation4 + $0xc0] sm:$0xff] }
 0x102   : > { %1332 = vmatpush.msra.mxu0 %v4998_v13 }
 0x103   : > { %1144 = vmatpush.msrb.mxu2 %v1044_v14  ;;  %1164 = vmatpush.msrb.mxu3 %v1076_v15  ;;  %v5002_v14 = vld [vmem:[#allocation4 + $0x2e8] sm:$0xff]  ;;  %v5006_v15 = vld [vmem:[#allocation4 + $0x2c0] sm:$0xff] }
 0x104   : > { %1352 = vmatpush.msra.mxu1 %v5006_v15 }
 0x105   : > { %1145 = vmatpush.msrb.mxu2 %v1042_v16  ;;  %1165 = vmatpush.msrb.mxu3 %v1074_v17  ;;  %v5008_v16 = vld [vmem:[#allocation4 + $0xc8] sm:$0xff]  ;;  %v5010_v17 = vld [vmem:[#allocation4 + $0xa0] sm:$0xff] }
 0x106   : > { %1333 = vmatpush.msra.mxu0 %v5010_v17 }
 0x107   : > { %1146 = vmatpush.msrb.mxu2 %v1040_v20  ;;  %1166 = vmatpush.msrb.mxu3 %v1072_v21  ;;  %v5014_v20 = vld [vmem:[#allocation4 + $0x2c8] sm:$0xff]  ;;  %v5018_v21 = vld [vmem:[#allocation4 + $0x2a0] sm:$0xff] }
 0x108   : > { %8563 = vst [vmem:[#allocation17_spill] sm:$0xff] %v5014_v20  ;;  %1353 = vmatpush.msra.mxu1 %v5018_v21  ;;  %1334 = vmatpush.msra.mxu0 %v5022_v23 }
 0x109   : > { %1147 = vmatpush.msrb.mxu2 %v1038_v24  ;;  %1167 = vmatpush.msrb.mxu3 %v1070_v25  ;;  %8564 = vst [vmem:[#allocation18_spill] sm:$0xff] %v5018_v21  ;;  %v5026_v24 = vld [vmem:[#allocation4 + $0x2a8] sm:$0xff]  ;;  %v5030_v25 = vld [vmem:[#allocation4 + $0x280] sm:$0xff] }
 0x10a   : > { %8566 = vst [vmem:[#allocation20_spill] sm:$0xff] %v5026_v24  ;;  %1354 = vmatpush.msra.mxu1 %v5030_v25  ;;  %1335 = vmatpush.msra.mxu0 %v5034_v27 }
 0x10b   : > { %1148 = vmatpush.msrb.mxu2 %v1036_v28  ;;  %1168 = vmatpush.msrb.mxu3 %v1068_v29  ;;  %8567 = vst [vmem:[#allocation21_spill] sm:$0xff] %v5030_v25  ;;  %v5038_v28 = vld [vmem:[#allocation4 + $0x288] sm:$0xff]  ;;  %v5042_v29 = vld [vmem:[#allocation4 + $0x260] sm:$0xff] }
 0x10c   : > { %8569 = vst [vmem:[#allocation23_spill] sm:$0xff] %v5038_v28  ;;  %1355 = vmatpush.msra.mxu1 %v5042_v29  ;;  %1336 = vmatpush.msra.mxu0 %v5046_v31 }
 0x10d   : > { %1149 = vmatpush.msrb.mxu2 %v1034_v32  ;;  %1169 = vmatpush.msrb.mxu3 %v1066_v33  ;;  %8570 = vst [vmem:[#allocation24_spill] sm:$0xff] %v5042_v29  ;;  %v5050_v32 = vld [vmem:[#allocation4 + $0x268] sm:$0xff]  ;;  %v5054_v33 = vld [vmem:[#allocation4 + $0x240] sm:$0xff]  ;;  %v5104_v29 = vld [vmem:[#allocation4 + $0x3d0] sm:$0xff] }
 0x10e   : > { %8573 = vst [vmem:[#allocation27_spill] sm:$0xff] %v5050_v32  ;;  %1356 = vmatpush.msra.mxu1 %v5054_v33  ;;  %1337 = vmatpush.msra.mxu0 %v5058_v35 }
 0x10f   : > { %1150 = vmatpush.msrb.mxu2 %v1032_v36  ;;  %1170 = vmatpush.msrb.mxu3 %v1064_v37  ;;  %8574 = vst [vmem:[#allocation28_spill] sm:$0xff] %v5054_v33  ;;  %v5062_v36 = vld [vmem:[#allocation4 + $0x248] sm:$0xff]  ;;  %v5066_v37 = vld [vmem:[#allocation4 + $0x220] sm:$0xff]  ;;  %v5092_v33 = vld [vmem:[#allocation4 + $0x3f0] sm:$0xff] }
 0x110   : > { %8577 = vst [vmem:[#allocation31_spill] sm:$0xff] %v5062_v36  ;;  %1357 = vmatpush.msra.mxu1 %v5066_v37 }
 0x111   : > { %1363 = vmatpush.msra.mxu2 %v4906_v43  ;;  %1383 = vmatpush.msra.mxu3 %v4912_v45  ;;  %8578 = vst [vmem:[#allocation32_spill] sm:$0xff] %v5066_v37  ;;  %v5098_v37 = vld [vmem:[#allocation4 + $0x3f8] sm:$0xff] }
 0x112   : > { %8587 = vst [vmem:[#allocation41_spill] sm:$0xff] %v5092_v33  ;;  %1358 = vmatpush.msra.mxu1 %v5080_v19  ;;  %v5112_v19 = vld [vmem:[#allocation4 + $0x190] sm:$0xff] }
 0x113   : > { %1364 = vmatpush.msra.mxu2 %v4920_v48  ;;  %1384 = vmatpush.msra.mxu3 %v4922_v49  ;;  %8589 = vst [vmem:[#allocation43_spill] sm:$0xff] %v5098_v37 }
 0x114   : > { %8591 = vst [vmem:[#allocation45_spill] sm:$0xff] %v5104_v29 }
 0x115   : > { %1365 = vmatpush.msra.mxu2 %v4928_v51  ;;  %1385 = vmatpush.msra.mxu3 %v4930_v52  ;;  %8594 = vst [vmem:[#allocation48_spill] sm:$0xff] %v5112_v19 }
 0x117   : > { %1366 = vmatpush.msra.mxu2 %v4936_v54  ;;  %1386 = vmatpush.msra.mxu3 %v4942_v56 }
 0x119   : > { %1367 = vmatpush.msra.mxu2 %v4948_v58  ;;  %1387 = vmatpush.msra.mxu3 %v4954_v60 }
 0x11b   : > { %1368 = vmatpush.msra.mxu2 %v4960_v62  ;;  %1388 = vmatpush.msra.mxu3 %v4966_v0 }
 0x11d   : > { %1369 = vmatpush.msra.mxu2 %v4972_v2  ;;  %1389 = vmatpush.msra.mxu3 %v4978_v4 }
 0x11f   : > { %1370 = vmatpush.msra.mxu2 %v4984_v6  ;;  %1390 = vmatpush.msra.mxu3 %v4990_v10 }
 0x121   : > { %1371 = vmatpush.msra.mxu2 %v4996_v12  ;;  %1391 = vmatpush.msra.mxu3 %v5002_v14 }
 0x123   : > { %1372 = vmatpush.msra.mxu2 %v5008_v16  ;;  %1392 = vmatpush.msra.mxu3 %v5014_v20 }
 0x125   : > { %1373 = vmatpush.msra.mxu2 %v5020_v22  ;;  %1393 = vmatpush.msra.mxu3 %v5026_v24 }
 0x127   : > { %1374 = vmatpush.msra.mxu2 %v5032_v26  ;;  %1394 = vmatpush.msra.mxu3 %v5038_v28 }
 0x129   : > { %1375 = vmatpush.msra.mxu2 %v5044_v30  ;;  %1395 = vmatpush.msra.mxu3 %v5050_v32  ;;  %v5086_v32 = vld [vmem:[#allocation4 + $0x208] sm:$0xff] }
 0x12a   : > { %8585 = vst [vmem:[#allocation39_spill] sm:$0xff] %v5086_v32 }
 0x12b   : > { %1376 = vmatpush.msra.mxu2 %v5056_v34  ;;  %1396 = vmatpush.msra.mxu3 %v5062_v36  ;;  %v5089_v34 = vld [vmem:[#allocation4 + $0x1d0] sm:$0xff]  ;;  %v5096_v36 = vld [vmem:[#allocation4 + $0x1f8] sm:$0xff] }
 0x12c   : > { %8586 = vst [vmem:[#allocation40_spill] sm:$0xff] %v5089_v34 }
 0x12d   : > { %1397 = vmatpush.msra.mxu3 %v5074_v9  ;;  %8588 = vst [vmem:[#allocation42_spill] sm:$0xff] %v5096_v36  ;;  %v5108_v9 = vld [vmem:[#allocation4 + $0x1d8] sm:$0xff] }
 0x12e   : > { %8592 = vst [vmem:[#allocation46_spill] sm:$0xff] %v5108_v9 }
 0x12f   : > { %1398 = vmatpush.msra.mxu3 %v5086_v32  ;;  %v5120_v32 = vld [vmem:[#allocation4 + $0x1b8] sm:$0xff] }
 0x130   : > { %8596 = vst [vmem:[#allocation50_spill] sm:$0xff] %v5120_v32 }
 0x133   : > { %v718_v38 = vpop.f32.mrf.mxu2  ;;  %v738_v39 = vpop.f32.mrf.mxu3 }
 0x134   : > { %1111 = vmatmul.f32.vlgmr.msrb.gmra.mxu0 %v718_v38  ;;  %1131 = vmatmul.f32.vlgmr.msrb.gmra.mxu1 %v738_v39 }
 0x135   : > { %1151 = vmatmul.f32.vlgmr.msrb.gmra.mxu2 %v718_v38  ;;  %1171 = vmatmul.f32.vlgmr.msrb.gmra.mxu3 %v738_v39  ;;  %v5068_v38 = vld [vmem:[#allocation4 + $0x28] sm:$0xff]  ;;  %v5070_v39 = vld [vmem:[#allocation4] sm:$0xff] }
 0x136   : > { %8579 = vst [vmem:[#allocation33_spill] sm:$0xff] %v5068_v38  ;;  %1377 = vmatpush.msra.mxu2 %v5068_v38  ;;  %1338 = vmatpush.msra.mxu0 %v5070_v39  ;;  %v5100_v38 = vld [vmem:[#allocation4 + $0x1b0] sm:$0xff] }
 0x137   : > { %8580 = vst [vmem:[#allocation34_spill] sm:$0xff] %v5070_v39  ;;  %1423 = vmatpush.msrb.mxu1 %v5092_v33  ;;  %1463 = vmatpush.msrb.mxu3 %v5098_v37  ;;  %v5116_v39 = vld [vmem:[#allocation4 + $0x3b0] sm:$0xff]  ;;  %v5132_v37 = vld [vmem:[#allocation4 + $0x198] sm:$0xff] }
 0x138   : > { %1403 = vmatpush.msrb.mxu0 %v5077_v8  ;;  %8590 = vst [vmem:[#allocation44_spill] sm:$0xff] %v5100_v38  ;;  %1378 = vmatpush.msra.mxu2 %v5084_v18  ;;  %v5110_v8 = vld [vmem:[#allocation4 + $0x3d8] sm:$0xff]  ;;  %v5124_v33 = vld [vmem:[#allocation4 + $0x170] sm:$0xff] }
 0x139   : > { %8593 = vst [vmem:[#allocation47_spill] sm:$0xff] %v5110_v8  ;;  %1424 = vmatpush.msrb.mxu1 %v5104_v29  ;;  %v5122_v18 = vld [vmem:[#allocation4 + $0x3b8] sm:$0xff]  ;;  %1464 = vmatpush.msrb.mxu3 %v5110_v8  ;;  %v5136_v29 = vld [vmem:[#allocation4 + $0x150] sm:$0xff] }
 0x13a   : > { %1404 = vmatpush.msrb.mxu0 %v5089_v34  ;;  %1443 = vmatpush.msrb.mxu2 %v5096_v36  ;;  %8595 = vst [vmem:[#allocation49_spill] sm:$0xff] %v5116_v39  ;;  %v5128_v34 = vld [vmem:[#allocation4 + $0x390] sm:$0xff]  ;;  %v5134_v36 = vld [vmem:[#allocation4 + $0x398] sm:$0xff] }
 0x13b   : > { %8597 = vst [vmem:[#allocation51_spill] sm:$0xff] %v5122_v18  ;;  %1425 = vmatpush.msrb.mxu1 %v5116_v39  ;;  %1465 = vmatpush.msrb.mxu3 %v5122_v18  ;;  %v5144_v8 = vld [vmem:[#allocation4 + $0x178] sm:$0xff]  ;;  %v5148_v39 = vld [vmem:[#allocation4 + $0x130] sm:$0xff] }
 0x13c   : > { %1405 = vmatpush.msrb.mxu0 %v5100_v38  ;;  %8598 = vst [vmem:[#allocation52_spill] sm:$0xff] %v5124_v33  ;;  %1444 = vmatpush.msrb.mxu2 %v5108_v9  ;;  %v5140_v38 = vld [vmem:[#allocation4 + $0x370] sm:$0xff]  ;;  %v5146_v9 = vld [vmem:[#allocation4 + $0x378] sm:$0xff] }
 0x13d   : > { %8599 = vst [vmem:[#allocation53_spill] sm:$0xff] %v5128_v34  ;;  %1426 = vmatpush.msrb.mxu1 %v5128_v34  ;;  %1466 = vmatpush.msrb.mxu3 %v5134_v36  ;;  %v5156_v18 = vld [vmem:[#allocation4 + $0x158] sm:$0xff]  ;;  %v5160_v34 = vld [vmem:[#allocation4 + $0x110] sm:$0xff] }
 0x13e   : > { %1406 = vmatpush.msrb.mxu0 %v5112_v19  ;;  %8600 = vst [vmem:[#allocation54_spill] sm:$0xff] %v5132_v37  ;;  %1445 = vmatpush.msrb.mxu2 %v5120_v32  ;;  %v5152_v19 = vld [vmem:[#allocation4 + $0x350] sm:$0xff]  ;;  %v5158_v32 = vld [vmem:[#allocation4 + $0x358] sm:$0xff] }
 0x13f   : > { %8601 = vst [vmem:[#allocation55_spill] sm:$0xff] %v5134_v36  ;;  %1427 = vmatpush.msrb.mxu1 %v5140_v38  ;;  %1467 = vmatpush.msrb.mxu3 %v5146_v9  ;;  %v5168_v36 = vld [vmem:[#allocation4 + $0x138] sm:$0xff] }
 0x140   : > { %8602 = vst [vmem:[#allocation56_spill] sm:$0xff] %v5136_v29  ;;  %1407 = vmatpush.msrb.mxu0 %v5124_v33  ;;  %1446 = vmatpush.msrb.mxu2 %v5132_v37  ;;  %v5164_v33 = vld [vmem:[#allocation4 + $0x330] sm:$0xff]  ;;  %v5170_v37 = vld [vmem:[#allocation4 + $0x338] sm:$0xff] }
 0x141   : > { %8603 = vst [vmem:[#allocation57_spill] sm:$0xff] %v5140_v38  ;;  %1428 = vmatpush.msrb.mxu1 %v5152_v19  ;;  %v5172_v38 = vld [vmem:[#allocation4 + $0xf0] sm:$0xff]  ;;  %1468 = vmatpush.msrb.mxu3 %v5158_v32 }
 0x142   : > { %8604 = vst [vmem:[#allocation58_spill] sm:$0xff] %v5144_v8  ;;  %1408 = vmatpush.msrb.mxu0 %v5136_v29  ;;  %1447 = vmatpush.msrb.mxu2 %v5144_v8  ;;  %v5176_v29 = vld [vmem:[#allocation4 + $0x310] sm:$0xff]  ;;  %v5182_v8 = vld [vmem:[#allocation4 + $0x318] sm:$0xff] }
 0x143   : > { %8605 = vst [vmem:[#allocation59_spill] sm:$0xff] %v5146_v9  ;;  %1429 = vmatpush.msrb.mxu1 %v5164_v33  ;;  %v5180_v9 = vld [vmem:[#allocation4 + $0x118] sm:$0xff]  ;;  %1469 = vmatpush.msrb.mxu3 %v5170_v37 }
 0x144   : > { %8606 = vst [vmem:[#allocation60_spill] sm:$0xff] %v5148_v39  ;;  %1409 = vmatpush.msrb.mxu0 %v5148_v39  ;;  %1448 = vmatpush.msrb.mxu2 %v5156_v18  ;;  %v5188_v39 = vld [vmem:[#allocation4 + $0x2f0] sm:$0xff] }
 0x145   : > { %8607 = vst [vmem:[#allocation61_spill] sm:$0xff] %v5152_v19  ;;  %v5184_v19 = vld [vmem:[#allocation4 + $0xd0] sm:$0xff]  ;;  %1430 = vmatpush.msrb.mxu1 %v5176_v29  ;;  %1470 = vmatpush.msrb.mxu3 %v5182_v8 }
 0x146   : > { %8608 = vst [vmem:[#allocation62_spill] sm:$0xff] %v5156_v18  ;;  %1410 = vmatpush.msrb.mxu0 %v5160_v34  ;;  %1449 = vmatpush.msrb.mxu2 %v5168_v36  ;;  %v5194_v18 = vld [vmem:[#allocation4 + $0x2f8] sm:$0xff] }
 0x147   : > { %8609 = vst [vmem:[#allocation63_spill] sm:$0xff] %v5158_v32  ;;  %v5192_v32 = vld [vmem:[#allocation4 + $0xf8] sm:$0xff]  ;;  %1431 = vmatpush.msrb.mxu1 %v5188_v39  ;;  %1471 = vmatpush.msrb.mxu3 %v5194_v18 }
 0x148   : > { %8610 = vst [vmem:[#allocation64_spill] sm:$0xff] %v5160_v34  ;;  %1411 = vmatpush.msrb.mxu0 %v5172_v38  ;;  %1450 = vmatpush.msrb.mxu2 %v5180_v9 }
 0x149   : > { %8611 = vst [vmem:[#allocation65_spill] sm:$0xff] %v5164_v33  ;;  %v5196_v33 = vld [vmem:[#allocation4 + $0xb0] sm:$0xff] }
 0x14a   : > { %8612 = vst [vmem:[#allocation66_spill] sm:$0xff] %v5168_v36  ;;  %1412 = vmatpush.msrb.mxu0 %v5184_v19  ;;  %1451 = vmatpush.msrb.mxu2 %v5192_v32  ;;  %v5210_v36 = vld [vmem:[#allocation4 + $0x2d0] sm:$0xff] }
 0x14b   : > { %8613 = vst [vmem:[#allocation67_spill] sm:$0xff] %v5170_v37  ;;  %v5202_v37 = vld [vmem:[#allocation4 + $0x90] sm:$0xff]  ;;  %1432 = vmatpush.msrb.mxu1 %v5210_v36 }
 0x14c   : > { %8614 = vst [vmem:[#allocation68_spill] sm:$0xff] %v5172_v38  ;;  %1413 = vmatpush.msrb.mxu0 %v5196_v33 }
 0x14d   : > { %8615 = vst [vmem:[#allocation69_spill] sm:$0xff] %v5176_v29  ;;  %v5208_v29 = vld [vmem:[#allocation4 + $0x70] sm:$0xff] }
 0x14e   : > { %8616 = vst [vmem:[#allocation70_spill] sm:$0xff] %v5180_v9  ;;  %1414 = vmatpush.msrb.mxu0 %v5202_v37  ;;  %v5212_v9 = vld [vmem:[#allocation4 + $0xd8] sm:$0xff] }
 0x14f   : > { %8617 = vst [vmem:[#allocation71_spill] sm:$0xff] %v5182_v8  ;;  %1452 = vmatpush.msrb.mxu2 %v5212_v9  ;;  %v5228_v8 = vld [vmem:[#allocation4 + $0x2b8] sm:$0xff] }
 0x150   : > { %8618 = vst [vmem:[#allocation72_spill] sm:$0xff] %v5184_v19  ;;  %1415 = vmatpush.msrb.mxu0 %v5208_v29 }
 0x151   : > { %8619 = vst [vmem:[#allocation73_spill] sm:$0xff] %v5188_v39  ;;  %v5216_v39 = vld [vmem:[#allocation4 + $0x2d8] sm:$0xff] }
 0x152   : > { %8620 = vst [vmem:[#allocation74_spill] sm:$0xff] %v5192_v32  ;;  %1472 = vmatpush.msrb.mxu3 %v5216_v39  ;;  %v5222_v32 = vld [vmem:[#allocation4 + $0x2b0] sm:$0xff] }
 0x153   : > { %8621 = vst [vmem:[#allocation75_spill] sm:$0xff] %v5194_v18  ;;  %v5220_v18 = vld [vmem:[#allocation4 + $0x50] sm:$0xff]  ;;  %1433 = vmatpush.msrb.mxu1 %v5222_v32 }
 0x154   : > { %8622 = vst [vmem:[#allocation76_spill] sm:$0xff] %v5196_v33  ;;  %1416 = vmatpush.msrb.mxu0 %v5220_v18  ;;  %1473 = vmatpush.msrb.mxu3 %v5228_v8  ;;  %v5276_v33 = vld [vmem:[#allocation4 + $0x218] sm:$0xff] }
 0x155   : > { %8623 = vst [vmem:[#allocation77_spill] sm:$0xff] %v5202_v37  ;;  %v5226_v37 = vld [vmem:[#allocation4 + $0xb8] sm:$0xff] }
 0x156   : > { %8624 = vst [vmem:[#allocation78_spill] sm:$0xff] %v5208_v29  ;;  %1453 = vmatpush.msrb.mxu2 %v5226_v37  ;;  %v5252_v29 = vld [vmem:[#allocation4 + $0x278] sm:$0xff] }
 0x157   : > { %8625 = vst [vmem:[#allocation79_spill] sm:$0xff] %v5210_v36  ;;  %v5232_v36 = vld [vmem:[#allocation4 + $0x30] sm:$0xff] }
 0x158   : > { %8626 = vst [vmem:[#allocation80_spill] sm:$0xff] %v5212_v9  ;;  %v5234_v9 = vld [vmem:[#allocation4 + $0x290] sm:$0xff]  ;;  %1417 = vmatpush.msrb.mxu0 %v5232_v36 }
 0x159   : > { %8627 = vst [vmem:[#allocation81_spill] sm:$0xff] %v5216_v39  ;;  %v5236_v39 = vld [vmem:[#allocation4 + $0x98] sm:$0xff]  ;;  %1434 = vmatpush.msrb.mxu1 %v5234_v9 }
 0x15a   : > { %8628 = vst [vmem:[#allocation82_spill] sm:$0xff] %v5220_v18  ;;  %v5240_v18 = vld [vmem:[#allocation4 + $0x298] sm:$0xff]  ;;  %1454 = vmatpush.msrb.mxu2 %v5236_v39 }
 0x15b   : > { %8629 = vst [vmem:[#allocation83_spill] sm:$0xff] %v5222_v32  ;;  %1474 = vmatpush.msrb.mxu3 %v5240_v18  ;;  %v5244_v32 = vld [vmem:[#allocation4 + $0x10] sm:$0xff] }
 0x15c   : > { %8630 = vst [vmem:[#allocation84_spill] sm:$0xff] %v5226_v37  ;;  %v5246_v37 = vld [vmem:[#allocation4 + $0x270] sm:$0xff]  ;;  %1418 = vmatpush.msrb.mxu0 %v5244_v32 }
 0x15d   : > { %8631 = vst [vmem:[#allocation85_spill] sm:$0xff] %v5228_v8  ;;  %v5248_v8 = vld [vmem:[#allocation4 + $0x78] sm:$0xff]  ;;  %1435 = vmatpush.msrb.mxu1 %v5246_v37  ;;  %1475 = vmatpush.msrb.mxu3 %v5252_v29 }
 0x15e   : > { %8632 = vst [vmem:[#allocation86_spill] sm:$0xff] %v5232_v36  ;;  %1455 = vmatpush.msrb.mxu2 %v5248_v8  ;;  %v5269_v36 = vld [vmem:[#allocation4 + $0x238] sm:$0xff] }
 0x15f   : > { %8633 = vst [vmem:[#allocation87_spill] sm:$0xff] %v5234_v9  ;;  %v5256_v9 = vld [vmem:[#allocation4 + $0x250] sm:$0xff] }
 0x160   : > { %8634 = vst [vmem:[#allocation88_spill] sm:$0xff] %v5236_v39  ;;  %v5258_v39 = vld [vmem:[#allocation4 + $0x58] sm:$0xff]  ;;  %1436 = vmatpush.msrb.mxu1 %v5256_v9 }
 0x161   : > { %8635 = vst [vmem:[#allocation89_spill] sm:$0xff] %v5240_v18  ;;  %v5260_v18 = vld [vmem:[#allocation4 + $0x258] sm:$0xff]  ;;  %1456 = vmatpush.msrb.mxu2 %v5258_v39 }
 0x162   : > { %8636 = vst [vmem:[#allocation90_spill] sm:$0xff] %v5244_v32  ;;  %1476 = vmatpush.msrb.mxu3 %v5260_v18  ;;  %v5265_v32 = vld [vmem:[#allocation4 + $0x230] sm:$0xff] }
 0x163   : > { %8637 = vst [vmem:[#allocation91_spill] sm:$0xff] %v5246_v37  ;;  %v5267_v37 = vld [vmem:[#allocation4 + $0x38] sm:$0xff]  ;;  %1437 = vmatpush.msrb.mxu1 %v5265_v32 }
 0x164   : > { %8638 = vst [vmem:[#allocation92_spill] sm:$0xff] %v5248_v8  ;;  %v5274_v8 = vld [vmem:[#allocation4 + $0x18] sm:$0xff]  ;;  %1457 = vmatpush.msrb.mxu2 %v5267_v37  ;;  %1477 = vmatpush.msrb.mxu3 %v5269_v36 }
 0x165   : > { %8639 = vst [vmem:[#allocation93_spill] sm:$0xff] %v5252_v29  ;;  %v5272_v29 = vld [vmem:[#allocation4 + $0x210] sm:$0xff] }
 0x166   : > { %8640 = vst [vmem:[#allocation94_spill] sm:$0xff] %v5256_v9  ;;  %1438 = vmatpush.msrb.mxu1 %v5272_v29  ;;  %1458 = vmatpush.msrb.mxu2 %v5274_v8  ;;  %v927_v9 = vpop.f32.mrf.mxu2 }
 0x167   : > { %8641 = vst [vmem:[#allocation95_spill] sm:$0xff] %v5258_v39  ;;  %v887_v39 = vpop.f32.mrf.mxu0  ;;  %1478 = vmatpush.msrb.mxu3 %v5276_v33 }
 0x168   : > { %8642 = vst [vmem:[#allocation96_spill] sm:$0xff] %v5260_v18  ;;  %v907_v18 = vpop.f32.mrf.mxu1 }
 0x169   : > { %8643 = vst [vmem:[#allocation97_spill] sm:$0xff] %v5265_v32  ;;  %v947_v32 = vpop.f32.mrf.mxu3  ;;  %v908_v34 = vadd.f32 %v907_v18, %v887_v39 }
 0x16a   : > { %8644 = vst [vmem:[#allocation98_spill] sm:$0xff] %v5267_v37  ;;  %v1177_v37 = vld [vmem:[%s8075_s6] sm:$0x3]  ;;  %v948_v24 = vadd.f32 %v947_v32, %v927_v9  ;;  %v8702_v32 = vld [vmem:[#allocation76_spill] sm:$0xff] }
 0x16b   : > { %8645 = vst [vmem:[#allocation99_spill] sm:$0xff] %v5269_v36 }
 0x16c   : > { %8646 = vst [vmem:[#allocation100_spill] sm:$0xff] %v5272_v29 }
 0x16d   : > { %8647 = vst [vmem:[#allocation101_spill] sm:$0xff] %v5274_v8  ;;  %v1179_v8 = vperm.slane %v1177_v37, 0 }
 0x16e   : > { %8648 = vst [vmem:[#allocation102_spill] sm:$0xff] %v5276_v33 }
 0x16f   : > { %v967_v19 = vpop.f32.mrf.mxu0 }
 0x170   : > { %v987_v38 = vpop.f32.mrf.mxu1  ;;  %v968_v30 = vadd.f32 %v967_v19, %v908_v34  ;;  %v1180_v34 = vperm.slane %v1177_v37, 1  ;;  %v8706_v37 = vld [vmem:[#allocation77_spill] sm:$0xff] }
 0x172   : > { %v988_v29 = vadd.f32 %v987_v38, %v968_v30  ;;  %v8700_v30 = vld [vmem:[#allocation66_spill] sm:$0xff]  ;;  %v8707_v38 = vld [vmem:[#allocation73_spill] sm:$0xff] }
 0x173   : > { %v1007_v28 = vpop.f32.mrf.mxu2  ;;  %v1027_v36 = vpop.f32.mrf.mxu3 }
 0x174   : > { %v1008_v21 = vadd.f32 %v1007_v28, %v948_v24  ;;  %v8694_v24 = vld [vmem:[#allocation68_spill] sm:$0xff] }
 0x175   : > { %v8698_v28 = vld [vmem:[#allocation72_spill] sm:$0xff] }
 0x176   : > { %v1028_v18 = vadd.f32 %v1027_v36, %v1008_v21  ;;  %v8691_v21 = vld [vmem:[#allocation57_spill] sm:$0xff]  ;;  %v8705_v36 = vld [vmem:[#allocation71_spill] sm:$0xff] }
 0x1b1   : > { %v1112_v25 = vpop.f32.mrf.mxu0  ;;  %v1132_v35 = vpop.f32.mrf.mxu1 }
 0x1b2   : > { %v1133_v26 = vadd.f32 %v1132_v35, %v1112_v25  ;;  %v8695_v25 = vld [vmem:[#allocation61_spill] sm:$0xff]  ;;  %v8704_v35 = vld [vmem:[#allocation70_spill] sm:$0xff] }
 0x1b4   : > { %v1175_v33 = vadd.f32 %v1133_v26, %v988_v29  ;;  %v8696_v26 = vld [vmem:[#allocation62_spill] sm:$0xff]  ;;  %v8699_v29 = vld [vmem:[#allocation65_spill] sm:$0xff] }
 0x1b6   : > { %v1183_v31 = vadd.f32 %v1179_v8, %v1175_v33  ;;  %v8649_v8 = vld [vmem:[#allocation17_spill] sm:$0xff] }
 0x1b7   : > { %v8703_v33 = vld [vmem:[#allocation69_spill] sm:$0xff] }
 0x1b8   : > { %v1152_v22 = vpop.f32.mrf.mxu2  ;;  %v1172_v20 = vpop.f32.mrf.mxu3  ;;  %1339 = vmatmul.f32.vlgmr.msra.gmra.mxu0 %v1183_v31  ;;  %1379 = vmatmul.f32.vlgmr.msra.gmra.mxu2 %v1183_v31 }
 0x1b9   : > { %v1173_v19 = vadd.f32 %v1172_v20, %v1152_v22  ;;  %1487 = vmatpush.msra.mxu0 %v4899_v40  ;;  %1527 = vmatpush.msra.mxu2 %v4906_v43  ;;  %v8650_v40 = vld [vmem:[#allocation19_spill] sm:$0xff]  ;;  %v8653_v43 = vld [vmem:[#allocation20_spill] sm:$0xff]  ;;  %v8692_v22 = vld [vmem:[#allocation58_spill] sm:$0xff] }
 0x1ba   : > { %v8690_v20 = vld [vmem:[#allocation64_spill] sm:$0xff] }
 0x1bb   : > { %v1176_v39 = vadd.f32 %v1173_v19, %v1028_v18  ;;  %1488 = vmatpush.msra.mxu0 %v4901_v41  ;;  %1528 = vmatpush.msra.mxu2 %v4920_v48  ;;  %v8651_v41 = vld [vmem:[#allocation26_spill] sm:$0xff]  ;;  %v8658_v48 = vld [vmem:[#allocation25_spill] sm:$0xff]  ;;  %v8709_v19 = vld [vmem:[#allocation75_spill] sm:$0xff] }
 0x1bc   : > { %v8708_v18 = vld [vmem:[#allocation74_spill] sm:$0xff] }
 0x1bd   : > { %v1184_v9 = vadd.f32 %v1180_v34, %v1176_v39  ;;  %1489 = vmatpush.msra.mxu0 %v4908_v44  ;;  %1529 = vmatpush.msra.mxu2 %v4928_v51  ;;  %v8654_v44 = vld [vmem:[#allocation22_spill] sm:$0xff]  ;;  %v8661_v51 = vld [vmem:[#allocation27_spill] sm:$0xff] }
 0x1be   : > { %v8710_v34 = vld [vmem:[#allocation78_spill] sm:$0xff]  ;;  %v8711_v39 = vld [vmem:[#allocation79_spill] sm:$0xff] }
 0x1bf   : > { %1359 = vmatmul.f32.vlgmr.msra.gmra.mxu1 %v1184_v9  ;;  %1399 = vmatmul.f32.vlgmr.msra.gmra.mxu3 %v1184_v9 }
 0x1c0   : > { %1490 = vmatpush.msra.mxu0 %v4917_v47  ;;  %1507 = vmatpush.msra.mxu1 %v4904_v42  ;;  %v8652_v42 = vld [vmem:[#allocation18_spill] sm:$0xff]  ;;  %v8657_v47 = vld [vmem:[#allocation23_spill] sm:$0xff] }
 0x1c1   : > { %1547 = vmatpush.msra.mxu3 %v4912_v45  ;;  %1419 = vmatmul.f32.vlgmr.msrb.gmra.mxu0 %v1183_v31  ;;  %v8655_v45 = vld [vmem:[#allocation30_spill] sm:$0xff] }
 0x1c2   : > { %1459 = vmatmul.f32.vlgmr.msrb.gmra.mxu2 %v1183_v31  ;;  %1491 = vmatpush.msra.mxu0 %v4938_v55  ;;  %v8665_v55 = vld [vmem:[#allocation31_spill] sm:$0xff] }
 0x1c3   : > { %1508 = vmatpush.msra.mxu1 %v4914_v46  ;;  %1548 = vmatpush.msra.mxu3 %v4922_v49  ;;  %v8656_v46 = vld [vmem:[#allocation21_spill] sm:$0xff]  ;;  %v8659_v49 = vld [vmem:[#allocation34_spill] sm:$0xff]  ;;  %v8701_v31 = vld [vmem:[#allocation67_spill] sm:$0xff] }
 0x1c4   : > { %1492 = vmatpush.msra.mxu0 %v4950_v59  ;;  %1530 = vmatpush.msra.mxu2 %v4936_v54  ;;  %v8664_v54 = vld [vmem:[#allocation29_spill] sm:$0xff]  ;;  %v8669_v59 = vld [vmem:[#allocation35_spill] sm:$0xff] }
 0x1c5   : > { %1509 = vmatpush.msra.mxu1 %v4926_v50  ;;  %1549 = vmatpush.msra.mxu3 %v4930_v52  ;;  %v8660_v50 = vld [vmem:[#allocation24_spill] sm:$0xff] }
 0x1c6   : > { %1493 = vmatpush.msra.mxu0 %v4962_v63  ;;  %1531 = vmatpush.msra.mxu2 %v4948_v58  ;;  %v8662_v52 = vld [vmem:[#allocation36_spill] sm:$0xff]  ;;  %v8668_v58 = vld [vmem:[#allocation33_spill] sm:$0xff]  ;;  %v8673_v63 = vld [vmem:[#allocation39_spill] sm:$0xff] }
 0x1c7   : > { %1510 = vmatpush.msra.mxu1 %v4934_v53  ;;  %1550 = vmatpush.msra.mxu3 %v4942_v56  ;;  %v8663_v53 = vld [vmem:[#allocation28_spill] sm:$0xff] }
 0x1c8   : > { %1439 = vmatmul.f32.vlgmr.msrb.gmra.mxu1 %v1184_v9  ;;  %1479 = vmatmul.f32.vlgmr.msrb.gmra.mxu3 %v1184_v9  ;;  %v8666_v56 = vld [vmem:[#allocation40_spill] sm:$0xff] }
 0x1c9   : > { %1494 = vmatpush.msra.mxu0 %v4974_v3  ;;  %1511 = vmatpush.msra.mxu1 %v4946_v57  ;;  %v8667_v57 = vld [vmem:[#allocation32_spill] sm:$0xff]  ;;  %v8677_v3 = vld [vmem:[#allocation43_spill] sm:$0xff] }
 0x1ca   : > { %1551 = vmatpush.msra.mxu3 %v4954_v60  ;;  %1532 = vmatpush.msra.mxu2 %v4960_v62  ;;  %v8670_v60 = vld [vmem:[#allocation44_spill] sm:$0xff]  ;;  %v8672_v62 = vld [vmem:[#allocation38_spill] sm:$0xff] }
 0x1cb   : > { %1495 = vmatpush.msra.mxu0 %v4986_v7  ;;  %1512 = vmatpush.msra.mxu1 %v4958_v61  ;;  %v8671_v61 = vld [vmem:[#allocation37_spill] sm:$0xff]  ;;  %v8681_v7 = vld [vmem:[#allocation47_spill] sm:$0xff]  ;;  %v8712_v9 = vld [vmem:[#allocation80_spill] sm:$0xff] }
 0x1cc   : > { %1552 = vmatpush.msra.mxu3 %v4966_v0  ;;  %1533 = vmatpush.msra.mxu2 %v4972_v2  ;;  %v8674_v0 = vld [vmem:[#allocation48_spill] sm:$0xff]  ;;  %v8676_v2 = vld [vmem:[#allocation42_spill] sm:$0xff] }
 0x1cd   : > { %1496 = vmatpush.msra.mxu0 %v4998_v13  ;;  %1513 = vmatpush.msra.mxu1 %v4970_v1  ;;  %v8675_v1 = vld [vmem:[#allocation41_spill] sm:$0xff]  ;;  %v8685_v13 = vld [vmem:[#allocation51_spill] sm:$0xff] }
 0x1ce   : > { %1553 = vmatpush.msra.mxu3 %v4978_v4  ;;  %1534 = vmatpush.msra.mxu2 %v4984_v6  ;;  %v8678_v4 = vld [vmem:[#allocation52_spill] sm:$0xff]  ;;  %v8680_v6 = vld [vmem:[#allocation46_spill] sm:$0xff] }
 0x1cf   : > { %1497 = vmatpush.msra.mxu0 %v5010_v17  ;;  %1514 = vmatpush.msra.mxu1 %v4982_v5  ;;  %v8679_v5 = vld [vmem:[#allocation45_spill] sm:$0xff]  ;;  %v8689_v17 = vld [vmem:[#allocation55_spill] sm:$0xff] }
 0x1d0   : > { %1554 = vmatpush.msra.mxu3 %v4990_v10  ;;  %1535 = vmatpush.msra.mxu2 %v4996_v12  ;;  %v8682_v10 = vld [vmem:[#allocation56_spill] sm:$0xff]  ;;  %v8684_v12 = vld [vmem:[#allocation50_spill] sm:$0xff] }
 0x1d1   : > { %1498 = vmatpush.msra.mxu0 %v5022_v23  ;;  %1515 = vmatpush.msra.mxu1 %v4994_v11  ;;  %v8683_v11 = vld [vmem:[#allocation49_spill] sm:$0xff]  ;;  %v8693_v23 = vld [vmem:[#allocation59_spill] sm:$0xff] }
 0x1d2   : > { %1555 = vmatpush.msra.mxu3 %v5002_v14  ;;  %1536 = vmatpush.msra.mxu2 %v5008_v16  ;;  %v8686_v14 = vld [vmem:[#allocation60_spill] sm:$0xff]  ;;  %v8688_v16 = vld [vmem:[#allocation54_spill] sm:$0xff] }
 0x1d3   : > { %1499 = vmatpush.msra.mxu0 %v5034_v27  ;;  %1516 = vmatpush.msra.mxu1 %v5006_v15  ;;  %v8687_v15 = vld [vmem:[#allocation53_spill] sm:$0xff]  ;;  %v8697_v27 = vld [vmem:[#allocation63_spill] sm:$0xff] }
 0x1d4   : > { %1556 = vmatpush.msra.mxu3 %v8649_v8  ;;  %1537 = vmatpush.msra.mxu2 %v8650_v40  ;;  %v8713_v8 = vld [vmem:[#allocation81_spill] sm:$0xff]  ;;  %v8714_v40 = vld [vmem:[#allocation82_spill] sm:$0xff] }
 0x1d5   : > { %1500 = vmatpush.msra.mxu0 %v8651_v41  ;;  %1517 = vmatpush.msra.mxu1 %v8652_v42  ;;  %v8715_v41 = vld [vmem:[#allocation83_spill] sm:$0xff]  ;;  %v8716_v42 = vld [vmem:[#allocation84_spill] sm:$0xff] }
 0x1d6   : > { %1557 = vmatpush.msra.mxu3 %v8653_v43  ;;  %1538 = vmatpush.msra.mxu2 %v8654_v44  ;;  %v8717_v43 = vld [vmem:[#allocation85_spill] sm:$0xff]  ;;  %v8718_v44 = vld [vmem:[#allocation86_spill] sm:$0xff] }
 0x1d7   : > { %1501 = vmatpush.msra.mxu0 %v8655_v45  ;;  %1518 = vmatpush.msra.mxu1 %v8656_v46  ;;  %v8719_v45 = vld [vmem:[#allocation87_spill] sm:$0xff]  ;;  %v8720_v46 = vld [vmem:[#allocation88_spill] sm:$0xff] }
 0x1d8   : > { %1558 = vmatpush.msra.mxu3 %v8657_v47  ;;  %1539 = vmatpush.msra.mxu2 %v8658_v48  ;;  %v8721_v47 = vld [vmem:[#allocation89_spill] sm:$0xff]  ;;  %v8722_v48 = vld [vmem:[#allocation90_spill] sm:$0xff] }
 0x1d9   : > { %1502 = vmatpush.msra.mxu0 %v8659_v49  ;;  %1519 = vmatpush.msra.mxu1 %v8660_v50  ;;  %v5402_v49 = vld [vmem:[#allocation6 + $0x1e0] sm:$0xff]  ;;  %v8723_v50 = vld [vmem:[#allocation91_spill] sm:$0xff] }
 0x1da   : > { %1559 = vmatpush.msra.mxu3 %v8661_v51  ;;  %1540 = vmatpush.msra.mxu2 %v8664_v54  ;;  %v8724_v51 = vld [vmem:[#allocation92_spill] sm:$0xff]  ;;  %v5408_v54 = vld [vmem:[#allocation6 + $0x1c0] sm:$0xff] }
 0x1db   : > { %1567 = vmatpush.msrb.mxu0 %v8662_v52  ;;  %1520 = vmatpush.msra.mxu1 %v8663_v53  ;;  %v8725_v52 = vld [vmem:[#allocation93_spill] sm:$0xff]  ;;  %v8726_v53 = vld [vmem:[#allocation15_spill] sm:$0xff] }
 0x1dc   : > { %1560 = vmatpush.msra.mxu3 %v8665_v55  ;;  %1541 = vmatpush.msra.mxu2 %v8668_v58  ;;  %v8727_v55 = vld [vmem:[#allocation94_spill] sm:$0xff]  ;;  %v5414_v58 = vld [vmem:[#allocation6 + $0x1a0] sm:$0xff] }
 0x1dd   : > { %1568 = vmatpush.msrb.mxu0 %v8666_v56  ;;  %1521 = vmatpush.msra.mxu1 %v8667_v57  ;;  %v8728_v56 = vld [vmem:[#allocation95_spill] sm:$0xff]  ;;  %v8729_v57 = vld [vmem:[#allocation96_spill] sm:$0xff] }
 0x1de   : > { %1561 = vmatpush.msra.mxu3 %v8669_v59  ;;  %1542 = vmatpush.msra.mxu2 %v8672_v62  ;;  %v8730_v59 = vld [vmem:[#allocation97_spill] sm:$0xff] }
 0x1df   : > { %1569 = vmatpush.msrb.mxu0 %v8670_v60  ;;  %1522 = vmatpush.msra.mxu1 %v8671_v61  ;;  %v8731_v60 = vld [vmem:[#allocation98_spill] sm:$0xff]  ;;  %v8732_v61 = vld [vmem:[#allocation99_spill] sm:$0xff]  ;;  %v5422_v62 = vld [vmem:[#allocation6 + $0x180] sm:$0xff] }
 0x1e0   : > { %1562 = vmatpush.msra.mxu3 %v8673_v63  ;;  %1607 = vmatpush.msrb.mxu2 %v8676_v2  ;;  %v8733_v63 = vld [vmem:[#allocation100_spill] sm:$0xff]  ;;  %v5428_v2 = vld [vmem:[#allocation6 + $0x1e8] sm:$0xff] }
 0x1e1   : > { %1570 = vmatpush.msrb.mxu0 %v8674_v0  ;;  %1587 = vmatpush.msrb.mxu1 %v8675_v1  ;;  %v8734_v0 = vld [vmem:[#allocation101_spill] sm:$0xff] }
 0x1e2   : > { %1627 = vmatpush.msrb.mxu3 %v8677_v3  ;;  %1608 = vmatpush.msrb.mxu2 %v8680_v6  ;;  %v5426_v1 = vld [vmem:[#allocation6 + $0x3e0] sm:$0xff]  ;;  %v8735_v3 = vld [vmem:[#allocation102_spill] sm:$0xff] }
 0x1e3   : > { %1571 = vmatpush.msrb.mxu0 %v8678_v4  ;;  %1588 = vmatpush.msrb.mxu1 %v8679_v5  ;;  %v8736_v4 = vld [vmem:[#allocation16_spill] sm:$0xff]  ;;  %v5432_v5 = vld [vmem:[#allocation6 + $0x3e8] sm:$0xff]  ;;  %v5434_v6 = vld [vmem:[#allocation6 + $0x160] sm:$0xff] }
 0x1e4   : > { %1628 = vmatpush.msrb.mxu3 %v8681_v7  ;;  %1609 = vmatpush.msrb.mxu2 %v8684_v12  ;;  %v5438_v7 = vld [vmem:[#allocation6 + $0x3c0] sm:$0xff] }
 0x1e5   : > { %1572 = vmatpush.msrb.mxu0 %v8682_v10  ;;  %1589 = vmatpush.msrb.mxu1 %v8683_v11  ;;  %v5440_v10 = vld [vmem:[#allocation6 + $0x1c8] sm:$0xff]  ;;  %v5446_v12 = vld [vmem:[#allocation6 + $0x140] sm:$0xff] }
 0x1e6   : > { %1629 = vmatpush.msrb.mxu3 %v8685_v13  ;;  %1610 = vmatpush.msrb.mxu2 %v8688_v16  ;;  %v5444_v11 = vld [vmem:[#allocation6 + $0x3c8] sm:$0xff]  ;;  %v5450_v13 = vld [vmem:[#allocation6 + $0x3a0] sm:$0xff] }
 0x1e7   : > { %1573 = vmatpush.msrb.mxu0 %v8686_v14  ;;  %1590 = vmatpush.msrb.mxu1 %v8687_v15  ;;  %v5452_v14 = vld [vmem:[#allocation6 + $0x1a8] sm:$0xff]  ;;  %v5458_v16 = vld [vmem:[#allocation6 + $0x120] sm:$0xff] }
 0x1e8   : > { %1630 = vmatpush.msrb.mxu3 %v8689_v17  ;;  %1611 = vmatpush.msrb.mxu2 %v8692_v22  ;;  %v5456_v15 = vld [vmem:[#allocation6 + $0x3a8] sm:$0xff]  ;;  %v5462_v17 = vld [vmem:[#allocation6 + $0x380] sm:$0xff] }
 0x1e9   : > { %1574 = vmatpush.msrb.mxu0 %v8690_v20  ;;  %1591 = vmatpush.msrb.mxu1 %v8691_v21  ;;  %v5464_v20 = vld [vmem:[#allocation6 + $0x188] sm:$0xff]  ;;  %v5470_v22 = vld [vmem:[#allocation6 + $0x100] sm:$0xff] }
 0x1ea   : > { %1631 = vmatpush.msrb.mxu3 %v8693_v23  ;;  %1612 = vmatpush.msrb.mxu2 %v8696_v26  ;;  %v5468_v21 = vld [vmem:[#allocation6 + $0x388] sm:$0xff]  ;;  %v5474_v23 = vld [vmem:[#allocation6 + $0x360] sm:$0xff] }
 0x1eb   : > { %1575 = vmatpush.msrb.mxu0 %v8694_v24  ;;  %1592 = vmatpush.msrb.mxu1 %v8695_v25  ;;  %v5476_v24 = vld [vmem:[#allocation6 + $0x168] sm:$0xff]  ;;  %v5482_v26 = vld [vmem:[#allocation6 + $0xe0] sm:$0xff] }
 0x1ec   : > { %1632 = vmatpush.msrb.mxu3 %v8697_v27  ;;  %1613 = vmatpush.msrb.mxu2 %v8700_v30  ;;  %v5480_v25 = vld [vmem:[#allocation6 + $0x368] sm:$0xff]  ;;  %v5486_v27 = vld [vmem:[#allocation6 + $0x340] sm:$0xff] }
 0x1ed   : > { %1576 = vmatpush.msrb.mxu0 %v8698_v28  ;;  %1593 = vmatpush.msrb.mxu1 %v8699_v29  ;;  %v5488_v28 = vld [vmem:[#allocation6 + $0x148] sm:$0xff]  ;;  %v5494_v30 = vld [vmem:[#allocation6 + $0xc0] sm:$0xff] }
 0x1ee   : > { %1633 = vmatpush.msrb.mxu3 %v8701_v31  ;;  %1614 = vmatpush.msrb.mxu2 %v8704_v35  ;;  %v5492_v29 = vld [vmem:[#allocation6 + $0x348] sm:$0xff]  ;;  %v5498_v31 = vld [vmem:[#allocation6 + $0x320] sm:$0xff] }
 0x1ef   : > { %1577 = vmatpush.msrb.mxu0 %v8702_v32  ;;  %1594 = vmatpush.msrb.mxu1 %v8703_v33  ;;  %v5500_v32 = vld [vmem:[#allocation6 + $0x128] sm:$0xff]  ;;  %v5506_v35 = vld [vmem:[#allocation6 + $0xa0] sm:$0xff] }
 0x1f0   : > { %1634 = vmatpush.msrb.mxu3 %v8705_v36  ;;  %1615 = vmatpush.msrb.mxu2 %v8708_v18  ;;  %v5504_v33 = vld [vmem:[#allocation6 + $0x328] sm:$0xff]  ;;  %v5510_v36 = vld [vmem:[#allocation6 + $0x300] sm:$0xff] }
 0x1f1   : > { %1578 = vmatpush.msrb.mxu0 %v8706_v37  ;;  %1595 = vmatpush.msrb.mxu1 %v8707_v38  ;;  %v5512_v37 = vld [vmem:[#allocation6 + $0x108] sm:$0xff]  ;;  %v5518_v18 = vld [vmem:[#allocation6 + $0x80] sm:$0xff] }
 0x1f2   : > { %1635 = vmatpush.msrb.mxu3 %v8709_v19  ;;  %1616 = vmatpush.msrb.mxu2 %v8712_v9  ;;  %v5516_v38 = vld [vmem:[#allocation6 + $0x308] sm:$0xff]  ;;  %v5522_v19 = vld [vmem:[#allocation6 + $0x2e0] sm:$0xff] }
 0x1f3   : > { %1579 = vmatpush.msrb.mxu0 %v8710_v34  ;;  %1596 = vmatpush.msrb.mxu1 %v8711_v39  ;;  %v5524_v34 = vld [vmem:[#allocation6 + $0xe8] sm:$0xff]  ;;  %v5530_v9 = vld [vmem:[#allocation6 + $0x60] sm:$0xff] }
 0x1f4   : > { %1636 = vmatpush.msrb.mxu3 %v8713_v8  ;;  %1617 = vmatpush.msrb.mxu2 %v8716_v42  ;;  %v5528_v39 = vld [vmem:[#allocation6 + $0x2e8] sm:$0xff]  ;;  %v5534_v8 = vld [vmem:[#allocation6 + $0x2c0] sm:$0xff] }
 0x1f5   : > { %1580 = vmatpush.msrb.mxu0 %v8714_v40  ;;  %1597 = vmatpush.msrb.mxu1 %v8715_v41  ;;  %v5536_v40 = vld [vmem:[#allocation6 + $0xc8] sm:$0xff]  ;;  %v5542_v42 = vld [vmem:[#allocation6 + $0x40] sm:$0xff] }
 0x1f6   : > { %1637 = vmatpush.msrb.mxu3 %v8717_v43  ;;  %1618 = vmatpush.msrb.mxu2 %v8720_v46  ;;  %v5540_v41 = vld [vmem:[#allocation6 + $0x2c8] sm:$0xff]  ;;  %v5546_v43 = vld [vmem:[#allocation6 + $0x2a0] sm:$0xff] }
 0x1f7   : > { %1581 = vmatpush.msrb.mxu0 %v8718_v44  ;;  %1598 = vmatpush.msrb.mxu1 %v8719_v45  ;;  %v5548_v44 = vld [vmem:[#allocation6 + $0xa8] sm:$0xff]  ;;  %v5554_v46 = vld [vmem:[#allocation6 + $0x20] sm:$0xff] }
 0x1f8   : > { %1638 = vmatpush.msrb.mxu3 %v8721_v47  ;;  %1619 = vmatpush.msrb.mxu2 %v8724_v51  ;;  %v5552_v45 = vld [vmem:[#allocation6 + $0x2a8] sm:$0xff]  ;;  %v5558_v47 = vld [vmem:[#allocation6 + $0x280] sm:$0xff] }
 0x1f9   : > { %1582 = vmatpush.msrb.mxu0 %v8722_v48  ;;  %1599 = vmatpush.msrb.mxu1 %v8723_v50  ;;  %v5560_v48 = vld [vmem:[#allocation6 + $0x88] sm:$0xff]  ;;  %v5570_v51 = vld [vmem:[#allocation6] sm:$0xff] }
 0x1fa   : > { %1639 = vmatpush.msrb.mxu3 %v8725_v52  ;;  %1503 = vmatmul.f32.vlgmr.msra.gmra.mxu0 %v8726_v53  ;;  %v5564_v50 = vld [vmem:[#allocation6 + $0x288] sm:$0xff]  ;;  %8737 = vst [vmem:[#allocation17_spill] sm:$0xff] %v5570_v51  ;;  %v5574_v52 = vld [vmem:[#allocation6 + $0x260] sm:$0xff] }
 0x1fb   : > { %1780 = vmatpush.msra.mxu0 %v5402_v49  ;;  %1600 = vmatpush.msrb.mxu1 %v8727_v55  ;;  %8738 = vst [vmem:[#allocation19_spill] sm:$0xff] %v5574_v52  ;;  %v5576_v55 = vld [vmem:[#allocation6 + $0x68] sm:$0xff] }
 0x1fc   : > { %1620 = vmatpush.msrb.mxu2 %v8728_v56  ;;  %1640 = vmatpush.msrb.mxu3 %v8729_v57  ;;  %8739 = vst [vmem:[#allocation26_spill] sm:$0xff] %v5576_v55  ;;  %v5580_v56 = vld [vmem:[#allocation6 + $0x268] sm:$0xff]  ;;  %v5582_v57 = vld [vmem:[#allocation6 + $0x1f0] sm:$0xff] }
 0x1fd   : > { %1781 = vmatpush.msra.mxu0 %v5408_v54  ;;  %1601 = vmatpush.msrb.mxu1 %v8730_v59  ;;  %8740 = vst [vmem:[#allocation18_spill] sm:$0xff] %v5580_v56  ;;  %v5586_v59 = vld [vmem:[#allocation6 + $0x240] sm:$0xff] }
 0x1fe   : > { %1621 = vmatpush.msrb.mxu2 %v8731_v60  ;;  %1641 = vmatpush.msrb.mxu3 %v8732_v61  ;;  %8741 = vst [vmem:[#allocation20_spill] sm:$0xff] %v5582_v57  ;;  %v5588_v60 = vld [vmem:[#allocation6 + $0x48] sm:$0xff] }
 0x1ff   : > { %1543 = vmatmul.f32.vlgmr.msra.gmra.mxu2 %v8726_v53  ;;  %1782 = vmatpush.msra.mxu0 %v5414_v58  ;;  %8742 = vst [vmem:[#allocation22_spill] sm:$0xff] %v5586_v59  ;;  %v5592_v61 = vld [vmem:[#allocation6 + $0x248] sm:$0xff] }
 0x200   : > { %1602 = vmatpush.msrb.mxu1 %v8733_v63  ;;  %1622 = vmatpush.msrb.mxu2 %v8734_v0  ;;  %8743 = vst [vmem:[#allocation30_spill] sm:$0xff] %v5588_v60  ;;  %v5594_v63 = vld [vmem:[#allocation6 + $0x1d0] sm:$0xff]  ;;  %v5598_v0 = vld [vmem:[#allocation6 + $0x220] sm:$0xff] }
 0x201   : > { %1642 = vmatpush.msrb.mxu3 %v8735_v3  ;;  %1523 = vmatmul.f32.vlgmr.msra.gmra.mxu1 %v8736_v4  ;;  %8744 = vst [vmem:[#allocation21_spill] sm:$0xff] %v5592_v61  ;;  %v5600_v3 = vld [vmem:[#allocation6 + $0x28] sm:$0xff] }
 0x202   : > { %1563 = vmatmul.f32.vlgmr.msra.gmra.mxu3 %v8736_v4  ;;  %1783 = vmatpush.msra.mxu0 %v5422_v62  ;;  %8745 = vst [vmem:[#allocation23_spill] sm:$0xff] %v5594_v63 }
 0x203   : > { %1800 = vmatpush.msra.mxu1 %v5426_v1  ;;  %1820 = vmatpush.msra.mxu2 %v5428_v2  ;;  %8746 = vst [vmem:[#allocation25_spill] sm:$0xff] %v5598_v0 }
 0x204   : > { %1840 = vmatpush.msra.mxu3 %v5432_v5  ;;  %1784 = vmatpush.msra.mxu0 %v5434_v6  ;;  %8747 = vst [vmem:[#allocation34_spill] sm:$0xff] %v5600_v3 }
 0x205   : > { %1801 = vmatpush.msra.mxu1 %v5438_v7  ;;  %1821 = vmatpush.msra.mxu2 %v5440_v10 }
 0x206   : > { %1841 = vmatpush.msra.mxu3 %v5444_v11  ;;  %1785 = vmatpush.msra.mxu0 %v5446_v12 }
 0x207   : > { %1802 = vmatpush.msra.mxu1 %v5450_v13  ;;  %1822 = vmatpush.msra.mxu2 %v5452_v14 }
 0x208   : > { %1842 = vmatpush.msra.mxu3 %v5456_v15  ;;  %1786 = vmatpush.msra.mxu0 %v5458_v16 }
 0x209   : > { %1803 = vmatpush.msra.mxu1 %v5462_v17  ;;  %1823 = vmatpush.msra.mxu2 %v5464_v20 }
 0x20a   : > { %1843 = vmatpush.msra.mxu3 %v5468_v21  ;;  %1787 = vmatpush.msra.mxu0 %v5470_v22 }
 0x20b   : > { %1804 = vmatpush.msra.mxu1 %v5474_v23  ;;  %1824 = vmatpush.msra.mxu2 %v5476_v24 }
 0x20c   : > { %1844 = vmatpush.msra.mxu3 %v5480_v25  ;;  %1788 = vmatpush.msra.mxu0 %v5482_v26 }
 0x20d   : > { %1805 = vmatpush.msra.mxu1 %v5486_v27  ;;  %1825 = vmatpush.msra.mxu2 %v5488_v28 }
 0x20e   : > { %1845 = vmatpush.msra.mxu3 %v5492_v29  ;;  %1789 = vmatpush.msra.mxu0 %v5494_v30 }
 0x20f   : > { %1806 = vmatpush.msra.mxu1 %v5498_v31  ;;  %1826 = vmatpush.msra.mxu2 %v5500_v32 }
 0x210   : > { %1846 = vmatpush.msra.mxu3 %v5504_v33  ;;  %1790 = vmatpush.msra.mxu0 %v5506_v35 }
 0x211   : > { %1807 = vmatpush.msra.mxu1 %v5510_v36  ;;  %1827 = vmatpush.msra.mxu2 %v5512_v37 }
 0x212   : > { %1847 = vmatpush.msra.mxu3 %v5516_v38  ;;  %1791 = vmatpush.msra.mxu0 %v5518_v18 }
 0x213   : > { %1808 = vmatpush.msra.mxu1 %v5522_v19  ;;  %1828 = vmatpush.msra.mxu2 %v5524_v34 }
 0x214   : > { %1848 = vmatpush.msra.mxu3 %v5528_v39  ;;  %1792 = vmatpush.msra.mxu0 %v5530_v9 }
 0x215   : > { %1809 = vmatpush.msra.mxu1 %v5534_v8  ;;  %1829 = vmatpush.msra.mxu2 %v5536_v40 }
 0x216   : > { %1849 = vmatpush.msra.mxu3 %v5540_v41  ;;  %1793 = vmatpush.msra.mxu0 %v5542_v42 }
 0x217   : > { %1810 = vmatpush.msra.mxu1 %v5546_v43  ;;  %1830 = vmatpush.msra.mxu2 %v5548_v44 }
 0x218   : > { %1850 = vmatpush.msra.mxu3 %v5552_v45  ;;  %1794 = vmatpush.msra.mxu0 %v5554_v46 }
 0x219   : > { %1811 = vmatpush.msra.mxu1 %v5558_v47  ;;  %1831 = vmatpush.msra.mxu2 %v5560_v48 }
 0x21a   : > { %1851 = vmatpush.msra.mxu3 %v5564_v50  ;;  %1583 = vmatmul.f32.vlgmr.msrb.gmra.mxu0 %v8726_v53 }
 0x21b   : > { %1603 = vmatmul.f32.vlgmr.msrb.gmra.mxu1 %v8736_v4  ;;  %1623 = vmatmul.f32.vlgmr.msrb.gmra.mxu2 %v8726_v53  ;;  %v5606_v53 = vld [vmem:[#allocation6 + $0x1b0] sm:$0xff] }
 0x21c   : > { %1643 = vmatmul.f32.vlgmr.msrb.gmra.mxu3 %v8736_v4  ;;  %1795 = vmatpush.msra.mxu0 %v5570_v51  ;;  %v5604_v4 = vld [vmem:[#allocation6 + $0x228] sm:$0xff]  ;;  %8749 = vst [vmem:[#allocation27_spill] sm:$0xff] %v5606_v53  ;;  %v5652_v51 = vld [vmem:[#allocation6 + $0x1b8] sm:$0xff] }
 0x21d   : > { %1812 = vmatpush.msra.mxu1 %v5574_v52  ;;  %1832 = vmatpush.msra.mxu2 %v5576_v55  ;;  %8748 = vst [vmem:[#allocation24_spill] sm:$0xff] %v5604_v4  ;;  %v5610_v55 = vld [vmem:[#allocation6 + $0x200] sm:$0xff]  ;;  %v5650_v52 = vld [vmem:[#allocation6 + $0x3b0] sm:$0xff] }
 0x21e   : > { %1852 = vmatpush.msra.mxu3 %v5580_v56  ;;  %1860 = vmatpush.msrb.mxu0 %v5582_v57  ;;  %8750 = vst [vmem:[#allocation36_spill] sm:$0xff] %v5610_v55  ;;  %v5612_v56 = vld [vmem:[#allocation6 + $0x8] sm:$0xff] }
 0x21f   : > { %1813 = vmatpush.msra.mxu1 %v5586_v59  ;;  %1833 = vmatpush.msra.mxu2 %v5588_v60  ;;  %8751 = vst [vmem:[#allocation28_spill] sm:$0xff] %v5612_v56  ;;  %v5616_v57 = vld [vmem:[#allocation6 + $0x208] sm:$0xff]  ;;  %v5626_v60 = vld [vmem:[#allocation6 + $0x3f0] sm:$0xff] }
 0x220   : > { %1853 = vmatpush.msra.mxu3 %v5592_v61  ;;  %1861 = vmatpush.msrb.mxu0 %v5594_v63  ;;  %8752 = vst [vmem:[#allocation29_spill] sm:$0xff] %v5616_v57  ;;  %v5622_v61 = vld [vmem:[#allocation6 + $0x190] sm:$0xff]  ;;  %v8754_v63 = vld [vmem:[#allocation13_spill] sm:$0xff] }
 0x221   : > { %1814 = vmatpush.msra.mxu1 %v5598_v0  ;;  %1834 = vmatpush.msra.mxu2 %v5600_v3  ;;  %8753 = vst [vmem:[#allocation31_spill] sm:$0xff] %v5622_v61  ;;  %v5628_v0 = vld [vmem:[#allocation6 + $0x1f8] sm:$0xff]  ;;  %v8757_v3 = vld [vmem:[#allocation14_spill] sm:$0xff]  ;;  %v5646_v59 = vld [vmem:[#allocation6 + $0x150] sm:$0xff] }
 0x222   : > { %1854 = vmatpush.msra.mxu3 %v5604_v4  ;;  %1862 = vmatpush.msrb.mxu0 %v5606_v53  ;;  %8755 = vst [vmem:[#allocation40_spill] sm:$0xff] %v5626_v60  ;;  %v5632_v4 = vld [vmem:[#allocation6 + $0x3f8] sm:$0xff]  ;;  %v5634_v53 = vld [vmem:[#allocation6 + $0x170] sm:$0xff] }
 0x223   : > { %1815 = vmatpush.msra.mxu1 %v5610_v55  ;;  %1835 = vmatpush.msra.mxu2 %v5612_v56  ;;  %8756 = vst [vmem:[#allocation32_spill] sm:$0xff] %v5628_v0  ;;  %v5638_v56 = vld [vmem:[#allocation6 + $0x3d0] sm:$0xff]  ;;  %v5644_v55 = vld [vmem:[#allocation6 + $0x3d8] sm:$0xff] }
 0x224   : > { %1855 = vmatpush.msra.mxu3 %v5616_v57  ;;  %1796 = vmatmul.f32.vlgmr.msra.gmra.mxu0 %v8754_v63  ;;  %8758 = vst [vmem:[#allocation33_spill] sm:$0xff] %v5632_v4  ;;  %v5640_v57 = vld [vmem:[#allocation6 + $0x1d8] sm:$0xff] }
 0x225   : > { %1816 = vmatmul.f32.vlgmr.msra.gmra.mxu1 %v8757_v3  ;;  %1836 = vmatmul.f32.vlgmr.msra.gmra.mxu2 %v8754_v63  ;;  %8759 = vst [vmem:[#allocation35_spill] sm:$0xff] %v5634_v53 }
 0x226   : > { %1856 = vmatmul.f32.vlgmr.msra.gmra.mxu3 %v8757_v3  ;;  %1863 = vmatpush.msrb.mxu0 %v5622_v61  ;;  %8760 = vst [vmem:[#allocation44_spill] sm:$0xff] %v5638_v56  ;;  %v5656_v61 = vld [vmem:[#allocation6 + $0x3b8] sm:$0xff] }
 0x227   : > { %8761 = vst [vmem:[#allocation37_spill] sm:$0xff] %v5640_v57  ;;  %1880 = vmatpush.msrb.mxu1 %v5626_v60  ;;  %1900 = vmatpush.msrb.mxu2 %v5628_v0  ;;  %v5658_v60 = vld [vmem:[#allocation6 + $0x130] sm:$0xff] }
 0x228   : > { %8762 = vst [vmem:[#allocation38_spill] sm:$0xff] %v5644_v55  ;;  %1920 = vmatpush.msrb.mxu3 %v5632_v4  ;;  %1864 = vmatpush.msrb.mxu0 %v5634_v53  ;;  %v5662_v0 = vld [vmem:[#allocation6 + $0x390] sm:$0xff]  ;;  %v5664_v4 = vld [vmem:[#allocation6 + $0x198] sm:$0xff] }
 0x229   : > { %8763 = vst [vmem:[#allocation39_spill] sm:$0xff] %v5646_v59  ;;  %1881 = vmatpush.msrb.mxu1 %v5638_v56  ;;  %1901 = vmatpush.msrb.mxu2 %v5640_v57  ;;  %v5668_v53 = vld [vmem:[#allocation6 + $0x398] sm:$0xff]  ;;  %v5670_v56 = vld [vmem:[#allocation6 + $0x110] sm:$0xff] }
 0x22a   : > { %8764 = vst [vmem:[#allocation48_spill] sm:$0xff] %v5650_v52  ;;  %1921 = vmatpush.msrb.mxu3 %v5644_v55  ;;  %1865 = vmatpush.msrb.mxu0 %v5646_v59  ;;  %v5674_v57 = vld [vmem:[#allocation6 + $0x370] sm:$0xff]  ;;  %v5676_v55 = vld [vmem:[#allocation6 + $0x178] sm:$0xff] }
 0x22b   : > { %8765 = vst [vmem:[#allocation41_spill] sm:$0xff] %v5652_v51  ;;  %1882 = vmatpush.msrb.mxu1 %v5650_v52  ;;  %1902 = vmatpush.msrb.mxu2 %v5652_v51  ;;  %v5680_v59 = vld [vmem:[#allocation6 + $0x378] sm:$0xff]  ;;  %v5682_v52 = vld [vmem:[#allocation6 + $0xf0] sm:$0xff] }
 0x22c   : > { %8766 = vst [vmem:[#allocation42_spill] sm:$0xff] %v5656_v61  ;;  %1922 = vmatpush.msrb.mxu3 %v5656_v61  ;;  %1866 = vmatpush.msrb.mxu0 %v5658_v60  ;;  %v5686_v51 = vld [vmem:[#allocation6 + $0x350] sm:$0xff]  ;;  %v5688_v61 = vld [vmem:[#allocation6 + $0x158] sm:$0xff] }
 0x22d   : > { %8767 = vst [vmem:[#allocation43_spill] sm:$0xff] %v5658_v60  ;;  %1883 = vmatpush.msrb.mxu1 %v5662_v0  ;;  %1903 = vmatpush.msrb.mxu2 %v5664_v4  ;;  %v5692_v60 = vld [vmem:[#allocation6 + $0x358] sm:$0xff] }
 0x22e   : > { %8768 = vst [vmem:[#allocation52_spill] sm:$0xff] %v5662_v0  ;;  %1923 = vmatpush.msrb.mxu3 %v5668_v53  ;;  %1867 = vmatpush.msrb.mxu0 %v5670_v56  ;;  %v5694_v0 = vld [vmem:[#allocation6 + $0xd0] sm:$0xff] }
 0x22f   : > { %8769 = vst [vmem:[#allocation45_spill] sm:$0xff] %v5664_v4  ;;  %1884 = vmatpush.msrb.mxu1 %v5674_v57  ;;  %1904 = vmatpush.msrb.mxu2 %v5676_v55  ;;  %v5698_v4 = vld [vmem:[#allocation6 + $0x330] sm:$0xff] }
 0x230   : > { %8770 = vst [vmem:[#allocation46_spill] sm:$0xff] %v5668_v53  ;;  %1924 = vmatpush.msrb.mxu3 %v5680_v59  ;;  %1868 = vmatpush.msrb.mxu0 %v5682_v52  ;;  %v5700_v53 = vld [vmem:[#allocation6 + $0x138] sm:$0xff] }
 0x231   : > { %8771 = vst [vmem:[#allocation47_spill] sm:$0xff] %v5670_v56  ;;  %1885 = vmatpush.msrb.mxu1 %v5686_v51  ;;  %1905 = vmatpush.msrb.mxu2 %v5688_v61  ;;  %v5704_v56 = vld [vmem:[#allocation6 + $0x338] sm:$0xff] }
 0x232   : > { %8772 = vst [vmem:[#allocation56_spill] sm:$0xff] %v5674_v57  ;;  %v5706_v57 = vld [vmem:[#allocation6 + $0xb0] sm:$0xff]  ;;  %1925 = vmatpush.msrb.mxu3 %v5692_v60  ;;  %1869 = vmatpush.msrb.mxu0 %v5694_v0 }
 0x233   : > { %8773 = vst [vmem:[#allocation49_spill] sm:$0xff] %v5676_v55  ;;  %v5710_v55 = vld [vmem:[#allocation6 + $0x310] sm:$0xff]  ;;  %1886 = vmatpush.msrb.mxu1 %v5698_v4  ;;  %1906 = vmatpush.msrb.mxu2 %v5700_v53 }
 0x234   : > { %8774 = vst [vmem:[#allocation50_spill] sm:$0xff] %v5680_v59  ;;  %v5712_v59 = vld [vmem:[#allocation6 + $0x118] sm:$0xff]  ;;  %1926 = vmatpush.msrb.mxu3 %v5704_v56  ;;  %1870 = vmatpush.msrb.mxu0 %v5706_v57 }
 0x235   : > { %8775 = vst [vmem:[#allocation51_spill] sm:$0xff] %v5682_v52  ;;  %v5716_v52 = vld [vmem:[#allocation6 + $0x318] sm:$0xff]  ;;  %1887 = vmatpush.msrb.mxu1 %v5710_v55  ;;  %1907 = vmatpush.msrb.mxu2 %v5712_v59 }
 0x236   : > { %8776 = vst [vmem:[#allocation60_spill] sm:$0xff] %v5686_v51  ;;  %v5718_v51 = vld [vmem:[#allocation6 + $0x90] sm:$0xff]  ;;  %1927 = vmatpush.msrb.mxu3 %v5716_v52 }
 0x237   : > { %8777 = vst [vmem:[#allocation53_spill] sm:$0xff] %v5688_v61  ;;  %v5722_v61 = vld [vmem:[#allocation6 + $0x2f0] sm:$0xff]  ;;  %1871 = vmatpush.msrb.mxu0 %v5718_v51 }
 0x238   : > { %8778 = vst [vmem:[#allocation54_spill] sm:$0xff] %v5692_v60  ;;  %v5724_v60 = vld [vmem:[#allocation6 + $0xf8] sm:$0xff]  ;;  %1888 = vmatpush.msrb.mxu1 %v5722_v61 }
 0x239   : > { %8779 = vst [vmem:[#allocation55_spill] sm:$0xff] %v5694_v0  ;;  %v5728_v0 = vld [vmem:[#allocation6 + $0x2f8] sm:$0xff]  ;;  %1908 = vmatpush.msrb.mxu2 %v5724_v60 }
 0x23a   : > { %8780 = vst [vmem:[#allocation64_spill] sm:$0xff] %v5698_v4  ;;  %v5730_v4 = vld [vmem:[#allocation6 + $0x70] sm:$0xff]  ;;  %1928 = vmatpush.msrb.mxu3 %v5728_v0 }
 0x23b   : > { %8781 = vst [vmem:[#allocation57_spill] sm:$0xff] %v5700_v53  ;;  %v5734_v53 = vld [vmem:[#allocation6 + $0x2d0] sm:$0xff]  ;;  %1872 = vmatpush.msrb.mxu0 %v5730_v4 }
 0x23c   : > { %8782 = vst [vmem:[#allocation58_spill] sm:$0xff] %v5704_v56  ;;  %v5736_v56 = vld [vmem:[#allocation6 + $0xd8] sm:$0xff]  ;;  %1889 = vmatpush.msrb.mxu1 %v5734_v53 }
 0x23d   : > { %8783 = vst [vmem:[#allocation59_spill] sm:$0xff] %v5706_v57  ;;  %v5740_v57 = vld [vmem:[#allocation6 + $0x2d8] sm:$0xff]  ;;  %1909 = vmatpush.msrb.mxu2 %v5736_v56 }
 0x23e   : > { %8784 = vst [vmem:[#allocation68_spill] sm:$0xff] %v5710_v55  ;;  %v5742_v55 = vld [vmem:[#allocation6 + $0x50] sm:$0xff]  ;;  %1929 = vmatpush.msrb.mxu3 %v5740_v57 }
 0x23f   : > { %8785 = vst [vmem:[#allocation61_spill] sm:$0xff] %v5712_v59  ;;  %v5746_v59 = vld [vmem:[#allocation6 + $0x2b0] sm:$0xff]  ;;  %1873 = vmatpush.msrb.mxu0 %v5742_v55 }
 0x240   : > { %8786 = vst [vmem:[#allocation62_spill] sm:$0xff] %v5716_v52  ;;  %v5748_v52 = vld [vmem:[#allocation6 + $0xb8] sm:$0xff]  ;;  %1890 = vmatpush.msrb.mxu1 %v5746_v59 }
 0x241   : > { %8787 = vst [vmem:[#allocation63_spill] sm:$0xff] %v5718_v51  ;;  %v5752_v51 = vld [vmem:[#allocation6 + $0x2b8] sm:$0xff]  ;;  %1910 = vmatpush.msrb.mxu2 %v5748_v52 }
 0x242   : > { %8788 = vst [vmem:[#allocation72_spill] sm:$0xff] %v5722_v61  ;;  %v5754_v61 = vld [vmem:[#allocation6 + $0x30] sm:$0xff]  ;;  %1930 = vmatpush.msrb.mxu3 %v5752_v51 }
 0x243   : > { %8789 = vst [vmem:[#allocation65_spill] sm:$0xff] %v5724_v60  ;;  %v5758_v60 = vld [vmem:[#allocation6 + $0x290] sm:$0xff]  ;;  %1874 = vmatpush.msrb.mxu0 %v5754_v61 }
 0x244   : > { %8790 = vst [vmem:[#allocation66_spill] sm:$0xff] %v5728_v0  ;;  %v5760_v0 = vld [vmem:[#allocation6 + $0x98] sm:$0xff]  ;;  %1891 = vmatpush.msrb.mxu1 %v5758_v60 }
 0x245   : > { %8791 = vst [vmem:[#allocation67_spill] sm:$0xff] %v5730_v4  ;;  %v5764_v4 = vld [vmem:[#allocation6 + $0x298] sm:$0xff]  ;;  %1911 = vmatpush.msrb.mxu2 %v5760_v0 }
 0x246   : > { %8792 = vst [vmem:[#allocation76_spill] sm:$0xff] %v5734_v53  ;;  %v5766_v53 = vld [vmem:[#allocation6 + $0x10] sm:$0xff]  ;;  %1931 = vmatpush.msrb.mxu3 %v5764_v4 }
 0x247   : > { %8793 = vst [vmem:[#allocation69_spill] sm:$0xff] %v5736_v56  ;;  %v5770_v56 = vld [vmem:[#allocation6 + $0x270] sm:$0xff]  ;;  %1875 = vmatpush.msrb.mxu0 %v5766_v53 }
 0x248   : > { %8794 = vst [vmem:[#allocation70_spill] sm:$0xff] %v5740_v57  ;;  %v5772_v57 = vld [vmem:[#allocation6 + $0x78] sm:$0xff]  ;;  %1892 = vmatpush.msrb.mxu1 %v5770_v56  ;;  %1876 = vmatmul.f32.vlgmr.msrb.gmra.mxu0 %v8754_v63 }
 0x249   : > { %8795 = vst [vmem:[#allocation71_spill] sm:$0xff] %v5742_v55  ;;  %v5776_v55 = vld [vmem:[#allocation6 + $0x278] sm:$0xff]  ;;  %1912 = vmatpush.msrb.mxu2 %v5772_v57  ;;  %1957 = vmatpush.msra.mxu0 %v5402_v49 }
 0x24a   : > { %8796 = vst [vmem:[#allocation77_spill] sm:$0xff] %v5746_v59  ;;  %v5782_v59 = vld [vmem:[#allocation6 + $0x58] sm:$0xff]  ;;  %1932 = vmatpush.msrb.mxu3 %v5776_v55 }
 0x24b   : > { %8797 = vst [vmem:[#allocation73_spill] sm:$0xff] %v5748_v52  ;;  %v5780_v52 = vld [vmem:[#allocation6 + $0x250] sm:$0xff]  ;;  %1913 = vmatpush.msrb.mxu2 %v5782_v59  ;;  %1958 = vmatpush.msra.mxu0 %v5408_v54  ;;  %v5806_v49 = vld [vmem:[#allocation6 + $0x218] sm:$0xff]  ;;  %v8804_v54 = vld [vmem:[#allocation17_spill] sm:$0xff] }
 0x24c   : > { %8798 = vst [vmem:[#allocation74_spill] sm:$0xff] %v5754_v61  ;;  %v5786_v61 = vld [vmem:[#allocation6 + $0x258] sm:$0xff]  ;;  %1893 = vmatpush.msrb.mxu1 %v5780_v52 }
 0x24d   : > { %8799 = vst [vmem:[#allocation75_spill] sm:$0xff] %v5758_v60  ;;  %v5792_v60 = vld [vmem:[#allocation6 + $0x38] sm:$0xff]  ;;  %1933 = vmatpush.msrb.mxu3 %v5786_v61  ;;  %1959 = vmatpush.msra.mxu0 %v5414_v58  ;;  %v8805_v58 = vld [vmem:[#allocation19_spill] sm:$0xff] }
 0x24e   : > { %8800 = vst [vmem:[#allocation78_spill] sm:$0xff] %v5760_v0  ;;  %v5790_v0 = vld [vmem:[#allocation6 + $0x230] sm:$0xff]  ;;  %1914 = vmatpush.msrb.mxu2 %v5792_v60 }
 0x24f   : > { %8801 = vst [vmem:[#allocation79_spill] sm:$0xff] %v5766_v53  ;;  %v5796_v53 = vld [vmem:[#allocation6 + $0x238] sm:$0xff]  ;;  %1894 = vmatpush.msrb.mxu1 %v5790_v0  ;;  %1960 = vmatpush.msra.mxu0 %v5422_v62  ;;  %v8806_v62 = vld [vmem:[#allocation26_spill] sm:$0xff] }
 0x250   : > { %8802 = vst [vmem:[#allocation80_spill] sm:$0xff] %v5770_v56  ;;  %v5802_v56 = vld [vmem:[#allocation6 + $0x18] sm:$0xff]  ;;  %1934 = vmatpush.msrb.mxu3 %v5796_v53 }
 0x251   : > { %8803 = vst [vmem:[#allocation81_spill] sm:$0xff] %v5772_v57  ;;  %v5800_v57 = vld [vmem:[#allocation6 + $0x210] sm:$0xff]  ;;  %1915 = vmatpush.msrb.mxu2 %v5802_v56  ;;  %1961 = vmatpush.msra.mxu0 %v5434_v6  ;;  %v8810_v6 = vld [vmem:[#allocation30_spill] sm:$0xff] }
 0x252   : > { %1895 = vmatpush.msrb.mxu1 %v5800_v57  ;;  %1935 = vmatpush.msrb.mxu3 %v5806_v49 }
 0x253   : > { %1896 = vmatmul.f32.vlgmr.msrb.gmra.mxu1 %v8757_v3  ;;  %1916 = vmatmul.f32.vlgmr.msrb.gmra.mxu2 %v8754_v63  ;;  %v8847_v63 = vld [vmem:[#allocation64_spill] sm:$0xff] }
 0x254   : > { %1936 = vmatmul.f32.vlgmr.msrb.gmra.mxu3 %v8757_v3  ;;  %1977 = vmatpush.msra.mxu1 %v5426_v1  ;;  %v8807_v1 = vld [vmem:[#allocation18_spill] sm:$0xff]  ;;  %v8848_v3 = vld [vmem:[#allocation57_spill] sm:$0xff] }
 0x255   : > { %1997 = vmatpush.msra.mxu2 %v5428_v2  ;;  %2017 = vmatpush.msra.mxu3 %v5432_v5  ;;  %v8808_v2 = vld [vmem:[#allocation20_spill] sm:$0xff]  ;;  %v8809_v5 = vld [vmem:[#allocation22_spill] sm:$0xff] }
 0x256   : > { %1978 = vmatpush.msra.mxu1 %v5438_v7  ;;  %1962 = vmatpush.msra.mxu0 %v5446_v12  ;;  %v8811_v7 = vld [vmem:[#allocation21_spill] sm:$0xff]  ;;  %v8814_v12 = vld [vmem:[#allocation34_spill] sm:$0xff] }
 0x257   : > { %1998 = vmatpush.msra.mxu2 %v5440_v10  ;;  %2018 = vmatpush.msra.mxu3 %v5444_v11  ;;  %v8812_v10 = vld [vmem:[#allocation23_spill] sm:$0xff]  ;;  %v8813_v11 = vld [vmem:[#allocation25_spill] sm:$0xff] }
 0x258   : > { %1979 = vmatpush.msra.mxu1 %v5450_v13  ;;  %1963 = vmatpush.msra.mxu0 %v5458_v16  ;;  %v5876_v13 = vpop.f32.mrf.mxu0  ;;  %v8817_v16 = vld [vmem:[#allocation36_spill] sm:$0xff] }
 0x259   : > { %1999 = vmatpush.msra.mxu2 %v5452_v14  ;;  %2019 = vmatpush.msra.mxu3 %v5456_v15  ;;  %v8815_v14 = vld [vmem:[#allocation24_spill] sm:$0xff]  ;;  %v8816_v15 = vld [vmem:[#allocation27_spill] sm:$0xff] }
 0x25a   : > { %1980 = vmatpush.msra.mxu1 %v5462_v17  ;;  %1964 = vmatpush.msra.mxu0 %v5470_v22  ;;  %v8818_v17 = vld [vmem:[#allocation28_spill] sm:$0xff] }
 0x25b   : > { %2000 = vmatpush.msra.mxu2 %v5464_v20  ;;  %2020 = vmatpush.msra.mxu3 %v5468_v21  ;;  %v8819_v20 = vld [vmem:[#allocation29_spill] sm:$0xff]  ;;  %v8820_v21 = vld [vmem:[#allocation15_spill] sm:$0xff]  ;;  %v8821_v22 = vld [vmem:[#allocation16_spill] sm:$0xff] }
 0x25c   : > { %1981 = vmatpush.msra.mxu1 %v5474_v23  ;;  %1965 = vmatpush.msra.mxu0 %v5482_v26  ;;  %v8822_v23 = vld [vmem:[#allocation31_spill] sm:$0xff]  ;;  %v5890_v26 = vpop.f32.mrf.mxu1 }
 0x25d   : > { %2001 = vmatpush.msra.mxu2 %v5476_v24  ;;  %2021 = vmatpush.msra.mxu3 %v5480_v25  ;;  %v8823_v24 = vld [vmem:[#allocation40_spill] sm:$0xff] }
 0x25e   : > { %1982 = vmatpush.msra.mxu1 %v5486_v27  ;;  %1966 = vmatpush.msra.mxu0 %v5494_v30  ;;  %v8824_v25 = vld [vmem:[#allocation32_spill] sm:$0xff]  ;;  %v8825_v27 = vld [vmem:[#allocation33_spill] sm:$0xff] }
 0x25f   : > { %2002 = vmatpush.msra.mxu2 %v5488_v28  ;;  %2022 = vmatpush.msra.mxu3 %v5492_v29  ;;  %v8826_v28 = vld [vmem:[#allocation35_spill] sm:$0xff]  ;;  %v8827_v29 = vld [vmem:[#allocation44_spill] sm:$0xff]  ;;  %v8828_v30 = vld [vmem:[#allocation37_spill] sm:$0xff] }
 0x260   : > { %1983 = vmatpush.msra.mxu1 %v5498_v31  ;;  %1967 = vmatpush.msra.mxu0 %v5506_v35  ;;  %v8829_v31 = vld [vmem:[#allocation38_spill] sm:$0xff]  ;;  %v8832_v35 = vld [vmem:[#allocation41_spill] sm:$0xff] }
 0x261   : > { %2003 = vmatpush.msra.mxu2 %v5500_v32  ;;  %2023 = vmatpush.msra.mxu3 %v5504_v33  ;;  %v8830_v32 = vld [vmem:[#allocation39_spill] sm:$0xff]  ;;  %v8831_v33 = vld [vmem:[#allocation48_spill] sm:$0xff] }
 0x262   : > { %1984 = vmatpush.msra.mxu1 %v5510_v36  ;;  %1968 = vmatpush.msra.mxu0 %v5518_v18  ;;  %v5900_v36 = vpop.f32.mrf.mxu2  ;;  %v8834_v18 = vld [vmem:[#allocation43_spill] sm:$0xff] }
 0x263   : > { %2004 = vmatpush.msra.mxu2 %v5512_v37  ;;  %2024 = vmatpush.msra.mxu3 %v5516_v38  ;;  %v5902_v37 = vpop.f32.mrf.mxu0  ;;  %v8833_v38 = vld [vmem:[#allocation42_spill] sm:$0xff] }
 0x264   : > { %1985 = vmatpush.msra.mxu1 %v5522_v19  ;;  %1969 = vmatpush.msra.mxu0 %v5530_v9  ;;  %v8835_v19 = vld [vmem:[#allocation52_spill] sm:$0xff]  ;;  %v8838_v9 = vld [vmem:[#allocation47_spill] sm:$0xff] }
 0x265   : > { %2005 = vmatpush.msra.mxu2 %v5524_v34  ;;  %2025 = vmatpush.msra.mxu3 %v5528_v39  ;;  %v8836_v34 = vld [vmem:[#allocation45_spill] sm:$0xff]  ;;  %v8837_v39 = vld [vmem:[#allocation46_spill] sm:$0xff] }
 0x266   : > { %1986 = vmatpush.msra.mxu1 %v5534_v8  ;;  %1970 = vmatpush.msra.mxu0 %v5542_v42  ;;  %v5910_v8 = vpop.f32.mrf.mxu3  ;;  %v8841_v42 = vld [vmem:[#allocation50_spill] sm:$0xff] }
 0x267   : > { %2006 = vmatpush.msra.mxu2 %v5536_v40  ;;  %2026 = vmatpush.msra.mxu3 %v5540_v41  ;;  %v8839_v40 = vld [vmem:[#allocation56_spill] sm:$0xff]  ;;  %v8840_v41 = vld [vmem:[#allocation49_spill] sm:$0xff] }
 0x268   : > { %1987 = vmatpush.msra.mxu1 %v5546_v43  ;;  %1971 = vmatpush.msra.mxu0 %v5554_v46  ;;  %v8842_v43 = vld [vmem:[#allocation51_spill] sm:$0xff]  ;;  %v5921_v46 = vld [vmem:[%s8077_s8] sm:$0xf] }
 0x269   : > { %2007 = vmatpush.msra.mxu2 %v5548_v44  ;;  %2027 = vmatpush.msra.mxu3 %v5552_v45  ;;  %v8843_v44 = vld [vmem:[#allocation60_spill] sm:$0xff]  ;;  %v8844_v45 = vld [vmem:[#allocation53_spill] sm:$0xff] }
 0x26a   : > { %1988 = vmatpush.msra.mxu1 %v5558_v47  ;;  %1972 = vmatpush.msra.mxu0 %v8804_v54  ;;  %v5923_v47 = vpop.f32.mrf.mxu1  ;;  %v8849_v54 = vld [vmem:[#allocation58_spill] sm:$0xff] }
 0x26b   : > { %2008 = vmatpush.msra.mxu2 %v5560_v48  ;;  %2028 = vmatpush.msra.mxu3 %v5564_v50  ;;  %v8845_v48 = vld [vmem:[#allocation54_spill] sm:$0xff]  ;;  %v8846_v50 = vld [vmem:[#allocation55_spill] sm:$0xff] }
 0x26c   : > { %1989 = vmatpush.msra.mxu1 %v8805_v58  ;;  %2037 = vmatpush.msrb.mxu0 %v8808_v2  ;;  %v8850_v58 = vld [vmem:[#allocation59_spill] sm:$0xff]  ;;  %v8851_v2 = vld [vmem:[#allocation68_spill] sm:$0xff] }
 0x26d   : > { %2009 = vmatpush.msra.mxu2 %v8806_v62  ;;  %2029 = vmatpush.msra.mxu3 %v8807_v1  ;;  %v1315_v1 = vperm.slane %v5921_v46, 0 }
 0x26e   : > { %1990 = vmatpush.msra.mxu1 %v8809_v5  ;;  %2038 = vmatpush.msrb.mxu0 %v8812_v10  ;;  %v8852_v5 = vld [vmem:[#allocation61_spill] sm:$0xff]  ;;  %v8854_v10 = vld [vmem:[#allocation63_spill] sm:$0xff] }
 0x26f   : > { %2010 = vmatpush.msra.mxu2 %v8810_v6  ;;  %2030 = vmatpush.msra.mxu3 %v8811_v7  ;;  %v5934_v6 = vpop.f32.mrf.mxu2  ;;  %v8853_v7 = vld [vmem:[#allocation62_spill] sm:$0xff] }
 0x270   : > { %1991 = vmatpush.msra.mxu1 %v8813_v11  ;;  %2039 = vmatpush.msrb.mxu0 %v8816_v15  ;;  %v8855_v11 = vld [vmem:[#allocation72_spill] sm:$0xff]  ;;  %v8857_v15 = vld [vmem:[#allocation66_spill] sm:$0xff] }
 0x271   : > { %2011 = vmatpush.msra.mxu2 %v8814_v12  ;;  %2031 = vmatpush.msra.mxu3 %v8815_v14  ;;  %v8856_v12 = vld [vmem:[#allocation65_spill] sm:$0xff] }
 0x272   : > { %1992 = vmatpush.msra.mxu1 %v8817_v16  ;;  %1973 = vmatmul.f32.vlgmr.msra.gmra.mxu0 %v8820_v21  ;;  %v8858_v16 = vld [vmem:[#allocation67_spill] sm:$0xff] }
 0x273   : > { %2012 = vmatpush.msra.mxu2 %v8818_v17  ;;  %2032 = vmatpush.msra.mxu3 %v8819_v20  ;;  %v5944_v17 = vpop.f32.mrf.mxu3  ;;  %v8859_v20 = vld [vmem:[#allocation76_spill] sm:$0xff] }
 0x274   : > { %1993 = vmatmul.f32.vlgmr.msra.gmra.mxu1 %v8821_v22  ;;  %2013 = vmatmul.f32.vlgmr.msra.gmra.mxu2 %v8820_v21 }
 0x275   : > { %2033 = vmatmul.f32.vlgmr.msra.gmra.mxu3 %v8821_v22  ;;  %2040 = vmatpush.msrb.mxu0 %v8822_v23  ;;  %v8860_v23 = vld [vmem:[#allocation69_spill] sm:$0xff] }
 0x276   : > { %2057 = vmatpush.msrb.mxu1 %v8823_v24  ;;  %2077 = vmatpush.msrb.mxu2 %v8824_v25  ;;  %v8861_v24 = vld [vmem:[#allocation70_spill] sm:$0xff]  ;;  %v8862_v25 = vld [vmem:[#allocation71_spill] sm:$0xff] }
 0x277   : > { %2097 = vmatpush.msrb.mxu3 %v8825_v27  ;;  %2041 = vmatpush.msrb.mxu0 %v8826_v28  ;;  %v1504_v62 = vpop.f32.mrf.mxu0  ;;  %v8863_v28 = vld [vmem:[#allocation77_spill] sm:$0xff] }
 0x278   : > { %2058 = vmatpush.msrb.mxu1 %v8827_v29  ;;  %2078 = vmatpush.msrb.mxu2 %v8828_v30  ;;  %v1505_v14 = vadd.f32 %v1504_v62, %v1315_v1  ;;  %v8864_v29 = vld [vmem:[#allocation73_spill] sm:$0xff] }
 0x279   : > { %2098 = vmatpush.msrb.mxu3 %v8829_v31  ;;  %2042 = vmatpush.msrb.mxu0 %v8830_v32  ;;  %v8865_v31 = vld [vmem:[#allocation74_spill] sm:$0xff]  ;;  %v1316_v32 = vperm.slane %v5921_v46, 1  ;;  %v2293_v62 = vld [vmem:[#allocation7 + $0x540] sm:$0xff] }
 0x27a   : > { %2059 = vmatpush.msrb.mxu1 %v8831_v33  ;;  %2079 = vmatpush.msrb.mxu2 %v8832_v35  ;;  %v8866_v33 = vld [vmem:[#allocation75_spill] sm:$0xff]  ;;  %v8867_v35 = vld [vmem:[#allocation78_spill] sm:$0xff] }
 0x27b   : > { %2099 = vmatpush.msrb.mxu3 %v8833_v38  ;;  %2043 = vmatpush.msrb.mxu0 %v8834_v18  ;;  %v2185_v38 = vld [vmem:[#allocation7 + $0x1e0] sm:$0xff]  ;;  %v8868_v18 = vld [vmem:[#allocation79_spill] sm:$0xff] }
 0x27c   : > { %2060 = vmatpush.msrb.mxu1 %v8835_v19  ;;  %2080 = vmatpush.msrb.mxu2 %v8836_v34  ;;  %v8869_v34 = vld [vmem:[#allocation80_spill] sm:$0xff] }
 0x27d   : > { %2100 = vmatpush.msrb.mxu3 %v8837_v39  ;;  %2044 = vmatpush.msrb.mxu0 %v8838_v9  ;;  %v8870_v39 = vld [vmem:[#allocation81_spill] sm:$0xff] }
 0x27e   : > { %2061 = vmatpush.msrb.mxu1 %v8839_v40  ;;  %2081 = vmatpush.msrb.mxu2 %v8840_v41  ;;  %v1524_v27 = vpop.f32.mrf.mxu1  ;;  %v2181_v9 = vld [vmem:[#allocation7 + $0x1c0] sm:$0xff] }
 0x27f   : > { %2101 = vmatpush.msrb.mxu3 %v8841_v42  ;;  %2045 = vmatpush.msrb.mxu0 %v8842_v43  ;;  %v5952_v30 = vadd.f32 %v1524_v27, %v1505_v14  ;;  %v2177_v40 = vld [vmem:[#allocation7 + $0x1a0] sm:$0xff] }
 0x280   : > { %2062 = vmatpush.msrb.mxu1 %v8843_v44  ;;  %2082 = vmatpush.msrb.mxu2 %v8844_v45  ;;  %v2305_v42 = vld [vmem:[#allocation7 + $0x5a0] sm:$0xff] }
 0x281   : > { %2102 = vmatpush.msrb.mxu3 %v8845_v48  ;;  %2046 = vmatpush.msrb.mxu0 %v8846_v50  ;;  %v2161_v43 = vld [vmem:[#allocation7 + $0x120] sm:$0xff] }
 0x282   : > { %2063 = vmatpush.msrb.mxu1 %v8847_v63  ;;  %2083 = vmatpush.msrb.mxu2 %v8848_v3  ;;  %v1544_v19 = vpop.f32.mrf.mxu2  ;;  %v2369_v44 = vld [vmem:[#allocation7 + $0x7a0] sm:$0xff] }
 0x283   : > { %2103 = vmatpush.msrb.mxu3 %v8849_v54  ;;  %2047 = vmatpush.msrb.mxu0 %v8850_v58  ;;  %v2301_v45 = vld [vmem:[#allocation7 + $0x580] sm:$0xff] }
 0x284   : > { %2064 = vmatpush.msrb.mxu1 %v8851_v2  ;;  %2084 = vmatpush.msrb.mxu2 %v8852_v5  ;;  %v2365_v48 = vld [vmem:[#allocation7 + $0x780] sm:$0xff] }
 0x285   : > { %2104 = vmatpush.msrb.mxu3 %v8853_v7  ;;  %2048 = vmatpush.msrb.mxu0 %v8854_v10  ;;  %v2233_v50 = vld [vmem:[#allocation7 + $0x360] sm:$0xff]  ;;  %v1317_v7 = vperm.slane %v5921_v46, 2 }
 0x286   : > { %2065 = vmatpush.msrb.mxu1 %v8855_v11  ;;  %2085 = vmatpush.msrb.mxu2 %v8856_v12  ;;  %v2297_v63 = vld [vmem:[#allocation7 + $0x560] sm:$0xff] }
 0x287   : > { %2105 = vmatpush.msrb.mxu3 %v8857_v15  ;;  %2049 = vmatpush.msrb.mxu0 %v8858_v16  ;;  %v2153_v3 = vld [vmem:[#allocation7 + $0xe0] sm:$0xff] }
 0x288   : > { %2066 = vmatpush.msrb.mxu1 %v8859_v20  ;;  %2086 = vmatpush.msrb.mxu2 %v8860_v23  ;;  %v2361_v54 = vld [vmem:[#allocation7 + $0x760] sm:$0xff] }
 0x289   : > { %2106 = vmatpush.msrb.mxu3 %v8861_v24  ;;  %2050 = vmatpush.msrb.mxu0 %v8862_v25  ;;  %v2229_v58 = vld [vmem:[#allocation7 + $0x340] sm:$0xff] }
 0x28a   : > { %2067 = vmatpush.msrb.mxu1 %v8863_v28  ;;  %2087 = vmatpush.msrb.mxu2 %v8864_v29  ;;  %v2149_v2 = vld [vmem:[#allocation7 + $0xc0] sm:$0xff] }
 0x28b   : > { %2107 = vmatpush.msrb.mxu3 %v5752_v51  ;;  %2051 = vmatpush.msrb.mxu0 %v8865_v31  ;;  %v1545_v51 = vadd.f32 %v1544_v19, %v1316_v32  ;;  %v2357_v5 = vld [vmem:[#allocation7 + $0x740] sm:$0xff]  ;;  %v1341_v19 = vadd.f32 %v5876_v13, %v1315_v1 }
 0x28c   : > { %2068 = vmatpush.msrb.mxu1 %v8866_v33  ;;  %2088 = vmatpush.msrb.mxu2 %v8867_v35  ;;  %v2225_v10 = vld [vmem:[#allocation7 + $0x320] sm:$0xff] }
 0x28d   : > { %2108 = vmatpush.msrb.mxu3 %v5764_v4  ;;  %2052 = vmatpush.msrb.mxu0 %v8868_v18  ;;  %v1564_v4 = vpop.f32.mrf.mxu3  ;;  %v2289_v11 = vld [vmem:[#allocation7 + $0x520] sm:$0xff] }
 0x28e   : > { %2069 = vmatpush.msrb.mxu1 %v8869_v34  ;;  %2089 = vmatpush.msrb.mxu2 %v8870_v39  ;;  %v5969_v41 = vadd.f32 %v1564_v4, %v1545_v51  ;;  %v2145_v12 = vld [vmem:[#allocation7 + $0xa0] sm:$0xff]  ;;  %v1318_v34 = vperm.slane %v5921_v46, 3 }
 0x28f   : > { %2109 = vmatpush.msrb.mxu3 %v5776_v55  ;;  %2411 = vmatpush.msra.mxu0 %v2185_v38  ;;  %v2249_v55 = vld [vmem:[#allocation7 + $0x3e0] sm:$0xff] }
 0x290   : > { %2070 = vmatpush.msrb.mxu1 %v5780_v52  ;;  %2090 = vmatpush.msrb.mxu2 %v5782_v59  ;;  %v2173_v52 = vld [vmem:[#allocation7 + $0x180] sm:$0xff] }
 0x291   : > { %2110 = vmatpush.msrb.mxu3 %v5786_v61  ;;  %2412 = vmatpush.msra.mxu0 %v2181_v9  ;;  %v2313_v59 = vld [vmem:[#allocation7 + $0x5e0] sm:$0xff] }
 0x292   : > { %2071 = vmatpush.msrb.mxu1 %v5790_v0  ;;  %2091 = vmatpush.msrb.mxu2 %v5792_v60  ;;  %v2169_v61 = vld [vmem:[#allocation7 + $0x160] sm:$0xff] }
 0x293   : > { %2111 = vmatpush.msrb.mxu3 %v5796_v53  ;;  %2413 = vmatpush.msra.mxu0 %v2177_v40  ;;  %v2377_v60 = vld [vmem:[#allocation7 + $0x7e0] sm:$0xff] }
 0x294   : > { %2072 = vmatpush.msrb.mxu1 %v5800_v57  ;;  %2092 = vmatpush.msrb.mxu2 %v5802_v56  ;;  %v2245_v53 = vld [vmem:[#allocation7 + $0x3c0] sm:$0xff] }
 0x295   : > { %2112 = vmatpush.msrb.mxu3 %v5806_v49  ;;  %2053 = vmatmul.f32.vlgmr.msrb.gmra.mxu0 %v8820_v21  ;;  %v2309_v57 = vld [vmem:[#allocation7 + $0x5c0] sm:$0xff] }
 0x296   : > { %2073 = vmatmul.f32.vlgmr.msrb.gmra.mxu1 %v8821_v22  ;;  %2093 = vmatmul.f32.vlgmr.msrb.gmra.mxu2 %v8820_v21  ;;  %v2165_v56 = vld [vmem:[#allocation7 + $0x140] sm:$0xff] }
 0x297   : > { %2113 = vmatmul.f32.vlgmr.msrb.gmra.mxu3 %v8821_v22  ;;  %2414 = vmatpush.msra.mxu0 %v2173_v52  ;;  %v2373_v0 = vld [vmem:[#allocation7 + $0x7c0] sm:$0xff]  ;;  %v1584_v14 = vpop.f32.mrf.mxu0  ;;  %v1361_v52 = vadd.f32 %v5890_v26, %v1341_v19  ;;  %v6019_v19 = vld [vmem:[#allocation7 + $0x148] sm:$0xff] }
 0x298   : > { %2431 = vmatpush.msra.mxu1 %v2249_v55  ;;  %2451 = vmatpush.msra.mxu2 %v2313_v59  ;;  %v2241_v49 = vld [vmem:[#allocation7 + $0x3a0] sm:$0xff]  ;;  %v1585_v20 = vadd.f32 %v1584_v14, %v1317_v7  ;;  %v1604_v23 = vpop.f32.mrf.mxu1  ;;  %v2174_v14 = vld [vmem:[#allocation7 + $0x188] sm:$0xff] }
 0x299   : > { %2415 = vmatpush.msra.mxu0 %v2169_v61  ;;  %2471 = vmatpush.msra.mxu3 %v2377_v60  ;;  %v2237_v21 = vld [vmem:[#allocation7 + $0x380] sm:$0xff] }
 0x29a   : > { %2432 = vmatpush.msra.mxu1 %v2245_v53  ;;  %2452 = vmatpush.msra.mxu2 %v2309_v57  ;;  %v2157_v22 = vld [vmem:[#allocation7 + $0x100] sm:$0xff]  ;;  %v5984_v29 = vadd.f32 %v1604_v23, %v1585_v20 }
 0x29b   : > { %2416 = vmatpush.msra.mxu0 %v2165_v56  ;;  %2472 = vmatpush.msra.mxu3 %v2373_v0  ;;  %v2353_v15 = vld [vmem:[#allocation7 + $0x720] sm:$0xff] }
 0x29c   : > { %2433 = vmatpush.msra.mxu1 %v2241_v49  ;;  %2453 = vmatpush.msra.mxu2 %v2305_v42  ;;  %v2221_v16 = vld [vmem:[#allocation7 + $0x300] sm:$0xff]  ;;  %v2186_v42 = vld [vmem:[#allocation7 + $0x1e8] sm:$0xff] }
 0x29d   : > { %2417 = vmatpush.msra.mxu0 %v2161_v43  ;;  %2473 = vmatpush.msra.mxu3 %v2369_v44  ;;  %v2285_v24 = vld [vmem:[#allocation7 + $0x500] sm:$0xff]  ;;  %v1483_v44 = vmax.f32 %v1361_v52, 0.0  ;;  %v6025_v52 = vld [vmem:[#allocation7 + $0x128] sm:$0xff] }
 0x29e   : > { %2434 = vmatpush.msra.mxu1 %v2237_v21  ;;  %2454 = vmatpush.msra.mxu2 %v2301_v45  ;;  %v2141_v25 = vld [vmem:[#allocation7 + $0x80] sm:$0xff]  ;;  %v1624_v40 = vpop.f32.mrf.mxu2 }
 0x29f   : > { %2418 = vmatpush.msra.mxu0 %v2157_v22  ;;  %2474 = vmatpush.msra.mxu3 %v2365_v48  ;;  %v2349_v27 = vld [vmem:[#allocation7 + $0x700] sm:$0xff]  ;;  %v1625_v59 = vadd.f32 %v1624_v40, %v1318_v34  ;;  %v1644_v61 = vpop.f32.mrf.mxu3  ;;  %v2378_v40 = vld [vmem:[#allocation7 + $0x7e8] sm:$0xff] }
 0x2a0   : > { %2435 = vmatpush.msra.mxu1 %v2233_v50  ;;  %2455 = vmatpush.msra.mxu2 %v2297_v63  ;;  %v2217_v28 = vld [vmem:[#allocation7 + $0x2e0] sm:$0xff]  ;;  %v1381_v50 = vadd.f32 %v5900_v36, %v1316_v32 }
 0x2a1   : > { %2419 = vmatpush.msra.mxu0 %v2153_v3  ;;  %2475 = vmatpush.msra.mxu3 %v2361_v54  ;;  %v2281_v31 = vld [vmem:[#allocation7 + $0x4e0] sm:$0xff]  ;;  %v5998_v26 = vadd.f32 %v1644_v61, %v1625_v59  ;;  %v1797_v56 = vpop.f32.mrf.mxu0  ;;  %v2182_v3 = vld [vmem:[#allocation7 + $0x1c8] sm:$0xff] }
 0x2a2   : > { %2436 = vmatpush.msra.mxu1 %v2229_v58  ;;  %2456 = vmatpush.msra.mxu2 %v2293_v62  ;;  %v2137_v33 = vld [vmem:[#allocation7 + $0x60] sm:$0xff]  ;;  %v1817_v43 = vpop.f32.mrf.mxu1  ;;  %v2306_v59 = vld [vmem:[#allocation7 + $0x5a8] sm:$0xff] }
 0x2a3   : > { %2420 = vmatpush.msra.mxu0 %v2149_v2  ;;  %2476 = vmatpush.msra.mxu3 %v2357_v5  ;;  %v2345_v35 = vld [vmem:[#allocation7 + $0x6e0] sm:$0xff]  ;;  %8872 = vst [vmem:[#allocation83_spill] sm:$0xff] %v5998_v26  ;;  %v1818_v21 = vadd.f32 %v1817_v43, %v1797_v56  ;;  %v1401_v2 = vadd.f32 %v5910_v8, %v1381_v50  ;;  %v6009_v8 = vld [vmem:[#allocation7 + $0x3e8] sm:$0xff] }
 0x2a4   : > { %2437 = vmatpush.msra.mxu1 %v2225_v10  ;;  %2457 = vmatpush.msra.mxu2 %v2289_v11  ;;  %v2213_v38 = vld [vmem:[#allocation7 + $0x2c0] sm:$0xff]  ;;  %v2178_v10 = vld [vmem:[#allocation7 + $0x1a8] sm:$0xff] }
 0x2a5   : > { %2421 = vmatpush.msra.mxu0 %v2145_v12  ;;  %2477 = vmatpush.msra.mxu3 %v2353_v15  ;;  %v2277_v18 = vld [vmem:[#allocation7 + $0x4c0] sm:$0xff]  ;;  %v1940_v54 = vadd.f32 %v1818_v21, %v1483_v44  ;;  %v6032_v61 = vld [vmem:[#allocation7 + $0x388] sm:$0xff] }
 0x2a6   : > { %2438 = vmatpush.msra.mxu1 %v2221_v16  ;;  %2458 = vmatpush.msra.mxu2 %v2285_v24  ;;  %v2133_v39 = vld [vmem:[#allocation7 + $0x40] sm:$0xff]  ;;  %v1484_v24 = vmax.f32 %v1401_v2, 0.0  ;;  %v2302_v56 = vld [vmem:[#allocation7 + $0x588] sm:$0xff] }
 0x2a7   : > { %2422 = vmatpush.msra.mxu0 %v2141_v25  ;;  %2478 = vmatpush.msra.mxu3 %v2349_v27  ;;  %v2341_v9 = vld [vmem:[#allocation7 + $0x6c0] sm:$0xff]  ;;  %v6013_v27 = vld [vmem:[#allocation7 + $0x168] sm:$0xff] }
 0x2a8   : > { %2439 = vmatpush.msra.mxu1 %v2217_v28  ;;  %2459 = vmatpush.msra.mxu2 %v2281_v31  ;;  %v2209_v51 = vld [vmem:[#allocation7 + $0x2a0] sm:$0xff]  ;;  %v1837_v15 = vpop.f32.mrf.mxu2  ;;  %v6043_v43 = vld [vmem:[#allocation7 + $0xe8] sm:$0xff] }
 0x2a9   : > { %2423 = vmatpush.msra.mxu0 %v2137_v33  ;;  %v2273_v4 = vld [vmem:[#allocation7 + $0x4a0] sm:$0xff]  ;;  %2479 = vmatpush.msra.mxu3 %v2345_v35  ;;  %v1857_v20 = vpop.f32.mrf.mxu3  ;;  %v2314_v33 = vld [vmem:[#allocation7 + $0x5e8] sm:$0xff] }
 0x2aa   : > { %2440 = vmatpush.msra.mxu1 %v2213_v38  ;;  %v2129_v55 = vld [vmem:[#allocation7 + $0x20] sm:$0xff]  ;;  %2460 = vmatpush.msra.mxu2 %v2277_v18  ;;  %v1858_v28 = vadd.f32 %v1857_v20, %v1837_v15  ;;  %v6016_v35 = vld [vmem:[#allocation7 + $0x3c8] sm:$0xff] }
 0x2ab   : > { %v2337_v13 = vld [vmem:[#allocation7 + $0x6a0] sm:$0xff]  ;;  %2424 = vmatpush.msra.mxu0 %v2133_v39  ;;  %2480 = vmatpush.msra.mxu3 %v2341_v9  ;;  %v2310_v9 = vld [vmem:[#allocation7 + $0x5c8] sm:$0xff] }
 0x2ac   : > { %v2205_v1 = vld [vmem:[#allocation7 + $0x280] sm:$0xff]  ;;  %2441 = vmatpush.msra.mxu1 %v2209_v51  ;;  %2461 = vmatpush.msra.mxu2 %v2273_v4  ;;  %v1941_v39 = vadd.f32 %v1858_v28, %v1484_v24  ;;  %v6022_v51 = vld [vmem:[#allocation7 + $0x3a8] sm:$0xff] }
 0x2ad   : > { %v5996_v60 = vld [vmem:[%s8079_s10] sm:$0xf]  ;;  %2425 = vmatpush.msra.mxu0 %v2129_v55  ;;  %2481 = vmatpush.msra.mxu3 %v2337_v13  ;;  %v2374_v13 = vld [vmem:[#allocation7 + $0x7c8] sm:$0xff] }
 0x2ae   : > { %8871 = vst [vmem:[#allocation82_spill] sm:$0xff] %v5996_v60  ;;  %v2269_v53 = vld [vmem:[#allocation7 + $0x480] sm:$0xff]  ;;  %2442 = vmatpush.msra.mxu1 %v2205_v1  ;;  %v8247_v45 = vperm.slane %v5996_v60, 0  ;;  %v8246_v31 = vperm.slane %v5996_v60, 1  ;;  %v2298_v21 = vld [vmem:[#allocation7 + $0x568] sm:$0xff] }
 0x2af   : > { %v2125_v57 = vld [vmem:[#allocation7] sm:$0xff]  ;;  %2462 = vmatpush.msra.mxu2 %v2269_v53  ;;  %v6037_v53 = vld [vmem:[#allocation7 + $0x108] sm:$0xff] }
 0x2b0   : > { %v2333_v0 = vld [vmem:[#allocation7 + $0x680] sm:$0xff]  ;;  %2426 = vmatpush.msra.mxu0 %v2125_v57  ;;  %v6007_v36 = vadd.f32 %v8247_v45, %v1940_v54  ;;  %v6029_v55 = vadd.f32 %v8246_v31, %v1941_v39  ;;  %v6049_v50 = vld [vmem:[#allocation7 + $0xc8] sm:$0xff]  ;;  %v8251_v45 = vperm.slane %v5996_v60, 2 }
 0x2b1   : > { %v2201_v49 = vld [vmem:[#allocation7 + $0x260] sm:$0xff]  ;;  %2482 = vmatpush.msra.mxu3 %v2333_v0  ;;  %v6061_v2 = vld [vmem:[#allocation7 + $0xa8] sm:$0xff] }
 0x2b2   : > { %v2265_v22 = vld [vmem:[#allocation7 + $0x460] sm:$0xff]  ;;  %2443 = vmatpush.msra.mxu1 %v2201_v49  ;;  %2491 = vmatpush.msrb.mxu0 %v2186_v42  ;;  %8873 = vst [vmem:[#allocation84_spill] sm:$0xff] %v6007_v36  ;;  %v2383_v16 = vsel %vm628_vm0, %v6007_v36, 0.0  ;;  %v2390_v1 = vsel %vm628_vm0, %v6029_v55, 0.0  ;;  %v6040_v49 = vld [vmem:[#allocation7 + $0x368] sm:$0xff]  ;;  %v6167_v36 = vld [vmem:[#allocation7 + $0x190] sm:$0xff] }
 0x2b3   : > { %v2329_v48 = vld [vmem:[#allocation7 + $0x660] sm:$0xff]  ;;  %2463 = vmatpush.msra.mxu2 %v2265_v22  ;;  %v2384_v25 = vrot.slane %v2383_v16, 4  ;;  %8874 = vst [vmem:[#allocation85_spill] sm:$0xff] %v6029_v55  ;;  %v2391_v0 = vrot.slane %v2390_v1, 4  ;;  %v2370_v42 = vld [vmem:[#allocation7 + $0x7a8] sm:$0xff] }
 0x2b4   : > { %v2197_v63 = vld [vmem:[#allocation7 + $0x240] sm:$0xff]  ;;  %2483 = vmatpush.msra.mxu3 %v2329_v48  ;;  %2492 = vmatpush.msrb.mxu0 %v2182_v3  ;;  %v6046_v48 = vld [vmem:[#allocation7 + $0x348] sm:$0xff]  ;;  %8882 = vst [vmem:[#allocation93_spill] sm:$0xff] %v6167_v36 }
 0x2b5   : > { %v2261_v58 = vld [vmem:[#allocation7 + $0x440] sm:$0xff]  ;;  %2444 = vmatpush.msra.mxu1 %v2197_v63  ;;  %v2385_v18 = vadd.f32 %v2384_v25, %v2383_v16  ;;  %v2392_v22 = vadd.f32 %v2391_v0, %v2390_v1  ;;  %v6053_v3 = vld [vmem:[#allocation7 + $0x548] sm:$0xff] }
 0x2b6   : > { %v2325_v62 = vld [vmem:[#allocation7 + $0x640] sm:$0xff]  ;;  %2464 = vmatpush.msra.mxu2 %v2261_v58  ;;  %2493 = vmatpush.msrb.mxu0 %v2178_v10  ;;  %v6056_v58 = vld [vmem:[#allocation7 + $0x328] sm:$0xff] }
 0x2b7   : > { %v2193_v5 = vld [vmem:[#allocation7 + $0x220] sm:$0xff]  ;;  %2484 = vmatpush.msra.mxu3 %v2325_v62  ;;  %v2386_v4 = vrot.slane %v2385_v18, 2  ;;  %v2393_v54 = vrot.slane %v2392_v22, 2  ;;  %v6058_v62 = vld [vmem:[#allocation7 + $0x788] sm:$0xff] }
 0x2b8   : > { %v2257_v32 = vld [vmem:[#allocation7 + $0x420] sm:$0xff]  ;;  %2445 = vmatpush.msra.mxu1 %v2193_v5  ;;  %2494 = vmatpush.msrb.mxu0 %v2174_v14  ;;  %v6064_v5 = vld [vmem:[#allocation7 + $0x528] sm:$0xff] }
 0x2b9   : > { %v2321_v11 = vld [vmem:[#allocation7 + $0x620] sm:$0xff]  ;;  %2465 = vmatpush.msra.mxu2 %v2257_v32  ;;  %v2387_v57 = vadd.f32 %v2386_v4, %v2385_v18  ;;  %v6067_v10 = vld [vmem:[#allocation7 + $0x308] sm:$0xff]  ;;  %v2394_v32 = vadd.f32 %v2393_v54, %v2392_v22  ;;  %v1421_v4 = vadd.f32 %v5902_v37, %v1317_v7  ;;  %v2187_v7 = vld [vmem:[#allocation7 + $0x1f0] sm:$0xff] }
 0x2ba   : > { %v2189_v12 = vld [vmem:[#allocation7 + $0x200] sm:$0xff]  ;;  %2485 = vmatpush.msra.mxu3 %v2321_v11  ;;  %2495 = vmatpush.msrb.mxu0 %v6013_v27  ;;  %v6070_v11 = vld [vmem:[#allocation7 + $0x768] sm:$0xff] }
 0x2bb   : > { %v2253_v23 = vld [vmem:[#allocation7 + $0x400] sm:$0xff]  ;;  %2446 = vmatpush.msra.mxu1 %v2189_v12  ;;  %v2388_v44 = vrot.slane %v2387_v57, 1  ;;  %v6073_v12 = vld [vmem:[#allocation7 + $0x88] sm:$0xff]  ;;  %v2395_v16 = vrot.slane %v2394_v32, 1 }
 0x2bc   : > { %v2317_v38 = vld [vmem:[#allocation7 + $0x600] sm:$0xff]  ;;  %2466 = vmatpush.msra.mxu2 %v2253_v23  ;;  %2496 = vmatpush.msrb.mxu0 %v6019_v19  ;;  %v6076_v14 = vld [vmem:[#allocation7 + $0x508] sm:$0xff] }
 0x2bd   : > { %2511 = vmatpush.msrb.mxu1 %v6009_v8  ;;  %2486 = vmatpush.msra.mxu3 %v2317_v38  ;;  %v6051_v63 = vadd.f32 %v2388_v44, %v2387_v57  ;;  %v6079_v15 = vld [vmem:[#allocation7 + $0x2e8] sm:$0xff]  ;;  %v6091_v25 = vadd.f32 %v2395_v16, %v2394_v32  ;;  %v6141_v44 = vld [vmem:[#allocation7 + $0x1d0] sm:$0xff] }
 0x2be   : > { %2531 = vmatpush.msrb.mxu2 %v2314_v33  ;;  %2497 = vmatpush.msrb.mxu0 %v6025_v52  ;;  %v6082_v20 = vld [vmem:[#allocation7 + $0x748] sm:$0xff]  ;;  %8876 = vst [vmem:[#allocation87_spill] sm:$0xff] %v6141_v44 }
 0x2bf   : > { %2512 = vmatpush.msrb.mxu1 %v6016_v35  ;;  %2551 = vmatpush.msrb.mxu3 %v2378_v40  ;;  %v6085_v23 = vld [vmem:[#allocation7 + $0x68] sm:$0xff] }
 0x2c0   : > { %2532 = vmatpush.msrb.mxu2 %v2310_v9  ;;  %2498 = vmatpush.msrb.mxu0 %v6037_v53  ;;  %v6089_v24 = vld [vmem:[#allocation7 + $0x2c8] sm:$0xff] }
 0x2c1   : > { %2513 = vmatpush.msrb.mxu1 %v6022_v51  ;;  %2552 = vmatpush.msrb.mxu3 %v2374_v13  ;;  %v6094_v28 = vld [vmem:[#allocation7 + $0x4e8] sm:$0xff] }
 0x2c2   : > { %2533 = vmatpush.msrb.mxu2 %v2306_v59  ;;  %2499 = vmatpush.msrb.mxu0 %v6043_v43  ;;  %v6097_v33 = vld [vmem:[#allocation7 + $0x48] sm:$0xff] }
 0x2c3   : > { %2514 = vmatpush.msrb.mxu1 %v6032_v61  ;;  %2553 = vmatpush.msrb.mxu3 %v2370_v42  ;;  %v6100_v38 = vld [vmem:[#allocation7 + $0x728] sm:$0xff] }
 0x2c4   : > { %2534 = vmatpush.msrb.mxu2 %v2302_v56  ;;  %2427 = vmatmul.f32.vlgmr.msra.gmra.mxu0 %v6051_v63  ;;  %v6103_v18 = vld [vmem:[#allocation7 + $0x2a8] sm:$0xff]  ;;  %v1441_v56 = vadd.f32 %v5923_v47, %v1421_v4  ;;  %v6152_v4 = vld [vmem:[#allocation7 + $0x1b0] sm:$0xff] }
 0x2c5   : > { %2515 = vmatpush.msrb.mxu1 %v6040_v49  ;;  %2500 = vmatpush.msrb.mxu0 %v6049_v50  ;;  %v6106_v39 = vld [vmem:[#allocation7 + $0x4c8] sm:$0xff]  ;;  %v1877_v47 = vpop.f32.mrf.mxu0  ;;  %8879 = vst [vmem:[#allocation90_spill] sm:$0xff] %v6152_v4 }
 0x2c6   : > { %2535 = vmatpush.msrb.mxu2 %v2298_v21  ;;  %2554 = vmatpush.msrb.mxu3 %v6058_v62  ;;  %v6109_v9 = vld [vmem:[#allocation7 + $0x28] sm:$0xff]  ;;  %v1485_v32 = vmax.f32 %v1441_v56, 0.0 }
 0x2c7   : > { %2516 = vmatpush.msrb.mxu1 %v6046_v48  ;;  %2501 = vmatpush.msrb.mxu0 %v6061_v2  ;;  %v6112_v40 = vld [vmem:[#allocation7 + $0x708] sm:$0xff] }
 0x2c8   : > { %2536 = vmatpush.msrb.mxu2 %v6053_v3  ;;  %2555 = vmatpush.msrb.mxu3 %v6070_v11  ;;  %v6118_v59 = vld [vmem:[#allocation7 + $0x288] sm:$0xff] }
 0x2c9   : > { %2517 = vmatpush.msrb.mxu1 %v6056_v58  ;;  %2502 = vmatpush.msrb.mxu0 %v6073_v12  ;;  %v6121_v13 = vld [vmem:[#allocation7 + $0x4a8] sm:$0xff] }
 0x2ca   : > { %2537 = vmatpush.msrb.mxu2 %v6064_v5  ;;  %2556 = vmatpush.msrb.mxu3 %v6082_v20  ;;  %v6124_v1 = vld [vmem:[#allocation7 + $0x8] sm:$0xff] }
 0x2cb   : > { %2518 = vmatpush.msrb.mxu1 %v6067_v10  ;;  %2503 = vmatpush.msrb.mxu0 %v6085_v23  ;;  %v6127_v57 = vld [vmem:[#allocation7 + $0x6e8] sm:$0xff] }
 0x2cc   : > { %2538 = vmatpush.msrb.mxu2 %v6076_v14  ;;  %2447 = vmatmul.f32.vlgmr.msra.gmra.mxu1 %v6091_v25  ;;  %8875 = vst [vmem:[#allocation86_spill] sm:$0xff] %v6127_v57  ;;  %v6131_v37 = vld [vmem:[#allocation7 + $0x268] sm:$0xff] }
 0x2cd   : > { %2519 = vmatpush.msrb.mxu1 %v6079_v15  ;;  %2504 = vmatpush.msrb.mxu0 %v6097_v33  ;;  %v6136_v0 = vld [vmem:[#allocation7 + $0x488] sm:$0xff] }
 0x2ce   : > { %2539 = vmatpush.msrb.mxu2 %v6094_v28  ;;  %2557 = vmatpush.msrb.mxu3 %v6100_v38  ;;  %v6139_v42 = vld [vmem:[#allocation7 + $0x248] sm:$0xff] }
 0x2cf   : > { %2520 = vmatpush.msrb.mxu1 %v6089_v24  ;;  %2505 = vmatpush.msrb.mxu0 %v6109_v9  ;;  %v6145_v22 = vld [vmem:[#allocation7 + $0x468] sm:$0xff] }
 0x2d0   : > { %2540 = vmatpush.msrb.mxu2 %v6106_v39  ;;  %2558 = vmatpush.msrb.mxu3 %v6112_v40  ;;  %v1897_v21 = vpop.f32.mrf.mxu1  ;;  %8877 = vst [vmem:[#allocation88_spill] sm:$0xff] %v6145_v22  ;;  %v6147_v54 = vld [vmem:[#allocation7 + $0x6c8] sm:$0xff] }
 0x2d1   : > { %2521 = vmatpush.msrb.mxu1 %v6103_v18  ;;  %2506 = vmatpush.msrb.mxu0 %v6124_v1  ;;  %8878 = vst [vmem:[#allocation89_spill] sm:$0xff] %v6147_v54  ;;  %v6149_v16 = vld [vmem:[#allocation7 + $0x228] sm:$0xff]  ;;  %v1898_v31 = vadd.f32 %v1897_v21, %v1877_v47 }
 0x2d2   : > { %2541 = vmatpush.msrb.mxu2 %v6121_v13  ;;  %2559 = vmatpush.msrb.mxu3 %v6127_v57  ;;  %v6161_v56 = vld [vmem:[#allocation7 + $0x448] sm:$0xff] }
 0x2d3   : > { %2522 = vmatpush.msrb.mxu1 %v6118_v59  ;;  %2571 = vmatpush.msra.mxu0 %v2187_v7  ;;  %v1461_v7 = vadd.f32 %v5934_v6, %v1318_v34  ;;  %8880 = vst [vmem:[#allocation91_spill] sm:$0xff] %v6161_v56  ;;  %v6163_v26 = vld [vmem:[#allocation7 + $0x6a8] sm:$0xff]  ;;  %v1942_v47 = vadd.f32 %v1898_v31, %v1485_v32  ;;  %v6174_v6 = vld [vmem:[#allocation7 + $0x3f0] sm:$0xff] }
 0x2d4   : > { %2507 = vmatmul.f32.vlgmr.msrb.gmra.mxu0 %v6051_v63  ;;  %2542 = vmatpush.msrb.mxu2 %v6136_v0  ;;  %8881 = vst [vmem:[#allocation92_spill] sm:$0xff] %v6163_v26  ;;  %v6165_v55 = vld [vmem:[#allocation7 + $0x208] sm:$0xff] }
 0x2d5   : > { %2523 = vmatpush.msrb.mxu1 %v6131_v37  ;;  %2572 = vmatpush.msra.mxu0 %v6141_v44  ;;  %v1481_v46 = vadd.f32 %v5944_v17, %v1461_v7  ;;  %8883 = vst [vmem:[#allocation94_spill] sm:$0xff] %v6174_v6  ;;  %v6176_v34 = vld [vmem:[#allocation7 + $0x428] sm:$0xff]  ;;  %v6180_v21 = vadd.f32 %v8251_v45, %v1942_v47  ;;  %v6182_v44 = vld [vmem:[#allocation7 + $0x170] sm:$0xff] }
 0x2d6   : > { %2543 = vmatpush.msrb.mxu2 %v6145_v22  ;;  %2560 = vmatpush.msrb.mxu3 %v6147_v54  ;;  %8884 = vst [vmem:[#allocation95_spill] sm:$0xff] %v6176_v34  ;;  %v6188_v17 = vld [vmem:[#allocation7 + $0x3d0] sm:$0xff]  ;;  %v1917_v31 = vpop.f32.mrf.mxu2  ;;  %v6190_v32 = vld [vmem:[#allocation7 + $0x688] sm:$0xff] }
 0x2d7   : > { %2524 = vmatpush.msrb.mxu1 %v6139_v42  ;;  %2573 = vmatpush.msra.mxu0 %v6152_v4  ;;  %8885 = vst [vmem:[#allocation96_spill] sm:$0xff] %v6180_v21  ;;  %v2397_v7 = vsel %vm628_vm0, %v6180_v21, 0.0  ;;  %v6195_v47 = vld [vmem:[#allocation7 + $0x150] sm:$0xff]  ;;  %v1937_v45 = vpop.f32.mrf.mxu3  ;;  %v6198_v4 = vld [vmem:[#allocation7 + $0x408] sm:$0xff] }
 0x2d8   : > { %8886 = vst [vmem:[#allocation97_spill] sm:$0xff] %v6182_v44  ;;  %2544 = vmatpush.msrb.mxu2 %v6161_v56  ;;  %2561 = vmatpush.msrb.mxu3 %v6163_v26  ;;  %v1486_v26 = vmax.f32 %v1481_v46, 0.0  ;;  %v2398_v54 = vrot.slane %v2397_v7, 4  ;;  %v1938_v56 = vadd.f32 %v1937_v45, %v1917_v31  ;;  %v6205_v57 = vld [vmem:[#allocation7 + $0x668] sm:$0xff]  ;;  %v6208_v21 = vld [vmem:[#allocation7 + $0x130] sm:$0xff] }
 0x2d9   : > { %2525 = vmatpush.msrb.mxu1 %v6149_v16  ;;  %2574 = vmatpush.msra.mxu0 %v6167_v36  ;;  %8887 = vst [vmem:[#allocation98_spill] sm:$0xff] %v6188_v17  ;;  %v6202_v36 = vld [vmem:[#allocation7 + $0x3b0] sm:$0xff]  ;;  %v6215_v22 = vld [vmem:[#allocation7 + $0x648] sm:$0xff] }
 0x2da   : > { %8888 = vst [vmem:[#allocation99_spill] sm:$0xff] %v6195_v47  ;;  %2545 = vmatpush.msrb.mxu2 %v6176_v34  ;;  %2562 = vmatpush.msrb.mxu3 %v6190_v32  ;;  %v2399_v34 = vadd.f32 %v2398_v54, %v2397_v7  ;;  %v6212_v46 = vld [vmem:[#allocation7 + $0x390] sm:$0xff] }
 0x2db   : > { %2526 = vmatpush.msrb.mxu1 %v6165_v55  ;;  %2575 = vmatpush.msra.mxu0 %v6182_v44  ;;  %8889 = vst [vmem:[#allocation100_spill] sm:$0xff] %v6202_v36  ;;  %v1943_v44 = vadd.f32 %v1938_v56, %v1486_v26  ;;  %v6218_v45 = vld [vmem:[#allocation7 + $0x110] sm:$0xff]  ;;  %v6228_v26 = vld [vmem:[#allocation7 + $0x628] sm:$0xff] }
 0x2dc   : > { %2527 = vmatmul.f32.vlgmr.msrb.gmra.mxu1 %v6091_v25  ;;  %8890 = vst [vmem:[#allocation101_spill] sm:$0xff] %v6208_v21  ;;  %2546 = vmatpush.msrb.mxu2 %v6198_v4  ;;  %v2400_v31 = vrot.slane %v2399_v34, 2  ;;  %v6226_v7 = vld [vmem:[#allocation7 + $0x370] sm:$0xff] }
 0x2dd   : > { %2591 = vmatpush.msra.mxu1 %v6174_v6  ;;  %v8267_v6 = vperm.slane %v5996_v60, 3  ;;  %2576 = vmatpush.msra.mxu0 %v6195_v47  ;;  %8891 = vst [vmem:[#allocation102_spill] sm:$0xff] %v6212_v46  ;;  %v6231_v56 = vld [vmem:[#allocation7 + $0xf0] sm:$0xff] }
 0x2de   : > { %8892 = vst [vmem:[#allocation13_spill] sm:$0xff] %v6215_v22  ;;  %2563 = vmatpush.msrb.mxu3 %v6205_v57  ;;  %v2401_v60 = vadd.f32 %v2400_v31, %v2399_v34  ;;  %v6253_v34 = vld [vmem:[#allocation7 + $0x310] sm:$0xff] }
 0x2df   : > { %2592 = vmatpush.msra.mxu1 %v6188_v17  ;;  %8893 = vst [vmem:[#allocation14_spill] sm:$0xff] %v6218_v45  ;;  %2577 = vmatpush.msra.mxu0 %v6208_v21  ;;  %v6224_v54 = vadd.f32 %v8267_v6, %v1943_v44  ;;  %v6237_v17 = vld [vmem:[#allocation7 + $0x350] sm:$0xff]  ;;  %v6239_v44 = vld [vmem:[#allocation7 + $0x608] sm:$0xff] }
 0x2e0   : > { %8895 = vst [vmem:[#allocation19_spill] sm:$0xff] %v6226_v7  ;;  %2564 = vmatpush.msrb.mxu3 %v6215_v22  ;;  %v6242_v21 = vld [vmem:[#allocation7 + $0xd0] sm:$0xff]  ;;  %v2402_v47 = vrot.slane %v2401_v60, 1  ;;  %v6344_v22 = vld [vmem:[#allocation7 + $0x3f8] sm:$0xff] }
 0x2e1   : > { %2593 = vmatpush.msra.mxu1 %v6202_v36  ;;  %8894 = vst [vmem:[#allocation17_spill] sm:$0xff] %v6224_v54  ;;  %v2404_v36 = vsel %vm628_vm0, %v6224_v54, 0.0  ;;  %2578 = vmatpush.msra.mxu0 %v6218_v45  ;;  %v6249_v45 = vld [vmem:[#allocation7 + $0xb0] sm:$0xff] }
 0x2e2   : > { %8896 = vst [vmem:[#allocation26_spill] sm:$0xff] %v6228_v26  ;;  %v2405_v6 = vrot.slane %v2404_v36, 4  ;;  %2565 = vmatpush.msrb.mxu3 %v6228_v26  ;;  %v6255_v31 = vadd.f32 %v2402_v47, %v2401_v60  ;;  %v6273_v47 = vld [vmem:[#allocation7 + $0x2d0] sm:$0xff] }
 0x2e3   : > { %2594 = vmatpush.msra.mxu1 %v6212_v46  ;;  %8897 = vst [vmem:[#allocation18_spill] sm:$0xff] %v6231_v56  ;;  %2579 = vmatpush.msra.mxu0 %v6231_v56  ;;  %v6246_v46 = vld [vmem:[#allocation7 + $0x330] sm:$0xff] }
 0x2e4   : > { %8898 = vst [vmem:[#allocation20_spill] sm:$0xff] %v6237_v17  ;;  %v2406_v54 = vadd.f32 %v2405_v6, %v2404_v36  ;;  %2566 = vmatpush.msrb.mxu3 %v6239_v44  ;;  %v6260_v56 = vld [vmem:[#allocation7 + $0x90] sm:$0xff]  ;;  %2467 = vmatmul.f32.vlgmr.msra.gmra.mxu2 %v6255_v31 }
 0x2e5   : > { %8899 = vst [vmem:[#allocation22_spill] sm:$0xff] %v6239_v44  ;;  %2595 = vmatpush.msra.mxu1 %v6226_v7  ;;  %2580 = vmatpush.msra.mxu0 %v6242_v21  ;;  %v6257_v7 = vld [vmem:[#allocation7 + $0x5f0] sm:$0xff] }
 0x2e6   : > { %8900 = vst [vmem:[#allocation30_spill] sm:$0xff] %v6242_v21  ;;  %v2407_v26 = vrot.slane %v2406_v54, 2  ;;  %v6263_v36 = vld [vmem:[#allocation7 + $0x2f0] sm:$0xff]  ;;  %2611 = vmatpush.msra.mxu2 %v6257_v7 }
 0x2e7   : > { %8901 = vst [vmem:[#allocation21_spill] sm:$0xff] %v6246_v46  ;;  %2596 = vmatpush.msra.mxu1 %v6237_v17  ;;  %2581 = vmatpush.msra.mxu0 %v6249_v45  ;;  %v6266_v6 = vld [vmem:[#allocation7 + $0x5d0] sm:$0xff] }
 0x2e8   : > { %8902 = vst [vmem:[#allocation23_spill] sm:$0xff] %v6249_v45  ;;  %v6269_v17 = vld [vmem:[#allocation7 + $0x70] sm:$0xff]  ;;  %v2408_v60 = vadd.f32 %v2407_v26, %v2406_v54  ;;  %2612 = vmatpush.msra.mxu2 %v6266_v6 }
 0x2e9   : > { %8903 = vst [vmem:[#allocation25_spill] sm:$0xff] %v6253_v34  ;;  %2597 = vmatpush.msra.mxu1 %v6246_v46  ;;  %2582 = vmatpush.msra.mxu0 %v6260_v56  ;;  %v6275_v46 = vld [vmem:[#allocation7 + $0x5b0] sm:$0xff] }
 0x2ea   : > { %8904 = vst [vmem:[#allocation34_spill] sm:$0xff] %v6257_v7  ;;  %v6278_v45 = vld [vmem:[#allocation7 + $0x50] sm:$0xff]  ;;  %v2409_v21 = vrot.slane %v2408_v60, 1  ;;  %2613 = vmatpush.msra.mxu2 %v6275_v46 }
 0x2eb   : > { %8905 = vst [vmem:[#allocation24_spill] sm:$0xff] %v6260_v56  ;;  %2598 = vmatpush.msra.mxu1 %v6253_v34  ;;  %2583 = vmatpush.msra.mxu0 %v6269_v17  ;;  %v6282_v34 = vld [vmem:[#allocation7 + $0x2b0] sm:$0xff] }
 0x2ec   : > { %8906 = vst [vmem:[#allocation27_spill] sm:$0xff] %v6263_v36  ;;  %v6285_v54 = vld [vmem:[#allocation7 + $0x30] sm:$0xff]  ;;  %v6288_v26 = vadd.f32 %v2409_v21, %v2408_v60  ;;  %v6304_v21 = vld [vmem:[#allocation7 + $0x1f8] sm:$0xff]  ;;  %2547 = vmatmul.f32.vlgmr.msrb.gmra.mxu2 %v6255_v31 }
 0x2ed   : > { %8907 = vst [vmem:[#allocation36_spill] sm:$0xff] %v6266_v6  ;;  %2599 = vmatpush.msra.mxu1 %v6263_v36  ;;  %v6290_v7 = vld [vmem:[#allocation7 + $0x590] sm:$0xff]  ;;  %2584 = vmatpush.msra.mxu0 %v6278_v45 }
 0x2ee   : > { %8908 = vst [vmem:[#allocation28_spill] sm:$0xff] %v6269_v17  ;;  %v6293_v36 = vld [vmem:[#allocation7 + $0x290] sm:$0xff]  ;;  %2487 = vmatmul.f32.vlgmr.msra.gmra.mxu3 %v6288_v26  ;;  %2614 = vmatpush.msra.mxu2 %v6290_v7 }
 0x2ef   : > { %8909 = vst [vmem:[#allocation29_spill] sm:$0xff] %v6273_v47  ;;  %2600 = vmatpush.msra.mxu1 %v6273_v47  ;;  %v2379_v6 = vld [vmem:[#allocation7 + $0x7f0] sm:$0xff]  ;;  %2585 = vmatpush.msra.mxu0 %v6285_v54 }
 0x2f0   : > { %8910 = vst [vmem:[#allocation15_spill] sm:$0xff] %v6275_v46  ;;  %v6296_v17 = vld [vmem:[#allocation7 + $0x10] sm:$0xff]  ;;  %2631 = vmatpush.msra.mxu3 %v2379_v6 }
 0x2f1   : > { %8911 = vst [vmem:[#allocation16_spill] sm:$0xff] %v6278_v45  ;;  %2601 = vmatpush.msra.mxu1 %v6282_v34  ;;  %v6300_v47 = vld [vmem:[#allocation7 + $0x270] sm:$0xff]  ;;  %2586 = vmatpush.msra.mxu0 %v6296_v17 }
 0x2f2   : > { %8912 = vst [vmem:[#allocation31_spill] sm:$0xff] %v6282_v34  ;;  %v6306_v60 = vld [vmem:[#allocation7 + $0x570] sm:$0xff]  ;;  %2587 = vmatmul.f32.vlgmr.msra.gmra.mxu0 %v6051_v63 }
 0x2f3   : > { %8913 = vst [vmem:[#allocation40_spill] sm:$0xff] %v6285_v54  ;;  %2602 = vmatpush.msra.mxu1 %v6293_v36  ;;  %v6309_v46 = vld [vmem:[#allocation7 + $0x250] sm:$0xff]  ;;  %2651 = vmatpush.msrb.mxu0 %v6304_v21  ;;  %v6328_v54 = vld [vmem:[#allocation7 + $0x1b8] sm:$0xff] }
 0x2f4   : > { %8914 = vst [vmem:[#allocation32_spill] sm:$0xff] %v6290_v7  ;;  %v6312_v34 = vld [vmem:[#allocation7 + $0x7d0] sm:$0xff]  ;;  %v6316_v7 = vld [vmem:[#allocation7 + $0x1d8] sm:$0xff]  ;;  %2615 = vmatpush.msra.mxu2 %v6306_v60 }
 0x2f5   : > { %8915 = vst [vmem:[#allocation33_spill] sm:$0xff] %v6293_v36  ;;  %2603 = vmatpush.msra.mxu1 %v6300_v47  ;;  %v6318_v36 = vld [vmem:[#allocation7 + $0x550] sm:$0xff]  ;;  %2632 = vmatpush.msra.mxu3 %v6312_v34 }
 0x2f6   : > { %8916 = vst [vmem:[#allocation35_spill] sm:$0xff] %v6296_v17  ;;  %v6321_v6 = vld [vmem:[#allocation7 + $0x230] sm:$0xff]  ;;  %2652 = vmatpush.msrb.mxu0 %v6316_v7  ;;  %2616 = vmatpush.msra.mxu2 %v6318_v36 }
 0x2f7   : > { %8917 = vst [vmem:[#allocation44_spill] sm:$0xff] %v6300_v47  ;;  %v6324_v17 = vld [vmem:[#allocation7 + $0x7b0] sm:$0xff]  ;;  %2604 = vmatpush.msra.mxu1 %v6309_v46  ;;  %v1974_v47 = vpop.f32.mrf.mxu0  ;;  %2567 = vmatmul.f32.vlgmr.msrb.gmra.mxu3 %v6288_v26 }
 0x2f8   : > { %8918 = vst [vmem:[#allocation37_spill] sm:$0xff] %v6304_v21  ;;  %v6330_v45 = vld [vmem:[#allocation7 + $0x530] sm:$0xff]  ;;  %v1994_v21 = vpop.f32.mrf.mxu1  ;;  %2633 = vmatpush.msra.mxu3 %v6324_v17  ;;  %2653 = vmatpush.msrb.mxu0 %v6328_v54 }
 0x2f9   : > { %8919 = vst [vmem:[#allocation38_spill] sm:$0xff] %v6306_v60  ;;  %v6333_v56 = vld [vmem:[#allocation7 + $0x210] sm:$0xff]  ;;  %v1647_v60 = vmax.f32 %v5952_v30, 0.0  ;;  %2605 = vmatpush.msra.mxu1 %v6321_v6  ;;  %2617 = vmatpush.msra.mxu2 %v6330_v45  ;;  %v6351_v30 = vld [vmem:[#allocation7 + $0x178] sm:$0xff] }
 0x2fa   : > { %8920 = vst [vmem:[#allocation39_spill] sm:$0xff] %v6309_v46  ;;  %v6336_v44 = vld [vmem:[#allocation7 + $0x790] sm:$0xff]  ;;  %v1995_v46 = vadd.f32 %v1994_v21, %v1974_v47  ;;  %v6357_v47 = vld [vmem:[#allocation7 + $0x3d8] sm:$0xff] }
 0x2fb   : > { %8921 = vst [vmem:[#allocation48_spill] sm:$0xff] %v6312_v34  ;;  %v6341_v34 = vld [vmem:[#allocation7 + $0x198] sm:$0xff]  ;;  %2606 = vmatpush.msra.mxu1 %v6333_v56  ;;  %2634 = vmatpush.msra.mxu3 %v6336_v44  ;;  %v6359_v21 = vld [vmem:[#allocation7 + $0x770] sm:$0xff] }
 0x2fc   : > { %8922 = vst [vmem:[#allocation41_spill] sm:$0xff] %v6318_v36  ;;  %v6348_v36 = vadd.f32 %v1995_v46, %v1647_v60  ;;  %2607 = vmatmul.f32.vlgmr.msra.gmra.mxu1 %v6091_v25  ;;  %2654 = vmatpush.msrb.mxu0 %v6341_v34  ;;  %v6363_v46 = vld [vmem:[#allocation7 + $0x158] sm:$0xff]  ;;  %v6365_v60 = vld [vmem:[#allocation7 + $0x4f0] sm:$0xff] }
 0x2fd   : > { %8923 = vst [vmem:[#allocation42_spill] sm:$0xff] %v6321_v6  ;;  %v6353_v6 = vld [vmem:[#allocation7 + $0x510] sm:$0xff]  ;;  %2671 = vmatpush.msrb.mxu1 %v6344_v22  ;;  %2635 = vmatpush.msra.mxu3 %v6359_v21 }
 0x2fe   : > { %8924 = vst [vmem:[#allocation43_spill] sm:$0xff] %v6324_v17  ;;  %2655 = vmatpush.msrb.mxu0 %v6351_v30  ;;  %2618 = vmatpush.msra.mxu2 %v6353_v6  ;;  %v6371_v17 = vld [vmem:[#allocation7 + $0x750] sm:$0xff] }
 0x2ff   : > { %8925 = vst [vmem:[#allocation52_spill] sm:$0xff] %v6328_v54  ;;  %2672 = vmatpush.msrb.mxu1 %v6357_v47  ;;  %v6384_v54 = vld [vmem:[#allocation7 + $0x730] sm:$0xff]  ;;  %2636 = vmatpush.msra.mxu3 %v6371_v17 }
 0x300   : > { %8926 = vst [vmem:[#allocation45_spill] sm:$0xff] %v6330_v45  ;;  %v6375_v45 = vld [vmem:[#allocation7 + $0x138] sm:$0xff]  ;;  %2656 = vmatpush.msrb.mxu0 %v6363_v46  ;;  %2619 = vmatpush.msra.mxu2 %v6365_v60 }
 0x301   : > { %8927 = vst [vmem:[#allocation46_spill] sm:$0xff] %v6333_v56  ;;  %v6377_v56 = vld [vmem:[#allocation7 + $0x4d0] sm:$0xff]  ;;  %2637 = vmatpush.msra.mxu3 %v6384_v54 }
 0x302   : > { %8928 = vst [vmem:[#allocation47_spill] sm:$0xff] %v6336_v44  ;;  %v6369_v44 = vld [vmem:[#allocation7 + $0x3b8] sm:$0xff]  ;;  %2657 = vmatpush.msrb.mxu0 %v6375_v45  ;;  %2620 = vmatpush.msra.mxu2 %v6377_v56 }
 0x303   : > { %8929 = vst [vmem:[#allocation56_spill] sm:$0xff] %v6341_v34  ;;  %v1648_v34 = vmax.f32 %v5969_v41, 0.0  ;;  %2673 = vmatpush.msrb.mxu1 %v6369_v44 }
 0x304   : > { %8930 = vst [vmem:[#allocation49_spill] sm:$0xff] %v6344_v22  ;;  %v2034_v22 = vpop.f32.mrf.mxu3 }
 0x305   : > { %8931 = vst [vmem:[#allocation50_spill] sm:$0xff] %v6348_v36  ;;  %v2014_v36 = vpop.f32.mrf.mxu2 }
 0x306   : > { %8932 = vst [vmem:[#allocation51_spill] sm:$0xff] %v6351_v30  ;;  %v2035_v30 = vadd.f32 %v2034_v22, %v2014_v36  ;;  %v6402_v22 = vld [vmem:[#allocation7 + $0xf8] sm:$0xff]  ;;  %v6404_v36 = vld [vmem:[#allocation7 + $0x490] sm:$0xff] }
 0x307   : > { %8933 = vst [vmem:[#allocation60_spill] sm:$0xff] %v6353_v6  ;;  %v6382_v6 = vld [vmem:[#allocation7 + $0x398] sm:$0xff] }
 0x308   : > { %8934 = vst [vmem:[#allocation53_spill] sm:$0xff] %v6357_v47  ;;  %v6390_v47 = vld [vmem:[#allocation7 + $0x4b0] sm:$0xff]  ;;  %v6393_v41 = vadd.f32 %v2035_v30, %v1648_v34  ;;  %2674 = vmatpush.msrb.mxu1 %v6382_v6  ;;  %v6408_v34 = vld [vmem:[#allocation7 + $0x358] sm:$0xff] }
 0x309   : > { %8935 = vst [vmem:[#allocation54_spill] sm:$0xff] %v6359_v21  ;;  %v6388_v21 = vld [vmem:[#allocation7 + $0x118] sm:$0xff]  ;;  %2621 = vmatpush.msra.mxu2 %v6390_v47  ;;  %v6410_v30 = vld [vmem:[#allocation7 + $0x6f0] sm:$0xff] }
 0x30a   : > { %8936 = vst [vmem:[#allocation55_spill] sm:$0xff] %v6363_v46  ;;  %v6398_v46 = vld [vmem:[#allocation7 + $0x710] sm:$0xff]  ;;  %2658 = vmatpush.msrb.mxu0 %v6388_v21 }
 0x30b   : > { %8937 = vst [vmem:[#allocation64_spill] sm:$0xff] %v6365_v60  ;;  %v6396_v60 = vld [vmem:[#allocation7 + $0x378] sm:$0xff]  ;;  %2638 = vmatpush.msra.mxu3 %v6398_v46  ;;  %2622 = vmatpush.msra.mxu2 %v6404_v36 }
 0x30c   : > { %8938 = vst [vmem:[#allocation57_spill] sm:$0xff] %v6371_v17  ;;  %2675 = vmatpush.msrb.mxu1 %v6396_v60  ;;  %v6416_v17 = vld [vmem:[#allocation7 + $0x470] sm:$0xff]  ;;  %2659 = vmatpush.msrb.mxu0 %v6402_v22 }
 0x30d   : > { %8939 = vst [vmem:[#allocation58_spill] sm:$0xff] %v6377_v56  ;;  %v6422_v56 = vld [vmem:[#allocation7 + $0x6d0] sm:$0xff]  ;;  %2639 = vmatpush.msra.mxu3 %v6410_v30  ;;  %2623 = vmatpush.msra.mxu2 %v6416_v17 }
 0x30e   : > { %8940 = vst [vmem:[#allocation59_spill] sm:$0xff] %v6382_v6  ;;  %2676 = vmatpush.msrb.mxu1 %v6408_v34  ;;  %v6434_v6 = vld [vmem:[#allocation7 + $0x6b0] sm:$0xff] }
 0x30f   : > { %8941 = vst [vmem:[#allocation68_spill] sm:$0xff] %v6384_v54  ;;  %v6420_v54 = vld [vmem:[#allocation7 + $0x338] sm:$0xff]  ;;  %2640 = vmatpush.msra.mxu3 %v6422_v56 }
 0x310   : > { %8942 = vst [vmem:[#allocation61_spill] sm:$0xff] %v6390_v47  ;;  %v6426_v47 = vld [vmem:[#allocation7 + $0xb8] sm:$0xff]  ;;  %2677 = vmatpush.msrb.mxu1 %v6420_v54 }
 0x311   : > { %8943 = vst [vmem:[#allocation62_spill] sm:$0xff] %v6393_v41  ;;  %v6414_v41 = vld [vmem:[#allocation7 + $0xd8] sm:$0xff]  ;;  %2641 = vmatpush.msra.mxu3 %v6434_v6 }
 0x312   : > { %8944 = vst [vmem:[#allocation63_spill] sm:$0xff] %v6396_v60  ;;  %v6428_v60 = vld [vmem:[#allocation7 + $0x450] sm:$0xff]  ;;  %2660 = vmatpush.msrb.mxu0 %v6414_v41 }
 0x313   : > { %8945 = vst [vmem:[#allocation72_spill] sm:$0xff] %v6398_v46  ;;  %v6432_v46 = vld [vmem:[#allocation7 + $0x318] sm:$0xff]  ;;  %2624 = vmatpush.msra.mxu2 %v6428_v60 }
 0x314   : > { %8946 = vst [vmem:[#allocation65_spill] sm:$0xff] %v6404_v36  ;;  %v6438_v36 = vld [vmem:[#allocation7 + $0x98] sm:$0xff]  ;;  %2661 = vmatpush.msrb.mxu0 %v6426_v47  ;;  %2678 = vmatpush.msrb.mxu1 %v6432_v46 }
 0x315   : > { %8947 = vst [vmem:[#allocation66_spill] sm:$0xff] %v6408_v34  ;;  %v6440_v34 = vld [vmem:[#allocation7 + $0x430] sm:$0xff] }
 0x316   : > { %8948 = vst [vmem:[#allocation67_spill] sm:$0xff] %v6410_v30  ;;  %v6444_v30 = vld [vmem:[#allocation7 + $0x2f8] sm:$0xff]  ;;  %2662 = vmatpush.msrb.mxu0 %v6438_v36  ;;  %2625 = vmatpush.msra.mxu2 %v6440_v34 }
 0x317   : > { %8949 = vst [vmem:[#allocation76_spill] sm:$0xff] %v6414_v41  ;;  %v6446_v41 = vld [vmem:[#allocation7 + $0x690] sm:$0xff]  ;;  %2679 = vmatpush.msrb.mxu1 %v6444_v30 }
 0x318   : > { %8950 = vst [vmem:[#allocation69_spill] sm:$0xff] %v6416_v17  ;;  %v6450_v17 = vld [vmem:[#allocation7 + $0x78] sm:$0xff]  ;;  %2642 = vmatpush.msra.mxu3 %v6446_v41 }
 0x319   : > { %8951 = vst [vmem:[#allocation70_spill] sm:$0xff] %v6420_v54  ;;  %v6452_v54 = vld [vmem:[#allocation7 + $0x410] sm:$0xff]  ;;  %2663 = vmatpush.msrb.mxu0 %v6450_v17 }
 0x31a   : > { %8952 = vst [vmem:[#allocation71_spill] sm:$0xff] %v6422_v56  ;;  %v6456_v56 = vld [vmem:[#allocation7 + $0x2d8] sm:$0xff]  ;;  %2626 = vmatpush.msra.mxu2 %v6452_v54 }
 0x31b   : > { %8953 = vst [vmem:[#allocation77_spill] sm:$0xff] %v6426_v47  ;;  %v6458_v47 = vld [vmem:[#allocation7 + $0x670] sm:$0xff]  ;;  %2680 = vmatpush.msrb.mxu1 %v6456_v56  ;;  %2627 = vmatmul.f32.vlgmr.msra.gmra.mxu2 %v6255_v31 }
 0x31c   : > { %8954 = vst [vmem:[#allocation73_spill] sm:$0xff] %v6428_v60  ;;  %v6462_v60 = vld [vmem:[#allocation7 + $0x58] sm:$0xff]  ;;  %2643 = vmatpush.msra.mxu3 %v6458_v47 }
 0x31d   : > { %8955 = vst [vmem:[#allocation74_spill] sm:$0xff] %v6432_v46  ;;  %v6468_v46 = vld [vmem:[#allocation7 + $0x5f8] sm:$0xff]  ;;  %2664 = vmatpush.msrb.mxu0 %v6462_v60 }
 0x31e   : > { %8956 = vst [vmem:[#allocation75_spill] sm:$0xff] %v6434_v6  ;;  %v6466_v6 = vld [vmem:[#allocation7 + $0x2b8] sm:$0xff]  ;;  %2691 = vmatpush.msrb.mxu2 %v6468_v46 }
 0x31f   : > { %8957 = vst [vmem:[#allocation78_spill] sm:$0xff] %v6438_v36  ;;  %v6474_v36 = vld [vmem:[#allocation7 + $0x38] sm:$0xff]  ;;  %2681 = vmatpush.msrb.mxu1 %v6466_v6 }
 0x320   : > { %8958 = vst [vmem:[#allocation79_spill] sm:$0xff] %v6440_v34  ;;  %v6472_v34 = vld [vmem:[#allocation7 + $0x650] sm:$0xff]  ;;  %2665 = vmatpush.msrb.mxu0 %v6474_v36 }
 0x321   : > { %8959 = vst [vmem:[#allocation80_spill] sm:$0xff] %v6444_v30  ;;  %v6480_v30 = vld [vmem:[#allocation7 + $0x5d8] sm:$0xff]  ;;  %2644 = vmatpush.msra.mxu3 %v6472_v34 }
 0x322   : > { %8960 = vst [vmem:[#allocation81_spill] sm:$0xff] %v6446_v41  ;;  %v6478_v41 = vld [vmem:[#allocation7 + $0x298] sm:$0xff]  ;;  %2692 = vmatpush.msrb.mxu2 %v6480_v30 }
 0x323   : > { %8961 = vst [vmem:[#allocation103_spill] sm:$0xff] %v6450_v17  ;;  %2682 = vmatpush.msrb.mxu1 %v6478_v41  ;;  %v6496_v17 = vld [vmem:[#allocation7 + $0x610] sm:$0xff] }
 0x324   : > { %8962 = vst [vmem:[#allocation104_spill] sm:$0xff] %v6452_v54  ;;  %v6484_v54 = vld [vmem:[#allocation7 + $0x630] sm:$0xff] }
 0x325   : > { %8963 = vst [vmem:[#allocation105_spill] sm:$0xff] %v6456_v56  ;;  %v6486_v56 = vld [vmem:[#allocation7 + $0x18] sm:$0xff]  ;;  %2645 = vmatpush.msra.mxu3 %v6484_v54 }
 0x326   : > { %8964 = vst [vmem:[#allocation106_spill] sm:$0xff] %v6458_v47  ;;  %v6490_v47 = vld [vmem:[#allocation7 + $0x278] sm:$0xff]  ;;  %2666 = vmatpush.msrb.mxu0 %v6486_v56 }
 0x327   : > { %8965 = vst [vmem:[#allocation107_spill] sm:$0xff] %v6462_v60  ;;  %v6494_v60 = vld [vmem:[#allocation7 + $0x5b8] sm:$0xff]  ;;  %2683 = vmatpush.msrb.mxu1 %v6490_v47  ;;  %2667 = vmatmul.f32.vlgmr.msrb.gmra.mxu0 %v6051_v63 }
 0x328   : > { %8966 = vst [vmem:[#allocation108_spill] sm:$0xff] %v6466_v6  ;;  %v6506_v6 = vld [vmem:[#allocation7 + $0x7f8] sm:$0xff]  ;;  %2693 = vmatpush.msrb.mxu2 %v6494_v60  ;;  %2646 = vmatpush.msra.mxu3 %v6496_v17 }
 0x329   : > { %8967 = vst [vmem:[#allocation109_spill] sm:$0xff] %v6468_v46  ;;  %v6500_v46 = vld [vmem:[#allocation7 + $0x258] sm:$0xff]  ;;  %2647 = vmatmul.f32.vlgmr.msra.gmra.mxu3 %v6288_v26 }
 0x32a   : > { %8968 = vst [vmem:[#allocation110_spill] sm:$0xff] %v6472_v34  ;;  %v6504_v34 = vld [vmem:[#allocation7 + $0x598] sm:$0xff]  ;;  %2684 = vmatpush.msrb.mxu1 %v6500_v46  ;;  %2711 = vmatpush.msrb.mxu3 %v6506_v6 }
 0x32b   : > { %8969 = vst [vmem:[#allocation111_spill] sm:$0xff] %v6474_v36  ;;  %2694 = vmatpush.msrb.mxu2 %v6504_v34  ;;  %v6520_v63 = vld [vmem:[#allocation7 + $0x218] sm:$0xff]  ;;  %v6536_v36 = vld [vmem:[#allocation7 + $0x1c0] sm:$0xff] }
 0x32c   : > { %8970 = vst [vmem:[#allocation112_spill] sm:$0xff] %v6478_v41  ;;  %v6516_v41 = vld [vmem:[#allocation7 + $0x7d8] sm:$0xff] }
 0x32d   : > { %8971 = vst [vmem:[#allocation113_spill] sm:$0xff] %v6480_v30  ;;  %v6510_v30 = vld [vmem:[#allocation7 + $0x238] sm:$0xff]  ;;  %2712 = vmatpush.msrb.mxu3 %v6516_v41 }
 0x32e   : > { %8972 = vst [vmem:[#allocation114_spill] sm:$0xff] %v6484_v54  ;;  %v6514_v54 = vld [vmem:[#allocation7 + $0x578] sm:$0xff]  ;;  %2685 = vmatpush.msrb.mxu1 %v6510_v30 }
 0x32f   : > { %8973 = vst [vmem:[#allocation115_spill] sm:$0xff] %v6486_v56  ;;  %2695 = vmatpush.msrb.mxu2 %v6514_v54 }
 0x330   : > { %8974 = vst [vmem:[#allocation116_spill] sm:$0xff] %v6490_v47  ;;  %v6525_v47 = vld [vmem:[#allocation7 + $0x1e0] sm:$0xff]  ;;  %2686 = vmatpush.msrb.mxu1 %v6520_v63 }
 0x331   : > { %8975 = vst [vmem:[#allocation117_spill] sm:$0xff] %v6494_v60  ;;  %v6523_v60 = vld [vmem:[#allocation7 + $0x558] sm:$0xff]  ;;  %2775 = vmatpush.msra.mxu0 %v6525_v47  ;;  %2687 = vmatmul.f32.vlgmr.msrb.gmra.mxu1 %v6091_v25 }
 0x332   : > { %8976 = vst [vmem:[#allocation118_spill] sm:$0xff] %v6496_v17  ;;  %v2054_v17 = vpop.f32.mrf.mxu0  ;;  %2696 = vmatpush.msrb.mxu2 %v6523_v60  ;;  %v6558_v25 = vld [vmem:[#allocation7 + $0x4f8] sm:$0xff] }
 0x333   : > { %8977 = vst [vmem:[#allocation119_spill] sm:$0xff] %v6500_v46  ;;  %v6530_v46 = vld [vmem:[#allocation7 + $0x7b8] sm:$0xff]  ;;  %2776 = vmatpush.msra.mxu0 %v6536_v36 }
 0x334   : > { %8978 = vst [vmem:[#allocation120_spill] sm:$0xff] %v6504_v34  ;;  %v2074_v34 = vpop.f32.mrf.mxu1  ;;  %2713 = vmatpush.msrb.mxu3 %v6530_v46 }
 0x335   : > { %8979 = vst [vmem:[#allocation121_spill] sm:$0xff] %v6506_v6  ;;  %v1649_v6 = vmax.f32 %v5984_v29, 0.0  ;;  %v2075_v56 = vadd.f32 %v2074_v34, %v2054_v17  ;;  %v6546_v29 = vld [vmem:[#allocation7 + $0x518] sm:$0xff]  ;;  %v6554_v34 = vld [vmem:[#allocation7 + $0x3e0] sm:$0xff] }
 0x336   : > { %8980 = vst [vmem:[#allocation122_spill] sm:$0xff] %v6510_v30  ;;  %v6534_v30 = vld [vmem:[#allocation7 + $0x538] sm:$0xff]  ;;  %2795 = vmatpush.msra.mxu1 %v6554_v34 }
 0x337   : > { %8981 = vst [vmem:[#allocation123_spill] sm:$0xff] %v6514_v54  ;;  %v6541_v54 = vld [vmem:[#allocation7 + $0x798] sm:$0xff]  ;;  %2697 = vmatpush.msrb.mxu2 %v6534_v30 }
 0x338   : > { %8982 = vst [vmem:[#allocation124_spill] sm:$0xff] %v6516_v41  ;;  %v6544_v41 = vadd.f32 %v2075_v56, %v1649_v6  ;;  %v6552_v17 = vld [vmem:[#allocation7 + $0x778] sm:$0xff]  ;;  %2714 = vmatpush.msrb.mxu3 %v6541_v54  ;;  %v6560_v56 = vld [vmem:[#allocation7 + $0x180] sm:$0xff] }
 0x339   : > { %8983 = vst [vmem:[#allocation125_spill] sm:$0xff] %v6520_v63  ;;  %v6548_v63 = vld [vmem:[#allocation7 + $0x1a0] sm:$0xff]  ;;  %2698 = vmatpush.msrb.mxu2 %v6546_v29  ;;  %v6564_v6 = vld [vmem:[#allocation7 + $0x758] sm:$0xff] }
 0x33a   : > { %8984 = vst [vmem:[#allocation126_spill] sm:$0xff] %v6523_v60  ;;  %2777 = vmatpush.msra.mxu0 %v6548_v63  ;;  %2715 = vmatpush.msrb.mxu3 %v6552_v17  ;;  %v6578_v60 = vld [vmem:[#allocation7 + $0x3a0] sm:$0xff] }
 0x33b   : > { %8985 = vst [vmem:[#allocation127_spill] sm:$0xff] %v6530_v46  ;;  %v6566_v46 = vld [vmem:[#allocation7 + $0x3c0] sm:$0xff]  ;;  %2699 = vmatpush.msrb.mxu2 %v6558_v25 }
 0x33c   : > { %8986 = vst [vmem:[#allocation128_spill] sm:$0xff] %v6534_v30  ;;  %2778 = vmatpush.msra.mxu0 %v6560_v56  ;;  %2796 = vmatpush.msra.mxu1 %v6566_v46  ;;  %v6572_v30 = vld [vmem:[#allocation7 + $0x160] sm:$0xff] }
 0x33d   : > { %8987 = vst [vmem:[#allocation129_spill] sm:$0xff] %v6541_v54  ;;  %v6576_v54 = vld [vmem:[#allocation7 + $0x738] sm:$0xff]  ;;  %2716 = vmatpush.msrb.mxu3 %v6564_v6 }
 0x33e   : > { %8988 = vst [vmem:[#allocation130_spill] sm:$0xff] %v6544_v41  ;;  %v6570_v41 = vld [vmem:[#allocation7 + $0x4d8] sm:$0xff]  ;;  %2779 = vmatpush.msra.mxu0 %v6572_v30  ;;  %2797 = vmatpush.msra.mxu1 %v6578_v60 }
 0x33f   : > { %8989 = vst [vmem:[#allocation131_spill] sm:$0xff] %v6546_v29  ;;  %v6582_v29 = vld [vmem:[#allocation7 + $0x4b8] sm:$0xff]  ;;  %2700 = vmatpush.msrb.mxu2 %v6570_v41  ;;  %2717 = vmatpush.msrb.mxu3 %v6576_v54 }
 0x340   : > { %8990 = vst [vmem:[#allocation132_spill] sm:$0xff] %v6552_v17  ;;  %v6588_v17 = vld [vmem:[#allocation7 + $0x718] sm:$0xff] }
 0x341   : > { %8991 = vst [vmem:[#allocation133_spill] sm:$0xff] %v6554_v34  ;;  %v6590_v34 = vld [vmem:[#allocation7 + $0x380] sm:$0xff]  ;;  %2701 = vmatpush.msrb.mxu2 %v6582_v29  ;;  %2718 = vmatpush.msrb.mxu3 %v6588_v17 }
 0x342   : > { %8992 = vst [vmem:[#allocation134_spill] sm:$0xff] %v6558_v25  ;;  %2798 = vmatpush.msra.mxu1 %v6590_v34  ;;  %v6594_v25 = vld [vmem:[#allocation7 + $0x498] sm:$0xff] }
 0x343   : > { %8993 = vst [vmem:[#allocation135_spill] sm:$0xff] %v6564_v6  ;;  %v6600_v6 = vld [vmem:[#allocation7 + $0x6f8] sm:$0xff]  ;;  %2702 = vmatpush.msrb.mxu2 %v6594_v25 }
 0x344   : > { %8994 = vst [vmem:[#allocation136_spill] sm:$0xff] %v6566_v46  ;;  %v6584_v46 = vld [vmem:[#allocation7 + $0x140] sm:$0xff]  ;;  %2719 = vmatpush.msrb.mxu3 %v6600_v6 }
 0x345   : > { %8995 = vst [vmem:[#allocation137_spill] sm:$0xff] %v6570_v41  ;;  %2780 = vmatpush.msra.mxu0 %v6584_v46  ;;  %v6606_v41 = vld [vmem:[#allocation7 + $0x478] sm:$0xff] }
 0x346   : > { %8996 = vst [vmem:[#allocation138_spill] sm:$0xff] %v6576_v54  ;;  %v6612_v54 = vld [vmem:[#allocation7 + $0x6d8] sm:$0xff]  ;;  %2703 = vmatpush.msrb.mxu2 %v6606_v41 }
 0x347   : > { %8997 = vst [vmem:[#allocation139_spill] sm:$0xff] %v6578_v60  ;;  %v6596_v60 = vld [vmem:[#allocation7 + $0x120] sm:$0xff]  ;;  %2720 = vmatpush.msrb.mxu3 %v6612_v54 }
 0x348   : > { %8998 = vst [vmem:[#allocation140_spill] sm:$0xff] %v6582_v29  ;;  %2781 = vmatpush.msra.mxu0 %v6596_v60  ;;  %v6618_v29 = vld [vmem:[#allocation7 + $0x458] sm:$0xff] }
 0x349   : > { %8999 = vst [vmem:[#allocation141_spill] sm:$0xff] %v6584_v46  ;;  %v6602_v46 = vld [vmem:[#allocation7 + $0x360] sm:$0xff]  ;;  %2704 = vmatpush.msrb.mxu2 %v6618_v29 }
 0x34a   : > { %9000 = vst [vmem:[#allocation142_spill] sm:$0xff] %v6588_v17  ;;  %2799 = vmatpush.msra.mxu1 %v6602_v46  ;;  %v6624_v17 = vld [vmem:[#allocation7 + $0x6b8] sm:$0xff] }
 0x34b   : > { %9001 = vst [vmem:[#allocation143_spill] sm:$0xff] %v6590_v34  ;;  %v6608_v34 = vld [vmem:[#allocation7 + $0x100] sm:$0xff]  ;;  %2721 = vmatpush.msrb.mxu3 %v6624_v17 }
 0x34c   : > { %9002 = vst [vmem:[#allocation144_spill] sm:$0xff] %v6594_v25  ;;  %2782 = vmatpush.msra.mxu0 %v6608_v34  ;;  %v6630_v25 = vld [vmem:[#allocation7 + $0x438] sm:$0xff] }
 0x34d   : > { %9003 = vst [vmem:[#allocation145_spill] sm:$0xff] %v6596_v60  ;;  %v6614_v60 = vld [vmem:[#allocation7 + $0x340] sm:$0xff]  ;;  %2705 = vmatpush.msrb.mxu2 %v6630_v25 }
 0x34e   : > { %9004 = vst [vmem:[#allocation146_spill] sm:$0xff] %v6600_v6  ;;  %2800 = vmatpush.msra.mxu1 %v6614_v60  ;;  %v6636_v6 = vld [vmem:[#allocation7 + $0x698] sm:$0xff] }
 0x34f   : > { %9005 = vst [vmem:[#allocation147_spill] sm:$0xff] %v6602_v46  ;;  %v6620_v46 = vld [vmem:[#allocation7 + $0xe0] sm:$0xff]  ;;  %2722 = vmatpush.msrb.mxu3 %v6636_v6 }
 0x350   : > { %9006 = vst [vmem:[#allocation148_spill] sm:$0xff] %v6606_v41  ;;  %2783 = vmatpush.msra.mxu0 %v6620_v46  ;;  %v6642_v41 = vld [vmem:[#allocation7 + $0x418] sm:$0xff] }
 0x351   : > { %9007 = vst [vmem:[#allocation149_spill] sm:$0xff] %v6608_v34  ;;  %v6626_v34 = vld [vmem:[#allocation7 + $0x320] sm:$0xff]  ;;  %2706 = vmatpush.msrb.mxu2 %v6642_v41 }
 0x352   : > { %9008 = vst [vmem:[#allocation150_spill] sm:$0xff] %v6612_v54  ;;  %2801 = vmatpush.msra.mxu1 %v6626_v34  ;;  %v6648_v54 = vld [vmem:[#allocation7 + $0x678] sm:$0xff]  ;;  %2707 = vmatmul.f32.vlgmr.msrb.gmra.mxu2 %v6255_v31  ;;  %v6682_v31 = vld [vmem:[#allocation7 + $0x280] sm:$0xff] }
 0x353   : > { %9009 = vst [vmem:[#allocation151_spill] sm:$0xff] %v6614_v60  ;;  %v6632_v60 = vld [vmem:[#allocation7 + $0xc0] sm:$0xff]  ;;  %2723 = vmatpush.msrb.mxu3 %v6648_v54 }
 0x354   : > { %9010 = vst [vmem:[#allocation152_spill] sm:$0xff] %v6618_v29  ;;  %2784 = vmatpush.msra.mxu0 %v6632_v60  ;;  %v6654_v29 = vld [vmem:[#allocation7 + $0x80] sm:$0xff] }
 0x355   : > { %9011 = vst [vmem:[#allocation153_spill] sm:$0xff] %v6620_v46  ;;  %v6638_v46 = vld [vmem:[#allocation7 + $0x300] sm:$0xff] }
 0x356   : > { %9012 = vst [vmem:[#allocation154_spill] sm:$0xff] %v6624_v17  ;;  %2802 = vmatpush.msra.mxu1 %v6638_v46  ;;  %v6658_v17 = vld [vmem:[#allocation7 + $0x658] sm:$0xff] }
 0x357   : > { %9013 = vst [vmem:[#allocation155_spill] sm:$0xff] %v6626_v34  ;;  %v6644_v34 = vld [vmem:[#allocation7 + $0xa0] sm:$0xff]  ;;  %2724 = vmatpush.msrb.mxu3 %v6658_v17 }
 0x358   : > { %9014 = vst [vmem:[#allocation156_spill] sm:$0xff] %v6630_v25  ;;  %2785 = vmatpush.msra.mxu0 %v6644_v34  ;;  %v6665_v25 = vld [vmem:[#allocation7 + $0x638] sm:$0xff] }
 0x359   : > { %9015 = vst [vmem:[#allocation157_spill] sm:$0xff] %v6632_v60  ;;  %v6650_v60 = vld [vmem:[#allocation7 + $0x2e0] sm:$0xff]  ;;  %2725 = vmatpush.msrb.mxu3 %v6665_v25 }
 0x35a   : > { %9016 = vst [vmem:[#allocation158_spill] sm:$0xff] %v6636_v6  ;;  %2803 = vmatpush.msra.mxu1 %v6650_v60  ;;  %2786 = vmatpush.msra.mxu0 %v6654_v29  ;;  %v6670_v6 = vld [vmem:[#allocation7 + $0x2a0] sm:$0xff] }
 0x35b   : > { %9017 = vst [vmem:[#allocation159_spill] sm:$0xff] %v6638_v46  ;;  %v6660_v46 = vld [vmem:[#allocation7 + $0x2c0] sm:$0xff] }
 0x35c   : > { %9018 = vst [vmem:[#allocation160_spill] sm:$0xff] %v6642_v41  ;;  %2804 = vmatpush.msra.mxu1 %v6660_v46  ;;  %v6674_v41 = vld [vmem:[#allocation7 + $0x5e0] sm:$0xff] }
 0x35d   : > { %9019 = vst [vmem:[#allocation161_spill] sm:$0xff] %v6648_v54  ;;  %2815 = vmatpush.msra.mxu2 %v6674_v41  ;;  %v6679_v54 = vld [vmem:[#allocation7 + $0x40] sm:$0xff] }
 0x35e   : > { %9020 = vst [vmem:[#allocation162_spill] sm:$0xff] %v6650_v60  ;;  %v6667_v60 = vld [vmem:[#allocation7 + $0x60] sm:$0xff]  ;;  %2805 = vmatpush.msra.mxu1 %v6670_v6 }
 0x35f   : > { %9021 = vst [vmem:[#allocation163_spill] sm:$0xff] %v6658_v17  ;;  %2787 = vmatpush.msra.mxu0 %v6667_v60  ;;  %v6689_v17 = vld [vmem:[#allocation7 + $0x20] sm:$0xff] }
 0x360   : > { %9022 = vst [vmem:[#allocation164_spill] sm:$0xff] %v6660_v46  ;;  %v6677_v46 = vld [vmem:[#allocation7 + $0x618] sm:$0xff]  ;;  %2806 = vmatpush.msra.mxu1 %v6682_v31 }
 0x361   : > { %9023 = vst [vmem:[#allocation165_spill] sm:$0xff] %v6665_v25  ;;  %2788 = vmatpush.msra.mxu0 %v6679_v54  ;;  %2726 = vmatpush.msrb.mxu3 %v6677_v46  ;;  %v6700_v25 = vld [vmem:[#allocation7] sm:$0xff] }
 0x362   : > { %9024 = vst [vmem:[#allocation166_spill] sm:$0xff] %v6667_v60  ;;  %v6686_v60 = vld [vmem:[#allocation7 + $0x5c0] sm:$0xff]  ;;  %2727 = vmatmul.f32.vlgmr.msrb.gmra.mxu3 %v6288_v26  ;;  %v6715_v26 = vld [vmem:[#allocation7 + $0x1c8] sm:$0xff] }
 0x363   : > { %9025 = vst [vmem:[#allocation167_spill] sm:$0xff] %v6670_v6  ;;  %2816 = vmatpush.msra.mxu2 %v6686_v60  ;;  %2789 = vmatpush.msra.mxu0 %v6689_v17  ;;  %v6696_v6 = vld [vmem:[#allocation7 + $0x5a0] sm:$0xff] }
 0x364   : > { %9026 = vst [vmem:[#allocation168_spill] sm:$0xff] %v6674_v41  ;;  %v6692_v41 = vld [vmem:[#allocation7 + $0x260] sm:$0xff] }
 0x365   : > { %9027 = vst [vmem:[#allocation169_spill] sm:$0xff] %v6677_v46  ;;  %2807 = vmatpush.msra.mxu1 %v6692_v41  ;;  %2817 = vmatpush.msra.mxu2 %v6696_v6  ;;  %v6712_v46 = vld [vmem:[#allocation7 + $0x7e0] sm:$0xff] }
 0x366   : > { %9028 = vst [vmem:[#allocation170_spill] sm:$0xff] %v6682_v31  ;;  %2790 = vmatpush.msra.mxu0 %v6700_v25  ;;  %v6706_v31 = vld [vmem:[#allocation7 + $0x240] sm:$0xff]  ;;  %2835 = vmatpush.msra.mxu3 %v6712_v46 }
 0x367   : > { %9029 = vst [vmem:[#allocation171_spill] sm:$0xff] %v6686_v60  ;;  %v6703_v60 = vld [vmem:[#allocation7 + $0x1e8] sm:$0xff]  ;;  %2808 = vmatpush.msra.mxu1 %v6706_v31 }
 0x368   : > { %9030 = vst [vmem:[#allocation172_spill] sm:$0xff] %v6692_v41  ;;  %2855 = vmatpush.msrb.mxu0 %v6703_v60  ;;  %v6709_v41 = vld [vmem:[#allocation7 + $0x580] sm:$0xff] }
 0x369   : > { %9031 = vst [vmem:[#allocation173_spill] sm:$0xff] %v6696_v6  ;;  %2818 = vmatpush.msra.mxu2 %v6709_v41  ;;  %v6718_v6 = vld [vmem:[#allocation7 + $0x220] sm:$0xff] }
 0x36a   : > { %9032 = vst [vmem:[#allocation174_spill] sm:$0xff] %v6703_v60  ;;  %2856 = vmatpush.msrb.mxu0 %v6715_v26  ;;  %2809 = vmatpush.msra.mxu1 %v6718_v6  ;;  %v6721_v60 = vld [vmem:[#allocation7 + $0x560] sm:$0xff] }
 0x36b   : > { %9033 = vst [vmem:[#allocation175_spill] sm:$0xff] %v6706_v31  ;;  %2819 = vmatpush.msra.mxu2 %v6721_v60  ;;  %v6724_v31 = vld [vmem:[#allocation7 + $0x7c0] sm:$0xff] }
 0x36c   : > { %9034 = vst [vmem:[#allocation176_spill] sm:$0xff] %v6709_v41  ;;  %2836 = vmatpush.msra.mxu3 %v6724_v31  ;;  %v6727_v41 = vld [vmem:[#allocation7 + $0x1a8] sm:$0xff] }
 0x36d   : > { %9035 = vst [vmem:[#allocation177_spill] sm:$0xff] %v6712_v46  ;;  %2857 = vmatpush.msrb.mxu0 %v6727_v41  ;;  %v6730_v46 = vld [vmem:[#allocation7 + $0x200] sm:$0xff] }
 0x36e   : > { %9036 = vst [vmem:[#allocation178_spill] sm:$0xff] %v6715_v26  ;;  %2810 = vmatpush.msra.mxu1 %v6730_v46  ;;  %v6734_v26 = vld [vmem:[#allocation7 + $0x540] sm:$0xff] }
 0x36f   : > { %9037 = vst [vmem:[#allocation179_spill] sm:$0xff] %v6718_v6  ;;  %2820 = vmatpush.msra.mxu2 %v6734_v26  ;;  %v6737_v6 = vld [vmem:[#allocation7 + $0x188] sm:$0xff] }
 0x370   : > { %9038 = vst [vmem:[#allocation180_spill] sm:$0xff] %v6721_v60  ;;  %2875 = vmatpush.msrb.mxu1 %v6009_v8  ;;  %2858 = vmatpush.msrb.mxu0 %v6737_v6  ;;  %v6740_v60 = vld [vmem:[#allocation7 + $0x7a0] sm:$0xff] }
 0x371   : > { %9039 = vst [vmem:[#allocation181_spill] sm:$0xff] %v6724_v31  ;;  %2837 = vmatpush.msra.mxu3 %v6740_v60  ;;  %v6744_v31 = vld [vmem:[#allocation7 + $0x520] sm:$0xff] }
 0x372   : > { %9040 = vst [vmem:[#allocation182_spill] sm:$0xff] %v6734_v26  ;;  %2876 = vmatpush.msrb.mxu1 %v6016_v35  ;;  %2821 = vmatpush.msra.mxu2 %v6744_v31  ;;  %v6748_v8 = vld [vmem:[#allocation7 + $0x780] sm:$0xff] }
 0x373   : > { %9041 = vst [vmem:[#allocation183_spill] sm:$0xff] %v6740_v60  ;;  %2859 = vmatpush.msrb.mxu0 %v6013_v27  ;;  %2838 = vmatpush.msra.mxu3 %v6748_v8  ;;  %v6752_v26 = vld [vmem:[#allocation7 + $0x500] sm:$0xff] }
 0x374   : > { %2877 = vmatpush.msrb.mxu1 %v6022_v51  ;;  %2822 = vmatpush.msra.mxu2 %v6752_v26  ;;  %v6756_v60 = vld [vmem:[#allocation7 + $0x760] sm:$0xff] }
 0x375   : > { %2860 = vmatpush.msrb.mxu0 %v6019_v19  ;;  %2839 = vmatpush.msra.mxu3 %v6756_v60  ;;  %v6760_v35 = vld [vmem:[#allocation7 + $0x4e0] sm:$0xff] }
 0x376   : > { %2878 = vmatpush.msrb.mxu1 %v6032_v61  ;;  %2823 = vmatpush.msra.mxu2 %v6760_v35  ;;  %v6764_v27 = vld [vmem:[#allocation7 + $0x740] sm:$0xff] }
 0x377   : > { %2861 = vmatpush.msrb.mxu0 %v6025_v52  ;;  %2840 = vmatpush.msra.mxu3 %v6764_v27  ;;  %v6768_v51 = vld [vmem:[#allocation7 + $0x4c0] sm:$0xff] }
 0x378   : > { %2879 = vmatpush.msrb.mxu1 %v6040_v49  ;;  %2824 = vmatpush.msra.mxu2 %v6768_v51  ;;  %v6772_v19 = vld [vmem:[#allocation7 + $0x720] sm:$0xff] }
 0x379   : > { %2862 = vmatpush.msrb.mxu0 %v6037_v53  ;;  %2841 = vmatpush.msra.mxu3 %v6772_v19  ;;  %v6776_v61 = vld [vmem:[#allocation7 + $0x4a0] sm:$0xff] }
 0x37a   : > { %2880 = vmatpush.msrb.mxu1 %v6046_v48  ;;  %2825 = vmatpush.msra.mxu2 %v6776_v61  ;;  %v6780_v52 = vld [vmem:[#allocation7 + $0x700] sm:$0xff] }
 0x37b   : > { %2863 = vmatpush.msrb.mxu0 %v6043_v43  ;;  %2842 = vmatpush.msra.mxu3 %v6780_v52  ;;  %v6784_v49 = vld [vmem:[#allocation7 + $0x480] sm:$0xff] }
 0x37c   : > { %2881 = vmatpush.msrb.mxu1 %v6056_v58  ;;  %2826 = vmatpush.msra.mxu2 %v6784_v49  ;;  %v6788_v53 = vld [vmem:[#allocation7 + $0x6e0] sm:$0xff] }
 0x37d   : > { %2864 = vmatpush.msrb.mxu0 %v6049_v50  ;;  %2843 = vmatpush.msra.mxu3 %v6788_v53  ;;  %v6792_v48 = vld [vmem:[#allocation7 + $0x460] sm:$0xff] }
 0x37e   : > { %2882 = vmatpush.msrb.mxu1 %v6067_v10  ;;  %2827 = vmatpush.msra.mxu2 %v6792_v48  ;;  %v6796_v43 = vld [vmem:[#allocation7 + $0x6c0] sm:$0xff] }
 0x37f   : > { %2865 = vmatpush.msrb.mxu0 %v6061_v2  ;;  %2844 = vmatpush.msra.mxu3 %v6796_v43  ;;  %v6800_v58 = vld [vmem:[#allocation7 + $0x440] sm:$0xff] }
 0x380   : > { %2883 = vmatpush.msrb.mxu1 %v6079_v15  ;;  %2828 = vmatpush.msra.mxu2 %v6800_v58  ;;  %v6804_v50 = vld [vmem:[#allocation7 + $0x6a0] sm:$0xff] }
 0x381   : > { %2866 = vmatpush.msrb.mxu0 %v6073_v12  ;;  %2845 = vmatpush.msra.mxu3 %v6804_v50  ;;  %v6808_v10 = vld [vmem:[#allocation7 + $0x420] sm:$0xff]  ;;  %v6820_v12 = vld [vmem:[#allocation7 + $0x5e8] sm:$0xff] }
 0x382   : > { %2884 = vmatpush.msrb.mxu1 %v6089_v24  ;;  %2829 = vmatpush.msra.mxu2 %v6808_v10  ;;  %v6812_v2 = vld [vmem:[#allocation7 + $0x680] sm:$0xff] }
 0x383   : > { %2867 = vmatpush.msrb.mxu0 %v6085_v23  ;;  %2846 = vmatpush.msra.mxu3 %v6812_v2  ;;  %v6816_v15 = vld [vmem:[#allocation7 + $0x400] sm:$0xff]  ;;  %v6828_v23 = vld [vmem:[#allocation7 + $0x5c8] sm:$0xff] }
 0x384   : > { %2885 = vmatpush.msrb.mxu1 %v6103_v18  ;;  %2830 = vmatpush.msra.mxu2 %v6816_v15  ;;  %v6824_v24 = vld [vmem:[#allocation7 + $0x660] sm:$0xff] }
 0x385   : > { %2868 = vmatpush.msrb.mxu0 %v6097_v33  ;;  %2847 = vmatpush.msra.mxu3 %v6824_v24  ;;  %v6832_v18 = vld [vmem:[#allocation7 + $0x640] sm:$0xff]  ;;  %v6836_v33 = vld [vmem:[#allocation7 + $0x5a8] sm:$0xff] }
 0x386   : > { %2895 = vmatpush.msrb.mxu2 %v6820_v12  ;;  %2886 = vmatpush.msrb.mxu1 %v6118_v59  ;;  %9042 = vst [vmem:[#allocation184_spill] sm:$0xff] %v6832_v18  ;;  %v6840_v59 = vld [vmem:[#allocation7 + $0x620] sm:$0xff] }
 0x387   : > { %2869 = vmatpush.msrb.mxu0 %v6109_v9  ;;  %2848 = vmatpush.msra.mxu3 %v6832_v18  ;;  %9043 = vst [vmem:[#allocation185_spill] sm:$0xff] %v6840_v59  ;;  %v6843_v9 = vld [vmem:[#allocation7 + $0x588] sm:$0xff] }
 0x388   : > { %2896 = vmatpush.msrb.mxu2 %v6828_v23  ;;  %2887 = vmatpush.msrb.mxu1 %v6131_v37  ;;  %v6847_v37 = vld [vmem:[#allocation7 + $0x600] sm:$0xff]  ;;  %v6853_v18 = vld [vmem:[#allocation7 + $0x7e8] sm:$0xff] }
 0x389   : > { %2870 = vmatpush.msrb.mxu0 %v6124_v1  ;;  %2849 = vmatpush.msra.mxu3 %v6840_v59  ;;  %9044 = vst [vmem:[#allocation186_spill] sm:$0xff] %v6847_v37  ;;  %v6850_v1 = vld [vmem:[#allocation7 + $0x568] sm:$0xff]  ;;  %v9059_v59 = vld [vmem:[#allocation85_spill] sm:$0xff] }
 0x38a   : > { %2897 = vmatpush.msrb.mxu2 %v6836_v33  ;;  %2888 = vmatpush.msrb.mxu1 %v6139_v42  ;;  %9045 = vst [vmem:[#allocation187_spill] sm:$0xff] %v6853_v18  ;;  %v6858_v42 = vld [vmem:[#allocation7 + $0x7c8] sm:$0xff] }
 0x38b   : > { %2850 = vmatpush.msra.mxu3 %v6847_v37  ;;  %9046 = vst [vmem:[#allocation188_spill] sm:$0xff] %v6858_v42 }
 0x38c   : > { %2898 = vmatpush.msrb.mxu2 %v6843_v9  ;;  %2889 = vmatpush.msrb.mxu1 %v6149_v16  ;;  %v6862_v16 = vld [vmem:[#allocation7 + $0x7a8] sm:$0xff] }
 0x38d   : > { %2915 = vmatpush.msrb.mxu3 %v6853_v18  ;;  %9047 = vst [vmem:[#allocation189_spill] sm:$0xff] %v6862_v16  ;;  %v9057_v18 = vld [vmem:[#allocation84_spill] sm:$0xff] }
 0x38e   : > { %2899 = vmatpush.msrb.mxu2 %v6850_v1  ;;  %2890 = vmatpush.msrb.mxu1 %v6165_v55  ;;  %v6873_v55 = vpop.f32.mrf.mxu2 }
 0x38f   : > { %2916 = vmatpush.msrb.mxu3 %v6858_v42  ;;  %v9056_v42 = vld [vmem:[#allocation22_spill] sm:$0xff] }
 0x390   : > { %2900 = vmatpush.msrb.mxu2 %v6053_v3  ;;  %v9048_v3 = vld [vmem:[#allocation88_spill] sm:$0xff] }
 0x391   : > { %2917 = vmatpush.msrb.mxu3 %v6862_v16  ;;  %v9055_v16 = vld [vmem:[#allocation26_spill] sm:$0xff] }
 0x392   : > { %2901 = vmatpush.msrb.mxu2 %v6064_v5  ;;  %v6879_v5 = vpop.f32.mrf.mxu3 }
 0x393   : > { %2918 = vmatpush.msrb.mxu3 %v6058_v62  ;;  %v9049_v62 = vld [vmem:[#allocation86_spill] sm:$0xff] }
 0x394   : > { %2902 = vmatpush.msrb.mxu2 %v6076_v14  ;;  %v9051_v14 = vld [vmem:[#allocation89_spill] sm:$0xff] }
 0x395   : > { %2919 = vmatpush.msrb.mxu3 %v6070_v11  ;;  %v9050_v11 = vld [vmem:[#allocation91_spill] sm:$0xff] }
 0x396   : > { %2903 = vmatpush.msrb.mxu2 %v6094_v28  ;;  %v9052_v28 = vld [vmem:[#allocation95_spill] sm:$0xff] }
 0x397   : > { %2920 = vmatpush.msrb.mxu3 %v6082_v20  ;;  %v2448_v20 = vpop.f32.mrf.mxu1 }
 0x398   : > { %2904 = vmatpush.msrb.mxu2 %v6106_v39  ;;  %v2428_v39 = vpop.f32.mrf.mxu0 }
 0x399   : > { %2921 = vmatpush.msrb.mxu3 %v6100_v38  ;;  %v9053_v38 = vld [vmem:[#allocation92_spill] sm:$0xff] }
 0x39a   : > { %2905 = vmatpush.msrb.mxu2 %v6121_v13  ;;  %v2468_v13 = vpop.f32.mrf.mxu2 }
 0x39b   : > { %2922 = vmatpush.msrb.mxu3 %v6112_v40 }
 0x39c   : > { %2906 = vmatpush.msrb.mxu2 %v6136_v0  ;;  %v2449_v0 = vadd.f32 %v2448_v20, %v2428_v39 }
 0x39d   : > { %2923 = vmatpush.msrb.mxu3 %v9049_v62 }
 0x39e   : > { %2907 = vmatpush.msrb.mxu2 %v9048_v3  ;;  %v2469_v40 = vadd.f32 %v2468_v13, %v2449_v0  ;;  %v2488_v3 = vpop.f32.mrf.mxu3 }
 0x39f   : > { %2924 = vmatpush.msrb.mxu3 %v9051_v14 }
 0x3a0   : > { %2908 = vmatpush.msrb.mxu2 %v9050_v11  ;;  %v2489_v62 = vadd.f32 %v2488_v3, %v2469_v40  ;;  %v9054_v11 = vld [vmem:[#allocation13_spill] sm:$0xff] }
 0x3a1   : > { %2925 = vmatpush.msrb.mxu3 %v9053_v38  ;;  %v2528_v38 = vpop.f32.mrf.mxu1 }
 0x3a2   : > { %2909 = vmatpush.msrb.mxu2 %v9052_v28  ;;  %v2731_v14 = vmul.f32 0.001953125, %v2489_v62  ;;  %v2548_v39 = vpop.f32.mrf.mxu2 }
 0x3a3   : > { %2926 = vmatpush.msrb.mxu3 %v6190_v32 }
 0x3a4   : > { %2910 = vmatpush.msrb.mxu2 %v6198_v4  ;;  %v2735_v28 = vperm.slane %v2731_v14, 0  ;;  %v2508_v4 = vpop.f32.mrf.mxu0 }
 0x3a5   : > { %2927 = vmatpush.msrb.mxu3 %v6205_v57  ;;  %v2529_v32 = vadd.f32 %v2528_v38, %v2508_v4 }
 0x3a6   : > { %v6892_v20 = vsub.f32 %v9057_v18, %v2735_v28  ;;  %v2568_v3 = vpop.f32.mrf.mxu3 }
 0x3a7   : > { %2928 = vmatpush.msrb.mxu3 %v9054_v11  ;;  %v2549_v0 = vadd.f32 %v2548_v39, %v2529_v32  ;;  %v6906_v32 = vld [vmem:[#allocation7 + $0x1f0] sm:$0xff] }
 0x3a8   : > { %9058 = vst [vmem:[#allocation88_spill] sm:$0xff] %v6892_v20  ;;  %v2743_v57 = vmul.f32 %v6892_v20, %v6892_v20  ;;  %v9070_v20 = vld [vmem:[#allocation100_spill] sm:$0xff] }
 0x3a9   : > { %2929 = vmatpush.msrb.mxu3 %v9055_v16  ;;  %v2569_v62 = vadd.f32 %v2568_v3, %v2549_v0  ;;  %v9061_v0 = vld [vmem:[#allocation87_spill] sm:$0xff] }
 0x3aa   : > { %v2747_v13 = vsel %vm628_vm0, %v2743_v57, 0.0 }
 0x3ab   : > { %2930 = vmatpush.msrb.mxu3 %v9056_v42  ;;  %v2748_v40 = vrot.slane %v2747_v13, 4  ;;  %v2732_v11 = vmul.f32 0.001953125, %v2569_v62  ;;  %v9063_v62 = vld [vmem:[#allocation93_spill] sm:$0xff] }
 0x3ad   : > { %v2749_v16 = vadd.f32 %v2748_v40, %v2747_v13  ;;  %v2736_v42 = vperm.slane %v2732_v11, 0  ;;  %v9062_v40 = vld [vmem:[#allocation90_spill] sm:$0xff]  ;;  %v9064_v11 = vld [vmem:[#allocation97_spill] sm:$0xff] }
 0x3af   : > { %v2750_v14 = vrot.slane %v2749_v16, 2  ;;  %v6898_v18 = vsub.f32 %v9059_v59, %v2736_v42  ;;  %v2628_v42 = vpop.f32.mrf.mxu2 }
 0x3b1   : > { %v2751_v37 = vadd.f32 %v2750_v14, %v2749_v16  ;;  %9060 = vst [vmem:[#allocation86_spill] sm:$0xff] %v6898_v18  ;;  %v2744_v38 = vmul.f32 %v6898_v18, %v6898_v18  ;;  %v2588_v14 = vpop.f32.mrf.mxu0  ;;  %v9069_v18 = vld [vmem:[#allocation14_spill] sm:$0xff] }
 0x3b3   : > { %v2752_v28 = vrot.slane %v2751_v37, 1  ;;  %v2754_v57 = vsel %vm628_vm0, %v2744_v38, 0.0 }
 0x3b4   : > { %v2755_v39 = vrot.slane %v2754_v57, 4 }
 0x3b5   : > { %v6902_v4 = vadd.f32 %v2752_v28, %v2751_v37  ;;  %v2608_v37 = vpop.f32.mrf.mxu1 }
 0x3b6   : > { %v2756_v13 = vadd.f32 %v2755_v39, %v2754_v57  ;;  %v2609_v38 = vadd.f32 %v2608_v37, %v2588_v14  ;;  %v9065_v57 = vld [vmem:[#allocation99_spill] sm:$0xff]  ;;  %v9073_v14 = vld [vmem:[#allocation30_spill] sm:$0xff] }
 0x3b7   : > { %2791 = vmatmul.f32.vlgmr.msra.gmra.mxu0 %v6902_v4 }
 0x3b8   : > { %2935 = vmatpush.msra.mxu0 %v6906_v32  ;;  %v2757_v59 = vrot.slane %v2756_v13, 2  ;;  %v2629_v39 = vadd.f32 %v2628_v42, %v2609_v38  ;;  %v9074_v42 = vld [vmem:[#allocation96_spill] sm:$0xff] }
 0x3ba   : > { %2936 = vmatpush.msra.mxu0 %v9061_v0  ;;  %v2758_v3 = vadd.f32 %v2757_v59, %v2756_v13  ;;  %v9066_v0 = vld [vmem:[#allocation94_spill] sm:$0xff]  ;;  %v9067_v13 = vld [vmem:[#allocation101_spill] sm:$0xff]  ;;  %v2648_v59 = vpop.f32.mrf.mxu3 }
 0x3bc   : > { %2937 = vmatpush.msra.mxu0 %v9062_v40  ;;  %v2759_v16 = vrot.slane %v2758_v3, 1  ;;  %v2649_v40 = vadd.f32 %v2648_v59, %v2629_v39  ;;  %v9076_v39 = vld [vmem:[#allocation23_spill] sm:$0xff]  ;;  %v9079_v59 = vld [vmem:[#allocation21_spill] sm:$0xff] }
 0x3be   : > { %2938 = vmatpush.msra.mxu0 %v9063_v62  ;;  %v6914_v28 = vadd.f32 %v2759_v16, %v2758_v3  ;;  %v9068_v62 = vld [vmem:[#allocation98_spill] sm:$0xff] }
 0x3bf   : > { %2871 = vmatmul.f32.vlgmr.msrb.gmra.mxu0 %v6902_v4  ;;  %v9071_v3 = vld [vmem:[#allocation18_spill] sm:$0xff] }
 0x3c0   : > { %2939 = vmatpush.msra.mxu0 %v9064_v11  ;;  %2811 = vmatmul.f32.vlgmr.msra.gmra.mxu1 %v6914_v28  ;;  %v2733_v11 = vmul.f32 0.001953125, %v2649_v40  ;;  %v9072_v16 = vld [vmem:[#allocation102_spill] sm:$0xff]  ;;  %v9080_v40 = vld [vmem:[#allocation28_spill] sm:$0xff] }
 0x3c1   : > { %2955 = vmatpush.msra.mxu1 %v9066_v0  ;;  %v9078_v0 = vld [vmem:[#allocation24_spill] sm:$0xff] }
 0x3c2   : > { %2940 = vmatpush.msra.mxu0 %v9065_v57  ;;  %v2737_v37 = vperm.slane %v2733_v11, 0  ;;  %v9075_v57 = vld [vmem:[#allocation19_spill] sm:$0xff]  ;;  %v9081_v11 = vld [vmem:[#allocation25_spill] sm:$0xff] }
 0x3c3   : > { %2956 = vmatpush.msra.mxu1 %v9068_v62 }
 0x3c4   : > { %2941 = vmatpush.msra.mxu0 %v9067_v13  ;;  %v6928_v38 = vsub.f32 %v9074_v42, %v2737_v37 }
 0x3c5   : > { %2957 = vmatpush.msra.mxu1 %v9070_v20  ;;  %v9077_v20 = vld [vmem:[#allocation20_spill] sm:$0xff] }
 0x3c6   : > { %2942 = vmatpush.msra.mxu0 %v9069_v18  ;;  %v2745_v18 = vmul.f32 %v6928_v38, %v6928_v38 }
 0x3c7   : > { %2958 = vmatpush.msra.mxu1 %v9072_v16  ;;  %v9083_v16 = vld [vmem:[#allocation27_spill] sm:$0xff] }
 0x3c8   : > { %2943 = vmatpush.msra.mxu0 %v9071_v3  ;;  %2891 = vmatmul.f32.vlgmr.msrb.gmra.mxu1 %v6914_v28  ;;  %v2761_v13 = vsel %vm628_vm0, %v2745_v18, 0.0  ;;  %v9082_v3 = vld [vmem:[#allocation16_spill] sm:$0xff] }
 0x3c9   : > { %2959 = vmatpush.msra.mxu1 %v9075_v57  ;;  %v2762_v62 = vrot.slane %v2761_v13, 4  ;;  %v9085_v57 = vld [vmem:[#allocation29_spill] sm:$0xff] }
 0x3ca   : > { %2944 = vmatpush.msra.mxu0 %v9073_v14  ;;  %v9084_v14 = vld [vmem:[#allocation40_spill] sm:$0xff] }
 0x3cb   : > { %2960 = vmatpush.msra.mxu1 %v9077_v20  ;;  %v2763_v37 = vadd.f32 %v2762_v62, %v2761_v13  ;;  %v9087_v20 = vld [vmem:[#allocation31_spill] sm:$0xff]  ;;  %v9090_v62 = vld [vmem:[#allocation44_spill] sm:$0xff] }
 0x3cc   : > { %2945 = vmatpush.msra.mxu0 %v9076_v39  ;;  %v9086_v39 = vld [vmem:[#allocation35_spill] sm:$0xff] }
 0x3cd   : > { %2961 = vmatpush.msra.mxu1 %v9079_v59  ;;  %v2764_v42 = vrot.slane %v2763_v37, 2 }
 0x3ce   : > { %2946 = vmatpush.msra.mxu0 %v9078_v0  ;;  %v9088_v0 = vld [vmem:[#allocation37_spill] sm:$0xff] }
 0x3cf   : > { %2962 = vmatpush.msra.mxu1 %v9081_v11  ;;  %v2765_v18 = vadd.f32 %v2764_v42, %v2763_v37  ;;  %v9091_v11 = vld [vmem:[#allocation52_spill] sm:$0xff]  ;;  %v9093_v37 = vld [vmem:[#allocation39_spill] sm:$0xff] }
 0x3d0   : > { %2947 = vmatpush.msra.mxu0 %v9080_v40  ;;  %v9089_v40 = vld [vmem:[#allocation33_spill] sm:$0xff]  ;;  %v9095_v42 = vld [vmem:[#allocation36_spill] sm:$0xff] }
 0x3d1   : > { %2963 = vmatpush.msra.mxu1 %v9083_v16  ;;  %v2766_v59 = vrot.slane %v2765_v18, 1  ;;  %v9094_v16 = vld [vmem:[#allocation56_spill] sm:$0xff] }
 0x3d2   : > { %2948 = vmatpush.msra.mxu0 %v9082_v3  ;;  %v9092_v3 = vld [vmem:[#allocation34_spill] sm:$0xff] }
 0x3d3   : > { %2964 = vmatpush.msra.mxu1 %v9085_v57  ;;  %v6950_v13 = vadd.f32 %v2766_v59, %v2765_v18  ;;  %v9096_v57 = vld [vmem:[#allocation42_spill] sm:$0xff] }
 0x3d4   : > { %2949 = vmatpush.msra.mxu0 %v9084_v14  ;;  %v2688_v14 = vpop.f32.mrf.mxu1 }
 0x3d5   : > { %2965 = vmatpush.msra.mxu1 %v9087_v20  ;;  %2831 = vmatmul.f32.vlgmr.msra.gmra.mxu2 %v6950_v13  ;;  %v2708_v18 = vpop.f32.mrf.mxu2  ;;  %v9098_v20 = vld [vmem:[#allocation15_spill] sm:$0xff] }
 0x3d6   : > { %2950 = vmatpush.msra.mxu0 %v9086_v39  ;;  %2975 = vmatpush.msra.mxu2 %v9092_v3  ;;  %v2668_v39 = vpop.f32.mrf.mxu0 }
 0x3d7   : > { %2951 = vmatmul.f32.vlgmr.msra.gmra.mxu0 %v6902_v4  ;;  %2966 = vmatpush.msra.mxu1 %v9089_v40  ;;  %v2689_v59 = vadd.f32 %v2688_v14, %v2668_v39  ;;  %v9100_v40 = vld [vmem:[#allocation55_spill] sm:$0xff]  ;;  %v9105_v14 = vld [vmem:[#allocation41_spill] sm:$0xff] }
 0x3d8   : > { %3015 = vmatpush.msrb.mxu0 %v9088_v0  ;;  %2976 = vmatpush.msra.mxu2 %v9095_v42  ;;  %v9099_v0 = vld [vmem:[#allocation46_spill] sm:$0xff]  ;;  %v9104_v42 = vld [vmem:[#allocation53_spill] sm:$0xff] }
 0x3d9   : > { %2967 = vmatpush.msra.mxu1 %v9090_v62  ;;  %v9101_v62 = vld [vmem:[#allocation32_spill] sm:$0xff]  ;;  %v2709_v3 = vadd.f32 %v2708_v18, %v2689_v59  ;;  %v9106_v39 = vld [vmem:[#allocation45_spill] sm:$0xff]  ;;  %v9107_v18 = vld [vmem:[#allocation59_spill] sm:$0xff] }
 0x3da   : > { %3016 = vmatpush.msrb.mxu0 %v6316_v7  ;;  %v9097_v7 = vld [vmem:[#allocation51_spill] sm:$0xff]  ;;  %2977 = vmatpush.msra.mxu2 %v9098_v20  ;;  %v9108_v20 = vld [vmem:[#allocation76_spill] sm:$0xff] }
 0x3db   : > { %2968 = vmatpush.msra.mxu1 %v9093_v37  ;;  %v9110_v59 = vld [vmem:[#allocation63_spill] sm:$0xff] }
 0x3dc   : > { %3017 = vmatpush.msrb.mxu0 %v9091_v11  ;;  %2978 = vmatpush.msra.mxu2 %v9101_v62  ;;  %v9102_v11 = vld [vmem:[#allocation49_spill] sm:$0xff] }
 0x3dd   : > { %2969 = vmatpush.msra.mxu1 %v9096_v57  ;;  %2911 = vmatmul.f32.vlgmr.msrb.gmra.mxu2 %v6950_v13  ;;  %v9112_v62 = vld [vmem:[#allocation77_spill] sm:$0xff] }
 0x3de   : > { %3018 = vmatpush.msrb.mxu0 %v9094_v16  ;;  %v9103_v16 = vld [vmem:[#allocation38_spill] sm:$0xff] }
 0x3df   : > { %2970 = vmatpush.msra.mxu1 %v9099_v0  ;;  %2979 = vmatpush.msra.mxu2 %v9103_v16  ;;  %v9109_v0 = vld [vmem:[#allocation60_spill] sm:$0xff]  ;;  %v9117_v16 = vld [vmem:[#allocation70_spill] sm:$0xff] }
 0x3e0   : > { %3019 = vmatpush.msrb.mxu0 %v9097_v7  ;;  %2971 = vmatmul.f32.vlgmr.msra.gmra.mxu1 %v6914_v28 }
 0x3e1   : > { %3035 = vmatpush.msrb.mxu1 %v9102_v11  ;;  %2980 = vmatpush.msra.mxu2 %v9105_v14  ;;  %v9114_v11 = vld [vmem:[#allocation66_spill] sm:$0xff] }
 0x3e2   : > { %3020 = vmatpush.msrb.mxu0 %v9100_v40  ;;  %v9111_v40 = vld [vmem:[#allocation17_spill] sm:$0xff] }
 0x3e3   : > { %3036 = vmatpush.msrb.mxu1 %v9104_v42  ;;  %2981 = vmatpush.msra.mxu2 %v9106_v39  ;;  %v9120_v39 = vld [vmem:[#allocation74_spill] sm:$0xff] }
 0x3e4   : > { %3021 = vmatpush.msrb.mxu0 %v6375_v45 }
 0x3e5   : > { %v2728_v37 = vpop.f32.mrf.mxu3  ;;  %3037 = vmatpush.msrb.mxu1 %v6369_v44  ;;  %2982 = vmatpush.msra.mxu2 %v9109_v0  ;;  %v9113_v44 = vld [vmem:[#allocation64_spill] sm:$0xff] }
 0x3e6   : > { %v2729_v57 = vadd.f32 %v2728_v37, %v2709_v3  ;;  %3022 = vmatpush.msrb.mxu0 %v6388_v21  ;;  %v9115_v3 = vld [vmem:[#allocation78_spill] sm:$0xff]  ;;  %v9123_v0 = vld [vmem:[#allocation80_spill] sm:$0xff] }
 0x3e7   : > { %3038 = vmatpush.msrb.mxu1 %v9107_v18  ;;  %2983 = vmatpush.msra.mxu2 %v9113_v44  ;;  %v9116_v37 = vld [vmem:[#allocation58_spill] sm:$0xff]  ;;  %v9121_v18 = vld [vmem:[#allocation107_spill] sm:$0xff]  ;;  %v9126_v44 = vld [vmem:[#allocation105_spill] sm:$0xff] }
 0x3e8   : > { %v2734_v7 = vmul.f32 0.001953125, %v2729_v57  ;;  %3023 = vmatpush.msrb.mxu0 %v6402_v22  ;;  %v9118_v57 = vld [vmem:[#allocation103_spill] sm:$0xff] }
 0x3e9   : > { %3039 = vmatpush.msrb.mxu1 %v9110_v59  ;;  %2984 = vmatpush.msra.mxu2 %v9116_v37  ;;  %v9124_v59 = vld [vmem:[#allocation111_spill] sm:$0xff] }
 0x3ea   : > { %v2738_v45 = vperm.slane %v2734_v7, 0  ;;  %3024 = vmatpush.msrb.mxu0 %v9108_v20  ;;  %v9119_v7 = vld [vmem:[#allocation61_spill] sm:$0xff] }
 0x3eb   : > { %3040 = vmatpush.msrb.mxu1 %v9114_v11  ;;  %2985 = vmatpush.msra.mxu2 %v9119_v7  ;;  %v9122_v20 = vld [vmem:[#allocation65_spill] sm:$0xff]  ;;  %v9127_v11 = vld [vmem:[#allocation115_spill] sm:$0xff] }
 0x3ec   : > { %v6981_v21 = vsub.f32 %v9111_v40, %v2738_v45  ;;  %3025 = vmatpush.msrb.mxu0 %v9112_v62  ;;  %v9125_v62 = vld [vmem:[#allocation69_spill] sm:$0xff] }
 0x3ed   : > { %3041 = vmatpush.msrb.mxu1 %v9117_v16  ;;  %2986 = vmatpush.msra.mxu2 %v9122_v20  ;;  %v9130_v16 = vld [vmem:[#allocation79_spill] sm:$0xff]  ;;  %v9137_v20 = vld [vmem:[#allocation48_spill] sm:$0xff] }
 0x3ee   : > { %v2746_v22 = vmul.f32 %v6981_v21, %v6981_v21  ;;  %3026 = vmatpush.msrb.mxu0 %v9115_v3  ;;  %v9129_v3 = vld [vmem:[#allocation108_spill] sm:$0xff] }
 0x3ef   : > { %3042 = vmatpush.msrb.mxu1 %v9120_v39  ;;  %2987 = vmatpush.msra.mxu2 %v9125_v62  ;;  %v9133_v39 = vld [vmem:[#allocation116_spill] sm:$0xff] }
 0x3f0   : > { %v2768_v42 = vsel %vm628_vm0, %v2746_v22, 0.0  ;;  %3027 = vmatpush.msrb.mxu0 %v9118_v57  ;;  %v9128_v22 = vld [vmem:[#allocation73_spill] sm:$0xff] }
 0x3f1   : > { %v2769_v14 = vrot.slane %v2768_v42, 4  ;;  %3043 = vmatpush.msrb.mxu1 %v9123_v0  ;;  %2988 = vmatpush.msra.mxu2 %v9128_v22  ;;  %v9138_v0 = vld [vmem:[#allocation122_spill] sm:$0xff]  ;;  %v9144_v22 = vld [vmem:[#allocation125_spill] sm:$0xff] }
 0x3f2   : > { %3028 = vmatpush.msrb.mxu0 %v9121_v18  ;;  %v7016_v18 = vld [vmem:[#allocation7 + $0x7f0] sm:$0xff] }
 0x3f3   : > { %v2770_v45 = vadd.f32 %v2769_v14, %v2768_v42  ;;  %3044 = vmatpush.msrb.mxu1 %v9126_v44  ;;  %2989 = vmatpush.msra.mxu2 %v9130_v16  ;;  %v9131_v42 = vld [vmem:[#allocation112_spill] sm:$0xff]  ;;  %v9142_v44 = vld [vmem:[#allocation117_spill] sm:$0xff]  ;;  %v9147_v16 = vld [vmem:[#allocation123_spill] sm:$0xff] }
 0x3f4   : > { %3029 = vmatpush.msrb.mxu0 %v9124_v59  ;;  %v9132_v14 = vld [vmem:[#allocation104_spill] sm:$0xff]  ;;  %v9139_v59 = vld [vmem:[#allocation82_spill] sm:$0xff] }
 0x3f5   : > { %v2771_v40 = vrot.slane %v2770_v45, 2  ;;  %3045 = vmatpush.msrb.mxu1 %v9129_v3  ;;  %2990 = vmatpush.msra.mxu2 %v9132_v14  ;;  %v9145_v3 = vld [vmem:[#allocation120_spill] sm:$0xff]  ;;  %v9151_v14 = vld [vmem:[#allocation141_spill] sm:$0xff] }
 0x3f6   : > { %3030 = vmatpush.msrb.mxu0 %v9127_v11  ;;  %2991 = vmatmul.f32.vlgmr.msra.gmra.mxu2 %v6950_v13  ;;  %v9143_v11 = vld [vmem:[#allocation43_spill] sm:$0xff] }
 0x3f7   : > { %v2772_v37 = vadd.f32 %v2771_v40, %v2770_v45  ;;  %3031 = vmatmul.f32.vlgmr.msrb.gmra.mxu0 %v6902_v4  ;;  %3046 = vmatpush.msrb.mxu1 %v9131_v42  ;;  %v9134_v4 = vld [vmem:[#allocation109_spill] sm:$0xff]  ;;  %v9135_v45 = vld [vmem:[#allocation119_spill] sm:$0xff]  ;;  %v9141_v40 = vld [vmem:[#allocation50_spill] sm:$0xff] }
 0x3f8   : > { %3209 = vmatpush.msra.mxu0 %v6525_v47  ;;  %3055 = vmatpush.msrb.mxu2 %v9134_v4  ;;  %v9136_v47 = vld [vmem:[#allocation113_spill] sm:$0xff]  ;;  %v9153_v4 = vld [vmem:[#allocation136_spill] sm:$0xff] }
 0x3f9   : > { %v2773_v57 = vrot.slane %v2772_v37, 1  ;;  %3047 = vmatpush.msrb.mxu1 %v9133_v39  ;;  %v9149_v42 = vld [vmem:[#allocation133_spill] sm:$0xff] }
 0x3fa   : > { %3210 = vmatpush.msra.mxu0 %v6536_v36  ;;  %3056 = vmatpush.msrb.mxu2 %v9136_v47  ;;  %v9140_v36 = vperm.slane %v9139_v59, 0  ;;  %v9152_v39 = vld [vmem:[#allocation57_spill] sm:$0xff]  ;;  %v9156_v47 = vperm.slane %v9139_v59, 1 }
 0x3fb   : > { %v7009_v7 = vadd.f32 %v2773_v57, %v2772_v37  ;;  %3048 = vmatpush.msrb.mxu1 %v9135_v45  ;;  %v9150_v57 = vld [vmem:[#allocation126_spill] sm:$0xff]  ;;  %v9155_v45 = vld [vmem:[#allocation145_spill] sm:$0xff] }
 0x3fc   : > { %3211 = vmatpush.msra.mxu0 %v6548_v63  ;;  %v7027_v62 = vadd.f32 %v9141_v40, %v9140_v36  ;;  %3057 = vmatpush.msrb.mxu2 %v9142_v44  ;;  %v9146_v63 = vld [vmem:[#allocation47_spill] sm:$0xff]  ;;  %v9159_v36 = vld [vmem:[#allocation68_spill] sm:$0xff] }
 0x3fd   : > { %2851 = vmatmul.f32.vlgmr.msra.gmra.mxu3 %v7009_v7  ;;  %3049 = vmatpush.msrb.mxu1 %v9138_v0  ;;  %v9160_v40 = vld [vmem:[#allocation139_spill] sm:$0xff] }
 0x3fe   : > { %2995 = vmatpush.msra.mxu3 %v7016_v18  ;;  %3212 = vmatpush.msra.mxu0 %v6560_v56  ;;  %v3181_v37 = vsel %vm643_vm1, %v7027_v62, 0.0  ;;  %v9148_v56 = vld [vmem:[#allocation54_spill] sm:$0xff]  ;;  %v9161_v44 = vld [vmem:[#allocation131_spill] sm:$0xff] }
 0x3ff   : > { %3050 = vmatpush.msrb.mxu1 %v9144_v22  ;;  %3058 = vmatpush.msrb.mxu2 %v9145_v3  ;;  %v9163_v3 = vld [vmem:[#allocation72_spill] sm:$0xff] }
 0x400   : > { %2996 = vmatpush.msra.mxu3 %v9137_v20  ;;  %3051 = vmatmul.f32.vlgmr.msrb.gmra.mxu1 %v6914_v28  ;;  %v3182_v28 = vrot.slane %v3181_v37, 4  ;;  %v9157_v20 = vld [vmem:[#allocation62_spill] sm:$0xff] }
 0x401   : > { %3213 = vmatpush.msra.mxu0 %v6572_v30  ;;  %3059 = vmatpush.msrb.mxu2 %v9147_v16  ;;  %v9154_v30 = vld [vmem:[#allocation128_spill] sm:$0xff]  ;;  %v7052_v0 = vadd.f32 %v9157_v20, %v9156_v47  ;;  %v9165_v16 = vld [vmem:[#allocation134_spill] sm:$0xff]  ;;  %v9174_v20 = vld [vmem:[#allocation75_spill] sm:$0xff] }
 0x402   : > { %2997 = vmatpush.msra.mxu3 %v9143_v11  ;;  %3229 = vmatpush.msra.mxu1 %v9149_v42  ;;  %v9162_v11 = vld [vmem:[#allocation149_spill] sm:$0xff]  ;;  %v3183_v22 = vadd.f32 %v3182_v28, %v3181_v37  ;;  %v9171_v28 = vld [vmem:[#allocation71_spill] sm:$0xff]  ;;  %v9173_v47 = vld [vmem:[#allocation140_spill] sm:$0xff] }
 0x403   : > { %3060 = vmatpush.msrb.mxu2 %v9150_v57  ;;  %3214 = vmatpush.msra.mxu0 %v9151_v14  ;;  %9158 = vst [vmem:[#allocation91_spill] sm:$0xff] %v7052_v0  ;;  %v3188_v42 = vsel %vm643_vm1, %v7052_v0, 0.0  ;;  %v9167_v57 = vld [vmem:[#allocation67_spill] sm:$0xff]  ;;  %v7474_v0 = vld [vmem:[#allocation7 + $0x118] sm:$0xff] }
 0x404   : > { %2998 = vmatpush.msra.mxu3 %v9146_v63  ;;  %3230 = vmatpush.msra.mxu1 %v9153_v4  ;;  %v9164_v63 = vld [vmem:[#allocation143_spill] sm:$0xff]  ;;  %v9170_v4 = vld [vmem:[#allocation157_spill] sm:$0xff]  ;;  %v3184_v37 = vrot.slane %v3183_v22, 2  ;;  %9286 = vst [vmem:[#allocation59_spill] sm:$0xff] %v7474_v0 }
 0x405   : > { %2931 = vmatmul.f32.vlgmr.msrb.gmra.mxu3 %v7009_v7  ;;  %3061 = vmatpush.msrb.mxu2 %v9154_v30  ;;  %v9168_v14 = vld [vmem:[#allocation147_spill] sm:$0xff] }
 0x406   : > { %2999 = vmatpush.msra.mxu3 %v9148_v56  ;;  %3215 = vmatpush.msra.mxu0 %v9155_v45  ;;  %v9166_v56 = vld [vmem:[#allocation153_spill] sm:$0xff]  ;;  %v9172_v30 = vld [vmem:[#allocation151_spill] sm:$0xff]  ;;  %v3189_v45 = vrot.slane %v3188_v42, 4 }
 0x407   : > { %3231 = vmatpush.msra.mxu1 %v9160_v40  ;;  %3062 = vmatpush.msrb.mxu2 %v9161_v44  ;;  %v9176_v40 = vld [vmem:[#allocation144_spill] sm:$0xff]  ;;  %v9177_v44 = vld [vmem:[#allocation81_spill] sm:$0xff] }
 0x408   : > { %3000 = vmatpush.msra.mxu3 %v9152_v39  ;;  %3216 = vmatpush.msra.mxu0 %v9162_v11  ;;  %v9169_v39 = vld [vmem:[#allocation137_spill] sm:$0xff]  ;;  %v9178_v11 = vld [vmem:[#allocation159_spill] sm:$0xff] }
 0x409   : > { %3232 = vmatpush.msra.mxu1 %v9164_v63  ;;  %3063 = vmatpush.msrb.mxu2 %v9165_v16  ;;  %v3190_v63 = vadd.f32 %v3189_v45, %v3188_v42  ;;  %v9179_v16 = vld [vmem:[#allocation148_spill] sm:$0xff]  ;;  %v9187_v42 = vld [vmem:[#allocation114_spill] sm:$0xff] }
 0x40a   : > { %3001 = vmatpush.msra.mxu3 %v9159_v36  ;;  %3217 = vmatpush.msra.mxu0 %v9166_v56  ;;  %v9175_v36 = vld [vmem:[#allocation155_spill] sm:$0xff]  ;;  %v9180_v56 = vld [vmem:[#allocation166_spill] sm:$0xff] }
 0x40b   : > { %3233 = vmatpush.msra.mxu1 %v9168_v14  ;;  %3064 = vmatpush.msrb.mxu2 %v9169_v39  ;;  %v9183_v14 = vld [vmem:[#allocation152_spill] sm:$0xff]  ;;  %v9184_v39 = vld [vmem:[#allocation110_spill] sm:$0xff] }
 0x40c   : > { %3002 = vmatpush.msra.mxu3 %v9163_v3  ;;  %3218 = vmatpush.msra.mxu0 %v9170_v4  ;;  %v3185_v3 = vadd.f32 %v3184_v37, %v3183_v22  ;;  %v9186_v22 = vld [vmem:[#allocation156_spill] sm:$0xff]  ;;  %v9188_v37 = vld [vmem:[#allocation167_spill] sm:$0xff]  ;;  %v9190_v45 = vld [vmem:[#allocation118_spill] sm:$0xff] }
 0x40d   : > { %3234 = vmatpush.msra.mxu1 %v9172_v30  ;;  %3065 = vmatpush.msrb.mxu2 %v9173_v47  ;;  %v9189_v30 = vld [vmem:[#allocation160_spill] sm:$0xff] }
 0x40e   : > { %3003 = vmatpush.msra.mxu3 %v9167_v57  ;;  %3219 = vmatpush.msra.mxu0 %v6644_v34  ;;  %v9181_v57 = vld [vmem:[#allocation106_spill] sm:$0xff]  ;;  %v3186_v4 = vrot.slane %v3185_v3, 1 }
 0x40f   : > { %3235 = vmatpush.msra.mxu1 %v9175_v36  ;;  %3066 = vmatpush.msrb.mxu2 %v9176_v40  ;;  %v9182_v34 = vld [vmem:[#allocation162_spill] sm:$0xff]  ;;  %v9193_v36 = vld [vmem:[#allocation168_spill] sm:$0xff] }
 0x410   : > { %3004 = vmatpush.msra.mxu3 %v9171_v28  ;;  %3220 = vmatpush.msra.mxu0 %v6654_v29  ;;  %v9185_v29 = vld [vmem:[#allocation164_spill] sm:$0xff]  ;;  %v3191_v28 = vrot.slane %v3190_v63, 2  ;;  %v7094_v47 = vadd.f32 %v3186_v4, %v3185_v3  ;;  %v9194_v40 = vld [vmem:[#allocation174_spill] sm:$0xff] }
 0x411   : > { %3236 = vmatpush.msra.mxu1 %v9178_v11  ;;  %3067 = vmatpush.msrb.mxu2 %v9179_v16  ;;  %v9197_v11 = vld [vmem:[#allocation171_spill] sm:$0xff]  ;;  %v9198_v3 = vld [vmem:[#allocation178_spill] sm:$0xff]  ;;  %v9207_v4 = vld [vmem:[#allocation176_spill] sm:$0xff] }
 0x412   : > { %3005 = vmatpush.msra.mxu3 %v9174_v20  ;;  %3221 = vmatpush.msra.mxu0 %v9180_v56  ;;  %v3192_v20 = vadd.f32 %v3191_v28, %v3190_v63  ;;  %v9200_v63 = vld [vmem:[#allocation130_spill] sm:$0xff] }
 0x413   : > { %3237 = vmatpush.msra.mxu1 %v9182_v34  ;;  %3068 = vmatpush.msrb.mxu2 %v9183_v14  ;;  %v9203_v34 = vld [vmem:[#allocation127_spill] sm:$0xff]  ;;  %v9204_v14 = vld [vmem:[#allocation173_spill] sm:$0xff] }
 0x414   : > { %3006 = vmatpush.msra.mxu3 %v9177_v44  ;;  %3222 = vmatpush.msra.mxu0 %v6679_v54  ;;  %v9191_v54 = vld [vmem:[#allocation170_spill] sm:$0xff]  ;;  %v9196_v44 = vld [vmem:[#allocation124_spill] sm:$0xff]  ;;  %v3193_v16 = vrot.slane %v3192_v20, 1 }
 0x415   : > { %3238 = vmatpush.msra.mxu1 %v9185_v29  ;;  %3069 = vmatpush.msrb.mxu2 %v9186_v22  ;;  %v9206_v29 = vld [vmem:[#allocation129_spill] sm:$0xff] }
 0x416   : > { %3007 = vmatpush.msra.mxu3 %v9181_v57  ;;  %3223 = vmatpush.msra.mxu0 %v6689_v17  ;;  %v9192_v17 = vld [vmem:[#allocation121_spill] sm:$0xff]  ;;  %v9202_v57 = vld [vmem:[#allocation175_spill] sm:$0xff]  ;;  %v7119_v28 = vadd.f32 %v3193_v16, %v3192_v20  ;;  %v7138_v20 = vld [vmem:[#allocation7 + $0x3c8] sm:$0xff] }
 0x417   : > { %3239 = vmatpush.msra.mxu1 %v9188_v37  ;;  %3070 = vmatpush.msrb.mxu2 %v9189_v30  ;;  %v7127_v37 = vld [vmem:[#allocation7 + $0x168] sm:$0xff] }
 0x418   : > { %3008 = vmatpush.msra.mxu3 %v9184_v39  ;;  %3224 = vmatpush.msra.mxu0 %v6700_v25  ;;  %v9195_v25 = vld [vmem:[#allocation172_spill] sm:$0xff]  ;;  %v9205_v39 = vld [vmem:[#allocation179_spill] sm:$0xff]  ;;  %v7130_v30 = vld [vmem:[#allocation7 + $0x3e8] sm:$0xff] }
 0x419   : > { %3240 = vmatpush.msra.mxu1 %v9191_v54  ;;  %3071 = vmatmul.f32.vlgmr.msrb.gmra.mxu2 %v6950_v13  ;;  %v9199_v13 = vperm.slane %v9139_v59, 2  ;;  %v9211_v54 = vld [vmem:[#allocation182_spill] sm:$0xff] }
 0x41a   : > { %3009 = vmatpush.msra.mxu3 %v9187_v42  ;;  %3225 = vmatmul.f32.vlgmr.msra.gmra.mxu0 %v7094_v47  ;;  %v9208_v42 = vld [vmem:[#allocation132_spill] sm:$0xff]  ;;  %v7159_v16 = vld [vmem:[#allocation7 + $0xe8] sm:$0xff] }
 0x41b   : > { %3249 = vmatpush.msra.mxu2 %v9193_v36  ;;  %3289 = vmatpush.msrb.mxu0 %v9194_v40  ;;  %v7109_v56 = vadd.f32 %v9200_v63, %v9199_v13  ;;  %v7143_v36 = vld [vmem:[#allocation7 + $0x128] sm:$0xff] }
 0x41c   : > { %3010 = vmatpush.msra.mxu3 %v9190_v45  ;;  %3241 = vmatpush.msra.mxu1 %v9195_v25  ;;  %v9210_v45 = vld [vmem:[#allocation135_spill] sm:$0xff]  ;;  %v7146_v40 = vld [vmem:[#allocation7 + $0x3a8] sm:$0xff] }
 0x41d   : > { %3011 = vmatmul.f32.vlgmr.msra.gmra.mxu3 %v7009_v7  ;;  %3250 = vmatpush.msra.mxu2 %v9197_v11  ;;  %9201 = vst [vmem:[#allocation89_spill] sm:$0xff] %v7109_v56  ;;  %v3195_v22 = vsel %vm643_vm1, %v7109_v56, 0.0  ;;  %v7151_v11 = vld [vmem:[#allocation7 + $0x108] sm:$0xff]  ;;  %v7328_v56 = vld [vmem:[#allocation7 + $0xb0] sm:$0xff] }
 0x41e   : > { %3075 = vmatpush.msrb.mxu3 %v9192_v17  ;;  %3290 = vmatpush.msrb.mxu0 %v9198_v3  ;;  %v9212_v17 = vld [vmem:[#allocation138_spill] sm:$0xff]  ;;  %9243 = vst [vmem:[#allocation100_spill] sm:$0xff] %v7328_v56 }
 0x41f   : > { %3242 = vmatpush.msra.mxu1 %v9202_v57  ;;  %3251 = vmatpush.msra.mxu2 %v9204_v14  ;;  %v7154_v3 = vld [vmem:[#allocation7 + $0x388] sm:$0xff] }
 0x420   : > { %3076 = vmatpush.msrb.mxu3 %v9196_v44  ;;  %3291 = vmatpush.msrb.mxu0 %v6727_v41  ;;  %v9209_v41 = vld [vmem:[#allocation180_spill] sm:$0xff]  ;;  %v9213_v44 = vld [vmem:[#allocation142_spill] sm:$0xff] }
 0x421   : > { %3243 = vmatpush.msra.mxu1 %v9205_v39  ;;  %3252 = vmatpush.msra.mxu2 %v9207_v4  ;;  %v7162_v13 = vld [vmem:[#allocation7 + $0x368] sm:$0xff] }
 0x422   : > { %3077 = vmatpush.msrb.mxu3 %v9203_v34  ;;  %3292 = vmatpush.msrb.mxu0 %v6737_v6  ;;  %v3196_v6 = vrot.slane %v3195_v22, 4  ;;  %v9215_v63 = vld [vmem:[#allocation150_spill] sm:$0xff] }
 0x423   : > { %3244 = vmatpush.msra.mxu1 %v6730_v46  ;;  %3253 = vmatpush.msra.mxu2 %v9209_v41  ;;  %v7135_v46 = vld [vmem:[#allocation7 + $0x148] sm:$0xff] }
 0x424   : > { %3078 = vmatpush.msrb.mxu3 %v9206_v29  ;;  %3245 = vmatmul.f32.vlgmr.msra.gmra.mxu1 %v7119_v28  ;;  %v3197_v25 = vadd.f32 %v3196_v6, %v3195_v22  ;;  %v7167_v57 = vld [vmem:[#allocation7 + $0xc8] sm:$0xff] }
 0x425   : > { %3293 = vmatpush.msrb.mxu0 %v7127_v37  ;;  %3309 = vmatpush.msrb.mxu1 %v7130_v30  ;;  %v7170_v34 = vld [vmem:[#allocation7 + $0x348] sm:$0xff] }
 0x426   : > { %3079 = vmatpush.msrb.mxu3 %v9208_v42  ;;  %3254 = vmatpush.msra.mxu2 %v9211_v54  ;;  %v7175_v14 = vld [vmem:[#allocation7 + $0xa8] sm:$0xff] }
 0x427   : > { %3294 = vmatpush.msrb.mxu0 %v7135_v46  ;;  %3310 = vmatpush.msrb.mxu1 %v7138_v20  ;;  %v7178_v39 = vld [vmem:[#allocation7 + $0x328] sm:$0xff] }
 0x428   : > { %3080 = vmatpush.msrb.mxu3 %v9210_v45  ;;  %3255 = vmatpush.msra.mxu2 %v6744_v31  ;;  %v9214_v31 = vld [vmem:[#allocation146_spill] sm:$0xff] }
 0x429   : > { %3295 = vmatpush.msrb.mxu0 %v7143_v36  ;;  %3311 = vmatpush.msrb.mxu1 %v7146_v40  ;;  %v7183_v4 = vld [vmem:[#allocation7 + $0x88] sm:$0xff] }
 0x42a   : > { %3081 = vmatpush.msrb.mxu3 %v9212_v17  ;;  %3256 = vmatpush.msra.mxu2 %v6752_v26  ;;  %v3198_v26 = vrot.slane %v3197_v25, 2  ;;  %v7186_v22 = vld [vmem:[#allocation7 + $0x308] sm:$0xff]  ;;  %v2115_v17 = vadd.f32 %v6879_v5, %v6873_v55 }
 0x42b   : > { %3296 = vmatpush.msrb.mxu0 %v7151_v11  ;;  %3312 = vmatpush.msrb.mxu1 %v7154_v3  ;;  %v7191_v42 = vld [vmem:[#allocation7 + $0x68] sm:$0xff] }
 0x42c   : > { %3082 = vmatpush.msrb.mxu3 %v9213_v44  ;;  %3257 = vmatpush.msra.mxu2 %v6760_v35  ;;  %v9216_v35 = vld [vmem:[#allocation154_spill] sm:$0xff]  ;;  %v3199_v29 = vadd.f32 %v3198_v26, %v3197_v25  ;;  %v9221_v44 = vld [vmem:[#allocation169_spill] sm:$0xff]  ;;  %v9222_v26 = vld [vmem:[#allocation83_spill] sm:$0xff] }
 0x42d   : > { %3297 = vmatpush.msrb.mxu0 %v7159_v16  ;;  %3313 = vmatpush.msrb.mxu1 %v7162_v13  ;;  %v7194_v41 = vld [vmem:[#allocation7 + $0x2e8] sm:$0xff] }
 0x42e   : > { %3083 = vmatpush.msrb.mxu3 %v9214_v31  ;;  %3258 = vmatpush.msra.mxu2 %v6768_v51  ;;  %v9217_v51 = vld [vmem:[#allocation158_spill] sm:$0xff]  ;;  %v3200_v6 = vrot.slane %v3199_v29, 1 }
 0x42f   : > { %3298 = vmatpush.msrb.mxu0 %v7167_v57  ;;  %3314 = vmatpush.msrb.mxu1 %v7170_v34  ;;  %v7199_v45 = vld [vmem:[#allocation7 + $0x48] sm:$0xff] }
 0x430   : > { %3084 = vmatpush.msrb.mxu3 %v9215_v63  ;;  %3259 = vmatpush.msra.mxu2 %v6776_v61  ;;  %v9218_v61 = vld [vmem:[#allocation161_spill] sm:$0xff]  ;;  %v7202_v54 = vld [vmem:[#allocation7 + $0x2c8] sm:$0xff]  ;;  %v7217_v31 = vadd.f32 %v3200_v6, %v3199_v29  ;;  %v1650_v63 = vmax.f32 %v9222_v26, 0.0  ;;  %v9226_v29 = vperm.slane %v9139_v59, 3  ;;  %v7257_v59 = vld [vmem:[#allocation7 + $0x190] sm:$0xff] }
 0x431   : > { %3299 = vmatpush.msrb.mxu0 %v7175_v14  ;;  %3315 = vmatpush.msrb.mxu1 %v7178_v39  ;;  %v7209_v25 = vld [vmem:[#allocation7 + $0x28] sm:$0xff]  ;;  %9230 = vst [vmem:[#allocation26_spill] sm:$0xff] %v7257_v59  ;;  %v7288_v26 = vld [vmem:[#allocation7 + $0x130] sm:$0xff] }
 0x432   : > { %3085 = vmatpush.msrb.mxu3 %v9216_v35  ;;  %3260 = vmatpush.msra.mxu2 %v6784_v49  ;;  %v9219_v49 = vld [vmem:[#allocation163_spill] sm:$0xff]  ;;  %v7223_v55 = vld [vmem:[#allocation7 + $0x288] sm:$0xff]  ;;  %v2120_v5 = vadd.f32 %v2115_v17, %v1650_v63  ;;  %v9223_v35 = vld [vmem:[#allocation177_spill] sm:$0xff]  ;;  %9235 = vst [vmem:[#allocation90_spill] sm:$0xff] %v7288_v26 }
 0x433   : > { %3300 = vmatpush.msrb.mxu0 %v7183_v4  ;;  %3316 = vmatpush.msrb.mxu1 %v7186_v22  ;;  %v7275_v17 = vld [vmem:[#allocation7 + $0x548] sm:$0xff] }
 0x434   : > { %3086 = vmatpush.msrb.mxu3 %v9217_v51  ;;  %3261 = vmatpush.msra.mxu2 %v6792_v48  ;;  %v9220_v48 = vld [vmem:[#allocation165_spill] sm:$0xff] }
 0x435   : > { %3301 = vmatpush.msrb.mxu0 %v7191_v42  ;;  %3317 = vmatpush.msrb.mxu1 %v7194_v41  ;;  %v9224_v51 = vld [vmem:[#allocation181_spill] sm:$0xff] }
 0x436   : > { %3087 = vmatpush.msrb.mxu3 %v9218_v61  ;;  %3262 = vmatpush.msra.mxu2 %v6800_v58  ;;  %v7212_v58 = vld [vmem:[#allocation7 + $0x2a8] sm:$0xff]  ;;  %v7242_v61 = vadd.f32 %v2120_v5, %v9226_v29  ;;  %v7308_v29 = vld [vmem:[#allocation7 + $0xf0] sm:$0xff] }
 0x437   : > { %3302 = vmatpush.msrb.mxu0 %v7199_v45  ;;  %3318 = vmatpush.msrb.mxu1 %v7202_v54  ;;  %v7295_v5 = vld [vmem:[#allocation7 + $0x508] sm:$0xff]  ;;  %9239 = vst [vmem:[#allocation94_spill] sm:$0xff] %v7308_v29 }
 0x438   : > { %3088 = vmatpush.msrb.mxu3 %v9219_v49  ;;  %3263 = vmatpush.msra.mxu2 %v6808_v10  ;;  %v7220_v10 = vld [vmem:[#allocation7 + $0x8] sm:$0xff]  ;;  %9227 = vst [vmem:[#allocation92_spill] sm:$0xff] %v7242_v61  ;;  %v3202_v6 = vsel %vm643_vm1, %v7242_v61, 0.0 }
 0x439   : > { %3303 = vmatpush.msrb.mxu0 %v7209_v25  ;;  %3319 = vmatpush.msrb.mxu1 %v7212_v58  ;;  %v7244_v49 = vld [vmem:[#allocation7 + $0x248] sm:$0xff] }
 0x43a   : > { %3089 = vmatpush.msrb.mxu3 %v9220_v48  ;;  %3264 = vmatpush.msra.mxu2 %v6816_v15  ;;  %v7232_v15 = vld [vmem:[#allocation7 + $0x268] sm:$0xff]  ;;  %v3203_v48 = vrot.slane %v3202_v6, 4 }
 0x43b   : > { %3304 = vmatpush.msrb.mxu0 %v7220_v10  ;;  %3320 = vmatpush.msrb.mxu1 %v7223_v55  ;;  %v7325_v61 = vld [vmem:[#allocation7 + $0x4a8] sm:$0xff] }
 0x43c   : > { %3090 = vmatpush.msrb.mxu3 %v9221_v44  ;;  %3265 = vmatmul.f32.vlgmr.msra.gmra.mxu2 %v7217_v31  ;;  %v7285_v44 = vld [vmem:[#allocation7 + $0x528] sm:$0xff]  ;;  %v3204_v63 = vadd.f32 %v3203_v48, %v3202_v6  ;;  %v7321_v48 = vld [vmem:[#allocation7 + $0x350] sm:$0xff] }
 0x43d   : > { %3091 = vmatmul.f32.vlgmr.msrb.gmra.mxu3 %v7009_v7  ;;  %3305 = vmatmul.f32.vlgmr.msrb.gmra.mxu0 %v7094_v47  ;;  %v7237_v7 = vld [vmem:[#allocation7 + $0x1d0] sm:$0xff]  ;;  %v7315_v6 = vld [vmem:[#allocation7 + $0x4c8] sm:$0xff]  ;;  %9242 = vst [vmem:[#allocation14_spill] sm:$0xff] %v7321_v48 }
 0x43e   : > { %3269 = vmatpush.msra.mxu3 %v9223_v35  ;;  %3329 = vmatpush.msrb.mxu2 %v6820_v12  ;;  %9225 = vst [vmem:[#allocation95_spill] sm:$0xff] %v7237_v7  ;;  %v9228_v12 = vld [vmem:[#allocation183_spill] sm:$0xff] }
 0x43f   : > { %3369 = vmatpush.msra.mxu0 %v6906_v32  ;;  %3321 = vmatpush.msrb.mxu1 %v7232_v15  ;;  %v7249_v32 = vld [vmem:[#allocation7 + $0x1b0] sm:$0xff] }
 0x440   : > { %3270 = vmatpush.msra.mxu3 %v9224_v51  ;;  %3330 = vmatpush.msrb.mxu2 %v6828_v23  ;;  %9229 = vst [vmem:[#allocation13_spill] sm:$0xff] %v7249_v32  ;;  %v7252_v23 = vld [vmem:[#allocation7 + $0x228] sm:$0xff]  ;;  %v7301_v35 = vld [vmem:[#allocation7 + $0x390] sm:$0xff] }
 0x441   : > { %3370 = vmatpush.msra.mxu0 %v7237_v7  ;;  %3322 = vmatpush.msrb.mxu1 %v7244_v49  ;;  %9238 = vst [vmem:[#allocation99_spill] sm:$0xff] %v7301_v35  ;;  %v7305_v51 = vld [vmem:[#allocation7 + $0x4e8] sm:$0xff]  ;;  %v7525_v7 = vld [vmem:[#allocation7 + $0x318] sm:$0xff] }
 0x442   : > { %3271 = vmatpush.msra.mxu3 %v9228_v12  ;;  %3331 = vmatpush.msrb.mxu2 %v6836_v33  ;;  %v7262_v33 = vld [vmem:[#allocation7 + $0x208] sm:$0xff]  ;;  %v3205_v12 = vrot.slane %v3204_v63, 2  ;;  %9303 = vst [vmem:[#allocation111_spill] sm:$0xff] %v7525_v7 }
 0x443   : > { %3371 = vmatpush.msra.mxu0 %v7249_v32  ;;  %3323 = vmatpush.msrb.mxu1 %v7252_v23 }
 0x444   : > { %3272 = vmatpush.msra.mxu3 %v6748_v8  ;;  %3332 = vmatpush.msrb.mxu2 %v6843_v9  ;;  %v7268_v8 = vld [vmem:[#allocation7 + $0x170] sm:$0xff] }
 0x445   : > { %3372 = vmatpush.msra.mxu0 %v7257_v59  ;;  %3324 = vmatpush.msrb.mxu1 %v7262_v33  ;;  %9231 = vst [vmem:[#allocation22_spill] sm:$0xff] %v7268_v8  ;;  %v7271_v9 = vld [vmem:[#allocation7 + $0x3f0] sm:$0xff]  ;;  %v2792_v59 = vpop.f32.mrf.mxu0 }
 0x446   : > { %3273 = vmatpush.msra.mxu3 %v6756_v60  ;;  %3325 = vmatmul.f32.vlgmr.msrb.gmra.mxu1 %v7119_v28  ;;  %9232 = vst [vmem:[#allocation84_spill] sm:$0xff] %v7271_v9  ;;  %v7278_v60 = vld [vmem:[#allocation7 + $0x150] sm:$0xff] }
 0x447   : > { %3333 = vmatpush.msrb.mxu2 %v6850_v1  ;;  %3373 = vmatpush.msra.mxu0 %v7268_v8  ;;  %9233 = vst [vmem:[#allocation85_spill] sm:$0xff] %v7278_v60  ;;  %v7281_v1 = vld [vmem:[#allocation7 + $0x3d0] sm:$0xff]  ;;  %v7510_v8 = vld [vmem:[#allocation7 + $0xb8] sm:$0xff] }
 0x448   : > { %3389 = vmatpush.msra.mxu1 %v7271_v9  ;;  %3274 = vmatpush.msra.mxu3 %v6764_v27  ;;  %9234 = vst [vmem:[#allocation87_spill] sm:$0xff] %v7281_v1  ;;  %v7291_v27 = vld [vmem:[#allocation7 + $0x3b0] sm:$0xff]  ;;  %v9252_v9 = vld [vmem:[#allocation185_spill] sm:$0xff] }
 0x449   : > { %3334 = vmatpush.msrb.mxu2 %v7275_v17  ;;  %3374 = vmatpush.msra.mxu0 %v7278_v60  ;;  %9236 = vst [vmem:[#allocation93_spill] sm:$0xff] %v7291_v27  ;;  %v2812_v60 = vpop.f32.mrf.mxu1 }
 0x44a   : > { %3390 = vmatpush.msra.mxu1 %v7281_v1  ;;  %3275 = vmatpush.msra.mxu3 %v6772_v19  ;;  %v7298_v19 = vld [vmem:[#allocation7 + $0x110] sm:$0xff]  ;;  %9298 = vst [vmem:[#allocation61_spill] sm:$0xff] %v7510_v8 }
 0x44b   : > { %3335 = vmatpush.msrb.mxu2 %v7285_v44  ;;  %3375 = vmatpush.msra.mxu0 %v7288_v26  ;;  %9237 = vst [vmem:[#allocation97_spill] sm:$0xff] %v7298_v19  ;;  %v7361_v1 = vld [vmem:[#allocation7 + $0x2d0] sm:$0xff]  ;;  %v7498_v26 = vld [vmem:[#allocation7 + $0xd8] sm:$0xff] }
 0x44c   : > { %3391 = vmatpush.msra.mxu1 %v7291_v27  ;;  %3276 = vmatpush.msra.mxu3 %v6780_v52  ;;  %v7311_v52 = vld [vmem:[#allocation7 + $0x370] sm:$0xff]  ;;  %v7345_v27 = vld [vmem:[#allocation7 + $0x468] sm:$0xff]  ;;  %9251 = vst [vmem:[#allocation20_spill] sm:$0xff] %v7361_v1 }
 0x44d   : > { %3336 = vmatpush.msrb.mxu2 %v7295_v5  ;;  %3376 = vmatpush.msra.mxu0 %v7298_v19  ;;  %9240 = vst [vmem:[#allocation101_spill] sm:$0xff] %v7311_v52  ;;  %v7486_v19 = vld [vmem:[#allocation7 + $0xf8] sm:$0xff] }
 0x44e   : > { %3392 = vmatpush.msra.mxu1 %v7301_v35  ;;  %3277 = vmatpush.msra.mxu3 %v6788_v53  ;;  %v7318_v53 = vld [vmem:[#allocation7 + $0xd0] sm:$0xff]  ;;  %9290 = vst [vmem:[#allocation17_spill] sm:$0xff] %v7486_v19 }
 0x44f   : > { %3337 = vmatpush.msrb.mxu2 %v7305_v51  ;;  %3377 = vmatpush.msra.mxu0 %v7308_v29  ;;  %9241 = vst [vmem:[#allocation98_spill] sm:$0xff] %v7318_v53  ;;  %v7341_v35 = vld [vmem:[#allocation7 + $0x310] sm:$0xff]  ;;  %v7462_v29 = vld [vmem:[#allocation7 + $0x138] sm:$0xff] }
 0x450   : > { %3393 = vmatpush.msra.mxu1 %v7311_v52  ;;  %3278 = vmatpush.msra.mxu3 %v6796_v43  ;;  %v7331_v43 = vld [vmem:[#allocation7 + $0x330] sm:$0xff]  ;;  %v7335_v52 = vld [vmem:[#allocation7 + $0x488] sm:$0xff]  ;;  %9246 = vst [vmem:[#allocation30_spill] sm:$0xff] %v7341_v35 }
 0x451   : > { %3338 = vmatpush.msrb.mxu2 %v7315_v6  ;;  %3378 = vmatpush.msra.mxu0 %v7318_v53  ;;  %9244 = vst [vmem:[#allocation18_spill] sm:$0xff] %v7331_v43  ;;  %v7450_v53 = vld [vmem:[#allocation7 + $0x158] sm:$0xff] }
 0x452   : > { %3394 = vmatpush.msra.mxu1 %v7321_v48  ;;  %3279 = vmatpush.msra.mxu3 %v6804_v50  ;;  %v3206_v48 = vadd.f32 %v3205_v12, %v3204_v63  ;;  %v7338_v50 = vld [vmem:[#allocation7 + $0x90] sm:$0xff]  ;;  %v9249_v63 = vld [vmem:[#allocation184_spill] sm:$0xff]  ;;  %v7355_v12 = vld [vmem:[#allocation7 + $0x448] sm:$0xff]  ;;  %9278 = vst [vmem:[#allocation46_spill] sm:$0xff] %v7450_v53 }
 0x453   : > { %3339 = vmatpush.msrb.mxu2 %v7325_v61  ;;  %3379 = vmatpush.msra.mxu0 %v7328_v56  ;;  %9245 = vst [vmem:[#allocation102_spill] sm:$0xff] %v7338_v50  ;;  %v7383_v56 = vld [vmem:[#allocation7 + $0x290] sm:$0xff] }
 0x454   : > { %3395 = vmatpush.msra.mxu1 %v7331_v43  ;;  %3280 = vmatpush.msra.mxu3 %v6812_v2  ;;  %v7348_v2 = vld [vmem:[#allocation7 + $0x70] sm:$0xff]  ;;  %9257 = vst [vmem:[#allocation25_spill] sm:$0xff] %v7383_v56 }
 0x455   : > { %3340 = vmatpush.msrb.mxu2 %v7335_v52  ;;  %3380 = vmatpush.msra.mxu0 %v7338_v50  ;;  %9247 = vst [vmem:[#allocation96_spill] sm:$0xff] %v7348_v2  ;;  %v7351_v43 = vld [vmem:[#allocation7 + $0x2f0] sm:$0xff]  ;;  %v9255_v50 = vld [vmem:[#allocation186_spill] sm:$0xff] }
 0x456   : > { %3396 = vmatpush.msra.mxu1 %v7341_v35  ;;  %3281 = vmatpush.msra.mxu3 %v6824_v24  ;;  %9248 = vst [vmem:[#allocation19_spill] sm:$0xff] %v7351_v43  ;;  %v3207_v35 = vrot.slane %v3206_v48, 1  ;;  %v7358_v24 = vld [vmem:[#allocation7 + $0x50] sm:$0xff] }
 0x457   : > { %3341 = vmatpush.msrb.mxu2 %v7345_v27  ;;  %3381 = vmatpush.msra.mxu0 %v7348_v2  ;;  %9250 = vst [vmem:[#allocation23_spill] sm:$0xff] %v7358_v24  ;;  %v7365_v2 = vld [vmem:[#allocation7 + $0x428] sm:$0xff] }
 0x458   : > { %3397 = vmatpush.msra.mxu1 %v7351_v43  ;;  %3282 = vmatpush.msra.mxu3 %v9249_v63  ;;  %v7368_v63 = vld [vmem:[#allocation7 + $0x30] sm:$0xff]  ;;  %9282 = vst [vmem:[#allocation38_spill] sm:$0xff] %v7462_v29  ;;  %v2832_v32 = vpop.f32.mrf.mxu2 }
 0x459   : > { %3342 = vmatpush.msrb.mxu2 %v7355_v12  ;;  %3382 = vmatpush.msra.mxu0 %v7358_v24  ;;  %9253 = vst [vmem:[#allocation24_spill] sm:$0xff] %v7368_v63  ;;  %v7371_v43 = vld [vmem:[#allocation7 + $0x2b0] sm:$0xff]  ;;  %v7375_v24 = vld [vmem:[#allocation7 + $0x408] sm:$0xff] }
 0x45a   : > { %3398 = vmatpush.msra.mxu1 %v7361_v1  ;;  %3283 = vmatpush.msra.mxu3 %v9252_v9  ;;  %9254 = vst [vmem:[#allocation21_spill] sm:$0xff] %v7371_v43  ;;  %v7378_v1 = vadd.f32 %v3207_v35, %v3206_v48  ;;  %v7380_v9 = vld [vmem:[#allocation7 + $0x10] sm:$0xff]  ;;  %v7393_v35 = vld [vmem:[#allocation7 + $0x1f8] sm:$0xff] }
 0x45b   : > { %3343 = vmatpush.msrb.mxu2 %v7365_v2  ;;  %3383 = vmatpush.msra.mxu0 %v7368_v63  ;;  %9256 = vst [vmem:[#allocation28_spill] sm:$0xff] %v7380_v9  ;;  %v7396_v48 = vld [vmem:[#allocation7 + $0x270] sm:$0xff] }
 0x45c   : > { %3399 = vmatpush.msra.mxu1 %v7371_v43  ;;  %3284 = vmatpush.msra.mxu3 %v9255_v50  ;;  %v9258_v43 = vld [vmem:[#allocation187_spill] sm:$0xff]  ;;  %9260 = vst [vmem:[#allocation27_spill] sm:$0xff] %v7393_v35 }
 0x45d   : > { %3344 = vmatpush.msrb.mxu2 %v7375_v24  ;;  %3384 = vmatpush.msra.mxu0 %v7380_v9  ;;  %v7390_v50 = vld [vmem:[#allocation7 + $0x5f0] sm:$0xff]  ;;  %9261 = vst [vmem:[#allocation40_spill] sm:$0xff] %v7396_v48 }
 0x45e   : > { %3400 = vmatpush.msra.mxu1 %v7383_v56  ;;  %3285 = vmatmul.f32.vlgmr.msra.gmra.mxu3 %v7378_v1  ;;  %9259 = vst [vmem:[#allocation16_spill] sm:$0xff] %v7390_v50  ;;  %v9262_v56 = vld [vmem:[#allocation188_spill] sm:$0xff]  ;;  %v7400_v9 = vld [vmem:[#allocation7 + $0x5d0] sm:$0xff] }
 0x45f   : > { %3345 = vmatmul.f32.vlgmr.msrb.gmra.mxu2 %v7217_v31  ;;  %3349 = vmatpush.msrb.mxu3 %v9258_v43  ;;  %9263 = vst [vmem:[#allocation29_spill] sm:$0xff] %v7400_v9  ;;  %v7403_v43 = vld [vmem:[#allocation7 + $0x1d8] sm:$0xff]  ;;  %v7406_v63 = vld [vmem:[#allocation7 + $0x250] sm:$0xff] }
 0x460   : > { %3385 = vmatmul.f32.vlgmr.msra.gmra.mxu0 %v7094_v47  ;;  %3409 = vmatpush.msra.mxu2 %v7390_v50  ;;  %9264 = vst [vmem:[#allocation35_spill] sm:$0xff] %v7403_v43  ;;  %v9266_v50 = vld [vmem:[#allocation189_spill] sm:$0xff] }
 0x461   : > { %3449 = vmatpush.msrb.mxu0 %v7393_v35  ;;  %3401 = vmatpush.msra.mxu1 %v7396_v48  ;;  %9265 = vst [vmem:[#allocation31_spill] sm:$0xff] %v7406_v63  ;;  %v7410_v35 = vld [vmem:[#allocation7 + $0x5b0] sm:$0xff]  ;;  %v7413_v48 = vld [vmem:[#allocation7 + $0x1b8] sm:$0xff] }
 0x462   : > { %3350 = vmatpush.msrb.mxu3 %v9262_v56  ;;  %3410 = vmatpush.msra.mxu2 %v7400_v9  ;;  %9267 = vst [vmem:[#allocation37_spill] sm:$0xff] %v7410_v35  ;;  %v7416_v56 = vld [vmem:[#allocation7 + $0x230] sm:$0xff]  ;;  %v7419_v9 = vld [vmem:[#allocation7 + $0x788] sm:$0xff] }
 0x463   : > { %3450 = vmatpush.msrb.mxu0 %v7403_v43  ;;  %3402 = vmatpush.msra.mxu1 %v7406_v63  ;;  %9268 = vst [vmem:[#allocation33_spill] sm:$0xff] %v7413_v48  ;;  %v7422_v43 = vld [vmem:[#allocation7 + $0x590] sm:$0xff]  ;;  %v7431_v63 = vld [vmem:[#allocation7 + $0x768] sm:$0xff] }
 0x464   : > { %3351 = vmatpush.msrb.mxu3 %v9266_v50  ;;  %3411 = vmatpush.msra.mxu2 %v7410_v35  ;;  %9269 = vst [vmem:[#allocation44_spill] sm:$0xff] %v7416_v56  ;;  %v7425_v50 = vld [vmem:[#allocation7 + $0x198] sm:$0xff]  ;;  %v7428_v35 = vld [vmem:[#allocation7 + $0x210] sm:$0xff] }
 0x465   : > { %3451 = vmatpush.msrb.mxu0 %v7413_v48  ;;  %3403 = vmatpush.msra.mxu1 %v7416_v56  ;;  %9270 = vst [vmem:[#allocation52_spill] sm:$0xff] %v7422_v43  ;;  %v7435_v56 = vld [vmem:[#allocation7 + $0x570] sm:$0xff]  ;;  %v7438_v48 = vld [vmem:[#allocation7 + $0x178] sm:$0xff] }
 0x466   : > { %3352 = vmatpush.msrb.mxu3 %v7419_v9  ;;  %3412 = vmatpush.msra.mxu2 %v7422_v43  ;;  %9271 = vst [vmem:[#allocation34_spill] sm:$0xff] %v7425_v50  ;;  %v7441_v43 = vld [vmem:[#allocation7 + $0x3f8] sm:$0xff] }
 0x467   : > { %3452 = vmatpush.msrb.mxu0 %v7425_v50  ;;  %9272 = vst [vmem:[#allocation39_spill] sm:$0xff] %v7428_v35  ;;  %3404 = vmatpush.msra.mxu1 %v7428_v35  ;;  %v7444_v50 = vld [vmem:[#allocation7 + $0x748] sm:$0xff]  ;;  %v7447_v35 = vld [vmem:[#allocation7 + $0x550] sm:$0xff] }
 0x468   : > { %3353 = vmatpush.msrb.mxu3 %v7431_v63  ;;  %3405 = vmatmul.f32.vlgmr.msra.gmra.mxu1 %v7119_v28  ;;  %9273 = vst [vmem:[#allocation56_spill] sm:$0xff] %v7435_v56 }
 0x469   : > { %3413 = vmatpush.msra.mxu2 %v7435_v56  ;;  %9274 = vst [vmem:[#allocation36_spill] sm:$0xff] %v7438_v48  ;;  %3453 = vmatpush.msrb.mxu0 %v7438_v48  ;;  %v7453_v56 = vld [vmem:[#allocation7 + $0x3d8] sm:$0xff]  ;;  %v7456_v48 = vld [vmem:[#allocation7 + $0x728] sm:$0xff] }
 0x46a   : > { %9275 = vst [vmem:[#allocation42_spill] sm:$0xff] %v7441_v43  ;;  %3469 = vmatpush.msrb.mxu1 %v7441_v43  ;;  %3354 = vmatpush.msrb.mxu3 %v7444_v50  ;;  %v7459_v43 = vld [vmem:[#allocation7 + $0x530] sm:$0xff] }
 0x46b   : > { %9276 = vst [vmem:[#allocation51_spill] sm:$0xff] %v7444_v50  ;;  %3414 = vmatpush.msra.mxu2 %v7447_v35  ;;  %3454 = vmatpush.msrb.mxu0 %v7450_v53  ;;  %v7468_v53 = vld [vmem:[#allocation7 + $0x708] sm:$0xff]  ;;  %v7699_v50 = vld [vmem:[#allocation7 + $0x670] sm:$0xff] }
 0x46c   : > { %9277 = vst [vmem:[#allocation15_spill] sm:$0xff] %v7447_v35  ;;  %3470 = vmatpush.msrb.mxu1 %v7453_v56  ;;  %3355 = vmatpush.msrb.mxu3 %v7456_v48  ;;  %v7465_v35 = vld [vmem:[#allocation7 + $0x3b8] sm:$0xff] }
 0x46d   : > { %9279 = vst [vmem:[#allocation55_spill] sm:$0xff] %v7453_v56  ;;  %3415 = vmatpush.msra.mxu2 %v7459_v43  ;;  %3455 = vmatpush.msrb.mxu0 %v7462_v29  ;;  %v7471_v56 = vld [vmem:[#allocation7 + $0x510] sm:$0xff]  ;;  %v7480_v29 = vld [vmem:[#allocation7 + $0x6e8] sm:$0xff] }
 0x46e   : > { %9280 = vst [vmem:[#allocation32_spill] sm:$0xff] %v7456_v48  ;;  %3471 = vmatpush.msrb.mxu1 %v7465_v35  ;;  %3356 = vmatpush.msrb.mxu3 %v7468_v53 }
 0x46f   : > { %9281 = vst [vmem:[#allocation49_spill] sm:$0xff] %v7459_v43  ;;  %3416 = vmatpush.msra.mxu2 %v7471_v56  ;;  %3456 = vmatpush.msrb.mxu0 %v7474_v0  ;;  %v7477_v43 = vld [vmem:[#allocation7 + $0x398] sm:$0xff]  ;;  %v7492_v0 = vld [vmem:[#allocation7 + $0x6c8] sm:$0xff] }
 0x470   : > { %9283 = vst [vmem:[#allocation53_spill] sm:$0xff] %v7465_v35  ;;  %3472 = vmatpush.msrb.mxu1 %v7477_v43  ;;  %3357 = vmatpush.msrb.mxu3 %v7480_v29  ;;  %v7483_v35 = vld [vmem:[#allocation7 + $0x4f0] sm:$0xff] }
 0x471   : > { %9284 = vst [vmem:[#allocation41_spill] sm:$0xff] %v7468_v53  ;;  %3417 = vmatpush.msra.mxu2 %v7483_v35  ;;  %3457 = vmatpush.msrb.mxu0 %v7486_v19  ;;  %v7504_v19 = vld [vmem:[#allocation7 + $0x6a8] sm:$0xff] }
 0x472   : > { %9285 = vst [vmem:[#allocation45_spill] sm:$0xff] %v7471_v56  ;;  %v7489_v56 = vld [vmem:[#allocation7 + $0x378] sm:$0xff]  ;;  %3358 = vmatpush.msrb.mxu3 %v7492_v0 }
 0x473   : > { %9287 = vst [vmem:[#allocation76_spill] sm:$0xff] %v7477_v43  ;;  %3473 = vmatpush.msrb.mxu1 %v7489_v56  ;;  %v7495_v43 = vld [vmem:[#allocation7 + $0x4d0] sm:$0xff]  ;;  %3458 = vmatpush.msrb.mxu0 %v7498_v26 }
 0x474   : > { %9288 = vst [vmem:[#allocation60_spill] sm:$0xff] %v7480_v29  ;;  %3418 = vmatpush.msra.mxu2 %v7495_v43  ;;  %3359 = vmatpush.msrb.mxu3 %v7504_v19  ;;  %v4472_v29 = vld [vmem:[#allocation7 + $0xc0] sm:$0xff] }
 0x475   : > { %9289 = vst [vmem:[#allocation63_spill] sm:$0xff] %v7483_v35  ;;  %v7501_v35 = vld [vmem:[#allocation7 + $0x358] sm:$0xff]  ;;  %3459 = vmatpush.msrb.mxu0 %v7510_v8  ;;  %v7528_v8 = vld [vmem:[#allocation7 + $0x668] sm:$0xff] }
 0x476   : > { %9291 = vst [vmem:[#allocation77_spill] sm:$0xff] %v7489_v56  ;;  %3474 = vmatpush.msrb.mxu1 %v7501_v35  ;;  %v7507_v56 = vld [vmem:[#allocation7 + $0x4b0] sm:$0xff] }
 0x477   : > { %9292 = vst [vmem:[#allocation64_spill] sm:$0xff] %v7492_v0  ;;  %3419 = vmatpush.msra.mxu2 %v7507_v56  ;;  %v7552_v0 = vld [vmem:[#allocation7 + $0x628] sm:$0xff] }
 0x478   : > { %9293 = vst [vmem:[#allocation66_spill] sm:$0xff] %v7495_v43  ;;  %v7513_v43 = vld [vmem:[#allocation7 + $0x338] sm:$0xff] }
 0x479   : > { %9294 = vst [vmem:[#allocation78_spill] sm:$0xff] %v7498_v26  ;;  %3475 = vmatpush.msrb.mxu1 %v7513_v43  ;;  %v7516_v26 = vld [vmem:[#allocation7 + $0x688] sm:$0xff] }
 0x47a   : > { %9295 = vst [vmem:[#allocation58_spill] sm:$0xff] %v7501_v35  ;;  %3360 = vmatpush.msrb.mxu3 %v7516_v26  ;;  %v7519_v35 = vld [vmem:[#allocation7 + $0x490] sm:$0xff] }
 0x47b   : > { %9296 = vst [vmem:[#allocation70_spill] sm:$0xff] %v7504_v19  ;;  %3420 = vmatpush.msra.mxu2 %v7519_v35  ;;  %3476 = vmatpush.msrb.mxu1 %v7525_v7  ;;  %v7540_v19 = vld [vmem:[#allocation7 + $0x648] sm:$0xff]  ;;  %v7543_v7 = vld [vmem:[#allocation7 + $0x450] sm:$0xff] }
 0x47c   : > { %9297 = vst [vmem:[#allocation103_spill] sm:$0xff] %v7507_v56  ;;  %v7522_v56 = vld [vmem:[#allocation7 + $0x98] sm:$0xff]  ;;  %3361 = vmatpush.msrb.mxu3 %v7528_v8 }
 0x47d   : > { %9299 = vst [vmem:[#allocation74_spill] sm:$0xff] %v7513_v43  ;;  %3460 = vmatpush.msrb.mxu0 %v7522_v56  ;;  %v7531_v43 = vld [vmem:[#allocation7 + $0x470] sm:$0xff] }
 0x47e   : > { %9300 = vst [vmem:[#allocation107_spill] sm:$0xff] %v7516_v26  ;;  %3421 = vmatpush.msra.mxu2 %v7531_v43  ;;  %v7534_v26 = vld [vmem:[#allocation7 + $0x78] sm:$0xff]  ;;  %3362 = vmatpush.msrb.mxu3 %v7540_v19 }
 0x47f   : > { %9301 = vst [vmem:[#allocation65_spill] sm:$0xff] %v7519_v35  ;;  %3461 = vmatpush.msrb.mxu0 %v7534_v26  ;;  %v7537_v35 = vld [vmem:[#allocation7 + $0x2f8] sm:$0xff] }
 0x480   : > { %9302 = vst [vmem:[#allocation80_spill] sm:$0xff] %v7522_v56  ;;  %3477 = vmatpush.msrb.mxu1 %v7537_v35  ;;  %v2813_v56 = vadd.f32 %v2812_v60, %v2792_v59  ;;  %3422 = vmatpush.msra.mxu2 %v7543_v7  ;;  %v7555_v59 = vld [vmem:[#allocation7 + $0x430] sm:$0xff]  ;;  %v7558_v60 = vld [vmem:[#allocation7 + $0x38] sm:$0xff] }
 0x481   : > { %9304 = vst [vmem:[#allocation69_spill] sm:$0xff] %v7528_v8  ;;  %v7546_v8 = vld [vmem:[#allocation7 + $0x58] sm:$0xff]  ;;  %3363 = vmatpush.msrb.mxu3 %v7552_v0 }
 0x482   : > { %9305 = vst [vmem:[#allocation105_spill] sm:$0xff] %v7531_v43  ;;  %3462 = vmatpush.msrb.mxu0 %v7546_v8  ;;  %v7549_v43 = vld [vmem:[#allocation7 + $0x2d8] sm:$0xff]  ;;  %3423 = vmatpush.msra.mxu2 %v7555_v59 }
 0x483   : > { %9306 = vst [vmem:[#allocation115_spill] sm:$0xff] %v7534_v26  ;;  %3478 = vmatpush.msrb.mxu1 %v7549_v43  ;;  %v2833_v26 = vadd.f32 %v2832_v32, %v2813_v56  ;;  %v7567_v32 = vld [vmem:[#allocation7 + $0x410] sm:$0xff] }
 0x484   : > { %9307 = vst [vmem:[#allocation73_spill] sm:$0xff] %v7537_v35  ;;  %3463 = vmatpush.msrb.mxu0 %v7558_v60  ;;  %v2852_v35 = vpop.f32.mrf.mxu3  ;;  %3424 = vmatpush.msra.mxu2 %v7567_v32 }
 0x485   : > { %9308 = vst [vmem:[#allocation108_spill] sm:$0xff] %v7540_v19  ;;  %v2853_v56 = vadd.f32 %v2852_v35, %v2833_v26  ;;  %3425 = vmatmul.f32.vlgmr.msra.gmra.mxu2 %v7217_v31  ;;  %v7580_v35 = vld [vmem:[#allocation7 + $0x5f8] sm:$0xff] }
 0x486   : > { %9309 = vst [vmem:[#allocation79_spill] sm:$0xff] %v7543_v7  ;;  %v7561_v7 = vld [vmem:[#allocation7 + $0x2b8] sm:$0xff]  ;;  %3489 = vmatpush.msrb.mxu2 %v7580_v35 }
 0x487   : > { %9310 = vst [vmem:[#allocation112_spill] sm:$0xff] %v7546_v8  ;;  %3479 = vmatpush.msrb.mxu1 %v7561_v7  ;;  %v7564_v8 = vld [vmem:[#allocation7 + $0x608] sm:$0xff]  ;;  %v7591_v19 = vld [vmem:[#allocation7 + $0x5d8] sm:$0xff] }
 0x488   : > { %9311 = vst [vmem:[#allocation104_spill] sm:$0xff] %v7549_v43  ;;  %3364 = vmatpush.msrb.mxu3 %v7564_v8  ;;  %v2892_v43 = vpop.f32.mrf.mxu1  ;;  %3490 = vmatpush.msrb.mxu2 %v7591_v19 }
 0x489   : > { %9312 = vst [vmem:[#allocation116_spill] sm:$0xff] %v7552_v0  ;;  %3365 = vmatmul.f32.vlgmr.msrb.gmra.mxu3 %v7378_v1  ;;  %v2912_v0 = vpop.f32.mrf.mxu2 }
 0x48a   : > { %9313 = vst [vmem:[#allocation109_spill] sm:$0xff] %v7555_v59  ;;  %v7570_v59 = vld [vmem:[#allocation7 + $0x18] sm:$0xff]  ;;  %3429 = vmatpush.msra.mxu3 %v7016_v18 }
 0x48b   : > { %9314 = vst [vmem:[#allocation119_spill] sm:$0xff] %v7558_v60  ;;  %3464 = vmatpush.msrb.mxu0 %v7570_v59  ;;  %v7573_v60 = vld [vmem:[#allocation7 + $0x298] sm:$0xff] }
 0x48c   : > { %9315 = vst [vmem:[#allocation113_spill] sm:$0xff] %v7561_v7  ;;  %3480 = vmatpush.msrb.mxu1 %v7573_v60  ;;  %v3095_v7 = vmul.f32 0.001953125, %v2853_v56  ;;  %3465 = vmatmul.f32.vlgmr.msrb.gmra.mxu0 %v7094_v47  ;;  %v4435_v56 = vld [vmem:[#allocation7 + $0x1e0] sm:$0xff]  ;;  %v7594_v47 = vld [vmem:[#allocation7 + $0x258] sm:$0xff] }
 0x48d   : > { %9316 = vst [vmem:[#allocation48_spill] sm:$0xff] %v7564_v8  ;;  %v2872_v8 = vpop.f32.mrf.mxu0  ;;  %3573 = vmatpush.msra.mxu0 %v4435_v56  ;;  %v7607_v56 = vld [vmem:[#allocation7 + $0x790] sm:$0xff] }
 0x48e   : > { %9317 = vst [vmem:[#allocation122_spill] sm:$0xff] %v7567_v32  ;;  %v2893_v26 = vadd.f32 %v2892_v43, %v2872_v8  ;;  %v7583_v32 = vld [vmem:[#allocation7 + $0x278] sm:$0xff]  ;;  %v7598_v8 = vld [vmem:[#allocation7 + $0x7b0] sm:$0xff]  ;;  %v4439_v43 = vld [vmem:[#allocation7 + $0x1c0] sm:$0xff] }
 0x48f   : > { %9318 = vst [vmem:[#allocation82_spill] sm:$0xff] %v7570_v59  ;;  %3481 = vmatpush.msrb.mxu1 %v7583_v32  ;;  %v7588_v59 = vld [vmem:[#allocation7 + $0x7d0] sm:$0xff]  ;;  %3574 = vmatpush.msra.mxu0 %v4439_v43  ;;  %v7613_v43 = vld [vmem:[#allocation7 + $0x218] sm:$0xff] }
 0x490   : > { %9319 = vst [vmem:[#allocation50_spill] sm:$0xff] %v7573_v60  ;;  %v7586_v60 = vadd.f32 1e-05, %v3095_v7  ;;  %3430 = vmatpush.msra.mxu3 %v7588_v59  ;;  %v2913_v18 = vadd.f32 %v2912_v0, %v2893_v26  ;;  %v2932_v7 = vpop.f32.mrf.mxu3  ;;  %v7604_v0 = vld [vmem:[#allocation7 + $0x238] sm:$0xff]  ;;  %v2972_v53 = vpop.f32.mrf.mxu1 }
 0x491   : > { %9320 = vst [vmem:[#allocation117_spill] sm:$0xff] %v7580_v35  ;;  %3482 = vmatpush.msrb.mxu1 %v7594_v47  ;;  %v7610_v35 = vld [vmem:[#allocation7 + $0x598] sm:$0xff]  ;;  %v2992_v48 = vpop.f32.mrf.mxu2 }
 0x492   : > { %9321 = vst [vmem:[#allocation43_spill] sm:$0xff] %v7583_v32  ;;  %4211 = vrsqrt.f32 %v7586_v60  ;;  %3431 = vmatpush.msra.mxu3 %v7598_v8  ;;  %v2933_v26 = vadd.f32 %v2932_v7, %v2913_v18  ;;  %v7622_v7 = vld [vmem:[#allocation7 + $0x578] sm:$0xff]  ;;  %vm3109_vm5 = vweird.f32 %v7586_v60 }
 0x493   : > { %9322 = vst [vmem:[#allocation125_spill] sm:$0xff] %v7588_v59  ;;  %v7601_v59 = vld [vmem:[#allocation7 + $0x5b8] sm:$0xff]  ;;  %3483 = vmatpush.msrb.mxu1 %v7604_v0 }
 0x494   : > { %9323 = vst [vmem:[#allocation120_spill] sm:$0xff] %v7591_v19  ;;  %3491 = vmatpush.msrb.mxu2 %v7601_v59  ;;  %3432 = vmatpush.msra.mxu3 %v7607_v56  ;;  %v4443_v19 = vld [vmem:[#allocation7 + $0x1a0] sm:$0xff] }
 0x495   : > { %9324 = vst [vmem:[#allocation47_spill] sm:$0xff] %v7594_v47  ;;  %3575 = vmatpush.msra.mxu0 %v4443_v19  ;;  %3484 = vmatpush.msrb.mxu1 %v7613_v43  ;;  %v7650_v47 = vld [vmem:[#allocation7 + $0x6f0] sm:$0xff] }
 0x496   : > { %9325 = vst [vmem:[#allocation123_spill] sm:$0xff] %v7598_v8  ;;  %3492 = vmatpush.msrb.mxu2 %v7610_v35  ;;  %v7616_v8 = vld [vmem:[#allocation7 + $0x770] sm:$0xff]  ;;  %3485 = vmatmul.f32.vlgmr.msrb.gmra.mxu1 %v7119_v28  ;;  %v7632_v28 = vld [vmem:[#allocation7 + $0x558] sm:$0xff] }
 0x497   : > { %9326 = vst [vmem:[#allocation54_spill] sm:$0xff] %v7601_v59  ;;  %v3096_v59 = vmul.f32 0.001953125, %v2933_v26  ;;  %3433 = vmatpush.msra.mxu3 %v7616_v8  ;;  %v7629_v26 = vld [vmem:[#allocation7 + $0x750] sm:$0xff] }
 0x498   : > { %9327 = vst [vmem:[#allocation133_spill] sm:$0xff] %v7604_v0  ;;  %v7620_v18 = vpop.eup %4211  ;;  %3493 = vmatpush.msrb.mxu2 %v7622_v7  ;;  %v7640_v0 = vld [vmem:[#allocation7 + $0x538] sm:$0xff] }
 0x499   : > { %9328 = vst [vmem:[#allocation126_spill] sm:$0xff] %v7607_v56  ;;  %v7625_v19 = vadd.f32 1e-05, %v3096_v59  ;;  %v3104_v56 = vmul.f32 %v7620_v18, %v7586_v60  ;;  %3434 = vmatpush.msra.mxu3 %v7629_v26  ;;  %vm3110_vm4 = vweird.f32 %v7620_v18  ;;  %v7678_v60 = vld [vmem:[%s8082_s13] sm:$0xf] }
 0x49a   : > { %9329 = vst [vmem:[#allocation141_spill] sm:$0xff] %v7610_v35  ;;  %v4448_v35 = vld [vmem:[#allocation7 + $0x180] sm:$0xff]  ;;  %3494 = vmatpush.msrb.mxu2 %v7632_v28  ;;  %vm3111_vm6 = vmor %vm3109_vm5, %vm3110_vm4 }
 0x49b   : > { %9330 = vst [vmem:[#allocation57_spill] sm:$0xff] %v7613_v43  ;;  %3576 = vmatpush.msra.mxu0 %v4448_v35  ;;  %4213 = vrsqrt.f32 %v7625_v19  ;;  %v3105_v59 = vmul.f32 %v7620_v18, %v3104_v56  ;;  %v7637_v35 = vld [vmem:[#allocation7 + $0x730] sm:$0xff]  ;;  %v4454_v43 = vld [vmem:[#allocation7 + $0x3c0] sm:$0xff]  ;;  %v7646_v56 = vld [vmem:[#allocation7 + $0x518] sm:$0xff]  ;;  %vm3119_vm8 = vweird.f32 %v7625_v19 }
 0x49c   : > { %9331 = vst [vmem:[#allocation136_spill] sm:$0xff] %v7616_v8  ;;  %v4450_v8 = vld [vmem:[#allocation7 + $0x3e0] sm:$0xff]  ;;  %3435 = vmatpush.msra.mxu3 %v7637_v35  ;;  %3495 = vmatpush.msrb.mxu2 %v7640_v0 }
 0x49d   : > { %9332 = vst [vmem:[#allocation128_spill] sm:$0xff] %v7622_v7  ;;  %3593 = vmatpush.msra.mxu1 %v4450_v8  ;;  %v4452_v7 = vld [vmem:[#allocation7 + $0x160] sm:$0xff] }
 0x49e   : > { %9333 = vst [vmem:[#allocation145_spill] sm:$0xff] %v7629_v26  ;;  %3577 = vmatpush.msra.mxu0 %v4452_v7  ;;  %v4456_v8 = vld [vmem:[#allocation7 + $0x140] sm:$0xff]  ;;  %v3106_v26 = vmul.f32 0.5, %v3105_v59  ;;  %3496 = vmatpush.msrb.mxu2 %v7646_v56 }
 0x49f   : > { %9334 = vst [vmem:[#allocation62_spill] sm:$0xff] %v7632_v28  ;;  %3594 = vmatpush.msra.mxu1 %v4454_v43  ;;  %v7643_v28 = vld [vmem:[#allocation7 + $0x710] sm:$0xff]  ;;  %v4458_v7 = vld [vmem:[#allocation7 + $0x3a0] sm:$0xff] }
 0x4a0   : > { %9335 = vst [vmem:[#allocation68_spill] sm:$0xff] %v7637_v35  ;;  %3578 = vmatpush.msra.mxu0 %v4456_v8  ;;  %3436 = vmatpush.msra.mxu3 %v7643_v28  ;;  %v4460_v35 = vld [vmem:[#allocation7 + $0x120] sm:$0xff]  ;;  %v3107_v43 = vsub.f32 1.5, %v3106_v26 }
 0x4a1   : > { %9336 = vst [vmem:[#allocation139_spill] sm:$0xff] %v7640_v0  ;;  %3595 = vmatpush.msra.mxu1 %v4458_v7  ;;  %v4462_v59 = vld [vmem:[#allocation7 + $0x380] sm:$0xff]  ;;  %v7653_v8 = vpop.eup %4213  ;;  %v7682_v0 = vld [vmem:[#allocation7 + $0x6b0] sm:$0xff] }
 0x4a2   : > { %9337 = vst [vmem:[#allocation131_spill] sm:$0xff] %v7643_v28  ;;  %3579 = vmatpush.msra.mxu0 %v4460_v35  ;;  %3437 = vmatpush.msra.mxu3 %v7650_v47  ;;  %v7655_v28 = vld [vmem:[#allocation7 + $0x4f8] sm:$0xff]  ;;  %v4464_v7 = vld [vmem:[#allocation7 + $0x100] sm:$0xff]  ;;  %v3108_v35 = vmul.f32 %v7620_v18, %v3107_v43  ;;  %vm3120_vm7 = vweird.f32 %v7653_v8 }
 0x4a3   : > { %9338 = vst [vmem:[#allocation149_spill] sm:$0xff] %v7646_v56  ;;  %3596 = vmatpush.msra.mxu1 %v4462_v59  ;;  %3497 = vmatpush.msrb.mxu2 %v7655_v28  ;;  %v7661_v26 = vld [vmem:[%s8081_s12] sm:$0xf]  ;;  %v3114_v59 = vmul.f32 %v7653_v8, %v7625_v19  ;;  %vm3121_vm9 = vmor %vm3119_vm8, %vm3120_vm7 }
 0x4a4   : > { %9339 = vst [vmem:[#allocation72_spill] sm:$0xff] %v7650_v47  ;;  %3580 = vmatpush.msra.mxu0 %v4464_v7  ;;  %v7667_v47 = vld [vmem:[#allocation7 + $0x6d0] sm:$0xff]  ;;  %v4466_v56 = vld [vmem:[#allocation7 + $0x360] sm:$0xff]  ;;  %v7672_v7 = vld [vmem:[#allocation7 + $0x4d8] sm:$0xff]  ;;  %v3112_v43 = vsel %vm3111_vm6, %v7620_v18, %v3108_v35 }
 0x4a5   : > { %9340 = vst [vmem:[#allocation143_spill] sm:$0xff] %v7655_v28  ;;  %3438 = vmatpush.msra.mxu3 %v7667_v47  ;;  %3597 = vmatpush.msra.mxu1 %v4466_v56  ;;  %v4468_v28 = vld [vmem:[#allocation7 + $0xe0] sm:$0xff]  ;;  %v3143_v32 = vperm.slane %v3112_v43, 0  ;;  %v7689_v35 = vld [vmem:[#allocation7 + $0x690] sm:$0xff] }
 0x4a6   : > { %9341 = vst [vmem:[#allocation134_spill] sm:$0xff] %v7667_v47  ;;  %3498 = vmatpush.msrb.mxu2 %v7672_v7  ;;  %3581 = vmatpush.msra.mxu0 %v4468_v28  ;;  %v3115_v47 = vmul.f32 %v7653_v8, %v3114_v59  ;;  %v4470_v56 = vld [vmem:[#allocation7 + $0x340] sm:$0xff]  ;;  %v7686_v28 = vld [vmem:[#allocation7 + $0x4b8] sm:$0xff] }
 0x4a7   : > { %9342 = vst [vmem:[#allocation153_spill] sm:$0xff] %v7672_v7  ;;  %3439 = vmatpush.msra.mxu3 %v7682_v0  ;;  %3598 = vmatpush.msra.mxu1 %v4470_v56  ;;  %v4474_v59 = vld [vmem:[#allocation7 + $0x320] sm:$0xff]  ;;  %v7695_v7 = vld [vmem:[#allocation7 + $0x498] sm:$0xff] }
 0x4a8   : > { %9343 = vst [vmem:[#allocation67_spill] sm:$0xff] %v7682_v0  ;;  %3499 = vmatpush.msrb.mxu2 %v7686_v28  ;;  %3582 = vmatpush.msra.mxu0 %v4472_v29  ;;  %v3116_v18 = vmul.f32 0.5, %v3115_v47  ;;  %v9346_v0 = vld [vmem:[#allocation88_spill] sm:$0xff]  ;;  %v2952_v29 = vpop.f32.mrf.mxu0 }
 0x4a9   : > { %9344 = vst [vmem:[#allocation147_spill] sm:$0xff] %v7686_v28  ;;  %3440 = vmatpush.msra.mxu3 %v7689_v35  ;;  %3599 = vmatpush.msra.mxu1 %v4474_v59  ;;  %v3147_v56 = vmul.f32 %v3143_v32, %v9346_v0  ;;  %v4476_v28 = vld [vmem:[#allocation7 + $0xa0] sm:$0xff]  ;;  %v2973_v32 = vadd.f32 %v2972_v53, %v2952_v29  ;;  %v9347_v0 = vperm.slane %v7661_v26, 0 }
 0x4aa   : > { %9345 = vst [vmem:[#allocation137_spill] sm:$0xff] %v7689_v35  ;;  %3500 = vmatpush.msrb.mxu2 %v7695_v7  ;;  %3583 = vmatpush.msra.mxu0 %v4476_v28  ;;  %v3117_v47 = vsub.f32 1.5, %v3116_v18  ;;  %v4478_v59 = vld [vmem:[#allocation7 + $0x300] sm:$0xff]  ;;  %v7704_v35 = vld [vmem:[#allocation7 + $0x478] sm:$0xff] }
 0x4ab   : > { %3441 = vmatpush.msra.mxu3 %v7699_v50  ;;  %3600 = vmatpush.msra.mxu1 %v4478_v59  ;;  %v3160_v43 = vmul.f32 %v9347_v0, %v3147_v56  ;;  %9348 = vst [vmem:[#allocation157_spill] sm:$0xff] %v7704_v35  ;;  %v4480_v28 = vld [vmem:[#allocation7 + $0x80] sm:$0xff]  ;;  %v7714_v59 = vld [vmem:[#allocation7 + $0x650] sm:$0xff]  ;;  %v9351_v56 = vperm.slane %v7678_v60, 0  ;;  %v2993_v0 = vadd.f32 %v2992_v48, %v2973_v32  ;;  %v7730_v32 = vld [vmem:[#allocation7 + $0x438] sm:$0xff] }
 0x4ac   : > { %3501 = vmatpush.msrb.mxu2 %v7704_v35  ;;  %3584 = vmatpush.msra.mxu0 %v4480_v28  ;;  %v3118_v18 = vmul.f32 %v7653_v8, %v3117_v47  ;;  %9350 = vst [vmem:[#allocation71_spill] sm:$0xff] %v7714_v59  ;;  %v4482_v53 = vld [vmem:[#allocation7 + $0x2e0] sm:$0xff]  ;;  %v7721_v28 = vld [vmem:[#allocation7 + $0x458] sm:$0xff]  ;;  %v7725_v35 = vld [vmem:[#allocation7 + $0x630] sm:$0xff] }
 0x4ad   : > { %3442 = vmatpush.msra.mxu3 %v7714_v59  ;;  %3601 = vmatpush.msra.mxu1 %v4482_v53  ;;  %v3173_v29 = vadd.f32 %v9351_v56, %v3160_v43  ;;  %9352 = vst [vmem:[#allocation151_spill] sm:$0xff] %v7721_v28  ;;  %v4484_v47 = vld [vmem:[#allocation7 + $0x60] sm:$0xff]  ;;  %v3012_v53 = vpop.f32.mrf.mxu3  ;;  %v8546_v43 = vperm.slane %v7661_v26, 1 }
 0x4ae   : > { %3502 = vmatpush.msrb.mxu2 %v7721_v28  ;;  %3585 = vmatpush.msra.mxu0 %v4484_v47  ;;  %v3122_v19 = vsel %vm3121_vm9, %v7653_v8, %v3118_v18  ;;  %9353 = vst [vmem:[#allocation140_spill] sm:$0xff] %v7725_v35  ;;  %v4486_v59 = vld [vmem:[#allocation7 + $0x2c0] sm:$0xff]  ;;  %v3013_v56 = vadd.f32 %v3012_v53, %v2993_v0  ;;  %v7733_v47 = vld [vmem:[#allocation7 + $0x610] sm:$0xff]  ;;  %v9354_v18 = vld [vmem:[#allocation86_spill] sm:$0xff] }
 0x4af   : > { %3443 = vmatpush.msra.mxu3 %v7725_v35  ;;  %3602 = vmatpush.msra.mxu1 %v4486_v59  ;;  %3177 = vst [vmem:[%s7710_s21] sm:$0xf] %v3173_v29  ;;  %v3144_v48 = vperm.slane %v3122_v19, 0  ;;  %v4488_v28 = vld [vmem:[#allocation7 + $0x40] sm:$0xff]  ;;  %v8547_v59 = vperm.slane %v7678_v60, 1  ;;  %v7738_v29 = vld [vmem:[#allocation7 + $0x418] sm:$0xff] }
 0x4b0   : > { %3503 = vmatpush.msrb.mxu2 %v7730_v32  ;;  %3586 = vmatpush.msra.mxu0 %v4488_v28  ;;  %v4490_v8 = vld [vmem:[#allocation7 + $0x2a0] sm:$0xff]  ;;  %v3097_v19 = vmul.f32 0.001953125, %v3013_v56  ;;  %v7743_v0 = vld [vmem:[#allocation7 + $0x7f8] sm:$0xff] }
 0x4b1   : > { %3444 = vmatpush.msra.mxu3 %v7733_v47  ;;  %3603 = vmatpush.msra.mxu1 %v4490_v8  ;;  %v3148_v35 = vmul.f32 %v3144_v48, %v9354_v18  ;;  %9355 = vst [vmem:[#allocation75_spill] sm:$0xff] %v7743_v0  ;;  %v4493_v48 = vld [vmem:[#allocation7 + $0x20] sm:$0xff]  ;;  %v7750_v18 = vld [vmem:[#allocation7 + $0x7d8] sm:$0xff] }
 0x4b2   : > { %3504 = vmatpush.msrb.mxu2 %v7738_v29  ;;  %3445 = vmatmul.f32.vlgmr.msra.gmra.mxu3 %v7378_v1  ;;  %v7748_v53 = vadd.f32 1e-05, %v3097_v19  ;;  %v4494_v8 = vld [vmem:[#allocation7 + $0x280] sm:$0xff]  ;;  %v7756_v19 = vld [vmem:[#allocation7 + $0x7b8] sm:$0xff] }
 0x4b3   : > { %3505 = vmatmul.f32.vlgmr.msrb.gmra.mxu2 %v7217_v31  ;;  %3509 = vmatpush.msrb.mxu3 %v7743_v0  ;;  %v3161_v28 = vmul.f32 %v8546_v43, %v3148_v35  ;;  %v4496_v56 = vld [vmem:[#allocation7 + $0x5e0] sm:$0xff]  ;;  %9356 = vst [vmem:[#allocation155_spill] sm:$0xff] %v7756_v19 }
 0x4b4   : > { %3587 = vmatpush.msra.mxu0 %v4493_v48  ;;  %3604 = vmatpush.msra.mxu1 %v4494_v8  ;;  %4215 = vrsqrt.f32 %v7748_v53  ;;  %v4497_v0 = vld [vmem:[#allocation7] sm:$0xff]  ;;  %v4500_v48 = vld [vmem:[#allocation7 + $0x1e8] sm:$0xff]  ;;  %vm3129_vm11 = vweird.f32 %v7748_v53 }
 0x4b5   : > { %3510 = vmatpush.msrb.mxu3 %v7750_v18  ;;  %3613 = vmatpush.msra.mxu2 %v4496_v56  ;;  %v3174_v31 = vadd.f32 %v8547_v59, %v3161_v28  ;;  %v4498_v35 = vld [vmem:[#allocation7 + $0x260] sm:$0xff]  ;;  %v7760_v56 = vld [vmem:[#allocation7 + $0x798] sm:$0xff]  ;;  %v4504_v28 = vld [vmem:[#allocation7 + $0x1c8] sm:$0xff] }
 0x4b6   : > { %3588 = vmatpush.msra.mxu0 %v4497_v0  ;;  %3605 = vmatpush.msra.mxu1 %v4498_v35  ;;  %v4501_v8 = vld [vmem:[#allocation7 + $0x240] sm:$0xff]  ;;  %9357 = vst [vmem:[#allocation144_spill] sm:$0xff] %v7760_v56  ;;  %v7763_v59 = vld [vmem:[#allocation7 + $0x778] sm:$0xff] }
 0x4b7   : > { %3511 = vmatpush.msrb.mxu3 %v7756_v19  ;;  %3178 = vst [vmem:[%s7710_s21 + $0x8] sm:$0xf] %v3174_v31  ;;  %v4502_v43 = vld [vmem:[#allocation7 + $0x5c0] sm:$0xff] }
 0x4b8   : > { %3653 = vmatpush.msrb.mxu0 %v4500_v48  ;;  %3606 = vmatpush.msra.mxu1 %v4501_v8  ;;  %v4505_v0 = vld [vmem:[#allocation7 + $0x220] sm:$0xff]  ;;  %9358 = vst [vmem:[#allocation81_spill] sm:$0xff] %v7763_v59  ;;  %v4508_v48 = vld [vmem:[#allocation7 + $0x1a8] sm:$0xff] }
 0x4b9   : > { %3614 = vmatpush.msra.mxu2 %v4502_v43  ;;  %3512 = vmatpush.msrb.mxu3 %v7760_v56  ;;  %v4506_v35 = vld [vmem:[#allocation7 + $0x5a0] sm:$0xff]  ;;  %v7767_v56 = vld [vmem:[#allocation7 + $0x758] sm:$0xff] }
 0x4ba   : > { %3654 = vmatpush.msrb.mxu0 %v4504_v28  ;;  %3607 = vmatpush.msra.mxu1 %v4505_v0  ;;  %v4216_v31 = vpop.eup %4215  ;;  %v4509_v8 = vld [vmem:[#allocation7 + $0x200] sm:$0xff]  ;;  %v4512_v28 = vld [vmem:[#allocation7 + $0x188] sm:$0xff] }
 0x4bb   : > { %3615 = vmatpush.msra.mxu2 %v4506_v35  ;;  %3513 = vmatpush.msrb.mxu3 %v7763_v59  ;;  %v4510_v43 = vld [vmem:[#allocation7 + $0x580] sm:$0xff]  ;;  %v3124_v19 = vmul.f32 %v4216_v31, %v7748_v53  ;;  %v7771_v59 = vld [vmem:[#allocation7 + $0x738] sm:$0xff]  ;;  %vm3130_vm10 = vweird.f32 %v4216_v31  ;;  %v3154_v53 = vperm.slane %v7661_v26, 2 }
 0x4bc   : > { %3655 = vmatpush.msrb.mxu0 %v4508_v48  ;;  %3608 = vmatpush.msra.mxu1 %v4509_v8  ;;  %v4513_v0 = vld [vmem:[#allocation7 + $0x560] sm:$0xff]  ;;  %vm3131_vm12 = vmor %vm3129_vm11, %vm3130_vm10 }
 0x4bd   : > { %3616 = vmatpush.msra.mxu2 %v4510_v43  ;;  %3514 = vmatpush.msrb.mxu3 %v7767_v56  ;;  %v3125_v35 = vmul.f32 %v4216_v31, %v3124_v19  ;;  %v4515_v48 = vld [vmem:[#allocation7 + $0x540] sm:$0xff]  ;;  %v7776_v43 = vld [vmem:[#allocation7 + $0x718] sm:$0xff] }
 0x4be   : > { %3656 = vmatpush.msrb.mxu0 %v4512_v28  ;;  %3673 = vmatpush.msrb.mxu1 %v7130_v30  ;;  %v4517_v30 = vld [vmem:[#allocation7 + $0x520] sm:$0xff]  ;;  %v7781_v28 = vld [vmem:[#allocation7 + $0x6f8] sm:$0xff] }
 0x4bf   : > { %3617 = vmatpush.msra.mxu2 %v4513_v0  ;;  %3515 = vmatpush.msrb.mxu3 %v7771_v59  ;;  %v3126_v8 = vmul.f32 0.5, %v3125_v35  ;;  %v4523_v35 = vld [vmem:[#allocation7 + $0x4c0] sm:$0xff] }
 0x4c0   : > { %3657 = vmatpush.msrb.mxu0 %v7127_v37  ;;  %3674 = vmatpush.msrb.mxu1 %v7138_v20  ;;  %v4519_v37 = vld [vmem:[#allocation7 + $0x500] sm:$0xff] }
 0x4c1   : > { %3618 = vmatpush.msra.mxu2 %v4515_v48  ;;  %3516 = vmatpush.msrb.mxu3 %v7776_v43  ;;  %v3127_v19 = vsub.f32 1.5, %v3126_v8  ;;  %v3052_v48 = vpop.f32.mrf.mxu1  ;;  %v7805_v8 = vld [vmem:[#allocation7 + $0x678] sm:$0xff] }
 0x4c2   : > { %3658 = vmatpush.msrb.mxu0 %v7135_v46  ;;  %3675 = vmatpush.msrb.mxu1 %v7146_v40  ;;  %v7787_v46 = vld [vmem:[#allocation7 + $0x6d8] sm:$0xff]  ;;  %v4521_v40 = vld [vmem:[#allocation7 + $0x4e0] sm:$0xff] }
 0x4c3   : > { %3619 = vmatpush.msra.mxu2 %v4517_v30  ;;  %3517 = vmatpush.msrb.mxu3 %v7781_v28  ;;  %v3128_v20 = vmul.f32 %v4216_v31, %v3127_v19  ;;  %v3072_v30 = vpop.f32.mrf.mxu2 }
 0x4c4   : > { %3659 = vmatpush.msrb.mxu0 %v7143_v36  ;;  %3676 = vmatpush.msrb.mxu1 %v7154_v3  ;;  %v7792_v36 = vld [vmem:[#allocation7 + $0x6b8] sm:$0xff] }
 0x4c5   : > { %3620 = vmatpush.msra.mxu2 %v4519_v37  ;;  %3518 = vmatpush.msrb.mxu3 %v7787_v46  ;;  %v3132_v0 = vsel %vm3131_vm12, %v4216_v31, %v3128_v20  ;;  %v3167_v31 = vperm.slane %v7678_v60, 2  ;;  %v4529_v37 = vld [vmem:[#allocation7 + $0x460] sm:$0xff] }
 0x4c6   : > { %3660 = vmatpush.msrb.mxu0 %v7151_v11  ;;  %3677 = vmatpush.msrb.mxu1 %v7162_v13  ;;  %v3145_v3 = vperm.slane %v3132_v0, 0  ;;  %v7798_v11 = vld [vmem:[#allocation7 + $0x698] sm:$0xff]  ;;  %v3092_v0 = vpop.f32.mrf.mxu3 }
 0x4c7   : > { %3621 = vmatpush.msra.mxu2 %v4521_v40  ;;  %3519 = vmatpush.msrb.mxu3 %v7792_v36  ;;  %v4531_v40 = vld [vmem:[#allocation7 + $0x440] sm:$0xff] }
 0x4c8   : > { %3661 = vmatpush.msrb.mxu0 %v7159_v16  ;;  %3678 = vmatpush.msrb.mxu1 %v7170_v34  ;;  %v3149_v13 = vmul.f32 %v3145_v3, %v6928_v38  ;;  %v4525_v16 = vld [vmem:[#allocation7 + $0x4a0] sm:$0xff] }
 0x4c9   : > { %3622 = vmatpush.msra.mxu2 %v4523_v35  ;;  %3520 = vmatpush.msrb.mxu3 %v7798_v11  ;;  %v4527_v38 = vld [vmem:[#allocation7 + $0x480] sm:$0xff] }
 0x4ca   : > { %3662 = vmatpush.msrb.mxu0 %v7167_v57  ;;  %3679 = vmatpush.msrb.mxu1 %v7178_v39  ;;  %v3162_v34 = vmul.f32 %v3154_v53, %v3149_v13  ;;  %v3032_v57 = vpop.f32.mrf.mxu0  ;;  %v7812_v39 = vld [vmem:[#allocation7 + $0x658] sm:$0xff]  ;;  %v4535_v35 = vld [vmem:[#allocation7 + $0x400] sm:$0xff] }
 0x4cb   : > { %3623 = vmatpush.msra.mxu2 %v4525_v16  ;;  %3521 = vmatpush.msrb.mxu3 %v7805_v8  ;;  %v3053_v19 = vadd.f32 %v3052_v48, %v3032_v57  ;;  %v4543_v16 = vld [vmem:[#allocation7 + $0x760] sm:$0xff] }
 0x4cc   : > { %3663 = vmatpush.msrb.mxu0 %v7175_v14  ;;  %3680 = vmatpush.msrb.mxu1 %v7186_v22  ;;  %v3175_v14 = vadd.f32 %v3167_v31, %v3162_v34  ;;  %v7819_v22 = vld [vmem:[#allocation7 + $0x638] sm:$0xff]  ;;  %v4544_v34 = vld [vmem:[#allocation7 + $0x568] sm:$0xff] }
 0x4cd   : > { %3624 = vmatpush.msra.mxu2 %v4527_v38  ;;  %3522 = vmatpush.msrb.mxu3 %v7812_v39  ;;  %v3073_v20 = vadd.f32 %v3072_v30, %v3053_v19  ;;  %v4545_v38 = vld [vmem:[#allocation7 + $0x740] sm:$0xff] }
 0x4ce   : > { %3664 = vmatpush.msrb.mxu0 %v7183_v4  ;;  %3681 = vmatpush.msrb.mxu1 %v7194_v41  ;;  %3179 = vst [vmem:[%s7710_s21 + $0x10] sm:$0xf] %v3175_v14  ;;  %v7825_v4 = vld [vmem:[#allocation7 + $0x618] sm:$0xff]  ;;  %v4547_v19 = vld [vmem:[#allocation7 + $0x700] sm:$0xff] }
 0x4cf   : > { %3625 = vmatpush.msra.mxu2 %v4529_v37  ;;  %3523 = vmatpush.msrb.mxu3 %v7819_v22  ;;  %v3093_v41 = vadd.f32 %v3092_v0, %v3073_v20  ;;  %v4548_v14 = vld [vmem:[#allocation7 + $0x6e0] sm:$0xff]  ;;  %v3155_v0 = vperm.slane %v7661_v26, 3 }
 0x4d0   : > { %3665 = vmatpush.msrb.mxu0 %v7191_v42  ;;  %3682 = vmatpush.msrb.mxu1 %v7202_v54  ;;  %v4533_v42 = vld [vmem:[#allocation7 + $0x420] sm:$0xff] }
 0x4d1   : > { %3626 = vmatpush.msra.mxu2 %v4531_v40  ;;  %3524 = vmatpush.msrb.mxu3 %v7825_v4  ;;  %v3098_v3 = vmul.f32 0.001953125, %v3093_v41  ;;  %v4534_v54 = vld [vmem:[#allocation7 + $0x7e0] sm:$0xff] }
 0x4d2   : > { %3666 = vmatpush.msrb.mxu0 %v7199_v45  ;;  %3525 = vmatmul.f32.vlgmr.msrb.gmra.mxu3 %v7378_v1  ;;  %v4536_v45 = vld [vmem:[#allocation7 + $0x5e8] sm:$0xff]  ;;  %v4537_v1 = vld [vmem:[#allocation7 + $0x7c0] sm:$0xff] }
 0x4d3   : > { %3683 = vmatpush.msrb.mxu1 %v7212_v58  ;;  %3627 = vmatpush.msra.mxu2 %v4533_v42  ;;  %v3102_v13 = vadd.f32 1e-05, %v3098_v3  ;;  %v4539_v58 = vld [vmem:[#allocation7 + $0x7a0] sm:$0xff]  ;;  %v3246_v42 = vpop.f32.mrf.mxu1 }
 0x4d4   : > { %3667 = vmatpush.msrb.mxu0 %v7209_v25  ;;  %3633 = vmatpush.msra.mxu3 %v4534_v54  ;;  %v4538_v25 = vld [vmem:[#allocation7 + $0x5c8] sm:$0xff]  ;;  %v4549_v20 = vld [vmem:[#allocation7 + $0x6c0] sm:$0xff]  ;;  %v3226_v54 = vpop.f32.mrf.mxu0 }
 0x4d5   : > { %3684 = vmatpush.msrb.mxu1 %v7223_v55  ;;  %3628 = vmatpush.msra.mxu2 %v4535_v35  ;;  %4217 = vrsqrt.f32 %v3102_v13  ;;  %v4540_v55 = vld [vmem:[#allocation7 + $0x5a8] sm:$0xff]  ;;  %vm3139_vm14 = vweird.f32 %v3102_v13  ;;  %v4552_v3 = vld [vmem:[#allocation7 + $0x660] sm:$0xff]  ;;  %v3266_v35 = vpop.f32.mrf.mxu2 }
 0x4d6   : > { %3668 = vmatpush.msrb.mxu0 %v7220_v10  ;;  %3634 = vmatpush.msra.mxu3 %v4537_v1  ;;  %v4541_v10 = vld [vmem:[#allocation7 + $0x780] sm:$0xff] }
 0x4d7   : > { %3685 = vmatpush.msrb.mxu1 %v7232_v15  ;;  %3693 = vmatpush.msrb.mxu2 %v4536_v45  ;;  %v4542_v15 = vld [vmem:[#allocation7 + $0x588] sm:$0xff]  ;;  %v4554_v45 = vld [vmem:[#allocation7 + $0x620] sm:$0xff] }
 0x4d8   : > { %3635 = vmatpush.msra.mxu3 %v4539_v58  ;;  %v4556_v58 = vld [vmem:[#allocation7 + $0x7e8] sm:$0xff] }
 0x4d9   : > { %3686 = vmatpush.msrb.mxu1 %v7244_v49  ;;  %3694 = vmatpush.msrb.mxu2 %v4538_v25  ;;  %v4555_v25 = vld [vmem:[#allocation7 + $0x600] sm:$0xff] }
 0x4da   : > { %3636 = vmatpush.msra.mxu3 %v4541_v10  ;;  %v4557_v10 = vld [vmem:[#allocation7 + $0x7c8] sm:$0xff] }
 0x4db   : > { %3687 = vmatpush.msrb.mxu1 %v7252_v23  ;;  %3695 = vmatpush.msrb.mxu2 %v4540_v55  ;;  %v4218_v48 = vpop.eup %4217  ;;  %v4546_v23 = vld [vmem:[#allocation7 + $0x720] sm:$0xff] }
 0x4dc   : > { %3637 = vmatpush.msra.mxu3 %v4543_v16  ;;  %v3134_v49 = vmul.f32 %v4218_v48, %v3102_v13  ;;  %vm3140_vm13 = vweird.f32 %v4218_v48  ;;  %v3247_v13 = vadd.f32 %v3246_v42, %v3226_v54  ;;  %v4558_v16 = vld [vmem:[#allocation7 + $0x7a8] sm:$0xff]  ;;  %v3306_v42 = vpop.f32.mrf.mxu0 }
 0x4dd   : > { %3688 = vmatpush.msrb.mxu1 %v7262_v33  ;;  %3696 = vmatpush.msrb.mxu2 %v4542_v15  ;;  %vm3141_vm15 = vmor %vm3139_vm14, %vm3140_vm13  ;;  %v9371_v54 = vld [vmem:[#allocation26_spill] sm:$0xff] }
 0x4de   : > { %3638 = vmatpush.msra.mxu3 %v4545_v38  ;;  %v3135_v57 = vmul.f32 %v4218_v48, %v3134_v49  ;;  %v9360_v49 = vld [vmem:[#allocation32_spill] sm:$0xff] }
 0x4df   : > { %3697 = vmatpush.msrb.mxu2 %v4544_v34 }
 0x4e0   : > { %3639 = vmatpush.msra.mxu3 %v4546_v23  ;;  %v3136_v30 = vmul.f32 0.5, %v3135_v57  ;;  %v9361_v57 = vld [vmem:[#allocation41_spill] sm:$0xff] }
 0x4e1   : > { %3698 = vmatpush.msrb.mxu2 %v7275_v17  ;;  %v3286_v1 = vpop.f32.mrf.mxu3 }
 0x4e2   : > { %3640 = vmatpush.msra.mxu3 %v4547_v19  ;;  %v3137_v33 = vsub.f32 1.5, %v3136_v30 }
 0x4e3   : > { %3699 = vmatpush.msrb.mxu2 %v7285_v44  ;;  %v4550_v44 = vld [vmem:[#allocation7 + $0x6a0] sm:$0xff] }
 0x4e4   : > { %3641 = vmatpush.msra.mxu3 %v4548_v14  ;;  %v3138_v37 = vmul.f32 %v4218_v48, %v3137_v33  ;;  %v9364_v33 = vld [vmem:[#allocation70_spill] sm:$0xff]  ;;  %v9365_v14 = vld [vmem:[#allocation107_spill] sm:$0xff] }
 0x4e5   : > { %3700 = vmatpush.msrb.mxu2 %v7295_v5  ;;  %v4551_v5 = vld [vmem:[#allocation7 + $0x680] sm:$0xff] }
 0x4e6   : > { %3642 = vmatpush.msra.mxu3 %v4549_v20  ;;  %v3142_v17 = vsel %vm3141_vm15, %v4218_v48, %v3138_v37  ;;  %v9359_v48 = vld [vmem:[#allocation51_spill] sm:$0xff]  ;;  %v9366_v20 = vld [vmem:[#allocation69_spill] sm:$0xff] }
 0x4e7   : > { %3701 = vmatpush.msrb.mxu2 %v7305_v51  ;;  %v3146_v40 = vperm.slane %v3142_v17, 0  ;;  %v3168_v51 = vperm.slane %v7678_v60, 3  ;;  %v4559_v37 = vld [vmem:[#allocation7 + $0x1f0] sm:$0xff] }
 0x4e8   : > { %3643 = vmatpush.msra.mxu3 %v4550_v44  ;;  %v9367_v17 = vld [vmem:[#allocation95_spill] sm:$0xff]  ;;  %v9368_v44 = vld [vmem:[#allocation108_spill] sm:$0xff] }
 0x4e9   : > { %3702 = vmatpush.msrb.mxu2 %v7315_v6  ;;  %v3150_v41 = vmul.f32 %v3146_v40, %v6981_v21  ;;  %v3326_v40 = vpop.f32.mrf.mxu1 }
 0x4ea   : > { %3644 = vmatpush.msra.mxu3 %v4551_v5  ;;  %v9369_v5 = vld [vmem:[#allocation13_spill] sm:$0xff] }
 0x4eb   : > { %3703 = vmatpush.msrb.mxu2 %v7325_v61  ;;  %v3163_v6 = vmul.f32 %v3155_v0, %v3150_v41  ;;  %v4553_v61 = vld [vmem:[#allocation7 + $0x640] sm:$0xff]  ;;  %v9370_v41 = vld [vmem:[#allocation116_spill] sm:$0xff] }
 0x4ec   : > { %3645 = vmatpush.msra.mxu3 %v4552_v3  ;;  %v3346_v3 = vpop.f32.mrf.mxu2 }
 0x4ed   : > { %3704 = vmatpush.msrb.mxu2 %v7335_v52  ;;  %v3176_v21 = vadd.f32 %v3168_v51, %v3163_v6  ;;  %v3267_v52 = vadd.f32 %v3266_v35, %v3247_v13  ;;  %v3327_v6 = vadd.f32 %v3326_v40, %v3306_v42  ;;  %v9372_v35 = vld [vmem:[#allocation48_spill] sm:$0xff]  ;;  %v9373_v13 = vld [vmem:[#allocation22_spill] sm:$0xff]  ;;  %v9389_v40 = vld [vmem:[#allocation87_spill] sm:$0xff] }
 0x4ee   : > { %3646 = vmatpush.msra.mxu3 %v4553_v61 }
 0x4ef   : > { %3705 = vmatpush.msrb.mxu2 %v7345_v27  ;;  %3180 = vst [vmem:[%s7710_s21 + $0x18] sm:$0xf] %v3176_v21  ;;  %v3287_v27 = vadd.f32 %v3286_v1, %v3267_v52  ;;  %v3347_v61 = vadd.f32 %v3346_v3, %v3327_v6  ;;  %v9374_v52 = vld [vmem:[#allocation85_spill] sm:$0xff] }
 0x4f0   : > { %3647 = vmatpush.msra.mxu3 %v4554_v45  ;;  %v9391_v6 = vld [vmem:[#allocation93_spill] sm:$0xff] }
 0x4f1   : > { %3706 = vmatpush.msrb.mxu2 %v7355_v12  ;;  %v3529_v55 = vmul.f32 0.0013020834, %v3287_v27 }
 0x4f2   : > { %3648 = vmatpush.msra.mxu3 %v4555_v25  ;;  %v9375_v25 = vld [vmem:[#allocation90_spill] sm:$0xff] }
 0x4f3   : > { %3707 = vmatpush.msrb.mxu2 %v7365_v2  ;;  %v3533_v15 = vperm.slane %v3529_v55, 0  ;;  %v9377_v55 = vld [vmem:[#allocation91_spill] sm:$0xff] }
 0x4f4   : > { %3713 = vmatpush.msrb.mxu3 %v4556_v58  ;;  %v9376_v58 = vld [vmem:[#allocation97_spill] sm:$0xff] }
 0x4f5   : > { %3708 = vmatpush.msrb.mxu2 %v7375_v24  ;;  %v7858_v12 = vsub.f32 %v7027_v62, %v3533_v15  ;;  %v9362_v62 = vld [vmem:[#allocation60_spill] sm:$0xff]  ;;  %v9378_v15 = vld [vmem:[#allocation94_spill] sm:$0xff] }
 0x4f6   : > { %3714 = vmatpush.msrb.mxu3 %v4557_v10 }
 0x4f7   : > { %v3541_v2 = vmul.f32 %v7858_v12, %v7858_v12 }
 0x4f8   : > { %3715 = vmatpush.msrb.mxu3 %v4558_v16 }
 0x4f9   : > { %v3545_v24 = vsel %vm643_vm1, %v3541_v2, 0.0  ;;  %v9379_v2 = vld [vmem:[#allocation98_spill] sm:$0xff] }
 0x4fa   : > { %3716 = vmatpush.msrb.mxu3 %v7419_v9  ;;  %v3546_v34 = vrot.slane %v3545_v24, 4  ;;  %v9363_v9 = vld [vmem:[#allocation64_spill] sm:$0xff] }
 0x4fc   : > { %3717 = vmatpush.msrb.mxu3 %v7431_v63  ;;  %v3547_v38 = vadd.f32 %v3546_v34, %v3545_v24 }
 0x4fe   : > { %3718 = vmatpush.msrb.mxu3 %v9359_v48  ;;  %v3548_v23 = vrot.slane %v3547_v38, 2  ;;  %v9380_v48 = vld [vmem:[#allocation100_spill] sm:$0xff] }
 0x500   : > { %3719 = vmatpush.msrb.mxu3 %v9360_v49  ;;  %v3549_v30 = vadd.f32 %v3548_v23, %v3547_v38  ;;  %v9381_v49 = vld [vmem:[#allocation102_spill] sm:$0xff] }
 0x502   : > { %3720 = vmatpush.msrb.mxu3 %v9361_v57  ;;  %v3550_v19 = vrot.slane %v3549_v30, 1  ;;  %v9382_v57 = vld [vmem:[#allocation96_spill] sm:$0xff] }
 0x504   : > { %3721 = vmatpush.msrb.mxu3 %v9362_v62  ;;  %v7871_v63 = vadd.f32 %v3550_v19, %v3549_v30  ;;  %v9383_v62 = vld [vmem:[#allocation23_spill] sm:$0xff] }
 0x506   : > { %3722 = vmatpush.msrb.mxu3 %v9363_v9  ;;  %3589 = vmatmul.f32.vlgmr.msra.gmra.mxu0 %v7871_v63  ;;  %v9384_v9 = vld [vmem:[#allocation24_spill] sm:$0xff] }
 0x507   : > { %3733 = vmatpush.msra.mxu0 %v4559_v37  ;;  %v9386_v37 = vld [vmem:[#allocation27_spill] sm:$0xff] }
 0x508   : > { %3723 = vmatpush.msrb.mxu3 %v9364_v33  ;;  %v9385_v33 = vld [vmem:[#allocation28_spill] sm:$0xff]  ;;  %v3426_v42 = vpop.f32.mrf.mxu2 }
 0x509   : > { %3734 = vmatpush.msra.mxu0 %v9367_v17  ;;  %v9388_v17 = vld [vmem:[#allocation35_spill] sm:$0xff] }
 0x50a   : > { %3724 = vmatpush.msrb.mxu3 %v9365_v14 }
 0x50b   : > { %3735 = vmatpush.msra.mxu0 %v9369_v5  ;;  %v9390_v5 = vld [vmem:[#allocation33_spill] sm:$0xff] }
 0x50c   : > { %3725 = vmatpush.msrb.mxu3 %v9366_v20  ;;  %v3366_v21 = vpop.f32.mrf.mxu3  ;;  %v9387_v20 = vld [vmem:[#allocation84_spill] sm:$0xff] }
 0x50d   : > { %3736 = vmatpush.msra.mxu0 %v9371_v54  ;;  %v3367_v45 = vadd.f32 %v3366_v21, %v3347_v61  ;;  %v9392_v54 = vld [vmem:[#allocation34_spill] sm:$0xff]  ;;  %v9393_v61 = vld [vmem:[#allocation99_spill] sm:$0xff] }
 0x50e   : > { %3726 = vmatpush.msrb.mxu3 %v9368_v44  ;;  %3669 = vmatmul.f32.vlgmr.msrb.gmra.mxu0 %v7871_v63  ;;  %v3406_v44 = vpop.f32.mrf.mxu1 }
 0x50f   : > { %3737 = vmatpush.msra.mxu0 %v9373_v13  ;;  %v3530_v1 = vmul.f32 0.0013020834, %v3367_v45  ;;  %v9394_v13 = vld [vmem:[#allocation36_spill] sm:$0xff] }
 0x510   : > { %3727 = vmatpush.msrb.mxu3 %v9370_v41  ;;  %v3386_v41 = vpop.f32.mrf.mxu0 }
 0x511   : > { %3738 = vmatpush.msra.mxu0 %v9374_v52  ;;  %v3534_v27 = vperm.slane %v3530_v1, 0  ;;  %v3407_v3 = vadd.f32 %v3406_v44, %v3386_v41  ;;  %v9395_v52 = vld [vmem:[#allocation101_spill] sm:$0xff]  ;;  %v9396_v1 = vld [vmem:[#allocation46_spill] sm:$0xff] }
 0x512   : > { %3728 = vmatpush.msrb.mxu3 %v9372_v35 }
 0x513   : > { %3739 = vmatpush.msra.mxu0 %v9375_v25  ;;  %v7888_v10 = vsub.f32 %v9377_v55, %v3534_v27  ;;  %v3427_v35 = vadd.f32 %v3426_v42, %v3407_v3  ;;  %v9397_v27 = vld [vmem:[#allocation14_spill] sm:$0xff]  ;;  %v9414_v42 = vld [vmem:[#allocation31_spill] sm:$0xff] }
 0x514   : > { %v9415_v3 = vld [vmem:[#allocation119_spill] sm:$0xff] }
 0x515   : > { %3740 = vmatpush.msra.mxu0 %v9376_v58  ;;  %v3542_v16 = vmul.f32 %v7888_v10, %v7888_v10  ;;  %v9398_v58 = vld [vmem:[#allocation38_spill] sm:$0xff] }
 0x517   : > { %3741 = vmatpush.msra.mxu0 %v9378_v15  ;;  %v3552_v24 = vsel %vm643_vm1, %v3542_v16, 0.0  ;;  %v9399_v15 = vld [vmem:[#allocation18_spill] sm:$0xff]  ;;  %v9400_v16 = vld [vmem:[#allocation59_spill] sm:$0xff] }
 0x518   : > { %v3553_v34 = vrot.slane %v3552_v24, 4 }
 0x519   : > { %3742 = vmatpush.msra.mxu0 %v9379_v2  ;;  %v9401_v2 = vld [vmem:[#allocation89_spill] sm:$0xff] }
 0x51a   : > { %v3554_v38 = vadd.f32 %v3553_v34, %v3552_v24  ;;  %v9403_v34 = vld [vmem:[#allocation17_spill] sm:$0xff] }
 0x51b   : > { %3743 = vmatpush.msra.mxu0 %v9380_v48  ;;  %v9402_v48 = vld [vmem:[#allocation30_spill] sm:$0xff] }
 0x51c   : > { %v3555_v23 = vrot.slane %v3554_v38, 2 }
 0x51d   : > { %3744 = vmatpush.msra.mxu0 %v9381_v49 }
 0x51e   : > { %v3556_v30 = vadd.f32 %v3555_v23, %v3554_v38  ;;  %v9404_v38 = vld [vmem:[#allocation19_spill] sm:$0xff] }
 0x51f   : > { %3745 = vmatpush.msra.mxu0 %v9382_v57  ;;  %v9405_v57 = vld [vmem:[#allocation78_spill] sm:$0xff] }
 0x520   : > { %v3557_v19 = vrot.slane %v3556_v30, 1 }
 0x521   : > { %3746 = vmatpush.msra.mxu0 %v9383_v62  ;;  %v9406_v62 = vld [vmem:[#allocation20_spill] sm:$0xff] }
 0x522   : > { %v7901_v14 = vadd.f32 %v3557_v19, %v3556_v30  ;;  %v9407_v30 = vld [vmem:[#allocation61_spill] sm:$0xff] }
 0x523   : > { %3747 = vmatpush.msra.mxu0 %v9384_v9  ;;  %v9408_v19 = vld [vmem:[#allocation21_spill] sm:$0xff] }
 0x524   : > { %3609 = vmatmul.f32.vlgmr.msra.gmra.mxu1 %v7901_v14 }
 0x525   : > { %3748 = vmatpush.msra.mxu0 %v9385_v33  ;;  %3753 = vmatpush.msra.mxu1 %v9387_v20  ;;  %v9409_v33 = vld [vmem:[#allocation80_spill] sm:$0xff]  ;;  %v9410_v20 = vld [vmem:[#allocation25_spill] sm:$0xff] }
 0x526   : > { %3749 = vmatmul.f32.vlgmr.msra.gmra.mxu0 %v7871_v63 }
 0x527   : > { %3813 = vmatpush.msrb.mxu0 %v9386_v37  ;;  %3754 = vmatpush.msra.mxu1 %v9389_v40  ;;  %v9412_v40 = vld [vmem:[#allocation40_spill] sm:$0xff] }
 0x529   : > { %3814 = vmatpush.msrb.mxu0 %v9388_v17  ;;  %3755 = vmatpush.msra.mxu1 %v9391_v6  ;;  %v9411_v17 = vld [vmem:[#allocation115_spill] sm:$0xff] }
 0x52b   : > { %3815 = vmatpush.msrb.mxu0 %v9390_v5  ;;  %3756 = vmatpush.msra.mxu1 %v9393_v61  ;;  %v9413_v5 = vld [vmem:[#allocation112_spill] sm:$0xff] }
 0x52c   : > { %3689 = vmatmul.f32.vlgmr.msrb.gmra.mxu1 %v7901_v14 }
 0x52d   : > { %3816 = vmatpush.msrb.mxu0 %v9392_v54  ;;  %3757 = vmatpush.msra.mxu1 %v9395_v52  ;;  %v9416_v54 = vld [vmem:[#allocation44_spill] sm:$0xff]  ;;  %v3486_v52 = vpop.f32.mrf.mxu1 }
 0x52f   : > { %3817 = vmatpush.msrb.mxu0 %v9394_v13  ;;  %3758 = vmatpush.msra.mxu1 %v9397_v27  ;;  %v9418_v13 = vld [vmem:[#allocation39_spill] sm:$0xff]  ;;  %v3466_v27 = vpop.f32.mrf.mxu0 }
 0x531   : > { %3818 = vmatpush.msrb.mxu0 %v9396_v1  ;;  %3759 = vmatpush.msra.mxu1 %v9399_v15  ;;  %v9421_v1 = vld [vmem:[#allocation29_spill] sm:$0xff] }
 0x532   : > { %v9423_v15 = vld [vmem:[#allocation37_spill] sm:$0xff] }
 0x533   : > { %3819 = vmatpush.msrb.mxu0 %v9398_v58  ;;  %3760 = vmatpush.msra.mxu1 %v9402_v48  ;;  %v9426_v48 = vld [vmem:[#allocation76_spill] sm:$0xff] }
 0x535   : > { %v3446_v21 = vpop.f32.mrf.mxu3  ;;  %3820 = vmatpush.msrb.mxu0 %v9400_v16  ;;  %3761 = vmatpush.msra.mxu1 %v9404_v38  ;;  %v9427_v38 = vld [vmem:[#allocation56_spill] sm:$0xff] }
 0x536   : > { %v3447_v45 = vadd.f32 %v3446_v21, %v3427_v35  ;;  %v9417_v35 = vld [vmem:[#allocation82_spill] sm:$0xff]  ;;  %v9419_v21 = vld [vmem:[#allocation16_spill] sm:$0xff]  ;;  %v3506_v58 = vpop.f32.mrf.mxu2 }
 0x537   : > { %3821 = vmatpush.msrb.mxu0 %v9403_v34  ;;  %3762 = vmatpush.msra.mxu1 %v9406_v62  ;;  %v9429_v62 = vld [vmem:[#allocation15_spill] sm:$0xff] }
 0x538   : > { %v3531_v25 = vmul.f32 0.0013020834, %v3447_v45  ;;  %v9420_v45 = vld [vmem:[#allocation42_spill] sm:$0xff] }
 0x539   : > { %3822 = vmatpush.msrb.mxu0 %v9405_v57  ;;  %3763 = vmatpush.msra.mxu1 %v9408_v19  ;;  %v9428_v57 = vld [vmem:[#allocation77_spill] sm:$0xff] }
 0x53a   : > { %v3535_v55 = vperm.slane %v3531_v25, 0  ;;  %v9422_v25 = vld [vmem:[#allocation55_spill] sm:$0xff]  ;;  %v9431_v19 = vld [vmem:[#allocation49_spill] sm:$0xff] }
 0x53b   : > { %3823 = vmatpush.msrb.mxu0 %v9407_v30  ;;  %3764 = vmatpush.msra.mxu1 %v9410_v20  ;;  %v9430_v30 = vld [vmem:[#allocation58_spill] sm:$0xff] }
 0x53c   : > { %v7922_v24 = vsub.f32 %v9401_v2, %v3535_v55  ;;  %v3487_v55 = vadd.f32 %v3486_v52, %v3466_v27  ;;  %v9425_v2 = vld [vmem:[#allocation52_spill] sm:$0xff]  ;;  %v9443_v52 = vld [vmem:[#allocation50_spill] sm:$0xff]  ;;  %v9445_v27 = vld [vmem:[#allocation43_spill] sm:$0xff] }
 0x53d   : > { %3824 = vmatpush.msrb.mxu0 %v9409_v33  ;;  %3765 = vmatpush.msra.mxu1 %v9412_v40  ;;  %v9432_v33 = vld [vmem:[#allocation74_spill] sm:$0xff] }
 0x53e   : > { %v3543_v49 = vmul.f32 %v7922_v24, %v7922_v24  ;;  %v3507_v16 = vadd.f32 %v3506_v58, %v3487_v55  ;;  %v9446_v55 = vld [vmem:[#allocation79_spill] sm:$0xff] }
 0x53f   : > { %3825 = vmatpush.msrb.mxu0 %v9411_v17  ;;  %3766 = vmatpush.msra.mxu1 %v9414_v42  ;;  %v9434_v17 = vld [vmem:[#allocation45_spill] sm:$0xff] }
 0x540   : > { %v3559_v23 = vsel %vm643_vm1, %v3543_v49, 0.0 }
 0x541   : > { %v3560_v9 = vrot.slane %v3559_v23, 4  ;;  %3826 = vmatpush.msrb.mxu0 %v9413_v5  ;;  %3767 = vmatpush.msra.mxu1 %v9416_v54  ;;  %v9436_v5 = vld [vmem:[#allocation63_spill] sm:$0xff] }
 0x543   : > { %v3561_v37 = vadd.f32 %v3560_v9, %v3559_v23  ;;  %3827 = vmatpush.msrb.mxu0 %v9415_v3  ;;  %3768 = vmatpush.msra.mxu1 %v9418_v13  ;;  %v9438_v3 = vld [vmem:[#allocation66_spill] sm:$0xff]  ;;  %v9441_v13 = vld [vmem:[#allocation113_spill] sm:$0xff] }
 0x544   : > { %3769 = vmatmul.f32.vlgmr.msra.gmra.mxu1 %v7901_v14 }
 0x545   : > { %v3562_v44 = vrot.slane %v3561_v37, 2  ;;  %3828 = vmatpush.msrb.mxu0 %v9417_v35  ;;  %3833 = vmatpush.msrb.mxu1 %v9420_v45  ;;  %v9440_v35 = vld [vmem:[#allocation103_spill] sm:$0xff]  ;;  %v9442_v45 = vld [vmem:[#allocation65_spill] sm:$0xff] }
 0x546   : > { %3829 = vmatmul.f32.vlgmr.msrb.gmra.mxu0 %v7871_v63  ;;  %v9424_v63 = vld [vmem:[#allocation53_spill] sm:$0xff] }
 0x547   : > { %v3563_v41 = vadd.f32 %v3562_v44, %v3561_v37  ;;  %3834 = vmatpush.msrb.mxu1 %v9422_v25  ;;  %v9433_v37 = vld [vmem:[#allocation92_spill] sm:$0xff]  ;;  %v9435_v44 = vld [vmem:[#allocation111_spill] sm:$0xff]  ;;  %v9444_v25 = vld [vmem:[#allocation105_spill] sm:$0xff] }
 0x549   : > { %v3564_v6 = vrot.slane %v3563_v41, 1  ;;  %3835 = vmatpush.msrb.mxu1 %v9424_v63 }
 0x54b   : > { %v7943_v61 = vadd.f32 %v3564_v6, %v3563_v41  ;;  %3836 = vmatpush.msrb.mxu1 %v9426_v48  ;;  %v9437_v41 = vld [vmem:[#allocation73_spill] sm:$0xff]  ;;  %v9439_v6 = vld [vmem:[#allocation104_spill] sm:$0xff] }
 0x54d   : > { %3629 = vmatmul.f32.vlgmr.msra.gmra.mxu2 %v7943_v61  ;;  %3837 = vmatpush.msrb.mxu1 %v9428_v57  ;;  %v9452_v57 = vld [vmem:[#allocation117_spill] sm:$0xff] }
 0x54e   : > { %3773 = vmatpush.msra.mxu2 %v9419_v21 }
 0x54f   : > { %3838 = vmatpush.msrb.mxu1 %v9430_v30  ;;  %v9455_v30 = vld [vmem:[#allocation123_spill] sm:$0xff] }
 0x550   : > { %3774 = vmatpush.msra.mxu2 %v9421_v1 }
 0x551   : > { %3839 = vmatpush.msrb.mxu1 %v9432_v33  ;;  %v9458_v33 = vld [vmem:[#allocation141_spill] sm:$0xff] }
 0x552   : > { %3775 = vmatpush.msra.mxu2 %v9423_v15  ;;  %v9447_v15 = vld [vmem:[#allocation47_spill] sm:$0xff] }
 0x553   : > { %3840 = vmatpush.msrb.mxu1 %v9435_v44  ;;  %v9462_v44 = vld [vmem:[#allocation62_spill] sm:$0xff] }
 0x554   : > { %3776 = vmatpush.msra.mxu2 %v9425_v2  ;;  %v9449_v2 = vld [vmem:[#allocation133_spill] sm:$0xff] }
 0x555   : > { %v3526_v34 = vpop.f32.mrf.mxu3  ;;  %3709 = vmatmul.f32.vlgmr.msrb.gmra.mxu2 %v7943_v61  ;;  %3841 = vmatpush.msrb.mxu1 %v9437_v41  ;;  %v9465_v41 = vld [vmem:[#allocation131_spill] sm:$0xff] }
 0x556   : > { %v3527_v49 = vadd.f32 %v3526_v34, %v3507_v16  ;;  %3777 = vmatpush.msra.mxu2 %v9427_v38  ;;  %v9448_v16 = vld [vmem:[#allocation109_spill] sm:$0xff]  ;;  %v9450_v34 = vld [vmem:[#allocation122_spill] sm:$0xff]  ;;  %v4560_v38 = vld [vmem:[#allocation7 + $0x7f0] sm:$0xff] }
 0x557   : > { %3842 = vmatpush.msrb.mxu1 %v9439_v6  ;;  %v9468_v6 = vld [vmem:[#allocation143_spill] sm:$0xff] }
 0x558   : > { %v3532_v23 = vmul.f32 0.0013020834, %v3527_v49  ;;  %3778 = vmatpush.msra.mxu2 %v9429_v62  ;;  %v9451_v49 = vld [vmem:[#allocation57_spill] sm:$0xff]  ;;  %v9454_v62 = vld [vmem:[#allocation120_spill] sm:$0xff] }
 0x559   : > { %3843 = vmatpush.msrb.mxu1 %v9441_v13  ;;  %v9471_v13 = vld [vmem:[#allocation67_spill] sm:$0xff] }
 0x55a   : > { %v3536_v9 = vperm.slane %v3532_v23, 0  ;;  %3779 = vmatpush.msra.mxu2 %v9431_v19  ;;  %v9453_v23 = vld [vmem:[#allocation125_spill] sm:$0xff]  ;;  %v9457_v19 = vld [vmem:[#allocation126_spill] sm:$0xff] }
 0x55b   : > { %3844 = vmatpush.msrb.mxu1 %v9443_v52  ;;  %v9474_v52 = vld [vmem:[#allocation157_spill] sm:$0xff] }
 0x55c   : > { %v7965_v20 = vsub.f32 %v9433_v37, %v3536_v9  ;;  %3780 = vmatpush.msra.mxu2 %v9434_v17  ;;  %v9456_v9 = vld [vmem:[#allocation54_spill] sm:$0xff]  ;;  %v9459_v37 = vld [vmem:[#allocation136_spill] sm:$0xff] }
 0x55d   : > { %3845 = vmatpush.msrb.mxu1 %v9445_v27  ;;  %v9460_v17 = vld [vmem:[#allocation128_spill] sm:$0xff] }
 0x55e   : > { %v3544_v40 = vmul.f32 %v7965_v20, %v7965_v20  ;;  %3781 = vmatpush.msra.mxu2 %v9436_v5  ;;  %v9464_v5 = vld [vmem:[#allocation139_spill] sm:$0xff]  ;;  %v9477_v27 = vld [vmem:[#allocation140_spill] sm:$0xff] }
 0x55f   : > { %3846 = vmatpush.msrb.mxu1 %v9447_v15 }
 0x560   : > { %v3566_v42 = vsel %vm643_vm1, %v3544_v40, 0.0  ;;  %3782 = vmatpush.msra.mxu2 %v9438_v3  ;;  %v9463_v40 = vld [vmem:[#allocation68_spill] sm:$0xff] }
 0x561   : > { %v3567_v54 = vrot.slane %v3566_v42, 4  ;;  %3847 = vmatpush.msrb.mxu1 %v9449_v2  ;;  %v9467_v3 = vld [vmem:[#allocation72_spill] sm:$0xff] }
 0x562   : > { %3783 = vmatpush.msra.mxu2 %v9440_v35  ;;  %v9470_v35 = vld [vmem:[#allocation153_spill] sm:$0xff] }
 0x563   : > { %v3568_v21 = vadd.f32 %v3567_v54, %v3566_v42  ;;  %3848 = vmatpush.msrb.mxu1 %v9451_v49  ;;  %v9466_v42 = vld [vmem:[#allocation149_spill] sm:$0xff]  ;;  %v9469_v54 = vld [vmem:[#allocation134_spill] sm:$0xff] }
 0x564   : > { %3784 = vmatpush.msra.mxu2 %v9442_v45  ;;  %3849 = vmatmul.f32.vlgmr.msrb.gmra.mxu1 %v7901_v14  ;;  %v9461_v14 = vld [vmem:[#allocation145_spill] sm:$0xff] }
 0x565   : > { %v3569_v1 = vrot.slane %v3568_v21, 2  ;;  %v9473_v45 = vld [vmem:[#allocation137_spill] sm:$0xff] }
 0x566   : > { %3785 = vmatpush.msra.mxu2 %v9444_v25  ;;  %v9476_v25 = vld [vmem:[#allocation151_spill] sm:$0xff] }
 0x567   : > { %v3570_v58 = vadd.f32 %v3569_v1, %v3568_v21  ;;  %v9472_v21 = vld [vmem:[#allocation147_spill] sm:$0xff] }
 0x568   : > { %3786 = vmatpush.msra.mxu2 %v9446_v55  ;;  %v9475_v1 = vld [vmem:[#allocation71_spill] sm:$0xff]  ;;  %v9481_v55 = vld [vmem:[#allocation81_spill] sm:$0xff] }
 0x569   : > { %v3571_v63 = vrot.slane %v3570_v58, 1 }
 0x56a   : > { %3787 = vmatpush.msra.mxu2 %v9448_v16 }
 0x56b   : > { %v3572_v48 = vadd.f32 %v3571_v63, %v3570_v58  ;;  %v9480_v58 = vld [vmem:[#allocation144_spill] sm:$0xff] }
 0x56c   : > { %3788 = vmatpush.msra.mxu2 %v9450_v34 }
 0x56d   : > { %3649 = vmatmul.f32.vlgmr.msra.gmra.mxu3 %v3572_v48  ;;  %3789 = vmatmul.f32.vlgmr.msra.gmra.mxu2 %v7943_v61 }
 0x56e   : > { %3793 = vmatpush.msra.mxu3 %v4560_v38  ;;  %3853 = vmatpush.msrb.mxu2 %v9452_v57 }
 0x570   : > { %3794 = vmatpush.msra.mxu3 %v9453_v23  ;;  %3854 = vmatpush.msrb.mxu2 %v9454_v62 }
 0x572   : > { %3795 = vmatpush.msra.mxu3 %v9455_v30  ;;  %3855 = vmatpush.msrb.mxu2 %v9456_v9 }
 0x574   : > { %3796 = vmatpush.msra.mxu3 %v9457_v19  ;;  %3856 = vmatpush.msrb.mxu2 %v9458_v33 }
 0x575   : > { %3729 = vmatmul.f32.vlgmr.msrb.gmra.mxu3 %v3572_v48 }
 0x576   : > { %3797 = vmatpush.msra.mxu3 %v9459_v37  ;;  %3857 = vmatpush.msrb.mxu2 %v9460_v17 }
 0x578   : > { %3798 = vmatpush.msra.mxu3 %v9461_v14  ;;  %3858 = vmatpush.msrb.mxu2 %v9462_v44 }
 0x57a   : > { %3799 = vmatpush.msra.mxu3 %v9463_v40  ;;  %3859 = vmatpush.msrb.mxu2 %v9464_v5  ;;  %v9482_v5 = vperm.slane %v7661_v26, 0 }
 0x57c   : > { %3800 = vmatpush.msra.mxu3 %v9465_v41  ;;  %3860 = vmatpush.msrb.mxu2 %v9466_v42 }
 0x57e   : > { %3801 = vmatpush.msra.mxu3 %v9467_v3  ;;  %3861 = vmatpush.msrb.mxu2 %v9468_v6  ;;  %v9483_v3 = vperm.slane %v7678_v60, 0 }
 0x580   : > { %3802 = vmatpush.msra.mxu3 %v9469_v54  ;;  %3862 = vmatpush.msrb.mxu2 %v9470_v35 }
 0x582   : > { %3803 = vmatpush.msra.mxu3 %v9471_v13  ;;  %3863 = vmatpush.msrb.mxu2 %v9472_v21 }
 0x584   : > { %3804 = vmatpush.msra.mxu3 %v9473_v45  ;;  %3864 = vmatpush.msrb.mxu2 %v7695_v7  ;;  %v9478_v7 = vld [vmem:[#allocation75_spill] sm:$0xff] }
 0x586   : > { %3805 = vmatpush.msra.mxu3 %v7699_v50  ;;  %3865 = vmatpush.msrb.mxu2 %v9474_v52  ;;  %v9479_v50 = vld [vmem:[#allocation155_spill] sm:$0xff] }
 0x588   : > { %3806 = vmatpush.msra.mxu3 %v9475_v1  ;;  %3866 = vmatpush.msrb.mxu2 %v9476_v25  ;;  %v9484_v25 = vperm.slane %v7661_v26, 1 }
 0x58a   : > { %3807 = vmatpush.msra.mxu3 %v9477_v27  ;;  %3867 = vmatpush.msrb.mxu2 %v7730_v32 }
 0x58c   : > { %3808 = vmatpush.msra.mxu3 %v7733_v47  ;;  %3868 = vmatpush.msrb.mxu2 %v7738_v29  ;;  %v3590_v47 = vpop.f32.mrf.mxu0 }
 0x58d   : > { %3809 = vmatmul.f32.vlgmr.msra.gmra.mxu3 %v3572_v48  ;;  %3869 = vmatmul.f32.vlgmr.msrb.gmra.mxu2 %v7943_v61 }
 0x58e   : > { %3873 = vmatpush.msrb.mxu3 %v9478_v7 }
 0x590   : > { %3874 = vmatpush.msrb.mxu3 %v7750_v18 }
 0x592   : > { %3875 = vmatpush.msrb.mxu3 %v9479_v50  ;;  %v9485_v50 = vperm.slane %v7678_v60, 1 }
 0x594   : > { %3876 = vmatpush.msrb.mxu3 %v9480_v58 }
 0x596   : > { %3877 = vmatpush.msrb.mxu3 %v9481_v55 }
 0x598   : > { %3878 = vmatpush.msrb.mxu3 %v7767_v56 }
 0x59a   : > { %3879 = vmatpush.msrb.mxu3 %v7771_v59 }
 0x59c   : > { %3880 = vmatpush.msrb.mxu3 %v7776_v43 }
 0x59e   : > { %3881 = vmatpush.msrb.mxu3 %v7781_v28 }
 0x5a0   : > { %3882 = vmatpush.msrb.mxu3 %v7787_v46 }
 0x5a1   : > { %v3610_v32 = vpop.f32.mrf.mxu1 }
 0x5a2   : > { %3883 = vmatpush.msrb.mxu3 %v7792_v36  ;;  %v3611_v29 = vadd.f32 %v3610_v32, %v3590_v47  ;;  %v3670_v36 = vpop.f32.mrf.mxu0 }
 0x5a4   : > { %3884 = vmatpush.msrb.mxu3 %v7798_v11 }
 0x5a6   : > { %3885 = vmatpush.msrb.mxu3 %v7805_v8 }
 0x5a8   : > { %3886 = vmatpush.msrb.mxu3 %v7812_v39 }
 0x5a9   : > { %v3690_v28 = vpop.f32.mrf.mxu1 }
 0x5aa   : > { %3887 = vmatpush.msrb.mxu3 %v7819_v22  ;;  %v3691_v61 = vadd.f32 %v3690_v28, %v3670_v36  ;;  %v3750_v17 = vpop.f32.mrf.mxu0 }
 0x5ac   : > { %3888 = vmatpush.msrb.mxu3 %v7825_v4 }
 0x5ad   : > { %3889 = vmatmul.f32.vlgmr.msrb.gmra.mxu3 %v3572_v48 }
 0x5c1   : > { %v3770_v19 = vpop.f32.mrf.mxu1 }
 0x5c2   : > { %v3771_v40 = vadd.f32 %v3770_v19, %v3750_v17 }
 0x5c3   : > { %v3830_v36 = vpop.f32.mrf.mxu0 }
 0x5d0   : > { %v3630_v59 = vpop.f32.mrf.mxu2 }
 0x5d1   : > { %v3631_v18 = vadd.f32 %v3630_v59, %v3611_v29 }
 0x5d8   : > { %v3710_v11 = vpop.f32.mrf.mxu2 }
 0x5d9   : > { %v3711_v15 = vadd.f32 %v3710_v11, %v3691_v61 }
 0x5e1   : > { %v3850_v28 = vpop.f32.mrf.mxu1 }
 0x5e2   : > { %v3851_v61 = vadd.f32 %v3850_v28, %v3830_v36 }
 0x5f0   : > { %v3650_v56 = vpop.f32.mrf.mxu3  ;;  %v3790_v14 = vpop.f32.mrf.mxu2 }
 0x5f1   : > { %v3651_v43 = vadd.f32 %v3650_v56, %v3631_v18  ;;  %v3791_v54 = vadd.f32 %v3790_v14, %v3771_v40 }
 0x5f3   : > { %v3893_v46 = vmul.f32 0.0013020834, %v3651_v43 }
 0x5f5   : > { %v3897_v8 = vadd.f32 1e-05, %v3893_v46 }
 0x5f7   : > { %4219 = vrsqrt.f32 %v3897_v8  ;;  %vm3907_vm1 = vweird.f32 %v3897_v8 }
 0x5f8   : > { %v3730_v39 = vpop.f32.mrf.mxu3 }
 0x5f9   : > { %v3731_v22 = vadd.f32 %v3730_v39, %v3711_v15 }
 0x5fb   : > { %v3894_v63 = vmul.f32 0.0013020834, %v3731_v22 }
 0x5fd   : > { %v4220_v4 = vpop.eup %4219  ;;  %v3898_v16 = vadd.f32 1e-05, %v3894_v63 }
 0x5fe   : > { %v3902_v2 = vmul.f32 %v4220_v4, %v3897_v8  ;;  %vm3908_vm0 = vweird.f32 %v4220_v4 }
 0x5ff   : > { %4221 = vrsqrt.f32 %v3898_v16  ;;  %vm3909_vm2 = vmor %vm3907_vm1, %vm3908_vm0  ;;  %vm3917_vm4 = vweird.f32 %v3898_v16 }
 0x600   : > { %v3903_v48 = vmul.f32 %v4220_v4, %v3902_v2 }
 0x602   : > { %v3904_v34 = vmul.f32 0.5, %v3903_v48 }
 0x604   : > { %v3905_v49 = vsub.f32 1.5, %v3904_v34 }
 0x605   : > { %v4222_v38 = vpop.eup %4221 }
 0x606   : > { %v3906_v57 = vmul.f32 %v4220_v4, %v3905_v49  ;;  %v3912_v23 = vmul.f32 %v4222_v38, %v3898_v16  ;;  %vm3918_vm3 = vweird.f32 %v4222_v38 }
 0x607   : > { %vm3919_vm5 = vmor %vm3917_vm4, %vm3918_vm3 }
 0x608   : > { %v3910_v62 = vsel %vm3909_vm2, %v4220_v4, %v3906_v57  ;;  %v3913_v30 = vmul.f32 %v4222_v38, %v3912_v23 }
 0x609   : > { %v3941_v9 = vperm.slane %v3910_v62, 0 }
 0x60a   : > { %v3914_v33 = vmul.f32 0.5, %v3913_v30 }
 0x60b   : > { %v3945_v37 = vmul.f32 %v3941_v9, %v7858_v12 }
 0x60c   : > { %v3915_v44 = vsub.f32 1.5, %v3914_v33 }
 0x60d   : > { %v3949_v41 = vmul.f32 %v3945_v37, %v9482_v5 }
 0x60e   : > { %v3916_v42 = vmul.f32 %v4222_v38, %v3915_v44 }
 0x60f   : > { %v3953_v6 = vadd.f32 %v3949_v41, %v9483_v3 }
 0x610   : > { %v3920_v12 = vsel %vm3919_vm5, %v4222_v38, %v3916_v42  ;;  %v3810_v35 = vpop.f32.mrf.mxu3  ;;  %v3870_v11 = vpop.f32.mrf.mxu2 }
 0x611   : > { %v3961_v13 = vrot.slane %v3953_v6, 4  ;;  %v3942_v21 = vperm.slane %v3920_v12, 0  ;;  %v3811_v45 = vadd.f32 %v3810_v35, %v3791_v54  ;;  %v3871_v39 = vadd.f32 %v3870_v11, %v3851_v61 }
 0x613   : > { %3969 = vst [vmem:[%s7710_s21] sm:$0xf0] %v3961_v13  ;;  %v3946_v52 = vmul.f32 %v3942_v21, %v7888_v10  ;;  %v3895_v1 = vmul.f32 0.0013020834, %v3811_v45 }
 0x614   : > { %3973 = vst [vmem:[%s7710_s21 + $0x20] sm:$0x3] %v3961_v13 }
 0x615   : > { %v3950_v27 = vmul.f32 %v3946_v52, %v9484_v25  ;;  %v3899_v7 = vadd.f32 1e-05, %v3895_v1 }
 0x617   : > { %v3954_v58 = vadd.f32 %v3950_v27, %v9485_v50  ;;  %4223 = vrsqrt.f32 %v3899_v7  ;;  %vm3927_vm7 = vweird.f32 %v3899_v7 }
 0x619   : > { %v3962_v55 = vrot.slane %v3954_v58, 4 }
 0x61b   : > { %3970 = vst [vmem:[%s7710_s21 + $0x8] sm:$0xf0] %v3962_v55 }
 0x61c   : > { %3974 = vst [vmem:[%s7710_s21 + $0x28] sm:$0x3] %v3962_v55 }
 0x61d   : > { %v4224_v32 = vpop.eup %4223 }
 0x61e   : > { %v3922_v47 = vmul.f32 %v4224_v32, %v3899_v7  ;;  %vm3928_vm6 = vweird.f32 %v4224_v32 }
 0x61f   : > { %vm3929_vm8 = vmor %vm3927_vm7, %vm3928_vm6 }
 0x620   : > { %v3923_v59 = vmul.f32 %v4224_v32, %v3922_v47 }
 0x622   : > { %v3924_v29 = vmul.f32 0.5, %v3923_v59 }
 0x624   : > { %v3925_v18 = vsub.f32 1.5, %v3924_v29 }
 0x626   : > { %v3926_v10 = vmul.f32 %v4224_v32, %v3925_v18 }
 0x628   : > { %v3930_v56 = vsel %vm3929_vm8, %v4224_v32, %v3926_v10 }
 0x629   : > { %v3943_v43 = vperm.slane %v3930_v56, 0 }
 0x62b   : > { %v3947_v46 = vmul.f32 %v3943_v43, %v7922_v24 }
 0x62d   : > { %v3951_v8 = vmul.f32 %v3947_v46, %v3154_v53 }
 0x62f   : > { %v3955_v15 = vadd.f32 %v3951_v8, %v3167_v31 }
 0x630   : > { %v3890_v22 = vpop.f32.mrf.mxu3 }
 0x631   : > { %v3963_v63 = vrot.slane %v3955_v15, 4  ;;  %v3891_v4 = vadd.f32 %v3890_v22, %v3871_v39 }
 0x633   : > { %3971 = vst [vmem:[%s7710_s21 + $0x10] sm:$0xf0] %v3963_v63  ;;  %v3896_v16 = vmul.f32 0.0013020834, %v3891_v4 }
 0x634   : > { %3975 = vst [vmem:[%s7710_s21 + $0x30] sm:$0x3] %v3963_v63 }
 0x635   : > { %v3900_v2 = vadd.f32 1e-05, %v3896_v16 }
 0x637   : > { %4225 = vrsqrt.f32 %v3900_v2  ;;  %vm3937_vm10 = vweird.f32 %v3900_v2 }
 0x63d   : > { %v4226_v24 = vpop.eup %4225 }
 0x63e   : > { %v3932_v48 = vmul.f32 %v4226_v24, %v3900_v2  ;;  %vm3938_vm9 = vweird.f32 %v4226_v24 }
 0x63f   : > { %vm3939_vm11 = vmor %vm3937_vm10, %vm3938_vm9 }
 0x640   : > { %v3933_v34 = vmul.f32 %v4226_v24, %v3932_v48 }
 0x642   : > { %v3934_v49 = vmul.f32 0.5, %v3933_v34 }
 0x644   : > { %v3935_v38 = vsub.f32 1.5, %v3934_v49 }
 0x646   : > { %v3936_v53 = vmul.f32 %v4226_v24, %v3935_v38 }
 0x648   : > { %v3940_v31 = vsel %vm3939_vm11, %v4226_v24, %v3936_v53 }
 0x649   : > { %v3944_v57 = vperm.slane %v3940_v31, 0 }
 0x64b   : > { %v3948_v23 = vmul.f32 %v3944_v57, %v7965_v20 }
 0x64d   : > { %v3952_v62 = vmul.f32 %v3948_v23, %v3155_v0 }
 0x64f   : > { %v3956_v30 = vadd.f32 %v3952_v62, %v3168_v51 }
 0x651   : > { %v3964_v9 = vrot.slane %v3956_v30, 4 }
 0x653   : > { %3972 = vst [vmem:[%s7710_s21 + $0x18] sm:$0xf0] %v3964_v9 }
 0x654   : > { %3976 = vst [vmem:[%s7710_s21 + $0x38] sm:$0x3] %v3964_v9 }
 0x655 PF: > { %s9486_s22 = sld [smem:[#allocation12_spill]] }
 0x65b   : > { %s27_s29 = sadd.s32 1, %s9486_s22  }
 0x65c   : > { %p24_p7 = scmp.ge.s32.totalorder %s27_s29, 4  }
 0x65e   :  { %26 = sbr.rel (!%p24_p7) target bundleno = 7 (0x7), region = 137 }
 0x663   :  { %3998 = vsyncpa [#allocation3], 1 }
 0x664   :  { %4000 = vsyncpa [#allocation3 + $0x1], 1 }
 0x665   :  { %4001 = vsyncpa [#allocation5], 1 }
 0x666   :  { %4002 = vsyncpa [#allocation8], 1 }

</bundles_post_ra>
